<compile_context>
chip_gen: v7x
topology: tpu7x:2x2x1
jax: 0.10.0
libtpu: 0.0.40
codegen_flags: <defaults>
</compile_context>

<pallas_src>
import functools
import numpy as np
import jax
import jax.numpy as jnp
from jax.experimental import pallas as pl
from jax.experimental.pallas import tpu as pltpu

EPS = 1e-5  # BatchNorm eps


def _round_up(n, m):
    return ((n + m - 1) // m) * m


def _shift_rows(a, k):
    """result[r] = a[r + k] (wraps at the block end).

    Wrapped / out-of-image rows only ever land in per-image garbage rows
    (h >= valid height), which are never read by any later valid row.
    """
    if k == 0:
        return a
    return jnp.concatenate([a[k:, :], a[:k, :]], axis=0)


# ----------------------------------------------------------------------------- kernel
def lenet_kernel(x_ref, t1_ref, sh1_ref, sc1_ref, t2_ref, sh2_ref, sc2_ref,
                 w1_ref, b1_ref, w2_ref, b2_ref, w3_ref, b3_ref, out_ref):
    dot = functools.partial(jnp.dot, preferred_element_type=jnp.float32)

    x = x_ref[...]                                            # (R, 32), R = B_TILE*32

    # ---- conv1 (1->6, 5x5, pad=2) + folded BN1 + ReLU : one K=160 dot --------------
    im1 = jnp.concatenate([_shift_rows(x, kh) for kh in range(5)], axis=1)   # (R, 160)
    y1 = jnp.maximum(dot(im1, t1_ref[...]) + sh1_ref[...], 0.0)              # (R, 168)

    # ---- avgpool 2x2 s2: width via matmul, height via row-shift add ----------------
    y1c = dot(y1, sc1_ref[...])                                              # (R, 84)
    p1 = 0.5 * (y1c + _shift_rows(y1c, 1))        # valid at even rows (14 per image)

    # ---- conv2 (6->16, 5x5) + folded BN2 + ReLU : one K=420 dot --------------------
    im2 = jnp.concatenate([_shift_rows(p1, 2 * kh) for kh in range(5)], axis=1)  # (R, 420)
    y2 = jnp.maximum(dot(im2, t2_ref[...]) + sh2_ref[...], 0.0)              # (R, 160)

    # ---- avgpool 2x2 s2 ------------------------------------------------------------
    y2c = dot(y2, sc2_ref[...])                                              # (R, 80)
    p2 = 0.5 * (y2c + _shift_rows(y2c, 2))        # valid at rows 4m (5 per image)

    # ---- classifier: flatten via lane-concat of the 5 pooled rows, then 3 dots -----
    imf = jnp.concatenate([_shift_rows(p2, 4 * m) for m in range(5)], axis=1)  # (R, 400)
    h1 = jnp.maximum(dot(imf, w1_ref[...]) + b1_ref[...], 0.0)               # (R, 120)
    h2 = jnp.maximum(dot(h1, w2_ref[...]) + b2_ref[...], 0.0)                # (R, 84)
    out_ref[...] = dot(h2, w3_ref[...]) + b3_ref[...]          # (R, 10), valid @ rows b*32


# ------------------------------------------------------------------------ parameters
def init_params(key):
    ks = jax.random.split(key, 20)
    n = lambda k, s, sc=0.1: sc * jax.random.normal(k, s, jnp.float32)
    return dict(
        conv1_w=n(ks[0], (6, 1, 5, 5)), conv1_b=n(ks[1], (6,)),
        bn1_g=1.0 + n(ks[2], (6,)), bn1_b=n(ks[3], (6,)),
        bn1_m=n(ks[4], (6,)), bn1_v=1.0 + 0.2 * jax.random.uniform(ks[5], (6,)),
        conv2_w=n(ks[6], (16, 6, 5, 5)), conv2_b=n(ks[7], (16,)),
        bn2_g=1.0 + n(ks[8], (16,)), bn2_b=n(ks[9], (16,)),
        bn2_m=n(ks[10], (16,)), bn2_v=1.0 + 0.2 * jax.random.uniform(ks[11], (16,)),
        fc1_w=n(ks[12], (120, 400)), fc1_b=n(ks[13], (120,)),
        fc2_w=n(ks[14], (84, 120)), fc2_b=n(ks[15], (84,)),
        fc3_w=n(ks[16], (10, 84)), fc3_b=n(ks[17], (10,)),
    )


def pack_operands(p):
    """Re-pack LeNet parameters into the banded / pooling matrices the kernel uses."""
    g = {k: np.asarray(v, np.float32) for k, v in p.items()}

    # Fold inference-mode BatchNorm into the conv weights and bias.
    s1 = g['bn1_g'] / np.sqrt(g['bn1_v'] + EPS)
    w1 = g['conv1_w'] * s1[:, None, None, None]
    t1 = (g['conv1_b'] - g['bn1_m']) * s1 + g['bn1_b']
    s2 = g['bn2_g'] / np.sqrt(g['bn2_v'] + EPS)
    w2 = g['conv2_w'] * s2[:, None, None, None]
    t2 = (g['conv2_b'] - g['bn2_m']) * s2 + g['bn2_b']

    # conv1 fused banded matrix: T1r[kh*32 + (w+kw), co*28 + w] = w1[co, 0, kh, kw]
    T1r = np.zeros((5 * 32, 6 * 28), np.float32)
    for co in range(6):
        for kh in range(5):
            for kw in range(5):
                for w in range(28):
                    T1r[kh * 32 + w + kw, co * 28 + w] = w1[co, 0, kh, kw]
    shift1 = np.repeat(t1, 28)[None, :].astype(np.float32)          # (1, 168)

    # width pooling matrices (0.5 * adjacent-column pairs per channel)
    SC1 = np.zeros((6 * 28, 6 * 14), np.float32)
    for co in range(6):
        for j in range(14):
            SC1[co * 28 + 2 * j, co * 14 + j] = 0.5
            SC1[co * 28 + 2 * j + 1, co * 14 + j] = 0.5

    # conv2 fused banded matrix: T2r[kh*84 + ci*14 + (w+kw), co*10 + w] = w2[co, ci, kh, kw]
    T2r = np.zeros((5 * 84, 16 * 10), np.float32)
    for co in range(16):
        for ci in range(6):
            for kh in range(5):
                for kw in range(5):
                    for w in range(10):
                        T2r[kh * 84 + ci * 14 + w + kw, co * 10 + w] = w2[co, ci, kh, kw]
    shift2 = np.repeat(t2, 10)[None, :].astype(np.float32)          # (1, 160)

    SC2 = np.zeros((16 * 10, 16 * 5), np.float32)
    for co in range(16):
        for j in range(5):
            SC2[co * 10 + 2 * j, co * 5 + j] = 0.5
            SC2[co * 10 + 2 * j + 1, co * 5 + j] = 0.5

    # fc1 re-packed for the lane-concatenated flatten:
    # W1pr[m*80 + co*5 + j, o] = fc1_w[o, co*25 + m*5 + j]   (matches x.view(-1, 400))
    W1pr = np.zeros((400, 120), np.float32)
    for m in range(5):
        for co in range(16):
            for j in range(5):
                W1pr[m * 80 + co * 5 + j, :] = g['fc1_w'][:, co * 25 + m * 5 + j]

    ops = [T1r, shift1, SC1, T2r, shift2, SC2,
           W1pr, g['fc1_b'][None, :],
           g['fc2_w'].T.copy(), g['fc2_b'][None, :],
           g['fc3_w'].T.copy(), g['fc3_b'][None, :]]
    return [jnp.asarray(o) for o in ops]


# -------------------------------------------------------------------------- wrapper
def lenet_forward(x, ops, b_tile=32, vmem_limit_bytes=None):
    """x: (B, 1, 28, 28) float32 NCHW -> logits (B, 10).

    b_tile images are processed per grid step (batch on the M axis of every dot).
    b_tile=32 fits the default scoped-VMEM limit on all generations; raise it to
    64-128 together with vmem_limit_bytes on v5e/v6e/v7x for peak throughput.
    """
    B = x.shape[0]
    b_tile = min(b_tile, _round_up(B, 8))
    Bp = _round_up(B, b_tile)
    R = b_tile * 32

    # Pad batch to a tile multiple, pad each image to 32x32 (conv1 padding=2), and
    # stack images along rows: row index = b*32 + h.  (Input HBM traffic is tiny,
    # so this wrapper-side pad/reshape is negligible.)
    xp = jnp.pad(x[:, 0, :, :], ((0, Bp - B), (2, 2), (2, 2)))       # (Bp, 32, 32)
    x2 = xp.reshape(Bp * 32, 32)

    resident = lambda a: pl.BlockSpec(a.shape, lambda i: (0, 0))     # stays in VMEM

    cp_kwargs = dict(dimension_semantics=("parallel",))
    if vmem_limit_bytes is not None:
        cp_kwargs["vmem_limit_bytes"] = vmem_limit_bytes

    out = pl.pallas_call(
        lenet_kernel,
        out_shape=jax.ShapeDtypeStruct((Bp * 32, 10), jnp.float32),
        grid=(Bp // b_tile,),
        in_specs=[pl.BlockSpec((R, 32), lambda i: (i, 0))] + [resident(o) for o in ops],
        out_specs=pl.BlockSpec((R, 10), lambda i: (i, 0)),
        compiler_params=pltpu.CompilerParams(**cp_kwargs),
    )(x2, *ops)

    # Valid logits live at row b*32 of each 32-row image block.
    return out.reshape(Bp, 32, 10)[:B, 0, :]


# -------------------------------------------------------------- pure-JAX reference
def lenet_ref(x, p):
    hp = jax.lax.Precision.HIGHEST

    def conv(y, w, b, pad):
        y = jax.lax.conv_general_dilated(
            y, w, window_strides=(1, 1), padding=pad,
            dimension_numbers=('NCHW', 'OIHW', 'NCHW'), precision=hp)
        return y + b[None, :, None, None]

    def bn(y, gm, bt, m, v):
        return (y - m[None, :, None, None]) / jnp.sqrt(v[None, :, None, None] + EPS) \
            * gm[None, :, None, None] + bt[None, :, None, None]

    def pool(y):
        B, C, H, W = y.shape
        return y.reshape(B, C, H // 2, 2, W // 2, 2).mean(axis=(3, 5))

    y = jax.nn.relu(bn(conv(x, p['conv1_w'], p['conv1_b'], [(2, 2), (2, 2)]),
                       p['bn1_g'], p['bn1_b'], p['bn1_m'], p['bn1_v']))
    y = pool(y)
    y = jax.nn.relu(bn(conv(y, p['conv2_w'], p['conv2_b'], [(0, 0), (0, 0)]),
                       p['bn2_g'], p['bn2_b'], p['bn2_m'], p['bn2_v']))
    y = pool(y)
    y = y.reshape(y.shape[0], -1)
    y = jax.nn.relu(jnp.dot(y, p['fc1_w'].T, precision=hp) + p['fc1_b'])
    y = jax.nn.relu(jnp.dot(y, p['fc2_w'].T, precision=hp) + p['fc2_b'])
    return jnp.dot(y, p['fc3_w'].T, precision=hp) + p['fc3_b']


# ------------------------------------------------------------------------------ main
if __name__ == "__main__":
    key = jax.random.PRNGKey(0)
    kx, kp = jax.random.split(key)
    x = jax.random.normal(kx, (2, 1, 28, 28), jnp.float32)  # batch=2, MNIST-sized input
    params = init_params(kp)
    ops = pack_operands(params)

    out = jax.block_until_ready(lenet_forward(x, ops))
    ref = jax.block_until_ready(lenet_ref(x, params))

    assert out.shape == (2, 10) and out.dtype == jnp.float32
    np.testing.assert_allclose(np.asarray(out), np.asarray(ref), rtol=2e-3, atol=2e-3)
    print("KERNEL_OK")
</pallas_src>

<mosaic_0001>
module attributes {stable_mosaic.version = 11 : i64} {
  func.func @lenet_kernel(%arg0: i32, %arg1: memref<256x32xf32, #tpu.memory_space<vmem>>, %arg2: memref<160x168xf32, #tpu.memory_space<vmem>>, %arg3: memref<1x168xf32, #tpu.memory_space<vmem>>, %arg4: memref<168x84xf32, #tpu.memory_space<vmem>>, %arg5: memref<420x160xf32, #tpu.memory_space<vmem>>, %arg6: memref<1x160xf32, #tpu.memory_space<vmem>>, %arg7: memref<160x80xf32, #tpu.memory_space<vmem>>, %arg8: memref<400x120xf32, #tpu.memory_space<vmem>>, %arg9: memref<1x120xf32, #tpu.memory_space<vmem>>, %arg10: memref<120x84xf32, #tpu.memory_space<vmem>>, %arg11: memref<1x84xf32, #tpu.memory_space<vmem>>, %arg12: memref<84x10xf32, #tpu.memory_space<vmem>>, %arg13: memref<1x10xf32, #tpu.memory_space<vmem>>, %arg14: memref<256x10xf32, #tpu.memory_space<vmem>>) attributes {dimension_semantics = [#tpu.dimension_semantics<parallel>], iteration_bounds = array<i64: 1>, scalar_prefetch = 0 : i64, scratch_operands = 0 : i64, tpu.core_type = #tpu.core_type<tc>, window_params = [{transform_indices = @transform_0, window_bounds = array<i64: 256, 32>}, {pipeline_mode = #tpu.pipeline_mode<synchronous>, transform_indices = @transform_1, window_bounds = array<i64: 160, 168>}, {pipeline_mode = #tpu.pipeline_mode<synchronous>, transform_indices = @transform_2, window_bounds = array<i64: 1, 168>}, {pipeline_mode = #tpu.pipeline_mode<synchronous>, transform_indices = @transform_3, window_bounds = array<i64: 168, 84>}, {pipeline_mode = #tpu.pipeline_mode<synchronous>, transform_indices = @transform_4, window_bounds = array<i64: 420, 160>}, {pipeline_mode = #tpu.pipeline_mode<synchronous>, transform_indices = @transform_5, window_bounds = array<i64: 1, 160>}, {pipeline_mode = #tpu.pipeline_mode<synchronous>, transform_indices = @transform_6, window_bounds = array<i64: 160, 80>}, {pipeline_mode = #tpu.pipeline_mode<synchronous>, transform_indices = @transform_7, window_bounds = array<i64: 400, 120>}, {pipeline_mode = #tpu.pipeline_mode<synchronous>, transform_indices = @transform_8, window_bounds = array<i64: 1, 120>}, {pipeline_mode = #tpu.pipeline_mode<synchronous>, transform_indices = @transform_9, window_bounds = array<i64: 120, 84>}, {pipeline_mode = #tpu.pipeline_mode<synchronous>, transform_indices = @transform_10, window_bounds = array<i64: 1, 84>}, {pipeline_mode = #tpu.pipeline_mode<synchronous>, transform_indices = @transform_11, window_bounds = array<i64: 84, 10>}, {pipeline_mode = #tpu.pipeline_mode<synchronous>, transform_indices = @transform_12, window_bounds = array<i64: 1, 10>}, {transform_indices = @transform_13, window_bounds = array<i64: 256, 10>}]} {
    %c0 = arith.constant 0 : index
    %c0_0 = arith.constant 0 : index
    %0 = vector.load %arg1[%c0, %c0_0] : memref<256x32xf32, #tpu.memory_space<vmem>>, vector<256x32xf32>
    %1 = vector.extract_strided_slice %0 {offsets = [1, 0], sizes = [255, 32], strides = [1, 1]} : vector<256x32xf32> to vector<255x32xf32>
    %2 = vector.extract_strided_slice %0 {offsets = [0, 0], sizes = [1, 32], strides = [1, 1]} : vector<256x32xf32> to vector<1x32xf32>
    %3 = tpu.concatenate %1, %2 in 0 : vector<255x32xf32>, vector<1x32xf32> -> vector<256x32xf32>
    %4 = vector.extract_strided_slice %0 {offsets = [2, 0], sizes = [254, 32], strides = [1, 1]} : vector<256x32xf32> to vector<254x32xf32>
    %5 = vector.extract_strided_slice %0 {offsets = [0, 0], sizes = [2, 32], strides = [1, 1]} : vector<256x32xf32> to vector<2x32xf32>
    %6 = tpu.concatenate %4, %5 in 0 : vector<254x32xf32>, vector<2x32xf32> -> vector<256x32xf32>
    %7 = vector.extract_strided_slice %0 {offsets = [3, 0], sizes = [253, 32], strides = [1, 1]} : vector<256x32xf32> to vector<253x32xf32>
    %8 = vector.extract_strided_slice %0 {offsets = [0, 0], sizes = [3, 32], strides = [1, 1]} : vector<256x32xf32> to vector<3x32xf32>
    %9 = tpu.concatenate %7, %8 in 0 : vector<253x32xf32>, vector<3x32xf32> -> vector<256x32xf32>
    %10 = vector.extract_strided_slice %0 {offsets = [4, 0], sizes = [252, 32], strides = [1, 1]} : vector<256x32xf32> to vector<252x32xf32>
    %11 = vector.extract_strided_slice %0 {offsets = [0, 0], sizes = [4, 32], strides = [1, 1]} : vector<256x32xf32> to vector<4x32xf32>
    %12 = tpu.concatenate %10, %11 in 0 : vector<252x32xf32>, vector<4x32xf32> -> vector<256x32xf32>
    %13 = tpu.concatenate %0, %3, %6, %9, %12 in 1 : vector<256x32xf32>, vector<256x32xf32>, vector<256x32xf32>, vector<256x32xf32>, vector<256x32xf32> -> vector<256x160xf32>
    %c0_1 = arith.constant 0 : index
    %c0_2 = arith.constant 0 : index
    %14 = vector.load %arg2[%c0_1, %c0_2] : memref<160x168xf32, #tpu.memory_space<vmem>>, vector<160x168xf32>
    %cst = arith.constant dense<0.000000e+00> : vector<256x168xf32>
    %15 = tpu.matmul %13, %14, %cst {dimension_numbers = #tpu.dot_dimension_numbers<[1], [0], [0], [1], [0, 0, 1, 1], [], []>} : vector<256x160xf32>, vector<160x168xf32>, vector<256x168xf32> -> vector<256x168xf32>
    %c0_3 = arith.constant 0 : index
    %c0_4 = arith.constant 0 : index
    %16 = vector.load %arg3[%c0_3, %c0_4] : memref<1x168xf32, #tpu.memory_space<vmem>>, vector<1x168xf32>
    %17 = vector.broadcast %16 : vector<1x168xf32> to vector<256x168xf32>
    %18 = arith.addf %15, %17 : vector<256x168xf32>
    %cst_5 = arith.constant 0.000000e+00 : f32
    %19 = vector.broadcast %cst_5 : f32 to vector<256x168xf32>
    %20 = arith.maximumf %18, %19 : vector<256x168xf32>
    %c0_6 = arith.constant 0 : index
    %c0_7 = arith.constant 0 : index
    %21 = vector.load %arg4[%c0_6, %c0_7] : memref<168x84xf32, #tpu.memory_space<vmem>>, vector<168x84xf32>
    %cst_8 = arith.constant dense<0.000000e+00> : vector<256x84xf32>
    %22 = tpu.matmul %20, %21, %cst_8 {dimension_numbers = #tpu.dot_dimension_numbers<[1], [0], [0], [1], [0, 0, 1, 1], [], []>} : vector<256x168xf32>, vector<168x84xf32>, vector<256x84xf32> -> vector<256x84xf32>
    %23 = vector.extract_strided_slice %22 {offsets = [1, 0], sizes = [255, 84], strides = [1, 1]} : vector<256x84xf32> to vector<255x84xf32>
    %24 = vector.extract_strided_slice %22 {offsets = [0, 0], sizes = [1, 84], strides = [1, 1]} : vector<256x84xf32> to vector<1x84xf32>
    %25 = tpu.concatenate %23, %24 in 0 : vector<255x84xf32>, vector<1x84xf32> -> vector<256x84xf32>
    %26 = arith.addf %22, %25 : vector<256x84xf32>
    %cst_9 = arith.constant 5.000000e-01 : f32
    %27 = vector.broadcast %cst_9 : f32 to vector<256x84xf32>
    %28 = arith.mulf %27, %26 : vector<256x84xf32>
    %29 = vector.extract_strided_slice %28 {offsets = [2, 0], sizes = [254, 84], strides = [1, 1]} : vector<256x84xf32> to vector<254x84xf32>
    %30 = vector.extract_strided_slice %28 {offsets = [0, 0], sizes = [2, 84], strides = [1, 1]} : vector<256x84xf32> to vector<2x84xf32>
    %31 = tpu.concatenate %29, %30 in 0 : vector<254x84xf32>, vector<2x84xf32> -> vector<256x84xf32>
    %32 = vector.extract_strided_slice %28 {offsets = [4, 0], sizes = [252, 84], strides = [1, 1]} : vector<256x84xf32> to vector<252x84xf32>
    %33 = vector.extract_strided_slice %28 {offsets = [0, 0], sizes = [4, 84], strides = [1, 1]} : vector<256x84xf32> to vector<4x84xf32>
    %34 = tpu.concatenate %32, %33 in 0 : vector<252x84xf32>, vector<4x84xf32> -> vector<256x84xf32>
    %35 = vector.extract_strided_slice %28 {offsets = [6, 0], sizes = [250, 84], strides = [1, 1]} : vector<256x84xf32> to vector<250x84xf32>
    %36 = vector.extract_strided_slice %28 {offsets = [0, 0], sizes = [6, 84], strides = [1, 1]} : vector<256x84xf32> to vector<6x84xf32>
    %37 = tpu.concatenate %35, %36 in 0 : vector<250x84xf32>, vector<6x84xf32> -> vector<256x84xf32>
    %38 = vector.extract_strided_slice %28 {offsets = [8, 0], sizes = [248, 84], strides = [1, 1]} : vector<256x84xf32> to vector<248x84xf32>
    %39 = vector.extract_strided_slice %28 {offsets = [0, 0], sizes = [8, 84], strides = [1, 1]} : vector<256x84xf32> to vector<8x84xf32>
    %40 = tpu.concatenate %38, %39 in 0 : vector<248x84xf32>, vector<8x84xf32> -> vector<256x84xf32>
    %41 = tpu.concatenate %28, %31, %34, %37, %40 in 1 : vector<256x84xf32>, vector<256x84xf32>, vector<256x84xf32>, vector<256x84xf32>, vector<256x84xf32> -> vector<256x420xf32>
    %c0_10 = arith.constant 0 : index
    %c0_11 = arith.constant 0 : index
    %42 = vector.load %arg5[%c0_10, %c0_11] : memref<420x160xf32, #tpu.memory_space<vmem>>, vector<420x160xf32>
    %cst_12 = arith.constant dense<0.000000e+00> : vector<256x160xf32>
    %43 = tpu.matmul %41, %42, %cst_12 {dimension_numbers = #tpu.dot_dimension_numbers<[1], [0], [0], [1], [0, 0, 1, 1], [], []>} : vector<256x420xf32>, vector<420x160xf32>, vector<256x160xf32> -> vector<256x160xf32>
    %c0_13 = arith.constant 0 : index
    %c0_14 = arith.constant 0 : index
    %44 = vector.load %arg6[%c0_13, %c0_14] : memref<1x160xf32, #tpu.memory_space<vmem>>, vector<1x160xf32>
    %45 = vector.broadcast %44 : vector<1x160xf32> to vector<256x160xf32>
    %46 = arith.addf %43, %45 : vector<256x160xf32>
    %cst_15 = arith.constant 0.000000e+00 : f32
    %47 = vector.broadcast %cst_15 : f32 to vector<256x160xf32>
    %48 = arith.maximumf %46, %47 : vector<256x160xf32>
    %c0_16 = arith.constant 0 : index
    %c0_17 = arith.constant 0 : index
    %49 = vector.load %arg7[%c0_16, %c0_17] : memref<160x80xf32, #tpu.memory_space<vmem>>, vector<160x80xf32>
    %cst_18 = arith.constant dense<0.000000e+00> : vector<256x80xf32>
    %50 = tpu.matmul %48, %49, %cst_18 {dimension_numbers = #tpu.dot_dimension_numbers<[1], [0], [0], [1], [0, 0, 1, 1], [], []>} : vector<256x160xf32>, vector<160x80xf32>, vector<256x80xf32> -> vector<256x80xf32>
    %51 = vector.extract_strided_slice %50 {offsets = [2, 0], sizes = [254, 80], strides = [1, 1]} : vector<256x80xf32> to vector<254x80xf32>
    %52 = vector.extract_strided_slice %50 {offsets = [0, 0], sizes = [2, 80], strides = [1, 1]} : vector<256x80xf32> to vector<2x80xf32>
    %53 = tpu.concatenate %51, %52 in 0 : vector<254x80xf32>, vector<2x80xf32> -> vector<256x80xf32>
    %54 = arith.addf %50, %53 : vector<256x80xf32>
    %cst_19 = arith.constant 5.000000e-01 : f32
    %55 = vector.broadcast %cst_19 : f32 to vector<256x80xf32>
    %56 = arith.mulf %55, %54 : vector<256x80xf32>
    %57 = vector.extract_strided_slice %56 {offsets = [4, 0], sizes = [252, 80], strides = [1, 1]} : vector<256x80xf32> to vector<252x80xf32>
    %58 = vector.extract_strided_slice %56 {offsets = [0, 0], sizes = [4, 80], strides = [1, 1]} : vector<256x80xf32> to vector<4x80xf32>
    %59 = tpu.concatenate %57, %58 in 0 : vector<252x80xf32>, vector<4x80xf32> -> vector<256x80xf32>
    %60 = vector.extract_strided_slice %56 {offsets = [8, 0], sizes = [248, 80], strides = [1, 1]} : vector<256x80xf32> to vector<248x80xf32>
    %61 = vector.extract_strided_slice %56 {offsets = [0, 0], sizes = [8, 80], strides = [1, 1]} : vector<256x80xf32> to vector<8x80xf32>
    %62 = tpu.concatenate %60, %61 in 0 : vector<248x80xf32>, vector<8x80xf32> -> vector<256x80xf32>
    %63 = vector.extract_strided_slice %56 {offsets = [12, 0], sizes = [244, 80], strides = [1, 1]} : vector<256x80xf32> to vector<244x80xf32>
    %64 = vector.extract_strided_slice %56 {offsets = [0, 0], sizes = [12, 80], strides = [1, 1]} : vector<256x80xf32> to vector<12x80xf32>
    %65 = tpu.concatenate %63, %64 in 0 : vector<244x80xf32>, vector<12x80xf32> -> vector<256x80xf32>
    %66 = vector.extract_strided_slice %56 {offsets = [16, 0], sizes = [240, 80], strides = [1, 1]} : vector<256x80xf32> to vector<240x80xf32>
    %67 = vector.extract_strided_slice %56 {offsets = [0, 0], sizes = [16, 80], strides = [1, 1]} : vector<256x80xf32> to vector<16x80xf32>
    %68 = tpu.concatenate %66, %67 in 0 : vector<240x80xf32>, vector<16x80xf32> -> vector<256x80xf32>
    %69 = tpu.concatenate %56, %59, %62, %65, %68 in 1 : vector<256x80xf32>, vector<256x80xf32>, vector<256x80xf32>, vector<256x80xf32>, vector<256x80xf32> -> vector<256x400xf32>
    %c0_20 = arith.constant 0 : index
    %c0_21 = arith.constant 0 : index
    %70 = vector.load %arg8[%c0_20, %c0_21] : memref<400x120xf32, #tpu.memory_space<vmem>>, vector<400x120xf32>
    %cst_22 = arith.constant dense<0.000000e+00> : vector<256x120xf32>
    %71 = tpu.matmul %69, %70, %cst_22 {dimension_numbers = #tpu.dot_dimension_numbers<[1], [0], [0], [1], [0, 0, 1, 1], [], []>} : vector<256x400xf32>, vector<400x120xf32>, vector<256x120xf32> -> vector<256x120xf32>
    %c0_23 = arith.constant 0 : index
    %c0_24 = arith.constant 0 : index
    %72 = vector.load %arg9[%c0_23, %c0_24] : memref<1x120xf32, #tpu.memory_space<vmem>>, vector<1x120xf32>
    %73 = vector.broadcast %72 : vector<1x120xf32> to vector<256x120xf32>
    %74 = arith.addf %71, %73 : vector<256x120xf32>
    %cst_25 = arith.constant 0.000000e+00 : f32
    %75 = vector.broadcast %cst_25 : f32 to vector<256x120xf32>
    %76 = arith.maximumf %74, %75 : vector<256x120xf32>
    %c0_26 = arith.constant 0 : index
    %c0_27 = arith.constant 0 : index
    %77 = vector.load %arg10[%c0_26, %c0_27] : memref<120x84xf32, #tpu.memory_space<vmem>>, vector<120x84xf32>
    %cst_28 = arith.constant dense<0.000000e+00> : vector<256x84xf32>
    %78 = tpu.matmul %76, %77, %cst_28 {dimension_numbers = #tpu.dot_dimension_numbers<[1], [0], [0], [1], [0, 0, 1, 1], [], []>} : vector<256x120xf32>, vector<120x84xf32>, vector<256x84xf32> -> vector<256x84xf32>
    %c0_29 = arith.constant 0 : index
    %c0_30 = arith.constant 0 : index
    %79 = vector.load %arg11[%c0_29, %c0_30] : memref<1x84xf32, #tpu.memory_space<vmem>>, vector<1x84xf32>
    %80 = vector.broadcast %79 : vector<1x84xf32> to vector<256x84xf32>
    %81 = arith.addf %78, %80 : vector<256x84xf32>
    %cst_31 = arith.constant 0.000000e+00 : f32
    %82 = vector.broadcast %cst_31 : f32 to vector<256x84xf32>
    %83 = arith.maximumf %81, %82 : vector<256x84xf32>
    %c0_32 = arith.constant 0 : index
    %c0_33 = arith.constant 0 : index
    %84 = vector.load %arg12[%c0_32, %c0_33] : memref<84x10xf32, #tpu.memory_space<vmem>>, vector<84x10xf32>
    %cst_34 = arith.constant dense<0.000000e+00> : vector<256x10xf32>
    %85 = tpu.matmul %83, %84, %cst_34 {dimension_numbers = #tpu.dot_dimension_numbers<[1], [0], [0], [1], [0, 0, 1, 1], [], []>} : vector<256x84xf32>, vector<84x10xf32>, vector<256x10xf32> -> vector<256x10xf32>
    %c0_35 = arith.constant 0 : index
    %c0_36 = arith.constant 0 : index
    %86 = vector.load %arg13[%c0_35, %c0_36] : memref<1x10xf32, #tpu.memory_space<vmem>>, vector<1x10xf32>
    %87 = vector.broadcast %86 : vector<1x10xf32> to vector<256x10xf32>
    %88 = arith.addf %85, %87 : vector<256x10xf32>
    %c0_37 = arith.constant 0 : index
    %c0_38 = arith.constant 0 : index
    %89 = vector.load %arg14[%c0_37, %c0_38] : memref<256x10xf32, #tpu.memory_space<vmem>>, vector<256x10xf32>
    tpu.vector_store %arg14[%c0_37, %c0_38], %88 {strides = array<i32>} : memref<256x10xf32, #tpu.memory_space<vmem>>, vector<256x10xf32>,
    return
  }
  func.func @transform_0(%arg0: i32) -> (i32, i32) {
    %c0_i32 = arith.constant 0 : i32
    %c0_i32_0 = arith.constant 0 : i32
    return %arg0, %c0_i32 : i32, i32
  }
  func.func @transform_1(%arg0: i32) -> (i32, i32) {
    %c0_i32 = arith.constant 0 : i32
    %c0_i32_0 = arith.constant 0 : i32
    %c0_i32_1 = arith.constant 0 : i32
    return %c0_i32, %c0_i32_0 : i32, i32
  }
  func.func @transform_2(%arg0: i32) -> (i32, i32) {
    %c0_i32 = arith.constant 0 : i32
    %c0_i32_0 = arith.constant 0 : i32
    %c0_i32_1 = arith.constant 0 : i32
    return %c0_i32, %c0_i32_0 : i32, i32
  }
  func.func @transform_3(%arg0: i32) -> (i32, i32) {
    %c0_i32 = arith.constant 0 : i32
    %c0_i32_0 = arith.constant 0 : i32
    %c0_i32_1 = arith.constant 0 : i32
    return %c0_i32, %c0_i32_0 : i32, i32
  }
  func.func @transform_4(%arg0: i32) -> (i32, i32) {
    %c0_i32 = arith.constant 0 : i32
    %c0_i32_0 = arith.constant 0 : i32
    %c0_i32_1 = arith.constant 0 : i32
    return %c0_i32, %c0_i32_0 : i32, i32
  }
  func.func @transform_5(%arg0: i32) -> (i32, i32) {
    %c0_i32 = arith.constant 0 : i32
    %c0_i32_0 = arith.constant 0 : i32
    %c0_i32_1 = arith.constant 0 : i32
    return %c0_i32, %c0_i32_0 : i32, i32
  }
  func.func @transform_6(%arg0: i32) -> (i32, i32) {
    %c0_i32 = arith.constant 0 : i32
    %c0_i32_0 = arith.constant 0 : i32
    %c0_i32_1 = arith.constant 0 : i32
    return %c0_i32, %c0_i32_0 : i32, i32
  }
  func.func @transform_7(%arg0: i32) -> (i32, i32) {
    %c0_i32 = arith.constant 0 : i32
    %c0_i32_0 = arith.constant 0 : i32
    %c0_i32_1 = arith.constant 0 : i32
    return %c0_i32, %c0_i32_0 : i32, i32
  }
  func.func @transform_8(%arg0: i32) -> (i32, i32) {
    %c0_i32 = arith.constant 0 : i32
    %c0_i32_0 = arith.constant 0 : i32
    %c0_i32_1 = arith.constant 0 : i32
    return %c0_i32, %c0_i32_0 : i32, i32
  }
  func.func @transform_9(%arg0: i32) -> (i32, i32) {
    %c0_i32 = arith.constant 0 : i32
    %c0_i32_0 = arith.constant 0 : i32
    %c0_i32_1 = arith.constant 0 : i32
    return %c0_i32, %c0_i32_0 : i32, i32
  }
  func.func @transform_10(%arg0: i32) -> (i32, i32) {
    %c0_i32 = arith.constant 0 : i32
    %c0_i32_0 = arith.constant 0 : i32
    %c0_i32_1 = arith.constant 0 : i32
    return %c0_i32, %c0_i32_0 : i32, i32
  }
  func.func @transform_11(%arg0: i32) -> (i32, i32) {
    %c0_i32 = arith.constant 0 : i32
    %c0_i32_0 = arith.constant 0 : i32
    %c0_i32_1 = arith.constant 0 : i32
    return %c0_i32, %c0_i32_0 : i32, i32
  }
  func.func @transform_12(%arg0: i32) -> (i32, i32) {
    %c0_i32 = arith.constant 0 : i32
    %c0_i32_0 = arith.constant 0 : i32
    %c0_i32_1 = arith.constant 0 : i32
    return %c0_i32, %c0_i32_0 : i32, i32
  }
  func.func @transform_13(%arg0: i32) -> (i32, i32) {
    %c0_i32 = arith.constant 0 : i32
    %c0_i32_0 = arith.constant 0 : i32
    return %arg0, %c0_i32 : i32, i32
  }
}

</mosaic_0001>

<bundles_post_ra>
// kernel: tpu_custom_call.1
= control target key start
LH: loop header
LB: loop body
LE: loop exit
PB: predicated region body
PF: predicated region fallthrough
CT: control target
= control target key end

     0   :  { %vm108_vm0 = vcmask 1046528   ;;  %vm242_vm1 = vcmask 1044480   ;;  %vm175_vm2 = vcmask 1045504   ;;  %s7481_s22 = smov 32   ;;  %s7482_s23 = smov 96   ;;  %vm309_vm3 = vcmask 1043456   ;;  %s11100_s0 = inlined_call_operand.vmem [shape: f32[256,32], index: 0, kind: input, shape index: {}]   ;;  %s11101_s1 = inlined_call_operand.vmem [shape: f32[160,168], index: 1, kind: input, shape index: {}]   ;;  %s11102_s3 = inlined_call_operand.vmem [shape: f32[168,84], index: 3, kind: input, shape index: {}]   ;;  %s11103_s2 = inlined_call_operand.vmem [shape: f32[1,168], index: 2, kind: input, shape index: {}]   ;;  %s11104_s4 = inlined_call_operand.vmem [shape: f32[420,160], index: 4, kind: input, shape index: {}]   ;;  %s11105_s6 = inlined_call_operand.vmem [shape: f32[160,80], index: 6, kind: input, shape index: {}]   ;;  %s11106_s5 = inlined_call_operand.vmem [shape: f32[1,160], index: 5, kind: input, shape index: {}]   ;;  %s11107_s7 = inlined_call_operand.vmem [shape: f32[400,120], index: 7, kind: input, shape index: {}]   ;;  %s11108_s9 = inlined_call_operand.vmem [shape: f32[120,84], index: 9, kind: input, shape index: {}]   ;;  %s11109_s8 = inlined_call_operand.vmem [shape: f32[1,120], index: 8, kind: input, shape index: {}]   ;;  %s11110_s11 = inlined_call_operand.vmem [shape: f32[84,10], index: 11, kind: input, shape index: {}]   ;;  %s11111_s10 = inlined_call_operand.vmem [shape: f32[1,84], index: 10, kind: input, shape index: {}]   ;;  %s11112_s12 = inlined_call_operand.vmem [shape: f32[1,10], index: 12, kind: input, shape index: {}]   ;;  %s11113_s13 = inlined_call_operand.vmem [shape: f32[256,10], index: 13, kind: output, shape index: {}]  }
   0x1   :  { %v7564_v0 = vld [vmem:[%s11100_s0] sm:$0xff]  ;;  %v7569_v1 = vld [vmem:[%s11100_s0 + $0x8] sm:$0xff]  ;;  %v7574_v2 = vld [vmem:[%s11100_s0 + $0x10] sm:$0xff]  ;;  %s7483_s28 = smov 64   ;;  %vm667_vm4 = vcmask 261120   ;;  %vm700_vm5 = vcmask 523264  }
   0x2   :  { %v109_v3 = vrot.slane %v7564_v0, 1  ;;  %v110_v4 = vrot.slane %v7569_v1, 1  ;;  %v112_v5 = vrot.slane %v7574_v2, 1  ;;  %v243_v6 = vrot.slane %v7564_v0, 3  ;;  %v7583_v7 = vld [vmem:[%s11100_s0 + $0x18] sm:$0xff]  ;;  %v7592_v12 = vld [vmem:[%s11100_s0 + $0x20] sm:$0xff] }
   0x3   :  { %v244_v8 = vrot.slane %v7569_v1, 3  ;;  %v246_v9 = vrot.slane %v7574_v2, 3  ;;  %v176_v10 = vrot.slane %v7564_v0, 2  ;;  %v177_v11 = vrot.slane %v7569_v1, 2  ;;  %v7610_v21 = vld [vmem:[%s11100_s0 + $0x28] sm:$0xff]  ;;  %v7615_v22 = vld [vmem:[%s11100_s0 + $0x30] sm:$0xff] }
   0x4   :  { %v111_v13 = vsel %vm108_vm0, %v109_v3, %v110_v4  ;;  %v113_v14 = vsel %vm108_vm0, %v110_v4, %v112_v5  ;;  %v179_v15 = vrot.slane %v7574_v2, 2  ;;  %v114_v16 = vrot.slane %v7583_v7, 1  ;;  %v7636_v40 = vld [vmem:[%s11100_s0 + $0x38] sm:$0xff]  ;;  %v7641_v41 = vld [vmem:[%s11100_s0 + $0x40] sm:$0xff]  ;;  %v7668_v4 = vld [vmem:[%s11100_s0 + $0x48] sm:$0xff]  ;;  %s7486_s15 = smov 40  }
   0x5   :  { %v6790_v17 = vpack.i.bf16 %v113_v14, %v111_v13  ;;  %v245_v18 = vsel %vm242_vm1, %v243_v6, %v244_v8  ;;  %v247_v19 = vsel %vm242_vm1, %v244_v8, %v246_v9  ;;  %v178_v20 = vsel %vm175_vm2, %v176_v10, %v177_v11  ;;  %s7488_s16 = smov 124   ;;  %s7490_s27 = smov 112  }
   0x6   :  { %v6800_v23 = vpack.i.bf16 %v247_v19, %v245_v18  ;;  %v180_v24 = vsel %vm175_vm2, %v177_v11, %v179_v15  ;;  %v115_v25 = vsel %vm108_vm0, %v112_v5, %v114_v16  ;;  %v116_v26 = vrot.slane %v7592_v12, 1  ;;  %v7673_v5 = vld [vmem:[%s11100_s0 + $0x50] sm:$0xff] }
   0x7   :  { %6791 = vrot.lane.b32.xlu0 %v6790_v17, %s7481_s22  ;;  %v6795_v27 = vpack.i.bf16 %v180_v24, %v178_v20  ;;  %v181_v28 = vrot.slane %v7583_v7, 2  ;;  %v183_v29 = vrot.slane %v7592_v12, 2  ;;  %v248_v30 = vrot.slane %v7583_v7, 3  ;;  %v7688_v20 = vld [vmem:[%s11100_s0 + $0x58] sm:$0xff] }
   0x8   :  { %6801 = vrot.lane.b32.xlu1 %v6800_v23, %s7482_s23  ;;  %v117_v31 = vsel %vm108_vm0, %v114_v16, %v116_v26  ;;  %v250_v32 = vrot.slane %v7592_v12, 3  ;;  %v118_v33 = vrot.slane %v7610_v21, 1  ;;  %v120_v34 = vrot.slane %v7615_v22, 1  ;;  %v7693_v23 = vld [vmem:[%s11100_s0 + $0x60] sm:$0xff] }
   0x9   :  { %v6805_v35 = vpack.i.bf16 %v117_v31, %v115_v25  ;;  %v182_v36 = vsel %vm175_vm2, %v179_v15, %v181_v28  ;;  %v184_v37 = vsel %vm175_vm2, %v181_v28, %v183_v29  ;;  %v249_v38 = vsel %vm242_vm1, %v246_v9, %v248_v30 }
   0xa   :  { %v251_v39 = vsel %vm242_vm1, %v248_v30, %v250_v32  ;;  %v6810_v42 = vpack.i.bf16 %v184_v37, %v182_v36  ;;  %v119_v43 = vsel %vm108_vm0, %v116_v26, %v118_v33  ;;  %v185_v44 = vrot.slane %v7610_v21, 2 }
   0xb   :  { %6796 = vrot.lane.b32.xlu0 %v6795_v27, %s7483_s28  ;;  %v187_v45 = vrot.slane %v7615_v22, 2  ;;  %v6815_v46 = vpack.i.bf16 %v251_v39, %v249_v38  ;;  %v121_v47 = vsel %vm108_vm0, %v118_v33, %v120_v34  ;;  %v252_v48 = vrot.slane %v7610_v21, 3 }
   0xc   :  { %6806 = vrot.lane.b32.xlu1 %v6805_v35, %s7481_s22  ;;  %v254_v49 = vrot.slane %v7615_v22, 3  ;;  %v186_v50 = vsel %vm175_vm2, %v183_v29, %v185_v44  ;;  %v122_v52 = vrot.slane %v7636_v40, 1  ;;  %v124_v53 = vrot.slane %v7641_v41, 1 }
   0xd   :  { %v188_v51 = vsel %vm175_vm2, %v185_v44, %v187_v45  ;;  %v6820_v54 = vpack.i.bf16 %v121_v47, %v119_v43  ;;  %v189_v55 = vrot.slane %v7636_v40, 2  ;;  %v253_v57 = vsel %vm242_vm1, %v250_v32, %v252_v48  ;;  %v7723_v47 = vld [vmem:[%s11100_s0 + $0x70] sm:$0xff] }
   0xe   :  { %v6825_v56 = vpack.i.bf16 %v188_v51, %v186_v50  ;;  %v255_v58 = vsel %vm242_vm1, %v252_v48, %v254_v49  ;;  %v191_v59 = vrot.slane %v7641_v41, 2  ;;  %v123_v60 = vsel %vm108_vm0, %v120_v34, %v122_v52 }
   0xf   :  { %6811 = vrot.lane.b32.xlu0 %v6810_v42, %s7483_s28  ;;  %v125_v61 = vsel %vm108_vm0, %v122_v52, %v124_v53  ;;  %v256_v62 = vrot.slane %v7636_v40, 3  ;;  %v258_v63 = vrot.slane %v7641_v41, 3  ;;  %v6830_v8 = vpack.i.bf16 %v255_v58, %v253_v57  ;;  %v7714_v42 = vld [vmem:[%s11100_s0 + $0x68] sm:$0xff]  ;;  %v7738_v58 = vld [vmem:[%s11100_s0 + $0x78] sm:$0xff] }
  0x10   :  { %6816 = vrot.lane.b32.xlu1 %v6815_v46, %s7482_s23  ;;  %v190_v9 = vsel %vm175_vm2, %v187_v45, %v189_v55  ;;  %v6835_v11 = vpack.i.bf16 %v125_v61, %v123_v60  ;;  %v192_v13 = vsel %vm175_vm2, %v189_v55, %v191_v59  ;;  %v126_v14 = vrot.slane %v7668_v4, 1 }
  0x11   :  { %v128_v15 = vrot.slane %v7673_v5, 1  ;;  %v257_v16 = vsel %vm242_vm1, %v254_v49, %v256_v62  ;;  %v259_v17 = vsel %vm242_vm1, %v256_v62, %v258_v63  ;;  %v193_v18 = vrot.slane %v7668_v4, 2 }
  0x12   :  { %v195_v19 = vrot.slane %v7673_v5, 2  ;;  %v6840_v24 = vpack.i.bf16 %v192_v13, %v190_v9  ;;  %v260_v25 = vrot.slane %v7668_v4, 3  ;;  %v6845_v26 = vpack.i.bf16 %v259_v17, %v257_v16  ;;  %v7758_v16 = vld [vmem:[%s11100_s0 + $0x88] sm:$0xff]  ;;  %v7763_v17 = vld [vmem:[%s11100_s0 + $0x90] sm:$0xff] }
  0x13   :  { %6821 = vrot.lane.b32.xlu0 %v6820_v54, %s7481_s22  ;;  %v127_v27 = vsel %vm108_vm0, %v124_v53, %v126_v14  ;;  %v129_v28 = vsel %vm108_vm0, %v126_v14, %v128_v15  ;;  %v262_v29 = vrot.slane %v7673_v5, 3  ;;  %v194_v30 = vsel %vm175_vm2, %v191_v59, %v193_v18  ;;  %v7743_v59 = vld [vmem:[%s11100_s0 + $0x80] sm:$0xff] }
  0x14   :  { %6826 = vrot.lane.b32.xlu1 %v6825_v56, %s7483_s28  ;;  %v196_v31 = vsel %vm175_vm2, %v193_v18, %v195_v19  ;;  %v130_v32 = vrot.slane %v7688_v20, 1  ;;  %v132_v33 = vrot.slane %v7693_v23, 1  ;;  %v6850_v34 = vpack.i.bf16 %v129_v28, %v127_v27  ;;  %v767_v18 = vld [vmem:[%s11101_s1 + $0x8] sm:$0xff]  ;;  %v768_v27 = vld [vmem:[%s11101_s1 + $0x10] sm:$0xff] }
  0x15   :  { %v261_v35 = vsel %vm242_vm1, %v258_v63, %v260_v25  ;;  %v6855_v36 = vpack.i.bf16 %v196_v31, %v194_v30  ;;  %v263_v37 = vsel %vm242_vm1, %v260_v25, %v262_v29  ;;  %v197_v38 = vrot.slane %v7688_v20, 2  ;;  %v769_v25 = vld [vmem:[%s11101_s1 + $0x18] sm:$0xff] }
  0x16   :  { %v199_v39 = vrot.slane %v7693_v23, 2  ;;  %v131_v43 = vsel %vm108_vm0, %v128_v15, %v130_v32  ;;  %v133_v44 = vsel %vm108_vm0, %v130_v32, %v132_v33  ;;  %v264_v45 = vrot.slane %v7688_v20, 3  ;;  %v771_v32 = vld [vmem:[%s11101_s1 + $0x28] sm:$0xff] }
  0x17   :  { %6831 = vrot.lane.b32.xlu0 %v6830_v8, %s7482_s23  ;;  %v266_v46 = vrot.slane %v7693_v23, 3  ;;  %v6860_v48 = vpack.i.bf16 %v263_v37, %v261_v35  ;;  %v134_v49 = vrot.slane %v7714_v42, 1  ;;  %v6865_v50 = vpack.i.bf16 %v133_v44, %v131_v43 }
  0x18   :  { %6836 = vrot.lane.b32.xlu1 %v6835_v11, %s7481_s22  ;;  %v198_v51 = vsel %vm175_vm2, %v195_v19, %v197_v38  ;;  %v200_v52 = vsel %vm175_vm2, %v197_v38, %v199_v39  ;;  %v136_v53 = vrot.slane %v7723_v47, 1  ;;  %v265_v54 = vsel %vm242_vm1, %v262_v29, %v264_v45 }
  0x19   :  { %v267_v55 = vsel %vm242_vm1, %v264_v45, %v266_v46  ;;  %v201_v56 = vrot.slane %v7714_v42, 2  ;;  %v203_v57 = vrot.slane %v7723_v47, 2  ;;  %v6870_v60 = vpack.i.bf16 %v200_v52, %v198_v51  ;;  %v770_v45 = vld [vmem:[%s11101_s1 + $0x20] sm:$0xff]  ;;  %v775_v51 = vld [vmem:[%s11101_s1 + $0x48] sm:$0xff]  ;;  %v777_v52 = vld [vmem:[%s11101_s1 + $0x58] sm:$0xff] }
  0x1a   :  { %v135_v61 = vsel %vm108_vm0, %v132_v33, %v134_v49  ;;  %v6875_v62 = vpack.i.bf16 %v267_v55, %v265_v54  ;;  %v137_v63 = vsel %vm108_vm0, %v134_v49, %v136_v53  ;;  %v268_v8 = vrot.slane %v7714_v42, 3  ;;  %v773_v33 = vld [vmem:[%s11101_s1 + $0x38] sm:$0xff] }
  0x1b   :  { %6841 = vrot.lane.b32.xlu0 %v6840_v24, %s7483_s28  ;;  %v270_v9 = vrot.slane %v7723_v47, 3  ;;  %v202_v11 = vsel %vm175_vm2, %v199_v39, %v201_v56  ;;  %v204_v13 = vsel %vm175_vm2, %v201_v56, %v203_v57  ;;  %v138_v14 = vrot.slane %v7738_v58, 1 }
  0x1c   :  { %6846 = vrot.lane.b32.xlu1 %v6845_v26, %s7482_s23  ;;  %v140_v15 = vrot.slane %v7743_v59, 1  ;;  %v6880_v19 = vpack.i.bf16 %v137_v63, %v135_v61  ;;  %v205_v24 = vrot.slane %v7738_v58, 2  ;;  %v766_v26 = vld [vmem:[%s11101_s1] sm:$0xff]  ;;  %v6885_v28 = vpack.i.bf16 %v204_v13, %v202_v11 }
  0x1d   :  { %v269_v29 = vsel %vm242_vm1, %v266_v46, %v268_v8  ;;  %v271_v30 = vsel %vm242_vm1, %v268_v8, %v270_v9  ;;  %v207_v31 = vrot.slane %v7743_v59, 2  ;;  %v274_v37 = vrot.slane %v7743_v59, 3  ;;  %v772_v46 = vld [vmem:[%s11101_s1 + $0x30] sm:$0xff] }
  0x1e   :  { %v141_v35 = vsel %vm108_vm0, %v138_v14, %v140_v15  ;;  %v142_v38 = vrot.slane %v7758_v16, 1  ;;  %v144_v39 = vrot.slane %v7763_v17, 1  ;;  %v6229_v43 = vpack.c.bf16 %v769_v25, %v767_v18 }
  0x1f   :  { %6851 = vrot.lane.b32.xlu0 %v6850_v34, %s7481_s22  ;;  %v139_v34 = vsel %vm108_vm0, %v136_v53, %v138_v14  ;;  %v6231_v44 = vpack.c.bf16 %v768_v27, %v766_v26  ;;  %v206_v49 = vsel %vm175_vm2, %v203_v57, %v205_v24  ;;  %v208_v54 = vsel %vm175_vm2, %v205_v24, %v207_v31  ;;  %v7816_v57 = vld [vmem:[%s11100_s0 + $0x98] sm:$0xff]  ;;  %v779_v26 = vld [vmem:[%s11101_s1 + $0x68] sm:$0xff] }
  0x20   :  { %6856 = vrot.lane.b32.xlu1 %v6855_v36, %s7483_s28  ;;  %v272_v36 = vrot.slane %v7738_v58, 3  ;;  %v6895_v53 = vpack.i.bf16 %v141_v35, %v139_v34  ;;  %v209_v55 = vrot.slane %v7758_v16, 2  ;;  %v211_v56 = vrot.slane %v7763_v17, 2  ;;  %6230 = vmatprep.subr.bf16.mxu0 %v6229_v43  ;;  %v781_v27 = vld [vmem:[%s11101_s1 + $0x78] sm:$0xff] }
  0x21   :  { %v276_v63 = vrot.slane %v7758_v16, 3  ;;  %6232 = vmatpush1.bf16.msra.mxu0 %v6231_v44  ;;  %v6235_v8 = vpack.c.bf16 %v772_v46, %v770_v45  ;;  %v143_v11 = vsel %vm108_vm0, %v140_v15, %v142_v38  ;;  %v145_v13 = vsel %vm108_vm0, %v142_v38, %v144_v39  ;;  %v7853_v38 = vld [vmem:[%s11100_s0 + $0xa8] sm:$0xff]  ;;  %v780_v44 = vld [vmem:[%s11101_s1 + $0x70] sm:$0xff] }
  0x22   :  { %v273_v61 = vsel %vm242_vm1, %v270_v9, %v272_v36  ;;  %v278_v14 = vrot.slane %v7763_v17, 3  ;;  %v6237_v18 = vpack.c.bf16 %v777_v52, %v775_v51  ;;  %v776_v9 = vld [vmem:[%s11101_s1 + $0x50] sm:$0xff]  ;;  %v6900_v24 = vpack.i.bf16 %v208_v54, %v206_v49  ;;  %v785_v51 = vld [vmem:[%s11101_s1 + $0x98] sm:$0xff] }
  0x23   :  { %6861 = vrot.lane.b32.xlu0 %v6860_v48, %s7482_s23  ;;  %v6890_v48 = vpack.i.bf16 %v271_v30, %v269_v29  ;;  %v146_v25 = vrot.slane %v7816_v57, 1  ;;  %v6910_v29 = vpack.i.bf16 %v145_v13, %v143_v11  ;;  %v210_v30 = vsel %vm175_vm2, %v207_v31, %v209_v55  ;;  %v778_v31 = vld [vmem:[%s11101_s1 + $0x60] sm:$0xff]  ;;  %v7869_v49 = vld [vmem:[%s11100_s0 + $0xb0] sm:$0xff] }
  0x24   :  { %6866 = vrot.lane.b32.xlu1 %v6865_v50, %s7481_s22  ;;  %v6233_v50 = vpack.c.bf16 %v773_v33, %v771_v32  ;;  %v212_v32 = vsel %vm175_vm2, %v209_v55, %v211_v56  ;;  %v277_v34 = vsel %vm242_vm1, %v274_v37, %v276_v63  ;;  %v279_v35 = vsel %vm242_vm1, %v276_v63, %v278_v14  ;;  %v784_v11 = vld [vmem:[%s11101_s1 + $0x90] sm:$0xff] }
  0x25   :  { %v6241_v43 = vpack.c.bf16 %v781_v27, %v779_v26  ;;  %v6243_v54 = vpack.c.bf16 %v780_v44, %v778_v31  ;;  %v284_v27 = vrot.slane %v7853_v38, 3  ;;  %vm733_vm6 = vcmask 785408  }
  0x26   :  { %6234 = vmatprep.subr.bf16.mxu0 %v6233_v50  ;;  %v783_v50 = vld [vmem:[%s11101_s1 + $0x88] sm:$0xff]  ;;  %vm1225_vm7 = vcmask 326656   ;;  %vm1904_vm8 = vcmask 1041408   ;;  %vm2423_vm9 = vcmask 1014784   ;;  %vm2358_vm10 = vcmask 687104  }
  0x27   :  { %6871 = vrot.lane.b32.xlu0 %v6870_v60, %s7483_s28  ;;  %v7821_v60 = vld [vmem:[%s11100_s0 + $0xa0] sm:$0xff]  ;;  %6236 = vmatpush1.bf16.msra.mxu0 %v6235_v8  ;;  %v6245_v63 = vpack.c.bf16 %v785_v51, %v783_v50  ;;  %vm2607_vm11 = vcmask 293888   ;;  %vm2456_vm12 = vcmask 654336   ;;  %vm4337_vm13 = vcmask 916480  }
  0x28   :  { %6876 = vrot.lane.b32.xlu1 %v6875_v62, %s7482_s23  ;;  %v275_v62 = vsel %vm242_vm1, %v272_v36, %v274_v37  ;;  %v148_v15 = vrot.slane %v7821_v60, 1  ;;  %v213_v36 = vrot.slane %v7816_v57, 2  ;;  %6238 = vmatprep.subr.bf16.mxu0 %v6237_v18  ;;  %v147_v37 = vsel %vm108_vm0, %v144_v39, %v146_v25  ;;  %v782_v8 = vld [vmem:[%s11101_s1 + $0x80] sm:$0xff] }
  0x29   :  { %v215_v46 = vrot.slane %v7821_v60, 2  ;;  %v6915_v39 = vpack.i.bf16 %v212_v32, %v210_v30  ;;  %v282_v52 = vrot.slane %v7821_v60, 3  ;;  %v6247_v30 = vpack.c.bf16 %v784_v11, %v782_v8 }
  0x2a   :  { %v149_v45 = vsel %vm108_vm0, %v146_v25, %v148_v15  ;;  %v214_v13 = vsel %vm175_vm2, %v211_v56, %v213_v36  ;;  %v789_v25 = vld [vmem:[%s11101_s1 + $0xb8] sm:$0xff]  ;;  %v219_v56 = vrot.slane %v7869_v49, 2  ;;  %vm4459_vm14 = vcmask 130048  }
  0x2b   :  { %6881 = vrot.lane.b32.xlu0 %v6880_v19, %s7481_s22  ;;  %v774_v19 = vld [vmem:[%s11101_s1 + $0x40] sm:$0xff]  ;;  %v6925_v55 = vpack.i.bf16 %v149_v45, %v147_v37  ;;  %v216_v18 = vsel %vm175_vm2, %v213_v36, %v215_v46  ;;  %v788_v36 = vld [vmem:[%s11101_s1 + $0xb0] sm:$0xff]  ;;  %v793_v45 = vld [vmem:[%s11101_s1 + $0xd8] sm:$0xff]  ;;  %v7933_v50 = vsel %vm242_vm1, %v282_v52, %v284_v27  ;;  %vm5028_vm15 = vcmask 982016  }
  0x2c   :  { %6886 = vrot.lane.b32.xlu1 %v6885_v28, %s7483_s28  ;;  %v6905_v28 = vpack.i.bf16 %v275_v62, %v273_v61  ;;  %v6239_v33 = vpack.c.bf16 %v776_v9, %v774_v19  ;;  %v150_v61 = vrot.slane %v7853_v38, 1  ;;  %v152_v62 = vrot.slane %v7869_v49, 1 }
  0x2d   :  { %v217_v9 = vrot.slane %v7853_v38, 2  ;;  %v6930_v32 = vpack.i.bf16 %v216_v18, %v214_v13 }
  0x2e   :  { %6240 = vmatpush1.bf16.msra.mxu0 %v6239_v33  ;;  %v151_v33 = vsel %vm108_vm0, %v148_v15, %v150_v61  ;;  %v153_v31 = vsel %vm108_vm0, %v150_v61, %v152_v62  ;;  %v791_v15 = vld [vmem:[%s11101_s1 + $0xc8] sm:$0xff] }
  0x2f   :  { %6891 = vrot.lane.b32.xlu0 %v6890_v48, %s7482_s23  ;;  %v280_v48 = vrot.slane %v7816_v57, 3  ;;  %6242 = vmatprep.subr.bf16.mxu0 %v6241_v43  ;;  %v218_v44 = vsel %vm175_vm2, %v215_v46, %v217_v9  ;;  %v6253_v61 = vpack.c.bf16 %v793_v45, %v791_v15 }
  0x30   :  { %6896 = vrot.lane.b32.xlu1 %v6895_v53, %s7481_s22  ;;  %v6920_v53 = vpack.i.bf16 %v279_v35, %v277_v34  ;;  %v786_v35 = vld [vmem:[%s11101_s1 + $0xa0] sm:$0xff] }
  0x31   :  { %v281_v19 = vsel %vm242_vm1, %v278_v14, %v280_v48  ;;  %v283_v26 = vsel %vm242_vm1, %v280_v48, %v282_v52  ;;  %v286_v14 = vrot.slane %v7869_v49, 3  ;;  %v220_v48 = vsel %vm175_vm2, %v217_v9, %v219_v56  ;;  %v790_v52 = vld [vmem:[%s11101_s1 + $0xc0] sm:$0xff]  ;;  %v795_v9 = vld [vmem:[%s11101_s1 + $0xe8] sm:$0xff] }
  0x32   :  { %6244 = vmatpush1.bf16.msra.mxu0 %v6243_v54  ;;  %v6935_v43 = vpack.i.bf16 %v283_v26, %v281_v19  ;;  %v6940_v54 = vpack.i.bf16 %v153_v31, %v151_v33  ;;  %v6945_v8 = vpack.i.bf16 %v220_v48, %v218_v44  ;;  %v7958_v19 = vld [vmem:[%s11100_s0 + $0xd0] sm:$0xff]  ;;  %v7972_v26 = vld [vmem:[%s11100_s0 + $0xf8] sm:$0xff]  ;;  %v794_v44 = vld [vmem:[%s11101_s1 + $0xe0] sm:$0xff] }
  0x33   :  { %6901 = vrot.lane.b32.xlu0 %v6900_v24, %s7483_s28  ;;  %v787_v24 = vld [vmem:[%s11101_s1 + $0xa8] sm:$0xff]  ;;  %6246 = vmatprep.subr.bf16.mxu0 %v6245_v63  ;;  %v287_v46 = vsel %vm242_vm1, %v284_v27, %v286_v14  ;;  %v792_v63 = vld [vmem:[%s11101_s1 + $0xd0] sm:$0xff]  ;;  %v310_v27 = vrot.slane %v7564_v0, 4  ;;  %v227_v48 = vrot.slane %v7958_v19, 2 }
  0x34   :  { %6906 = vrot.lane.b32.xlu1 %v6905_v28, %s7482_s23  ;;  %v7906_v28 = vld [vmem:[%s11100_s0 + $0xb8] sm:$0xff]  ;;  %v6249_v34 = vpack.c.bf16 %v789_v25, %v787_v24  ;;  %v6950_v11 = vpack.i.bf16 %v287_v46, %v7933_v50  ;;  %v799_v50 = vld [vmem:[%s11101_s1 + $0x108] sm:$0xff] }
  0x35   :  { %v154_v37 = vrot.slane %v7906_v28, 1  ;;  %v797_v24 = vld [vmem:[%s11101_s1 + $0xf8] sm:$0xff] }
  0x36   :  { %6248 = vmatpush1.bf16.msra.mxu0 %v6247_v30  ;;  %v311_v30 = vrot.slane %v7569_v1, 4  ;;  %v6257_v31 = vpack.c.bf16 %v797_v24, %v795_v9  ;;  %v801_v46 = vld [vmem:[%s11101_s1 + $0x118] sm:$0xff]  ;;  %v798_v24 = vld [vmem:[%s11101_s1 + $0x100] sm:$0xff] }
  0x37   :  { %6911 = vrot.lane.b32.xlu0 %v6910_v29, %s7481_s22  ;;  %v7911_v29 = vld [vmem:[%s11100_s0 + $0xc0] sm:$0xff]  ;;  %6250 = vmatprep.subr.bf16.mxu0 %v6249_v34  ;;  %v155_v13 = vsel %vm108_vm0, %v152_v62, %v154_v37  ;;  %v288_v62 = vrot.slane %v7906_v28, 3  ;;  %v6255_v34 = vpack.c.bf16 %v792_v63, %v790_v52  ;;  %v8018_v52 = vld [vmem:[%s11100_s0 + $0xd8] sm:$0xff] }
  0x38   :  { %6916 = vrot.lane.b32.xlu1 %v6915_v39, %s7483_s28  ;;  %v156_v51 = vrot.slane %v7911_v29, 1  ;;  %v221_v39 = vrot.slane %v7906_v28, 2  ;;  %v223_v18 = vrot.slane %v7911_v29, 2  ;;  %v290_v33 = vrot.slane %v7911_v29, 3  ;;  %v8023_v63 = vld [vmem:[%s11100_s0 + $0xe0] sm:$0xff] }
  0x3a   :  { %v157_v25 = vsel %vm108_vm0, %v154_v37, %v156_v51  ;;  %v312_v37 = vsel %vm309_vm3, %v310_v27, %v311_v30  ;;  %v224_v15 = vsel %vm175_vm2, %v221_v39, %v223_v18 }
  0x3b   :  { %6921 = vrot.lane.b32.xlu0 %v6920_v53, %s7482_s23  ;;  %v6251_v53 = vpack.c.bf16 %v788_v36, %v786_v35  ;;  %v304_v35 = vrot.slane %v7972_v26, 3  ;;  %5761 = vmatprep.mubr.msk.f32.mxu0 %vm667_vm4, %v312_v37 }
  0x3c   :  { %6926 = vrot.lane.b32.xlu1 %v6925_v55, %s7481_s22  ;;  %v7943_v55 = vld [vmem:[%s11100_s0 + $0xc8] sm:$0xff] }
  0x3d   :  { %6252 = vmatpush1.bf16.msra.mxu0 %v6251_v53  ;;  %v158_v36 = vrot.slane %v7943_v55, 1  ;;  %v225_v45 = vrot.slane %v7943_v55, 2  ;;  %v6955_v53 = vpack.i.bf16 %v157_v25, %v155_v13  ;;  %v800_v25 = vld [vmem:[%s11101_s1 + $0x110] sm:$0xff] }
  0x3e   :  { %6254 = vmatprep.subr.bf16.mxu0 %v6253_v61  ;;  %v291_v61 = vsel %vm242_vm1, %v288_v62, %v290_v33 }
  0x3f   :  { %6931 = vrot.lane.b32.xlu0 %v6930_v32, %s7483_s28  ;;  %v222_v32 = vsel %vm175_vm2, %v219_v56, %v221_v39  ;;  %v796_v56 = vld [vmem:[%s11101_s1 + $0xf0] sm:$0xff]  ;;  %v8008_v39 = vsel %vm242_vm1, %v304_v35, %v243_v6  ;;  %v159_v13 = vsel %vm108_vm0, %v156_v51, %v158_v36  ;;  %v292_v51 = vrot.slane %v7943_v55, 3 }
  0x40   :  { %6936 = vrot.lane.b32.xlu1 %v6935_v43, %s7482_s23  ;;  %v160_v43 = vrot.slane %v7958_v19, 1  ;;  %v6259_v6 = vpack.c.bf16 %v796_v56, %v794_v44  ;;  %v6263_v56 = vpack.c.bf16 %v800_v25, %v798_v24  ;;  %v298_v24 = vrot.slane %v8023_v63, 3 }
  0x41   :  { %6256 = vmatpush1.bf16.msra.mxu0 %v6255_v34  ;;  %v294_v34 = vrot.slane %v7958_v19, 3 }
  0x42   :  { %v161_v9 = vsel %vm108_vm0, %v158_v36, %v160_v43  ;;  %6258 = vmatprep.subr.bf16.mxu0 %v6257_v31  ;;  %v803_v36 = vld [vmem:[%s11101_s1 + $0x128] sm:$0xff]  ;;  %v805_v31 = vld [vmem:[%s11101_s1 + $0x138] sm:$0xff] }
  0x43   :  { %6941 = vrot.lane.b32.xlu0 %v6940_v54, %s7481_s22  ;;  %v289_v54 = vsel %vm242_vm1, %v286_v14, %v288_v62  ;;  %v6261_v14 = vpack.c.bf16 %v801_v46, %v799_v50  ;;  %v226_v62 = vsel %vm175_vm2, %v223_v18, %v225_v45  ;;  %v164_v18 = vrot.slane %v8023_v63, 1  ;;  %v802_v50 = vld [vmem:[%s11101_s1 + $0x120] sm:$0xff]  ;;  %v804_v46 = vld [vmem:[%s11101_s1 + $0x130] sm:$0xff]  ;;  %s7489_s1 = smov 80  }
  0x44   :  { %6946 = vrot.lane.b32.xlu1 %v6945_v8, %s7483_s28  ;;  %v6960_v8 = vpack.i.bf16 %v224_v15, %v222_v32  ;;  %v228_v32 = vsel %vm175_vm2, %v225_v45, %v227_v48  ;;  %v6965_v44 = vpack.i.bf16 %v291_v61, %v289_v54  ;;  %v6970_v37 = vpack.i.bf16 %v161_v9, %v159_v13 }
  0x45   :  { %6260 = vmatpush1.bf16.msra.mxu0 %v6259_v6  ;;  %v6975_v15 = vpack.i.bf16 %v228_v32, %v226_v62  ;;  %v6265_v45 = vpack.c.bf16 %v805_v31, %v803_v36  ;;  %v295_v54 = vsel %vm242_vm1, %v292_v51, %v294_v34  ;;  %v229_v61 = vrot.slane %v8018_v52, 2 }
  0x46   :  { %6262 = vmatprep.subr.bf16.mxu0 %v6261_v14  ;;  %v231_v6 = vrot.slane %v8023_v63, 2  ;;  %v296_v14 = vrot.slane %v8018_v52, 3  ;;  %v6267_v25 = vpack.c.bf16 %v804_v46, %v802_v50 }
  0x47   :  { %6951 = vrot.lane.b32.xlu0 %v6950_v11, %s7482_s23  ;;  %v162_v11 = vrot.slane %v8018_v52, 1  ;;  %v230_v32 = vsel %vm175_vm2, %v227_v48, %v229_v61 }
  0x48   :  { %6956 = vrot.lane.b32.xlu1 %v6955_v53, %s7481_s22  ;;  %v293_v53 = vsel %vm242_vm1, %v290_v33, %v292_v51  ;;  %v8066_v33 = vld [vmem:[%s11100_s0 + $0xe8] sm:$0xff]  ;;  %v232_v51 = vsel %vm175_vm2, %v229_v61, %v231_v6  ;;  %v297_v36 = vsel %vm242_vm1, %v294_v34, %v296_v14  ;;  %v299_v31 = vsel %vm242_vm1, %v296_v14, %v298_v24 }
  0x49   :  { %v163_v13 = vsel %vm108_vm0, %v160_v43, %v162_v11  ;;  %v165_v9 = vsel %vm108_vm0, %v162_v11, %v164_v18  ;;  %6264 = vmatpush1.bf16.msra.mxu0 %v6263_v56  ;;  %v6980_v43 = vpack.i.bf16 %v295_v54, %v293_v53  ;;  %v233_v56 = vrot.slane %v8066_v33, 2 }
  0x4a   :  { %6266 = vmatprep.subr.bf16.mxu0 %v6265_v45  ;;  %v6985_v62 = vpack.i.bf16 %v165_v9, %v163_v13  ;;  %v6990_v48 = vpack.i.bf16 %v232_v51, %v230_v32  ;;  %v6995_v45 = vpack.i.bf16 %v299_v31, %v297_v36  ;;  %v300_v50 = vrot.slane %v8066_v33, 3 }
  0x4b   :  { %6961 = vrot.lane.b32.xlu0 %v6960_v8, %s7483_s28  ;;  %v8071_v8 = vld [vmem:[%s11100_s0 + $0xf0] sm:$0xff]  ;;  %v234_v53 = vsel %vm175_vm2, %v231_v6, %v233_v56  ;;  %v170_v14 = vrot.slane %v7972_v26, 1  ;;  %v237_v6 = vrot.slane %v7972_v26, 2  ;;  %v313_v31 = vrot.slane %v7574_v2, 4 }
  0x4c   :  { %6966 = vrot.lane.b32.xlu1 %v6965_v44, %s7482_s23  ;;  %v166_v44 = vrot.slane %v8066_v33, 1  ;;  %v168_v11 = vrot.slane %v8071_v8, 1  ;;  %v302_v46 = vrot.slane %v8071_v8, 3  ;;  %v301_v9 = vsel %vm242_vm1, %v298_v24, %v300_v50 }
  0x4d   :  { %6268 = vmatpush1.bf16.msra.mxu0 %v6267_v25  ;;  %v174_v32 = vsel %vm108_vm0, %v170_v14, %v109_v3  ;;  %v241_v51 = vsel %vm175_vm2, %v237_v6, %v176_v10 }
  0x4e   :  { %v169_v34 = vsel %vm108_vm0, %v166_v44, %v168_v11  ;;  %v305_v24 = vsel %vm242_vm1, %v302_v46, %v304_v35 }
  0x4f   :  { %6971 = vrot.lane.b32.xlu0 %v6970_v37, %s7481_s22  ;;  %v235_v37 = vrot.slane %v8071_v8, 2 }
  0x50   :  { %6976 = vrot.lane.b32.xlu1 %v6975_v15, %s7483_s28  ;;  %v167_v15 = vsel %vm108_vm0, %v164_v18, %v166_v44  ;;  %v303_v18 = vsel %vm242_vm1, %v300_v50, %v302_v46  ;;  %v1206_v50 = vld [vmem:[%s11102_s3 + $0x10] sm:$0xff] }
  0x51   :  { %v236_v54 = vsel %vm175_vm2, %v233_v56, %v235_v37  ;;  %v7000_v61 = vpack.i.bf16 %v169_v34, %v167_v15  ;;  %v7010_v25 = vpack.i.bf16 %v303_v18, %v301_v9  ;;  %v7484_v15 = vmov 0.0|0.0   ;;  %v1205_v34 = vld [vmem:[%s11102_s3 + $0x8] sm:$0xff] }
  0x52   :  { %v7005_v13 = vpack.i.bf16 %v236_v54, %v234_v53  ;;  %6269 = vmatprep.subr.bf16.mxu1 %v7484_v15  ;;  %v314_v53 = vsel %vm309_vm3, %v311_v30, %v313_v31  ;;  %v315_v54 = vrot.slane %v7583_v7, 4 }
  0x53   :  { %6981 = vrot.lane.b32.xlu0 %v6980_v43, %s7482_s23  ;;  %v171_v43 = vsel %vm108_vm0, %v168_v11, %v170_v14 }
  0x54   :  { %6986 = vrot.lane.b32.xlu1 %v6985_v62, %s7481_s22  ;;  %v238_v62 = vsel %vm175_vm2, %v235_v37, %v237_v6 }
  0x57   :  { %6991 = vrot.lane.b32.xlu0 %v6990_v48, %s7483_s28 }
  0x58   :  { %6996 = vrot.lane.b32.xlu1 %v6995_v45, %s7482_s23 }
  0x5b   :  { %7001 = vrot.lane.b32.xlu0 %v7000_v61, %s7481_s22 }
  0x5c   :  { %7006 = vrot.lane.b32.xlu1 %v7005_v13, %s7483_s28  ;;  %v1207_v13 = vld [vmem:[%s11102_s3 + $0x18] sm:$0xff] }
  0x5d   :  { %v6273_v30 = vpack.c.bf16 %v1207_v13, %v1206_v50 }
  0x5f   :  { %7011 = vrot.lane.b32.xlu0 %v7010_v25, %s7482_s23 }
  0x60   :  { %437 = vrot.lane.b32.xlu1 %v171_v43, %s7481_s22 }
  0x63   :  { %534 = vrot.lane.b32.xlu0 %v238_v62, %s7483_s28 }
  0x64   :  { %631 = vrot.lane.b32.xlu1 %v305_v24, %s7482_s23 }
  0x67   :  { %439 = vrot.lane.b32.xlu0 %v174_v32, %s7481_s22 }
  0x68   :  { %536 = vrot.lane.b32.xlu1 %v241_v51, %s7483_s28  ;;  %v1208_v51 = vld [vmem:[%s11102_s3 + $0x20] sm:$0xff] }
  0x6b   :  { %633 = vrot.lane.b32.xlu0 %v8008_v39, %s7482_s23  ;;  %v1204_v39 = vld [vmem:[%s11102_s3] sm:$0xff] }
  0x6c   :  { %v6270_v61 = vpack.c.bf16 %v1205_v34, %v1204_v39  ;;  %v319_v34 = vrot.slane %v7610_v21, 4 }
  0x6e   :  { %6271 = vmatpush1.bf16.msra.mxu1 %v6270_v61 }
  0x6f   :  { %6272 = vmatprep.subr.bf16.mxu1 %v7484_v15 }
  0x72   :  { %6274 = vmatpush1.bf16.msra.mxu1 %v6273_v30 }
  0x73   :  { %6275 = vmatprep.subr.bf16.mxu1 %v7484_v15 }
  0x79   :  { %v6792_v26 = vpop.permute.xlu0 %6791 }
  0x7a   :  { %v6802_v35 = vpop.permute.xlu1 %6801  ;;  %v6793_v36 = vunpack.i.l.bf16 %v6792_v26  ;;  %v6794_v44 = vunpack.i.h.bf16 %v6792_v26  ;;  %v316_v26 = vsel %vm309_vm3, %v313_v31, %v315_v54  ;;  %v1210_v31 = vld [vmem:[%s11102_s3 + $0x30] sm:$0xff] }
  0x7b   :  { %v6803_v11 = vunpack.i.l.bf16 %v6802_v35  ;;  %v6804_v9 = vunpack.i.h.bf16 %v6802_v35  ;;  %v317_v35 = vrot.slane %v7592_v12, 4 }
  0x7c   :  { %v668_v45 = vsel %vm667_vm4, %v7564_v0, %v6793_v36  ;;  %v669_v25 = vsel %vm667_vm4, %v7569_v1, %v6794_v44  ;;  %v1209_v1 = vld [vmem:[%s11102_s3 + $0x28] sm:$0xff]  ;;  %v806_v0 = vld [vmem:[%s11103_s2] sm:$0x3]  ;;  %s7487_s2 = smov 84  }
  0x7d   :  { %v6797_v56 = vpop.permute.xlu0 %6796  ;;  %v318_v39 = vsel %vm309_vm3, %v315_v54, %v317_v35  ;;  %v1212_v54 = vld [vmem:[%s11102_s3 + $0x40] sm:$0xff] }
  0x7e   :  { %v6799_v3 = vunpack.i.h.bf16 %v6797_v56  ;;  %v6798_v37 = vunpack.i.l.bf16 %v6797_v56  ;;  %v6807_v48 = vpop.permute.xlu1 %6806 }
  0x7f   :  { %v6808_v10 = vunpack.i.l.bf16 %v6807_v48  ;;  %v6809_v24 = vunpack.i.h.bf16 %v6807_v48 }
  0x80   :  { %v701_v46 = vsel %vm700_vm5, %v668_v45, %v6798_v37  ;;  %v702_v62 = vsel %vm700_vm5, %v669_v25, %v6799_v3  ;;  %v6276_v37 = vpack.c.bf16 %v1209_v1, %v1208_v51  ;;  %v1211_v45 = vld [vmem:[%s11102_s3 + $0x38] sm:$0xff] }
  0x81   :  { %v734_v18 = vsel %vm733_vm6, %v701_v46, %v6803_v11  ;;  %v6812_v14 = vpop.permute.xlu0 %6811  ;;  %v670_v32 = vsel %vm667_vm4, %v7574_v2, %v6808_v10  ;;  %v735_v44 = vsel %vm733_vm6, %v702_v62, %v6804_v9  ;;  %v671_v10 = vsel %vm667_vm4, %v7583_v7, %v6809_v24 }
  0x82   :  { %948 = vmatmul.mubr.f32.vlgmr.msra.gmra.mrb[0].mxu0 %v734_v18  ;;  %v6813_v6 = vunpack.i.l.bf16 %v6812_v14  ;;  %v6817_v43 = vpop.permute.xlu1 %6816  ;;  %v6814_v56 = vunpack.i.h.bf16 %v6812_v14  ;;  %6277 = vmatpush1.bf16.msra.mxu1 %v6276_v37  ;;  %v6279_v13 = vpack.c.bf16 %v1211_v45, %v1210_v31  ;;  %v1213_v14 = vld [vmem:[%s11102_s3 + $0x48] sm:$0xff]  ;;  %v1216_v45 = vld [vmem:[%s11102_s3 + $0x60] sm:$0xff] }
  0x83   :  { %5762 = vmatprep.mubr.msk.f32.mxu0 %vm667_vm4, %v314_v53  ;;  %v6818_v36 = vunpack.i.l.bf16 %v6817_v43  ;;  %v6819_v50 = vunpack.i.h.bf16 %v6817_v43  ;;  %6278 = vmatprep.subr.bf16.mxu1 %v7484_v15  ;;  %v321_v43 = vrot.slane %v7615_v22, 4  ;;  %v6282_v51 = vpack.c.bf16 %v1213_v14, %v1212_v54  ;;  %v1218_v14 = vld [vmem:[%s11102_s3 + $0x70] sm:$0xff] }
  0x84   :  { %v703_v2 = vsel %vm700_vm5, %v670_v32, %v6813_v6  ;;  %v704_v61 = vsel %vm700_vm5, %v671_v10, %v6814_v56  ;;  %v320_v6 = vsel %vm309_vm3, %v317_v35, %v319_v34  ;;  %v1214_v35 = vld [vmem:[%s11102_s3 + $0x50] sm:$0xff] }
  0x85   :  { %v6822_v11 = vpop.permute.xlu0 %6821  ;;  %v736_v46 = vsel %vm733_vm6, %v703_v2, %v6818_v36  ;;  %v737_v30 = vsel %vm733_vm6, %v704_v61, %v6819_v50  ;;  %v1215_v36 = vld [vmem:[%s11102_s3 + $0x58] sm:$0xff] }
  0x86   :  { %954 = vmatmul.mubr.f32.gmra.mrb[2].mxu0 %v735_v44  ;;  %v6827_v3 = vpop.permute.xlu1 %6826  ;;  %v6823_v48 = vunpack.i.l.bf16 %v6822_v11  ;;  %v6824_v9 = vunpack.i.h.bf16 %v6822_v11  ;;  %6280 = vmatpush1.bf16.msra.mxu1 %v6279_v13  ;;  %v322_v44 = vsel %vm309_vm3, %v319_v34, %v321_v43  ;;  %v323_v11 = vrot.slane %v7636_v40, 4 }
  0x87   :  { %5763 = vmatprep.mubr.msk.f32.mxu0 %vm667_vm4, %v316_v26  ;;  %v6828_v53 = vunpack.i.l.bf16 %v6827_v3  ;;  %v6829_v24 = vunpack.i.h.bf16 %v6827_v3  ;;  %6281 = vmatprep.subr.bf16.mxu1 %v7484_v15 }
  0x88   :  { %v672_v18 = vsel %vm667_vm4, %v7592_v12, %v6823_v48  ;;  %v673_v26 = vsel %vm667_vm4, %v7610_v21, %v6824_v9  ;;  %v6285_v48 = vpack.c.bf16 %v1215_v36, %v1214_v35  ;;  %v324_v50 = vsel %vm309_vm3, %v321_v43, %v323_v11  ;;  %v1221_v35 = vld [vmem:[%s11102_s3 + $0x88] sm:$0xff] }
  0x89   :  { %v6832_v7 = vpop.permute.xlu0 %6831  ;;  %v705_v12 = vsel %vm700_vm5, %v672_v18, %v6828_v53  ;;  %v706_v37 = vsel %vm700_vm5, %v673_v26, %v6829_v24  ;;  %v327_v43 = vrot.slane %v7668_v4, 4  ;;  %v1220_v26 = vld [vmem:[%s11102_s3 + $0x80] sm:$0xff] }
  0x8a   :  { %960 = vmatmul.mubr.f32.gmra.mrb[4].mxu0 %v736_v46  ;;  %v6837_v25 = vpop.permute.xlu1 %6836  ;;  %v6833_v62 = vunpack.i.l.bf16 %v6832_v7  ;;  %v6834_v56 = vunpack.i.h.bf16 %v6832_v7  ;;  %6283 = vmatpush1.bf16.msra.mxu1 %v6282_v51  ;;  %v325_v46 = vrot.slane %v7641_v41, 4 }
  0x8b   :  { %5764 = vmatprep.mubr.msk.f32.mxu0 %vm667_vm4, %v318_v39  ;;  %v6838_v1 = vunpack.i.l.bf16 %v6837_v25  ;;  %v6839_v10 = vunpack.i.h.bf16 %v6837_v25  ;;  %6284 = vmatprep.subr.bf16.mxu1 %v7484_v15  ;;  %v1217_v39 = vld [vmem:[%s11102_s3 + $0x68] sm:$0xff]  ;;  %v1219_v25 = vld [vmem:[%s11102_s3 + $0x78] sm:$0xff] }
  0x8c   :  { %v738_v2 = vsel %vm733_vm6, %v705_v12, %v6833_v62  ;;  %v739_v7 = vsel %vm733_vm6, %v706_v37, %v6834_v56  ;;  %v6288_v9 = vpack.c.bf16 %v1217_v39, %v1216_v45  ;;  %v6294_v37 = vpack.c.bf16 %v1221_v35, %v1220_v26 }
  0x8d   :  { %v6842_v32 = vpop.permute.xlu0 %6841  ;;  %v674_v31 = vsel %vm667_vm4, %v7615_v22, %v6838_v1  ;;  %v675_v54 = vsel %vm667_vm4, %v7636_v40, %v6839_v10  ;;  %v331_v45 = vrot.slane %v7688_v20, 4  ;;  %v337_v35 = vrot.slane %v7723_v47, 4 }
  0x8e   :  { %966 = vmatmul.mubr.f32.gmra.mrb[6].mxu0 %v737_v30  ;;  %v6843_v3 = vunpack.i.l.bf16 %v6842_v32  ;;  %v6847_v21 = vpop.permute.xlu1 %6846  ;;  %v6844_v61 = vunpack.i.h.bf16 %v6842_v32  ;;  %6286 = vmatpush1.bf16.msra.mxu1 %v6285_v48  ;;  %v6291_v32 = vpack.c.bf16 %v1219_v25, %v1218_v14 }
  0x8f   :  { %5765 = vmatprep.mubr.msk.f32.mxu0 %vm667_vm4, %v320_v6  ;;  %v6848_v53 = vunpack.i.l.bf16 %v6847_v21  ;;  %6287 = vmatprep.subr.bf16.mxu1 %v7484_v15  ;;  %v326_v6 = vsel %vm309_vm3, %v323_v11, %v325_v46  ;;  %v6849_v62 = vunpack.i.h.bf16 %v6847_v21  ;;  %v329_v11 = vrot.slane %v7673_v5, 4 }
  0x90   :  { %v707_v22 = vsel %vm700_vm5, %v674_v31, %v6843_v3  ;;  %v708_v12 = vsel %vm700_vm5, %v675_v54, %v6844_v61 }
  0x91   :  { %v6852_v34 = vpop.permute.xlu0 %6851  ;;  %v740_v30 = vsel %vm733_vm6, %v707_v22, %v6848_v53  ;;  %v330_v31 = vsel %vm309_vm3, %v327_v43, %v329_v11  ;;  %v332_v22 = vsel %vm309_vm3, %v329_v11, %v331_v45 }
  0x92   :  { %972 = vmatmul.mubr.f32.gmra.mrb[8].mxu0 %v738_v2  ;;  %v6857_v13 = vpop.permute.xlu1 %6856  ;;  %v6853_v18 = vunpack.i.l.bf16 %v6852_v34  ;;  %6289 = vmatpush1.bf16.msra.mxu1 %v6288_v9  ;;  %v6854_v51 = vunpack.i.h.bf16 %v6852_v34  ;;  %v741_v2 = vsel %vm733_vm6, %v708_v12, %v6849_v62  ;;  %v335_v62 = vrot.slane %v7714_v42, 4 }
  0x93   :  { %5766 = vmatprep.mubr.msk.f32.mxu0 %vm667_vm4, %v322_v44  ;;  %v6858_v24 = vunpack.i.l.bf16 %v6857_v13  ;;  %6290 = vmatprep.subr.bf16.mxu1 %v7484_v15  ;;  %v328_v44 = vsel %vm309_vm3, %v325_v46, %v327_v43  ;;  %v6859_v3 = vunpack.i.h.bf16 %v6857_v13  ;;  %v333_v13 = vrot.slane %v7693_v23, 4 }
  0x94   :  { %v676_v1 = vsel %vm667_vm4, %v7641_v41, %v6853_v18  ;;  %v677_v10 = vsel %vm667_vm4, %v7668_v4, %v6854_v51  ;;  %v7475_v51 = vld [vmem:[%s11100_s0 + $0x60] sm:$0xff] }
  0x95   :  { %v6862_v40 = vpop.permute.xlu0 %6861  ;;  %v709_v41 = vsel %vm700_vm5, %v676_v1, %v6858_v24  ;;  %v710_v53 = vsel %vm700_vm5, %v677_v10, %v6859_v3  ;;  %v334_v43 = vsel %vm309_vm3, %v331_v45, %v333_v13  ;;  %v336_v26 = vsel %vm309_vm3, %v333_v13, %v335_v62 }
  0x96   :  { %978 = vmatmul.mubr.f32.gmra.mrb[10].mxu0 %v739_v7  ;;  %v6867_v36 = vpop.permute.xlu1 %6866  ;;  %v6863_v56 = vunpack.i.l.bf16 %v6862_v40  ;;  %6292 = vmatpush1.bf16.msra.mxu1 %v6291_v32  ;;  %v6864_v39 = vunpack.i.h.bf16 %v6862_v40 }
  0x97   :  { %5767 = vmatprep.mubr.msk.f32.mxu0 %vm667_vm4, %v324_v50  ;;  %v6868_v48 = vunpack.i.l.bf16 %v6867_v36  ;;  %6293 = vmatprep.subr.bf16.mxu1 %v7484_v15  ;;  %v6869_v7 = vunpack.i.h.bf16 %v6867_v36 }
  0x98   :  { %v742_v34 = vsel %vm733_vm6, %v709_v41, %v6863_v56  ;;  %v743_v18 = vsel %vm733_vm6, %v710_v53, %v6864_v39  ;;  %v341_v53 = vrot.slane %v7743_v59, 4 }
  0x99   :  { %v6872_v21 = vpop.permute.xlu0 %6871  ;;  %v678_v4 = vsel %vm667_vm4, %v7673_v5, %v6868_v48  ;;  %v679_v5 = vsel %vm667_vm4, %v7688_v20, %v6869_v7 }
  0x9a   :  { %984 = vmatmul.mubr.f32.gmra.mrb[12].mxu0 %v740_v30  ;;  %v6873_v50 = vunpack.i.l.bf16 %v6872_v21  ;;  %v6877_v46 = vpop.permute.xlu1 %6876  ;;  %6295 = vmatpush1.bf16.msra.mxu1 %v6294_v37  ;;  %v6874_v54 = vunpack.i.h.bf16 %v6872_v21  ;;  %v338_v21 = vsel %vm309_vm3, %v335_v62, %v337_v35  ;;  %v339_v37 = vrot.slane %v7738_v58, 4  ;;  %v7476_v62 = vld [vmem:[%s11100_s0 + $0x80] sm:$0xff] }
  0x9b   :  { %5768 = vmatprep.mubr.msk.f32.mxu0 %vm667_vm4, %v326_v6  ;;  %6296 = vmatprep.subr.bf16.mxu1 %v7484_v15  ;;  %v6878_v9 = vunpack.i.l.bf16 %v6877_v46  ;;  %v6879_v30 = vunpack.i.h.bf16 %v6877_v46 }
  0x9c   :  { %v711_v14 = vsel %vm700_vm5, %v678_v4, %v6873_v50  ;;  %v712_v12 = vsel %vm700_vm5, %v679_v5, %v6874_v54  ;;  %v343_v54 = vrot.slane %v7758_v16, 4 }
  0x9d   :  { %v6882_v61 = vpop.permute.xlu0 %6881  ;;  %v744_v23 = vsel %vm733_vm6, %v711_v14, %v6878_v9 }
  0x9e   :  { %990 = vmatmul.mubr.f32.gmra.mrb[14].mxu0 %v741_v2  ;;  %v6887_v25 = vpop.permute.xlu1 %6886  ;;  %v6883_v6 = vunpack.i.l.bf16 %v6882_v61  ;;  %v6884_v32 = vunpack.i.h.bf16 %v6882_v61  ;;  %v344_v16 = vsel %vm309_vm3, %v341_v53, %v343_v54 }
  0x9f   :  { %5769 = vmatprep.mubr.msk.f32.mxu0 %vm667_vm4, %v328_v44  ;;  %v6888_v24 = vunpack.i.l.bf16 %v6887_v25  ;;  %v745_v44 = vsel %vm733_vm6, %v712_v12, %v6879_v30  ;;  %v6889_v11 = vunpack.i.h.bf16 %v6887_v25 }
  0xa0   :  { %v680_v20 = vsel %vm667_vm4, %v7475_v51, %v6883_v6  ;;  %v681_v41 = vsel %vm667_vm4, %v7714_v42, %v6884_v32  ;;  %v340_v42 = vsel %vm309_vm3, %v337_v35, %v339_v37 }
  0xa1   :  { %v6892_v40 = vpop.permute.xlu0 %6891  ;;  %v713_v56 = vsel %vm700_vm5, %v680_v20, %v6888_v24  ;;  %v714_v39 = vsel %vm700_vm5, %v681_v41, %v6889_v11  ;;  %v7478_v41 = vld [vmem:[%s11100_s0 + $0x90] sm:$0xff] }
  0xa2   :  { %996 = vmatmul.mubr.f32.gmra.mrb[16].mxu0 %v742_v34  ;;  %v6897_v1 = vpop.permute.xlu1 %6896  ;;  %v6893_v36 = vunpack.i.l.bf16 %v6892_v40  ;;  %v6894_v48 = vunpack.i.h.bf16 %v6892_v40 }
  0xa3   :  { %5770 = vmatprep.mubr.msk.f32.mxu0 %vm667_vm4, %v330_v31  ;;  %v6898_v3 = vunpack.i.l.bf16 %v6897_v1  ;;  %v6899_v34 = vunpack.i.h.bf16 %v6897_v1  ;;  %v7477_v1 = vld [vmem:[%s11100_s0 + $0x88] sm:$0xff] }
  0xa4   :  { %v746_v10 = vsel %vm733_vm6, %v713_v56, %v6893_v36  ;;  %v747_v4 = vsel %vm733_vm6, %v714_v39, %v6894_v48 }
  0xa5   :  { %v6902_v2 = vpop.permute.xlu0 %6901  ;;  %v682_v50 = vsel %vm667_vm4, %v7723_v47, %v6898_v3  ;;  %v342_v47 = vsel %vm309_vm3, %v339_v37, %v341_v53 }
  0xa6   :  { %1002 = vmatmul.mubr.f32.gmra.mrb[18].mxu0 %v743_v18  ;;  %v6903_v31 = vunpack.i.l.bf16 %v6902_v2  ;;  %v6907_v45 = vpop.permute.xlu1 %6906  ;;  %v6904_v61 = vunpack.i.h.bf16 %v6902_v2  ;;  %v683_v18 = vsel %vm667_vm4, %v7738_v58, %v6899_v34 }
  0xa7   :  { %5771 = vmatprep.mubr.msk.f32.mxu0 %vm667_vm4, %v332_v22  ;;  %v6908_v7 = vunpack.i.l.bf16 %v6907_v45  ;;  %v6909_v14 = vunpack.i.h.bf16 %v6907_v45 }
  0xa8   :  { %v715_v22 = vsel %vm700_vm5, %v682_v50, %v6903_v31  ;;  %v716_v5 = vsel %vm700_vm5, %v683_v18, %v6904_v61  ;;  %v7479_v18 = vld [vmem:[%s11100_s0 + $0xa0] sm:$0xff] }
  0xa9   :  { %v6912_v46 = vpop.permute.xlu0 %6911  ;;  %v748_v59 = vsel %vm733_vm6, %v715_v22, %v6908_v7  ;;  %v749_v40 = vsel %vm733_vm6, %v716_v5, %v6909_v14  ;;  %v351_v7 = vrot.slane %v7853_v38, 4  ;;  %v353_v14 = vrot.slane %v7869_v49, 4 }
  0xaa   :  { %1008 = vmatmul.mubr.f32.gmra.mrb[20].mxu0 %v744_v23  ;;  %v6917_v13 = vpop.permute.xlu1 %6916  ;;  %v6913_v9 = vunpack.i.l.bf16 %v6912_v46  ;;  %v345_v23 = vrot.slane %v7763_v17, 4  ;;  %v347_v17 = vrot.slane %v7816_v57, 4 }
  0xab   :  { %5772 = vmatprep.mubr.msk.f32.mxu0 %vm667_vm4, %v334_v43  ;;  %v6918_v25 = vunpack.i.l.bf16 %v6917_v13  ;;  %v6914_v43 = vunpack.i.h.bf16 %v6912_v46  ;;  %v6919_v12 = vunpack.i.h.bf16 %v6917_v13 }
  0xac   :  { %v684_v58 = vsel %vm667_vm4, %v7476_v62, %v6913_v9  ;;  %v346_v35 = vsel %vm309_vm3, %v343_v54, %v345_v23  ;;  %v348_v48 = vsel %vm309_vm3, %v345_v23, %v347_v17 }
  0xad   :  { %v6922_v6 = vpop.permute.xlu0 %6921  ;;  %v717_v32 = vsel %vm700_vm5, %v684_v58, %v6918_v25 }
  0xae   :  { %1014 = vmatmul.mubr.f32.gmra.mrb[22].mxu0 %v745_v44  ;;  %v6927_v30 = vpop.permute.xlu1 %6926  ;;  %v6923_v24 = vunpack.i.l.bf16 %v6922_v6  ;;  %v6924_v36 = vunpack.i.h.bf16 %v6922_v6 }
  0xaf   :  { %5773 = vmatprep.mubr.msk.f32.mxu0 %vm667_vm4, %v336_v26  ;;  %v6928_v20 = vunpack.i.l.bf16 %v6927_v30  ;;  %v685_v26 = vsel %vm667_vm4, %v7477_v1, %v6914_v43  ;;  %v6929_v3 = vunpack.i.h.bf16 %v6927_v30  ;;  %v354_v30 = vsel %vm309_vm3, %v351_v7, %v353_v14 }
  0xb0   :  { %v750_v44 = vsel %vm733_vm6, %v717_v32, %v6923_v24  ;;  %v718_v2 = vsel %vm700_vm5, %v685_v26, %v6919_v12  ;;  %v357_v26 = vrot.slane %v7911_v29, 4 }
  0xb1   :  { %v6932_v51 = vpop.permute.xlu0 %6931  ;;  %v751_v45 = vsel %vm733_vm6, %v718_v2, %v6924_v36 }
  0xb2   :  { %1020 = vmatmul.mubr.f32.gmra.mrb[24].mxu0 %v746_v10  ;;  %v6933_v11 = vunpack.i.l.bf16 %v6932_v51  ;;  %v6937_v56 = vpop.permute.xlu1 %6936  ;;  %v349_v10 = vrot.slane %v7821_v60, 4  ;;  %v6934_v39 = vunpack.i.h.bf16 %v6932_v51 }
  0xb3   :  { %5774 = vmatprep.mubr.msk.f32.mxu0 %vm667_vm4, %v338_v21  ;;  %v686_v21 = vsel %vm667_vm4, %v7478_v41, %v6928_v20  ;;  %v6938_v31 = vunpack.i.l.bf16 %v6937_v56 }
  0xb4   :  { %v719_v34 = vsel %vm700_vm5, %v686_v21, %v6933_v11  ;;  %v350_v53 = vsel %vm309_vm3, %v347_v17, %v349_v10  ;;  %v352_v54 = vsel %vm309_vm3, %v349_v10, %v351_v7  ;;  %v1223_v17 = vld [vmem:[%s11102_s3 + $0x98] sm:$0xff]  ;;  %v361_v7 = vrot.slane %v7958_v19, 4 }
  0xb5   :  { %v6942_v37 = vpop.permute.xlu0 %6941  ;;  %v752_v60 = vsel %vm733_vm6, %v719_v34, %v6938_v31  ;;  %v7485_v34 = vmov 0.0  }
  0xb6   :  { %1026 = vmatmul.mubr.f32.gmra.mrb[26].mxu0 %v747_v4  ;;  %v6947_v50 = vpop.permute.xlu1 %6946  ;;  %v6943_v46 = vunpack.i.l.bf16 %v6942_v37  ;;  %v6939_v4 = vunpack.i.h.bf16 %v6937_v56  ;;  %v6944_v9 = vunpack.i.h.bf16 %v6942_v37  ;;  %v359_v37 = vrot.slane %v7943_v55, 4 }
  0xb7   :  { %5775 = vmatprep.mubr.msk.f32.mxu0 %vm667_vm4, %v340_v42  ;;  %v687_v42 = vsel %vm667_vm4, %v7816_v57, %v6929_v3  ;;  %v6948_v61 = vunpack.i.l.bf16 %v6947_v50  ;;  %v6949_v6 = vunpack.i.h.bf16 %v6947_v50  ;;  %v1224_v50 = vld [vmem:[%s11102_s3 + $0xa0] sm:$0xff] }
  0xb8   :  { %v720_v13 = vsel %vm700_vm5, %v687_v42, %v6934_v39  ;;  %v688_v57 = vsel %vm667_vm4, %v7479_v18, %v6943_v46  ;;  %v689_v58 = vsel %vm667_vm4, %v7853_v38, %v6944_v9  ;;  %v362_v18 = vsel %vm309_vm3, %v359_v37, %v361_v7 }
  0xb9   :  { %v6952_v22 = vpop.permute.xlu0 %6951  ;;  %v753_v25 = vsel %vm733_vm6, %v720_v13, %v6939_v4  ;;  %v721_v5 = vsel %vm700_vm5, %v688_v57, %v6948_v61  ;;  %v722_v32 = vsel %vm700_vm5, %v689_v58, %v6949_v6  ;;  %v363_v57 = vrot.slane %v8018_v52, 4 }
  0xba   :  { %1032 = vmatmul.mubr.f32.gmra.mrb[28].mxu0 %v748_v59  ;;  %v6953_v59 = vunpack.i.l.bf16 %v6952_v22  ;;  %v6954_v23 = vunpack.i.h.bf16 %v6952_v22 }
  0xbb   :  { %5776 = vmatprep.mubr.msk.f32.mxu0 %vm667_vm4, %v342_v47  ;;  %v6957_v47 = vpop.permute.xlu1 %6956 }
  0xbc   :  { %v6958_v62 = vunpack.i.l.bf16 %v6957_v47  ;;  %v754_v24 = vsel %vm733_vm6, %v721_v5, %v6953_v59  ;;  %v6959_v51 = vunpack.i.h.bf16 %v6957_v47 }
  0xbd   :  { %v6962_v43 = vpop.permute.xlu0 %6961 }
  0xbe   :  { %1038 = vmatmul.mubr.f32.gmra.mrb[30].mxu0 %v749_v40  ;;  %v6963_v40 = vunpack.i.l.bf16 %v6962_v43  ;;  %v690_v20 = vsel %vm667_vm4, %v7869_v49, %v6958_v62  ;;  %v6964_v56 = vunpack.i.h.bf16 %v6962_v43  ;;  %v691_v41 = vsel %vm667_vm4, %v7906_v28, %v6959_v51 }
  0xbf   :  { %5777 = vmatprep.mubr.msk.f32.mxu0 %vm667_vm4, %v344_v16  ;;  %v355_v16 = vrot.slane %v7906_v28, 4  ;;  %v6967_v12 = vpop.permute.xlu1 %6966  ;;  %v365_v62 = vrot.slane %v8023_v63, 4 }
  0xc0   :  { %v6968_v36 = vunpack.i.l.bf16 %v6967_v12  ;;  %v723_v49 = vsel %vm700_vm5, %v690_v20, %v6963_v40  ;;  %v724_v39 = vsel %vm700_vm5, %v691_v41, %v6964_v56 }
  0xc1   :  { %v6972_v1 = vpop.permute.xlu0 %6971  ;;  %v356_v38 = vsel %vm309_vm3, %v353_v14, %v355_v16  ;;  %v358_v21 = vsel %vm309_vm3, %v355_v16, %v357_v26 }
  0xc2   :  { %1044 = vmatmul.mubr.f32.gmra.mrb[32].mxu0 %v750_v44  ;;  %v755_v44 = vsel %vm733_vm6, %v722_v32, %v6954_v23  ;;  %v6973_v3 = vunpack.i.l.bf16 %v6972_v1  ;;  %v756_v10 = vsel %vm733_vm6, %v723_v49, %v6968_v36  ;;  %v6974_v28 = vunpack.i.h.bf16 %v6972_v1 }
  0xc3   :  { %5778 = vmatprep.mubr.msk.f32.mxu0 %vm667_vm4, %v346_v35  ;;  %v1222_v35 = vld [vmem:[%s11102_s3 + $0x90] sm:$0xff]  ;;  %v6977_v2 = vpop.permute.xlu1 %6976  ;;  %v367_v32 = vrot.slane %v8066_v33, 4 }
  0xc4   :  { %v6297_v11 = vpack.c.bf16 %v1223_v17, %v1222_v35  ;;  %v6978_v31 = vunpack.i.l.bf16 %v6977_v2  ;;  %v692_v46 = vsel %vm667_vm4, %v7911_v29, %v6973_v3  ;;  %v6979_v61 = vunpack.i.h.bf16 %v6977_v2 }
  0xc5   :  { %v693_v29 = vsel %vm667_vm4, %v7943_v55, %v6974_v28  ;;  %v364_v55 = vsel %vm309_vm3, %v361_v7, %v363_v57 }
  0xc6   :  { %1050 = vmatmul.mubr.f32.gmra.mrb[34].mxu0 %v751_v45  ;;  %6298 = vmatpush1.bf16.msra.mxu1 %v6297_v11  ;;  %v6982_v45 = vpop.permute.xlu0 %6981  ;;  %v725_v22 = vsel %vm700_vm5, %v692_v46, %v6978_v31 }
  0xc7   :  { %5779 = vmatprep.mubr.msk.f32.mxu0 %vm667_vm4, %v348_v48  ;;  %v6969_v48 = vunpack.i.h.bf16 %v6967_v12  ;;  %1362 = vmatprep.subr.mxu1 %v7485_v34  ;;  %v6987_v42 = vpop.permute.xlu1 %6986  ;;  %v6983_v4 = vunpack.i.l.bf16 %v6982_v45  ;;  %v6984_v47 = vunpack.i.h.bf16 %v6982_v45 }
  0xc8   :  { %v6988_v9 = vunpack.i.l.bf16 %v6987_v42  ;;  %v6989_v6 = vunpack.i.h.bf16 %v6987_v42 }
  0xca   :  { %1056 = vmatmul.mubr.f32.gmra.mrb[36].mxu0 %v752_v60  ;;  %1363 = vmatpush1.msra.mxu1 %v1224_v50  ;;  %v757_v60 = vsel %vm733_vm6, %v724_v39, %v6969_v48  ;;  %v6992_v13 = vpop.permute.xlu0 %6991  ;;  %v694_v5 = vsel %vm667_vm4, %v7958_v19, %v6988_v9  ;;  %v695_v12 = vsel %vm667_vm4, %v8018_v52, %v6989_v6 }
  0xcb   :  { %5780 = vmatprep.mubr.msk.f32.mxu0 %vm667_vm4, %v350_v53  ;;  %v360_v53 = vsel %vm309_vm3, %v357_v26, %v359_v37  ;;  %6403 = vmatprep.subr.bf16.mxu1 %v7484_v15  ;;  %v6993_v14 = vunpack.i.l.bf16 %v6992_v13  ;;  %v6997_v59 = vpop.permute.xlu1 %6996  ;;  %v6994_v16 = vunpack.i.h.bf16 %v6992_v13  ;;  %v366_v19 = vsel %vm309_vm3, %v363_v57, %v365_v62 }
  0xcc   :  { %v6998_v58 = vunpack.i.l.bf16 %v6997_v59  ;;  %v6999_v51 = vunpack.i.h.bf16 %v6997_v59  ;;  %v368_v52 = vsel %vm309_vm3, %v365_v62, %v367_v32 }
  0xcd   :  { %v727_v23 = vsel %vm700_vm5, %v694_v5, %v6993_v14  ;;  %v728_v26 = vsel %vm700_vm5, %v695_v12, %v6994_v16 }
  0xce   :  { %1062 = vmatmul.mubr.f32.gmra.mrb[38].mxu0 %v753_v25  ;;  %v726_v25 = vsel %vm700_vm5, %v693_v29, %v6979_v61  ;;  %v7002_v43 = vpop.permute.xlu0 %7001  ;;  %v760_v20 = vsel %vm733_vm6, %v727_v23, %v6998_v58  ;;  %v761_v56 = vsel %vm733_vm6, %v728_v26, %v6999_v51  ;;  %v808_v61 = vlaneseq }
  0xcf   :  { %5781 = vmatprep.mubr.msk.f32.mxu0 %vm667_vm4, %v352_v54  ;;  %v758_v54 = vsel %vm733_vm6, %v725_v22, %v6983_v4  ;;  %v7007_v40 = vpop.permute.xlu1 %7006  ;;  %v7004_v35 = vunpack.i.h.bf16 %v7002_v43 }
  0xd0   :  { %v7008_v1 = vunpack.i.l.bf16 %v7007_v40  ;;  %v7009_v49 = vunpack.i.h.bf16 %v7007_v40  ;;  %v8427_v22 = vshrl.u32 %v808_v61, 7 }
  0xd1   :  { %v697_v41 = vsel %vm667_vm4, %v8066_v33, %v7004_v35 }
  0xd2   :  { %1068 = vmatmul.mubr.f32.gmra.mrb[40].mxu0 %v754_v24  ;;  %v7003_v24 = vunpack.i.l.bf16 %v7002_v43  ;;  %v730_v45 = vsel %vm700_vm5, %v697_v41, %v7009_v49  ;;  %v11115_v13 = vsub.s32 0, %v8427_v22 }
  0xd3   :  { %5782 = vmatprep.mubr.msk.f32.mxu0 %vm667_vm4, %v354_v30  ;;  %v759_v30 = vsel %vm733_vm6, %v726_v25, %v6984_v47  ;;  %v438_v17 = vpop.permute.xlu1 %437 }
  0xd4   :  { %v696_v36 = vsel %vm667_vm4, %v8023_v63, %v7003_v24  ;;  %v7480_v63 = vld [vmem:[%s11100_s0 + $0xf8] sm:$0xff]  ;;  %v698_v39 = vsel %vm667_vm4, %v8071_v8, %v438_v17  ;;  %v8436_v9 = vrot.slane %v806_v0, %v11115_v13 }
  0xd5   :  { %v729_v3 = vsel %vm700_vm5, %v696_v36, %v7008_v1  ;;  %v371_v37 = vrot.slane %v7480_v63, 4 }
  0xd6   :  { %1074 = vmatmul.mubr.f32.gmra.mrb[42].mxu0 %v755_v44  ;;  %v369_v44 = vrot.slane %v8071_v8, 4 }
  0xd7   :  { %5783 = vmatprep.mubr.msk.f32.mxu0 %vm667_vm4, %v356_v38  ;;  %v7012_v38 = vpop.permute.xlu0 %7011  ;;  %v632_v31 = vpop.permute.xlu1 %631 }
  0xd8   :  { %v7013_v11 = vunpack.i.l.bf16 %v7012_v38  ;;  %v7014_v48 = vunpack.i.h.bf16 %v7012_v38  ;;  %v372_v34 = vsel %vm309_vm3, %v369_v44, %v371_v37 }
  0xda   :  { %1080 = vmatmul.mubr.f32.gmra.mrb[44].mxu0 %v756_v10  ;;  %v762_v10 = vsel %vm733_vm6, %v729_v3, %v7013_v11  ;;  %v763_v50 = vsel %vm733_vm6, %v730_v45, %v7014_v48 }
  0xdb   :  { %5784 = vmatprep.mubr.msk.f32.mxu0 %vm667_vm4, %v358_v21  ;;  %v535_v2 = vpop.permute.xlu0 %534  ;;  %v370_v21 = vsel %vm309_vm3, %v367_v32, %v369_v44  ;;  %v537_v42 = vpop.permute.xlu1 %536 }
  0xdc   :  { %v731_v28 = vsel %vm700_vm5, %v698_v39, %v535_v2 }
  0xdd   :  { %v764_v8 = vsel %vm733_vm6, %v731_v28, %v632_v31 }
  0xde   :  { %1086 = vmatmul.mubr.f32.gmra.mrb[46].mxu0 %v757_v60 }
  0xdf   :  { %5785 = vmatprep.mubr.msk.f32.mxu0 %vm667_vm4, %v360_v53  ;;  %v440_v33 = vpop.permute.xlu0 %439  ;;  %v375_v53 = vsel %vm309_vm3, %v371_v37, %v310_v27  ;;  %v11114_v27 = vsub.s32 1, %v8427_v22 }
  0xe0   :  { %v699_v46 = vsel %vm667_vm4, %v7480_v63, %v440_v33 }
  0xe1   :  { %v732_v7 = vsel %vm700_vm5, %v699_v46, %v537_v42  ;;  %v8440_v29 = vrot.slane %v806_v0, %v11114_v27 }
  0xe2   :  { %1092 = vmatmul.mubr.f32.gmra.mrb[48].mxu0 %v758_v54 }
  0xe3   :  { %5786 = vmatprep.mubr.msk.f32.mxu0 %vm667_vm4, %v362_v18  ;;  %v634_v4 = vpop.permute.xlu0 %633 }
  0xe4   :  { %v765_v60 = vsel %vm733_vm6, %v732_v7, %v634_v4 }
  0xe6   :  { %1098 = vmatmul.mubr.f32.gmra.mrb[50].mxu0 %v759_v30 }
  0xe7   :  { %5787 = vmatprep.mubr.msk.f32.mxu0 %vm667_vm4, %v364_v55 }
  0xea   :  { %1104 = vmatmul.mubr.f32.gmra.mrb[52].mxu0 %v760_v20 }
  0xeb   :  { %5788 = vmatprep.mubr.msk.f32.mxu0 %vm667_vm4, %v366_v19 }
  0xee   :  { %1110 = vmatmul.mubr.f32.gmra.mrb[54].mxu0 %v761_v56 }
  0xef   :  { %5789 = vmatprep.mubr.msk.f32.mxu0 %vm667_vm4, %v368_v52 }
  0xf2   :  { %1116 = vmatmul.mubr.f32.gmra.mrb[56].mxu0 %v762_v10 }
  0xf3   :  { %5790 = vmatprep.mubr.msk.f32.mxu0 %vm667_vm4, %v370_v21 }
  0xf6   :  { %1122 = vmatmul.mubr.f32.gmra.mrb[58].mxu0 %v763_v50 }
  0xf7   :  { %5791 = vmatprep.mubr.msk.f32.mxu0 %vm667_vm4, %v372_v34 }
  0xfa   :  { %1128 = vmatmul.mubr.f32.gmra.mrb[60].mxu0 %v764_v8 }
  0xfb   :  { %5792 = vmatprep.mubr.msk.f32.mxu0 %vm667_vm4, %v375_v53 }
  0xfe   :  { %1134 = vmatmul.mubr.f32.gmra.mrb[62].mxu0 %v765_v60 }
 0x155   :  { %v949_v18 = vpop.f32.mrb[0].mxu0 }
 0x156   :  { %v950_v57 = vadd.f32 %v949_v18, %v8436_v9  ;;  %v951_v47 = vpop.f32.mrb[1].mxu0 }
 0x157   :  { %v952_v54 = vadd.f32 %v951_v47, %v8440_v29 }
 0x158   :  { %v1140_v25 = vmax.f32 %v950_v57, 0.0 }
 0x159   :  { %v1141_v14 = vmax.f32 %v952_v54, 0.0  ;;  %v955_v59 = vpop.f32.mrb[2].mxu0 }
 0x15a   :  { %v956_v6 = vadd.f32 %v955_v59, %v8436_v9  ;;  %v957_v5 = vpop.f32.mrb[3].mxu0 }
 0x15b   :  { %v958_v43 = vadd.f32 %v957_v5, %v8440_v29  ;;  %5793 = vmatprep.mubr.msk.f32.mxu1 %vm1225_vm7, %v1141_v14 }
 0x15c   :  { %1387 = vmatmul.mubr.f32.vlgmr.msra.gmra.mrb[0].mxu1 %v1140_v25  ;;  %v1142_v58 = vmax.f32 %v956_v6, 0.0 }
 0x15d   :  { %v1143_v55 = vmax.f32 %v958_v43, 0.0  ;;  %v961_v62 = vpop.f32.mrb[4].mxu0 }
 0x15e   :  { %v962_v30 = vadd.f32 %v961_v62, %v8436_v9  ;;  %v963_v16 = vpop.f32.mrb[5].mxu0 }
 0x15f   :  { %v964_v23 = vadd.f32 %v963_v16, %v8440_v29  ;;  %5794 = vmatprep.mubr.msk.f32.mxu1 %vm1225_vm7, %v1143_v55 }
 0x160   :  { %1392 = vmatmul.mubr.f32.gmra.mrb[2].mxu1 %v1142_v58  ;;  %v1144_v12 = vmax.f32 %v962_v30, 0.0 }
 0x161   :  { %v1145_v24 = vmax.f32 %v964_v23, 0.0  ;;  %v967_v40 = vpop.f32.mrb[6].mxu0 }
 0x162   :  { %v968_v19 = vadd.f32 %v967_v40, %v8436_v9  ;;  %v969_v32 = vpop.f32.mrb[7].mxu0 }
 0x163   :  { %v970_v51 = vadd.f32 %v969_v32, %v8440_v29  ;;  %5795 = vmatprep.mubr.msk.f32.mxu1 %vm1225_vm7, %v1145_v24 }
 0x164   :  { %1397 = vmatmul.mubr.f32.gmra.mrb[4].mxu1 %v1144_v12  ;;  %v1146_v38 = vmax.f32 %v968_v19, 0.0 }
 0x165   :  { %v1147_v20 = vmax.f32 %v970_v51, 0.0  ;;  %v973_v1 = vpop.f32.mrb[8].mxu0 }
 0x166   :  { %v974_v26 = vadd.f32 %v973_v1, %v8436_v9  ;;  %v975_v35 = vpop.f32.mrb[9].mxu0 }
 0x167   :  { %v976_v17 = vadd.f32 %v975_v35, %v8440_v29  ;;  %5796 = vmatprep.mubr.msk.f32.mxu1 %vm1225_vm7, %v1147_v20 }
 0x168   :  { %1402 = vmatmul.mubr.f32.gmra.mrb[6].mxu1 %v1146_v38  ;;  %v1148_v44 = vmax.f32 %v974_v26, 0.0 }
 0x169   :  { %v1149_v36 = vmax.f32 %v976_v17, 0.0  ;;  %v979_v52 = vpop.f32.mrb[10].mxu0 }
 0x16a   :  { %v980_v11 = vadd.f32 %v979_v52, %v8436_v9  ;;  %v981_v56 = vpop.f32.mrb[11].mxu0 }
 0x16b   :  { %v982_v49 = vadd.f32 %v981_v56, %v8440_v29  ;;  %5797 = vmatprep.mubr.msk.f32.mxu1 %vm1225_vm7, %v1149_v36 }
 0x16c   :  { %1407 = vmatmul.mubr.f32.gmra.mrb[8].mxu1 %v1148_v44  ;;  %v1150_v41 = vmax.f32 %v980_v11, 0.0 }
 0x16d   :  { %v1151_v2 = vmax.f32 %v982_v49, 0.0  ;;  %v985_v3 = vpop.f32.mrb[12].mxu0 }
 0x16e   :  { %v986_v21 = vadd.f32 %v985_v3, %v8436_v9  ;;  %v987_v63 = vpop.f32.mrb[13].mxu0 }
 0x16f   :  { %v988_v37 = vadd.f32 %v987_v63, %v8440_v29  ;;  %5798 = vmatprep.mubr.msk.f32.mxu1 %vm1225_vm7, %v1151_v2 }
 0x170   :  { %1412 = vmatmul.mubr.f32.gmra.mrb[10].mxu1 %v1150_v41  ;;  %v1152_v31 = vmax.f32 %v986_v21, 0.0 }
 0x171   :  { %v1153_v48 = vmax.f32 %v988_v37, 0.0  ;;  %v991_v10 = vpop.f32.mrb[14].mxu0 }
 0x172   :  { %v992_v45 = vadd.f32 %v991_v10, %v8436_v9  ;;  %v993_v39 = vpop.f32.mrb[15].mxu0 }
 0x173   :  { %v994_v33 = vadd.f32 %v993_v39, %v8440_v29  ;;  %5799 = vmatprep.mubr.msk.f32.mxu1 %vm1225_vm7, %v1153_v48 }
 0x174   :  { %1417 = vmatmul.mubr.f32.gmra.mrb[12].mxu1 %v1152_v31  ;;  %v1154_v28 = vmax.f32 %v992_v45, 0.0 }
 0x175   :  { %v1155_v34 = vmax.f32 %v994_v33, 0.0  ;;  %v997_v50 = vpop.f32.mrb[16].mxu0 }
 0x176   :  { %v998_v46 = vadd.f32 %v997_v50, %v8436_v9  ;;  %v999_v42 = vpop.f32.mrb[17].mxu0 }
 0x177   :  { %v1000_v53 = vadd.f32 %v999_v42, %v8440_v29  ;;  %5800 = vmatprep.mubr.msk.f32.mxu1 %vm1225_vm7, %v1155_v34 }
 0x178   :  { %1422 = vmatmul.mubr.f32.gmra.mrb[14].mxu1 %v1154_v28  ;;  %v1156_v4 = vmax.f32 %v998_v46, 0.0 }
 0x179   :  { %v1157_v8 = vmax.f32 %v1000_v53, 0.0  ;;  %v1003_v7 = vpop.f32.mrb[18].mxu0 }
 0x17a   :  { %v1004_v60 = vadd.f32 %v1003_v7, %v8436_v9  ;;  %v1005_v61 = vpop.f32.mrb[19].mxu0 }
 0x17b   :  { %v1006_v0 = vadd.f32 %v1005_v61, %v8440_v29  ;;  %5801 = vmatprep.mubr.msk.f32.mxu1 %vm1225_vm7, %v1157_v8 }
 0x17c   :  { %1427 = vmatmul.mubr.f32.gmra.mrb[16].mxu1 %v1156_v4  ;;  %v1158_v47 = vmax.f32 %v1004_v60, 0.0 }
 0x17d   :  { %v1159_v18 = vmax.f32 %v1006_v0, 0.0  ;;  %v1009_v57 = vpop.f32.mrb[20].mxu0 }
 0x17e   :  { %v1010_v54 = vadd.f32 %v1009_v57, %v8436_v9  ;;  %v1011_v14 = vpop.f32.mrb[21].mxu0 }
 0x17f   :  { %v1012_v59 = vadd.f32 %v1011_v14, %v8440_v29  ;;  %5802 = vmatprep.mubr.msk.f32.mxu1 %vm1225_vm7, %v1159_v18 }
 0x180   :  { %1432 = vmatmul.mubr.f32.gmra.mrb[18].mxu1 %v1158_v47  ;;  %v1160_v5 = vmax.f32 %v1010_v54, 0.0 }
 0x181   :  { %v1161_v25 = vmax.f32 %v1012_v59, 0.0  ;;  %v1015_v6 = vpop.f32.mrb[22].mxu0 }
 0x182   :  { %v1016_v43 = vadd.f32 %v1015_v6, %v8436_v9  ;;  %v1017_v55 = vpop.f32.mrb[23].mxu0 }
 0x183   :  { %v1018_v62 = vadd.f32 %v1017_v55, %v8440_v29  ;;  %5803 = vmatprep.mubr.msk.f32.mxu1 %vm1225_vm7, %v1161_v25 }
 0x184   :  { %1437 = vmatmul.mubr.f32.gmra.mrb[20].mxu1 %v1160_v5  ;;  %v1162_v16 = vmax.f32 %v1016_v43, 0.0 }
 0x185   :  { %v1163_v58 = vmax.f32 %v1018_v62, 0.0  ;;  %v1021_v30 = vpop.f32.mrb[24].mxu0 }
 0x186   :  { %v1022_v23 = vadd.f32 %v1021_v30, %v8436_v9  ;;  %v1023_v24 = vpop.f32.mrb[25].mxu0 }
 0x187   :  { %v1024_v40 = vadd.f32 %v1023_v24, %v8440_v29  ;;  %5804 = vmatprep.mubr.msk.f32.mxu1 %vm1225_vm7, %v1163_v58 }
 0x188   :  { %1442 = vmatmul.mubr.f32.gmra.mrb[22].mxu1 %v1162_v16  ;;  %v1164_v32 = vmax.f32 %v1022_v23, 0.0 }
 0x189   :  { %v1165_v12 = vmax.f32 %v1024_v40, 0.0  ;;  %v1027_v19 = vpop.f32.mrb[26].mxu0 }
 0x18a   :  { %v1028_v51 = vadd.f32 %v1027_v19, %v8436_v9  ;;  %v1029_v20 = vpop.f32.mrb[27].mxu0 }
 0x18b   :  { %v1030_v1 = vadd.f32 %v1029_v20, %v8440_v29  ;;  %5805 = vmatprep.mubr.msk.f32.mxu1 %vm1225_vm7, %v1165_v12 }
 0x18c   :  { %1447 = vmatmul.mubr.f32.gmra.mrb[24].mxu1 %v1164_v32  ;;  %v1166_v35 = vmax.f32 %v1028_v51, 0.0 }
 0x18d   :  { %v1167_v38 = vmax.f32 %v1030_v1, 0.0  ;;  %v1033_v26 = vpop.f32.mrb[28].mxu0 }
 0x18e   :  { %v1034_v17 = vadd.f32 %v1033_v26, %v8436_v9  ;;  %v1035_v36 = vpop.f32.mrb[29].mxu0 }
 0x18f   :  { %v1036_v52 = vadd.f32 %v1035_v36, %v8440_v29  ;;  %5806 = vmatprep.mubr.msk.f32.mxu1 %vm1225_vm7, %v1167_v38 }
 0x190   :  { %1452 = vmatmul.mubr.f32.gmra.mrb[26].mxu1 %v1166_v35  ;;  %v1168_v56 = vmax.f32 %v1034_v17, 0.0 }
 0x191   :  { %v1169_v44 = vmax.f32 %v1036_v52, 0.0  ;;  %v1039_v11 = vpop.f32.mrb[30].mxu0 }
 0x192   :  { %v1040_v49 = vadd.f32 %v1039_v11, %v8436_v9  ;;  %v1041_v2 = vpop.f32.mrb[31].mxu0 }
 0x193   :  { %v1042_v3 = vadd.f32 %v1041_v2, %v8440_v29  ;;  %5807 = vmatprep.mubr.msk.f32.mxu1 %vm1225_vm7, %v1169_v44 }
 0x194   :  { %1457 = vmatmul.mubr.f32.gmra.mrb[28].mxu1 %v1168_v56  ;;  %v1170_v63 = vmax.f32 %v1040_v49, 0.0 }
 0x195   :  { %v1171_v41 = vmax.f32 %v1042_v3, 0.0  ;;  %v1045_v21 = vpop.f32.mrb[32].mxu0 }
 0x196   :  { %v1046_v37 = vadd.f32 %v1045_v21, %v8436_v9  ;;  %v1047_v48 = vpop.f32.mrb[33].mxu0 }
 0x197   :  { %v1048_v10 = vadd.f32 %v1047_v48, %v8440_v29  ;;  %5808 = vmatprep.mubr.msk.f32.mxu1 %vm1225_vm7, %v1171_v41 }
 0x198   :  { %1462 = vmatmul.mubr.f32.gmra.mrb[30].mxu1 %v1170_v63  ;;  %v1172_v39 = vmax.f32 %v1046_v37, 0.0 }
 0x199   :  { %v1173_v31 = vmax.f32 %v1048_v10, 0.0  ;;  %v1051_v45 = vpop.f32.mrb[34].mxu0 }
 0x19a   :  { %v1052_v33 = vadd.f32 %v1051_v45, %v8436_v9  ;;  %v1053_v34 = vpop.f32.mrb[35].mxu0 }
 0x19b   :  { %v1054_v50 = vadd.f32 %v1053_v34, %v8440_v29  ;;  %5809 = vmatprep.mubr.msk.f32.mxu1 %vm1225_vm7, %v1173_v31 }
 0x19c   :  { %1467 = vmatmul.mubr.f32.gmra.mrb[32].mxu1 %v1172_v39  ;;  %v1174_v42 = vmax.f32 %v1052_v33, 0.0 }
 0x19d   :  { %v1175_v28 = vmax.f32 %v1054_v50, 0.0  ;;  %v1057_v46 = vpop.f32.mrb[36].mxu0 }
 0x19e   :  { %v1058_v53 = vadd.f32 %v1057_v46, %v8436_v9  ;;  %v1059_v8 = vpop.f32.mrb[37].mxu0 }
 0x19f   :  { %v1060_v7 = vadd.f32 %v1059_v8, %v8440_v29  ;;  %5810 = vmatprep.mubr.msk.f32.mxu1 %vm1225_vm7, %v1175_v28 }
 0x1a0   :  { %1472 = vmatmul.mubr.f32.gmra.mrb[34].mxu1 %v1174_v42  ;;  %v1176_v61 = vmax.f32 %v1058_v53, 0.0 }
 0x1a1   :  { %v1177_v4 = vmax.f32 %v1060_v7, 0.0  ;;  %v1063_v60 = vpop.f32.mrb[38].mxu0 }
 0x1a2   :  { %v1064_v0 = vadd.f32 %v1063_v60, %v8436_v9  ;;  %v1065_v18 = vpop.f32.mrb[39].mxu0  ;;  %v2490_v60 = vld [vmem:[%s11104_s4 + $0x8] sm:$0xff] }
 0x1a3   :  { %v1066_v57 = vadd.f32 %v1065_v18, %v8440_v29  ;;  %5811 = vmatprep.mubr.msk.f32.mxu1 %vm1225_vm7, %v1177_v4 }
 0x1a4   :  { %1477 = vmatmul.mubr.f32.gmra.mrb[36].mxu1 %v1176_v61  ;;  %v1178_v14 = vmax.f32 %v1064_v0, 0.0  ;;  %v2492_v61 = vld [vmem:[%s11104_s4 + $0x18] sm:$0xff] }
 0x1a5   :  { %v1179_v47 = vmax.f32 %v1066_v57, 0.0  ;;  %v1069_v54 = vpop.f32.mrb[40].mxu0  ;;  %v6299_v18 = vpack.c.bf16 %v2492_v61, %v2490_v60  ;;  %v2513_v60 = vld [vmem:[%s11104_s4 + $0xc0] sm:$0xff]  ;;  %v2515_v61 = vld [vmem:[%s11104_s4 + $0xd0] sm:$0xff] }
 0x1a6   :  { %v1070_v59 = vadd.f32 %v1069_v54, %v8436_v9  ;;  %v1071_v25 = vpop.f32.mrb[41].mxu0  ;;  %v2489_v54 = vld [vmem:[%s11104_s4] sm:$0xff] }
 0x1a7   :  { %v1072_v6 = vadd.f32 %v1071_v25, %v8440_v29  ;;  %5812 = vmatprep.mubr.msk.f32.mxu1 %vm1225_vm7, %v1179_v47  ;;  %6300 = vmatprep.subr.bf16.mxu0 %v6299_v18  ;;  %v2518_v18 = vld [vmem:[%s11104_s4 + $0xe8] sm:$0xff] }
 0x1a8   :  { %1482 = vmatmul.mubr.f32.gmra.mrb[38].mxu1 %v1178_v14  ;;  %v1180_v55 = vmax.f32 %v1070_v59, 0.0  ;;  %v2491_v14 = vld [vmem:[%s11104_s4 + $0x10] sm:$0xff] }
 0x1a9   :  { %v1181_v5 = vmax.f32 %v1072_v6, 0.0  ;;  %v1075_v43 = vpop.f32.mrb[42].mxu0 }
 0x1aa   :  { %v1076_v62 = vadd.f32 %v1075_v43, %v8436_v9  ;;  %v1077_v58 = vpop.f32.mrb[43].mxu0 }
 0x1ab   :  { %v1078_v30 = vadd.f32 %v1077_v58, %v8440_v29  ;;  %5813 = vmatprep.mubr.msk.f32.mxu1 %vm1225_vm7, %v1181_v5  ;;  %v6301_v5 = vpack.c.bf16 %v2491_v14, %v2489_v54  ;;  %v2494_v58 = vld [vmem:[%s11104_s4 + $0x28] sm:$0xff]  ;;  %v2517_v54 = vld [vmem:[%s11104_s4 + $0xe0] sm:$0xff]  ;;  %v2519_v14 = vld [vmem:[%s11104_s4 + $0xf0] sm:$0xff] }
 0x1ac   :  { %1487 = vmatmul.mubr.f32.gmra.mrb[40].mxu1 %v1180_v55  ;;  %v1182_v24 = vmax.f32 %v1076_v62, 0.0 }
 0x1ad   :  { %v1183_v16 = vmax.f32 %v1078_v30, 0.0  ;;  %v1081_v23 = vpop.f32.mrb[44].mxu0  ;;  %6302 = vmatpush1.bf16.msra.mxu0 %v6301_v5  ;;  %v2496_v30 = vld [vmem:[%s11104_s4 + $0x38] sm:$0xff] }
 0x1ae   :  { %v1082_v40 = vadd.f32 %v1081_v23, %v8436_v9  ;;  %v1083_v12 = vpop.f32.mrb[45].mxu0 }
 0x1af   :  { %v1084_v19 = vadd.f32 %v1083_v12, %v8440_v29  ;;  %5814 = vmatprep.mubr.msk.f32.mxu1 %vm1225_vm7, %v1183_v16 }
 0x1b0   :  { %1492 = vmatmul.mubr.f32.gmra.mrb[42].mxu1 %v1182_v24  ;;  %v1184_v20 = vmax.f32 %v1082_v40, 0.0  ;;  %v6303_v40 = vpack.c.bf16 %v2496_v30, %v2494_v58  ;;  %v2526_v58 = vld [vmem:[%s11104_s4 + $0x128] sm:$0xff]  ;;  %v2528_v30 = vld [vmem:[%s11104_s4 + $0x138] sm:$0xff] }
 0x1b1   :  { %v1185_v32 = vmax.f32 %v1084_v19, 0.0  ;;  %v1087_v51 = vpop.f32.mrb[46].mxu0 }
 0x1b2   :  { %v1088_v1 = vadd.f32 %v1087_v51, %v8436_v9  ;;  %v1089_v38 = vpop.f32.mrb[47].mxu0  ;;  %6304 = vmatprep.subr.bf16.mxu0 %v6303_v40  ;;  %v2493_v51 = vld [vmem:[%s11104_s4 + $0x20] sm:$0xff] }
 0x1b3   :  { %v1090_v26 = vadd.f32 %v1089_v38, %v8440_v29  ;;  %5815 = vmatprep.mubr.msk.f32.mxu1 %vm1225_vm7, %v1185_v32 }
 0x1b4   :  { %1497 = vmatmul.mubr.f32.gmra.mrb[44].mxu1 %v1184_v20  ;;  %v1186_v36 = vmax.f32 %v1088_v1, 0.0  ;;  %v2495_v20 = vld [vmem:[%s11104_s4 + $0x30] sm:$0xff] }
 0x1b5   :  { %v1187_v35 = vmax.f32 %v1090_v26, 0.0  ;;  %v1093_v17 = vpop.f32.mrb[48].mxu0 }
 0x1b6   :  { %v1094_v52 = vadd.f32 %v1093_v17, %v8436_v9  ;;  %v1095_v44 = vpop.f32.mrb[49].mxu0 }
 0x1b7   :  { %v1096_v11 = vadd.f32 %v1095_v44, %v8440_v29  ;;  %5816 = vmatprep.mubr.msk.f32.mxu1 %vm1225_vm7, %v1187_v35  ;;  %v6305_v35 = vpack.c.bf16 %v2495_v20, %v2493_v51  ;;  %v2500_v44 = vld [vmem:[%s11104_s4 + $0x58] sm:$0xff]  ;;  %v2529_v51 = vld [vmem:[%s11104_s4 + $0x140] sm:$0xff]  ;;  %v2531_v20 = vld [vmem:[%s11104_s4 + $0x150] sm:$0xff] }
 0x1b8   :  { %1502 = vmatmul.mubr.f32.gmra.mrb[46].mxu1 %v1186_v36  ;;  %v1188_v2 = vmax.f32 %v1094_v52, 0.0  ;;  %v2498_v52 = vld [vmem:[%s11104_s4 + $0x48] sm:$0xff] }
 0x1b9   :  { %v1189_v56 = vmax.f32 %v1096_v11, 0.0  ;;  %v1099_v49 = vpop.f32.mrb[50].mxu0  ;;  %6306 = vmatpush1.bf16.msra.mxu0 %v6305_v35 }
 0x1ba   :  { %v1100_v3 = vadd.f32 %v1099_v49, %v8436_v9  ;;  %v1101_v41 = vpop.f32.mrb[51].mxu0 }
 0x1bb   :  { %v1102_v21 = vadd.f32 %v1101_v41, %v8440_v29  ;;  %5817 = vmatprep.mubr.msk.f32.mxu1 %vm1225_vm7, %v1189_v56  ;;  %v6307_v56 = vpack.c.bf16 %v2500_v44, %v2498_v52  ;;  %v2538_v44 = vld [vmem:[%s11104_s4 + $0x188] sm:$0xff] }
 0x1bc   :  { %1507 = vmatmul.mubr.f32.gmra.mrb[48].mxu1 %v1188_v2  ;;  %v1190_v48 = vmax.f32 %v1100_v3, 0.0  ;;  %v2502_v2 = vld [vmem:[%s11104_s4 + $0x68] sm:$0xff]  ;;  %v2504_v3 = vld [vmem:[%s11104_s4 + $0x78] sm:$0xff] }
 0x1bd   :  { %v1191_v63 = vmax.f32 %v1102_v21, 0.0  ;;  %v1105_v37 = vpop.f32.mrb[52].mxu0  ;;  %6308 = vmatprep.subr.bf16.mxu0 %v6307_v56  ;;  %v6311_v41 = vpack.c.bf16 %v2504_v3, %v2502_v2  ;;  %v2501_v21 = vld [vmem:[%s11104_s4 + $0x60] sm:$0xff]  ;;  %v2542_v2 = vld [vmem:[%s11104_s4 + $0x1a8] sm:$0xff]  ;;  %v2544_v3 = vld [vmem:[%s11104_s4 + $0x1b8] sm:$0xff] }
 0x1be   :  { %v1106_v10 = vadd.f32 %v1105_v37, %v8436_v9  ;;  %v1107_v31 = vpop.f32.mrb[53].mxu0 }
 0x1bf   :  { %v1108_v45 = vadd.f32 %v1107_v31, %v8440_v29  ;;  %5818 = vmatprep.mubr.msk.f32.mxu1 %vm1225_vm7, %v1191_v63  ;;  %v2503_v63 = vld [vmem:[%s11104_s4 + $0x70] sm:$0xff] }
 0x1c0   :  { %1512 = vmatmul.mubr.f32.gmra.mrb[50].mxu1 %v1190_v48  ;;  %v1192_v34 = vmax.f32 %v1106_v10, 0.0  ;;  %v6313_v37 = vpack.c.bf16 %v2503_v63, %v2501_v21  ;;  %v2506_v48 = vld [vmem:[%s11104_s4 + $0x88] sm:$0xff]  ;;  %v2508_v10 = vld [vmem:[%s11104_s4 + $0x98] sm:$0xff] }
 0x1c1   :  { %v1193_v39 = vmax.f32 %v1108_v45, 0.0  ;;  %v1111_v33 = vpop.f32.mrb[54].mxu0  ;;  %v6315_v31 = vpack.c.bf16 %v2508_v10, %v2506_v48  ;;  %v2505_v45 = vld [vmem:[%s11104_s4 + $0x80] sm:$0xff]  ;;  %v2543_v48 = vld [vmem:[%s11104_s4 + $0x1b0] sm:$0xff]  ;;  %v2546_v10 = vld [vmem:[%s11104_s4 + $0x1c8] sm:$0xff] }
 0x1c2   :  { %v1112_v50 = vadd.f32 %v1111_v33, %v8436_v9  ;;  %v1113_v28 = vpop.f32.mrb[55].mxu0 }
 0x1c3   :  { %v1114_v46 = vadd.f32 %v1113_v28, %v8440_v29  ;;  %5819 = vmatprep.mubr.msk.f32.mxu1 %vm1225_vm7, %v1193_v39  ;;  %v2507_v39 = vld [vmem:[%s11104_s4 + $0x90] sm:$0xff] }
 0x1c4   :  { %1517 = vmatmul.mubr.f32.gmra.mrb[52].mxu1 %v1192_v34  ;;  %v1194_v8 = vmax.f32 %v1112_v50, 0.0  ;;  %v6317_v33 = vpack.c.bf16 %v2507_v39, %v2505_v45  ;;  %v2510_v34 = vld [vmem:[%s11104_s4 + $0xa8] sm:$0xff]  ;;  %v2512_v50 = vld [vmem:[%s11104_s4 + $0xb8] sm:$0xff]  ;;  %v2545_v39 = vld [vmem:[%s11104_s4 + $0x1c0] sm:$0xff] }
 0x1c5   :  { %v1195_v42 = vmax.f32 %v1114_v46, 0.0  ;;  %v1117_v53 = vpop.f32.mrb[56].mxu0  ;;  %v6319_v28 = vpack.c.bf16 %v2512_v50, %v2510_v34  ;;  %v2509_v46 = vld [vmem:[%s11104_s4 + $0xa0] sm:$0xff]  ;;  %v2548_v45 = vld [vmem:[%s11104_s4 + $0x1d8] sm:$0xff] }
 0x1c6   :  { %v1118_v7 = vadd.f32 %v1117_v53, %v8436_v9  ;;  %v1119_v4 = vpop.f32.mrb[57].mxu0  ;;  %v6355_v50 = vpack.c.bf16 %v2548_v45, %v2546_v10 }
 0x1c7   :  { %v1120_v0 = vadd.f32 %v1119_v4, %v8440_v29  ;;  %5820 = vmatprep.mubr.msk.f32.mxu1 %vm1225_vm7, %v1195_v42  ;;  %v2511_v42 = vld [vmem:[%s11104_s4 + $0xb0] sm:$0xff] }
 0x1c8   :  { %1522 = vmatmul.mubr.f32.gmra.mrb[54].mxu1 %v1194_v8  ;;  %v1196_v59 = vmax.f32 %v1118_v7, 0.0  ;;  %v6321_v53 = vpack.c.bf16 %v2511_v42, %v2509_v46  ;;  %v2514_v8 = vld [vmem:[%s11104_s4 + $0xc8] sm:$0xff]  ;;  %v2516_v7 = vld [vmem:[%s11104_s4 + $0xd8] sm:$0xff] }
 0x1c9   :  { %v1197_v57 = vmax.f32 %v1120_v0, 0.0  ;;  %v1123_v47 = vpop.f32.mrb[58].mxu0  ;;  %v6323_v4 = vpack.c.bf16 %v2516_v7, %v2514_v8  ;;  %v6325_v0 = vpack.c.bf16 %v2515_v61, %v2513_v60 }
 0x1ca   :  { %v1124_v25 = vadd.f32 %v1123_v47, %v8436_v9  ;;  %v1125_v6 = vpop.f32.mrb[59].mxu0 }
 0x1cb   :  { %v1126_v43 = vadd.f32 %v1125_v6, %v8440_v29  ;;  %5821 = vmatprep.mubr.msk.f32.mxu1 %vm1225_vm7, %v1197_v57  ;;  %v2520_v57 = vld [vmem:[%s11104_s4 + $0xf8] sm:$0xff] }
 0x1cc   :  { %1527 = vmatmul.mubr.f32.gmra.mrb[56].mxu1 %v1196_v59  ;;  %v1198_v16 = vmax.f32 %v1124_v25, 0.0  ;;  %v6327_v47 = vpack.c.bf16 %v2520_v57, %v2518_v18  ;;  %v6329_v59 = vpack.c.bf16 %v2519_v14, %v2517_v54  ;;  %v2522_v25 = vld [vmem:[%s11104_s4 + $0x108] sm:$0xff]  ;;  %v2524_v6 = vld [vmem:[%s11104_s4 + $0x118] sm:$0xff] }
 0x1cd   :  { %v1199_v55 = vmax.f32 %v1126_v43, 0.0  ;;  %v1129_v62 = vpop.f32.mrb[60].mxu0  ;;  %v6331_v5 = vpack.c.bf16 %v2524_v6, %v2522_v25  ;;  %v2521_v43 = vld [vmem:[%s11104_s4 + $0x100] sm:$0xff]  ;;  %v2552_v18 = vld [vmem:[%s11104_s4 + $0x1f8] sm:$0xff]  ;;  %v2551_v25 = vld [vmem:[%s11104_s4 + $0x1f0] sm:$0xff] }
 0x1ce   :  { %v1130_v23 = vadd.f32 %v1129_v62, %v8436_v9  ;;  %v1131_v24 = vpop.f32.mrb[61].mxu0 }
 0x1cf   :  { %v1132_v12 = vadd.f32 %v1131_v24, %v8440_v29  ;;  %5822 = vmatprep.mubr.msk.f32.mxu1 %vm1225_vm7, %v1199_v55  ;;  %v2523_v55 = vld [vmem:[%s11104_s4 + $0x110] sm:$0xff] }
 0x1d0   :  { %1532 = vmatmul.mubr.f32.gmra.mrb[58].mxu1 %v1198_v16  ;;  %v1200_v1 = vmax.f32 %v1130_v23, 0.0  ;;  %v6333_v62 = vpack.c.bf16 %v2523_v55, %v2521_v43  ;;  %v6335_v16 = vpack.c.bf16 %v2528_v30, %v2526_v58  ;;  %v2525_v23 = vld [vmem:[%s11104_s4 + $0x120] sm:$0xff]  ;;  %v2527_v24 = vld [vmem:[%s11104_s4 + $0x130] sm:$0xff] }
 0x1d1   :  { %v1201_v19 = vmax.f32 %v1132_v12, 0.0  ;;  %v1135_v32 = vpop.f32.mrb[62].mxu0  ;;  %v6337_v40 = vpack.c.bf16 %v2527_v24, %v2525_v23  ;;  %v2530_v12 = vld [vmem:[%s11104_s4 + $0x148] sm:$0xff] }
 0x1d2   :  { %v1136_v38 = vadd.f32 %v1135_v32, %v8436_v9  ;;  %v1137_v26 = vpop.f32.mrb[63].mxu0  ;;  %v2497_v9 = vld [vmem:[%s11104_s4 + $0x40] sm:$0xff] }
 0x1d3   :  { %v1138_v17 = vadd.f32 %v1137_v26, %v8440_v29  ;;  %5823 = vmatprep.mubr.msk.f32.mxu1 %vm1225_vm7, %v1201_v19  ;;  %v2499_v29 = vld [vmem:[%s11104_s4 + $0x50] sm:$0xff]  ;;  %v2532_v19 = vld [vmem:[%s11104_s4 + $0x158] sm:$0xff] }
 0x1d4   :  { %1537 = vmatmul.mubr.f32.gmra.mrb[60].mxu1 %v1200_v1  ;;  %v1202_v11 = vmax.f32 %v1136_v38, 0.0  ;;  %v6309_v49 = vpack.c.bf16 %v2499_v29, %v2497_v9  ;;  %v6339_v32 = vpack.c.bf16 %v2532_v19, %v2530_v12  ;;  %v6341_v1 = vpack.c.bf16 %v2531_v20, %v2529_v51  ;;  %v2534_v38 = vld [vmem:[%s11104_s4 + $0x168] sm:$0xff]  ;;  %v2536_v26 = vld [vmem:[%s11104_s4 + $0x178] sm:$0xff]  ;;  %v2537_v9 = vld [vmem:[%s11104_s4 + $0x180] sm:$0xff] }
 0x1d5   :  { %v1203_v36 = vmax.f32 %v1138_v17, 0.0  ;;  %v6343_v35 = vpack.c.bf16 %v2536_v26, %v2534_v38  ;;  %v2533_v17 = vld [vmem:[%s11104_s4 + $0x160] sm:$0xff]  ;;  %v2539_v29 = vld [vmem:[%s11104_s4 + $0x190] sm:$0xff]  ;;  %v2556_v38 = vld [vmem:[%s11104_s4 + $0x218] sm:$0xff] }
 0x1d6   :  { %6310 = vmatpush1.bf16.msra.mxu0 %v6309_v49  ;;  %v6349_v49 = vpack.c.bf16 %v2539_v29, %v2537_v9 }
 0x1d7   :  { %5824 = vmatprep.mubr.msk.f32.mxu1 %vm1225_vm7, %v1203_v36  ;;  %6312 = vmatprep.subr.bf16.mxu0 %v6311_v41  ;;  %v2535_v36 = vld [vmem:[%s11104_s4 + $0x170] sm:$0xff]  ;;  %v6351_v41 = vpack.c.bf16 %v2544_v3, %v2542_v2 }
 0x1d8   :  { %1542 = vmatmul.mubr.f32.gmra.mrb[62].mxu1 %v1202_v11  ;;  %v6345_v52 = vpack.c.bf16 %v2535_v36, %v2533_v17  ;;  %v2540_v11 = vld [vmem:[%s11104_s4 + $0x198] sm:$0xff] }
 0x1d9   :  { %v6347_v56 = vpack.c.bf16 %v2540_v11, %v2538_v44 }
 0x1da   :  { %6314 = vmatpush1.bf16.msra.mxu0 %v6313_v37  ;;  %v2541_v37 = vld [vmem:[%s11104_s4 + $0x1a0] sm:$0xff] }
 0x1db   :  { %6316 = vmatprep.subr.bf16.mxu0 %v6315_v31  ;;  %v6353_v31 = vpack.c.bf16 %v2543_v48, %v2541_v37 }
 0x1de   :  { %6318 = vmatpush1.bf16.msra.mxu0 %v6317_v33  ;;  %v2547_v33 = vld [vmem:[%s11104_s4 + $0x1d0] sm:$0xff] }
 0x1df   :  { %6320 = vmatprep.subr.bf16.mxu0 %v6319_v28 }
 0x1e2   :  { %6322 = vmatpush1.bf16.msra.mxu0 %v6321_v53  ;;  %v6357_v53 = vpack.c.bf16 %v2547_v33, %v2545_v39 }
 0x1e3   :  { %6324 = vmatprep.subr.bf16.mxu0 %v6323_v4 }
 0x1e6   :  { %6326 = vmatpush1.bf16.msra.mxu0 %v6325_v0  ;;  %v2550_v0 = vld [vmem:[%s11104_s4 + $0x1e8] sm:$0xff] }
 0x1e7   :  { %6328 = vmatprep.subr.bf16.mxu0 %v6327_v47  ;;  %v6359_v57 = vpack.c.bf16 %v2552_v18, %v2550_v0 }
 0x1ea   :  { %6330 = vmatpush1.bf16.msra.mxu0 %v6329_v59  ;;  %v2549_v59 = vld [vmem:[%s11104_s4 + $0x1e0] sm:$0xff] }
 0x1eb   :  { %6332 = vmatprep.subr.bf16.mxu0 %v6331_v5  ;;  %v6361_v43 = vpack.c.bf16 %v2551_v25, %v2549_v59 }
 0x1ee   :  { %6334 = vmatpush1.bf16.msra.mxu0 %v6333_v62 }
 0x1ef   :  { %6336 = vmatprep.subr.bf16.mxu0 %v6335_v16 }
 0x1f2   :  { %6338 = vmatpush1.bf16.msra.mxu0 %v6337_v40 }
 0x1f3   :  { %6340 = vmatprep.subr.bf16.mxu0 %v6339_v32 }
 0x1f6   :  { %6342 = vmatpush1.bf16.msra.mxu0 %v6341_v1  ;;  %v2554_v1 = vld [vmem:[%s11104_s4 + $0x208] sm:$0xff] }
 0x1f7   :  { %6344 = vmatprep.subr.bf16.mxu0 %v6343_v35  ;;  %v6363_v29 = vpack.c.bf16 %v2556_v38, %v2554_v1 }
 0x1fa   :  { %6346 = vmatpush1.bf16.msra.mxu0 %v6345_v52 }
 0x1fb   :  { %6348 = vmatprep.subr.bf16.mxu0 %v6347_v56 }
 0x1fe   :  { %6350 = vmatpush1.bf16.msra.mxu0 %v6349_v49 }
 0x1ff   :  { %6352 = vmatprep.subr.bf16.mxu0 %v6351_v41 }
 0x202   :  { %6354 = vmatpush1.bf16.msra.mxu0 %v6353_v31 }
 0x203   :  { %6356 = vmatprep.subr.bf16.mxu0 %v6355_v50 }
 0x206   :  { %6358 = vmatpush1.bf16.msra.mxu0 %v6357_v53 }
 0x207   :  { %6360 = vmatprep.subr.bf16.mxu0 %v6359_v57 }
 0x20a   :  { %6362 = vmatpush1.bf16.msra.mxu0 %v6361_v43 }
 0x20b   :  { %6364 = vmatprep.subr.bf16.mxu0 %v6363_v29 }
 0x22f   :  { %v8700_v21 = vpop.f32.mrb[0].mxu1 }
 0x230   :  { %v1390_v63 = vpop.f32.mrb[1].mxu1  ;;  %v1579_v28 = vrot.slane %v8700_v21, 1 }
 0x233   :  { %v1393_v34 = vpop.f32.mrb[2].mxu1 }
 0x234   :  { %v1580_v46 = vrot.slane %v1393_v34, 1  ;;  %v1395_v42 = vpop.f32.mrb[3].mxu1 }
 0x236   :  { %v1581_v8 = vsel %vm108_vm0, %v1579_v28, %v1580_v46 }
 0x237   :  { %v1676_v7 = vadd.f32 %v1581_v8, %v8700_v21  ;;  %v1398_v4 = vpop.f32.mrb[4].mxu1 }
 0x238   :  { %v1582_v60 = vrot.slane %v1398_v4, 1  ;;  %v1400_v61 = vpop.f32.mrb[5].mxu1 }
 0x239   :  { %v8740_v62 = vmul.f32 0.5, %v1676_v7 }
 0x23a   :  { %v1583_v47 = vsel %vm108_vm0, %v1580_v46, %v1582_v60 }
 0x23b   :  { %v1677_v54 = vadd.f32 %v1583_v47, %v1393_v34  ;;  %v1403_v14 = vpop.f32.mrb[6].mxu1  ;;  %v1838_v51 = vrot.slane %v8740_v62, 4  ;;  %v1772_v20 = vrot.slane %v8740_v62, 2  ;;  %v1905_v45 = vrot.slane %v8740_v62, 6 }
 0x23c   :  { %v1584_v6 = vrot.slane %v1403_v14, 1  ;;  %v1405_v5 = vpop.f32.mrb[7].mxu1 }
 0x23d   :  { %v8738_v55 = vmul.f32 0.5, %v1677_v54 }
 0x23e   :  { %v1585_v58 = vsel %vm108_vm0, %v1582_v60, %v1584_v6 }
 0x23f   :  { %v1678_v30 = vadd.f32 %v1585_v58, %v1398_v4  ;;  %v1408_v16 = vpop.f32.mrb[8].mxu1  ;;  %v1839_v40 = vrot.slane %v8738_v55, 4  ;;  %v1773_v19 = vrot.slane %v8738_v55, 2  ;;  %v1906_v9 = vrot.slane %v8738_v55, 6 }
 0x240   :  { %v1586_v23 = vrot.slane %v1408_v16, 1  ;;  %v1410_v24 = vpop.f32.mrb[9].mxu1 }
 0x241   :  { %v8744_v12 = vmul.f32 0.5, %v1678_v30  ;;  %v1840_v56 = vsel %vm309_vm3, %v1838_v51, %v1839_v40  ;;  %v1774_v3 = vsel %vm175_vm2, %v1772_v20, %v1773_v19  ;;  %v1907_v42 = vsel %vm1904_vm8, %v1905_v45, %v1906_v9 }
 0x242   :  { %v1587_v32 = vsel %vm108_vm0, %v1584_v6, %v1586_v23 }
 0x243   :  { %v1679_v26 = vadd.f32 %v1587_v32, %v1403_v14  ;;  %v1413_v35 = vpop.f32.mrb[10].mxu1  ;;  %v1841_v17 = vrot.slane %v8744_v12, 4  ;;  %v1775_v36 = vrot.slane %v8744_v12, 2  ;;  %v1908_v52 = vrot.slane %v8744_v12, 6 }
 0x244   :  { %v1588_v44 = vrot.slane %v1413_v35, 1  ;;  %v1415_v11 = vpop.f32.mrb[11].mxu1 }
 0x245   :  { %v8763_v49 = vmul.f32 0.5, %v1679_v26  ;;  %v1842_v2 = vsel %vm309_vm3, %v1839_v40, %v1841_v17  ;;  %v1776_v41 = vsel %vm175_vm2, %v1773_v19, %v1775_v36  ;;  %v1909_v39 = vsel %vm1904_vm8, %v1906_v9, %v1908_v52 }
 0x246   :  { %v1589_v63 = vsel %vm108_vm0, %v1586_v23, %v1588_v44  ;;  %v7020_v37 = vpack.i.bf16 %v1842_v2, %v1840_v56  ;;  %v7015_v48 = vpack.i.bf16 %v1776_v41, %v1774_v3  ;;  %v7025_v7 = vpack.i.bf16 %v1909_v39, %v1907_v42 }
 0x247   :  { %v1680_v10 = vadd.f32 %v1589_v63, %v1408_v16  ;;  %v1418_v31 = vpop.f32.mrb[12].mxu1  ;;  %v1843_v50 = vrot.slane %v8763_v49, 4  ;;  %v1777_v53 = vrot.slane %v8763_v49, 2  ;;  %v1910_v14 = vrot.slane %v8763_v49, 6 }
 0x248   :  { %v1590_v33 = vrot.slane %v1418_v31, 1  ;;  %7021 = vrot.lane.b32.xlu0 %v7020_v37, %s7486_s15  ;;  %7016 = vrot.lane.b32.xlu1 %v7015_v48, %s7487_s2  ;;  %v1420_v34 = vpop.f32.mrb[13].mxu1 }
 0x249   :  { %v8776_v46 = vmul.f32 0.5, %v1680_v10  ;;  %v1844_v54 = vsel %vm309_vm3, %v1841_v17, %v1843_v50  ;;  %v1778_v6 = vsel %vm175_vm2, %v1775_v36, %v1777_v53  ;;  %v1911_v38 = vsel %vm1904_vm8, %v1908_v52, %v1910_v14 }
 0x24a   :  { %v1591_v8 = vsel %vm108_vm0, %v1588_v44, %v1590_v33 }
 0x24b   :  { %v1681_v4 = vadd.f32 %v1591_v8, %v1413_v35  ;;  %v1423_v60 = vpop.f32.mrb[14].mxu1  ;;  %v1845_v61 = vrot.slane %v8776_v46, 4  ;;  %v1779_v0 = vrot.slane %v8776_v46, 2  ;;  %v1912_v18 = vrot.slane %v8776_v46, 6 }
 0x24c   :  { %v1592_v57 = vrot.slane %v1423_v60, 1  ;;  %7026 = vrot.lane.b32.xlu1 %v7025_v7, %s7488_s16  ;;  %v1425_v47 = vpop.f32.mrb[15].mxu1 }
 0x24d   :  { %v8789_v59 = vmul.f32 0.5, %v1681_v4  ;;  %v1846_v25 = vsel %vm309_vm3, %v1843_v50, %v1845_v61  ;;  %v1780_v5 = vsel %vm175_vm2, %v1777_v53, %v1779_v0  ;;  %v1913_v24 = vsel %vm1904_vm8, %v1910_v14, %v1912_v18 }
 0x24e   :  { %v1593_v43 = vsel %vm108_vm0, %v1590_v33, %v1592_v57  ;;  %v7035_v58 = vpack.i.bf16 %v1846_v25, %v1844_v54  ;;  %v7030_v30 = vpack.i.bf16 %v1780_v5, %v1778_v6  ;;  %v7040_v17 = vpack.i.bf16 %v1913_v24, %v1911_v38 }
 0x24f   :  { %v1682_v16 = vadd.f32 %v1593_v43, %v1418_v31  ;;  %v1428_v23 = vpop.f32.mrb[16].mxu1  ;;  %v1847_v32 = vrot.slane %v8789_v59, 4  ;;  %v1781_v26 = vrot.slane %v8789_v59, 2  ;;  %v1914_v52 = vrot.slane %v8789_v59, 6 }
 0x250   :  { %v1594_v40 = vrot.slane %v1428_v23, 1  ;;  %7036 = vrot.lane.b32.xlu1 %v7035_v58, %s7486_s15  ;;  %7031 = vrot.lane.b32.xlu0 %v7030_v30, %s7487_s2  ;;  %v1430_v19 = vpop.f32.mrb[17].mxu1 }
 0x251   :  { %v8799_v1 = vmul.f32 0.5, %v1682_v16  ;;  %v1848_v3 = vsel %vm309_vm3, %v1845_v61, %v1847_v32  ;;  %v1782_v37 = vsel %vm175_vm2, %v1779_v0, %v1781_v26  ;;  %v1915_v4 = vsel %vm1904_vm8, %v1912_v18, %v1914_v52 }
 0x252   :  { %v1595_v35 = vsel %vm108_vm0, %v1592_v57, %v1594_v40 }
 0x253   :  { %v1683_v36 = vadd.f32 %v1595_v35, %v1423_v60  ;;  %v1433_v44 = vpop.f32.mrb[18].mxu1  ;;  %v1849_v11 = vrot.slane %v8799_v1, 4  ;;  %v1783_v56 = vrot.slane %v8799_v1, 2  ;;  %v1916_v9 = vrot.slane %v8799_v1, 6 }
 0x254   :  { %v1596_v29 = vrot.slane %v1433_v44, 1  ;;  %7041 = vrot.lane.b32.xlu0 %v7040_v17, %s7488_s16  ;;  %v1435_v2 = vpop.f32.mrb[19].mxu1 }
 0x255   :  { %v8810_v41 = vmul.f32 0.5, %v1683_v36  ;;  %v1850_v63 = vsel %vm309_vm3, %v1847_v32, %v1849_v11  ;;  %v1784_v48 = vsel %vm175_vm2, %v1781_v26, %v1783_v56  ;;  %v1917_v50 = vsel %vm1904_vm8, %v1914_v52, %v1916_v9 }
 0x256   :  { %v1597_v10 = vsel %vm108_vm0, %v1594_v40, %v1596_v29  ;;  %v7050_v31 = vpack.i.bf16 %v1850_v63, %v1848_v3  ;;  %v7045_v39 = vpack.i.bf16 %v1784_v48, %v1782_v37  ;;  %v7055_v0 = vpack.i.bf16 %v1917_v50, %v1915_v4 }
 0x257   :  { %v1684_v33 = vadd.f32 %v1597_v10, %v1428_v23  ;;  %v1438_v34 = vpop.f32.mrb[20].mxu1  ;;  %v1851_v8 = vrot.slane %v8810_v41, 4  ;;  %v1785_v60 = vrot.slane %v8810_v41, 2  ;;  %v1918_v18 = vrot.slane %v8810_v41, 6 }
 0x258   :  { %v1598_v42 = vrot.slane %v1438_v34, 1  ;;  %7051 = vrot.lane.b32.xlu0 %v7050_v31, %s7486_s15  ;;  %7046 = vrot.lane.b32.xlu1 %v7045_v39, %s7487_s2  ;;  %v1440_v53 = vpop.f32.mrb[21].mxu1 }
 0x259   :  { %v8820_v7 = vmul.f32 0.5, %v1684_v33  ;;  %v1852_v43 = vsel %vm309_vm3, %v1849_v11, %v1851_v8  ;;  %v1786_v16 = vsel %vm175_vm2, %v1783_v56, %v1785_v60  ;;  %v1919_v11 = vsel %vm1904_vm8, %v1916_v9, %v1918_v18 }
 0x25a   :  { %v1599_v61 = vsel %vm108_vm0, %v1596_v29, %v1598_v42 }
 0x25b   :  { %v1685_v57 = vadd.f32 %v1599_v61, %v1433_v44  ;;  %v1443_v47 = vpop.f32.mrb[22].mxu1  ;;  %v1853_v54 = vrot.slane %v8820_v7, 4  ;;  %v1787_v14 = vrot.slane %v8820_v7, 2  ;;  %v1920_v25 = vrot.slane %v8820_v7, 6 }
 0x25c   :  { %v1600_v6 = vrot.slane %v1443_v47, 1  ;;  %7056 = vrot.lane.b32.xlu1 %v7055_v0, %s7488_s16  ;;  %v1445_v5 = vpop.f32.mrb[23].mxu1 }
 0x25d   :  { %v8831_v58 = vmul.f32 0.5, %v1685_v57  ;;  %v1854_v30 = vsel %vm309_vm3, %v1851_v8, %v1853_v54  ;;  %v1788_v23 = vsel %vm175_vm2, %v1785_v60, %v1787_v14  ;;  %v1921_v26 = vsel %vm1904_vm8, %v1918_v18, %v1920_v25 }
 0x25e   :  { %v1601_v24 = vsel %vm108_vm0, %v1598_v42, %v1600_v6  ;;  %v7065_v40 = vpack.i.bf16 %v1854_v30, %v1852_v43  ;;  %v7060_v19 = vpack.i.bf16 %v1788_v23, %v1786_v16  ;;  %v7070_v2 = vpack.i.bf16 %v1921_v26, %v1919_v11 }
 0x25f   :  { %v1686_v32 = vadd.f32 %v1601_v24, %v1438_v34  ;;  %v1448_v38 = vpop.f32.mrb[24].mxu1  ;;  %v1855_v36 = vrot.slane %v8831_v58, 4  ;;  %v1789_v56 = vrot.slane %v8831_v58, 2  ;;  %v1922_v9 = vrot.slane %v8831_v58, 6 }
 0x260   :  { %v1602_v35 = vrot.slane %v1448_v38, 1  ;;  %7066 = vrot.lane.b32.xlu1 %v7065_v40, %s7486_s15  ;;  %7061 = vrot.lane.b32.xlu0 %v7060_v19, %s7487_s2  ;;  %v1450_v17 = vpop.f32.mrb[25].mxu1 }
 0x261   :  { %v8841_v44 = vmul.f32 0.5, %v1686_v32  ;;  %v1856_v39 = vsel %vm309_vm3, %v1853_v54, %v1855_v36  ;;  %v1790_v50 = vsel %vm175_vm2, %v1787_v14, %v1789_v56  ;;  %v1923_v14 = vsel %vm1904_vm8, %v1920_v25, %v1922_v9 }
 0x262   :  { %v1603_v29 = vsel %vm108_vm0, %v1600_v6, %v1602_v35 }
 0x263   :  { %v1687_v3 = vadd.f32 %v1603_v29, %v1443_v47  ;;  %v1453_v52 = vpop.f32.mrb[26].mxu1  ;;  %v1857_v63 = vrot.slane %v8841_v44, 4  ;;  %v1791_v37 = vrot.slane %v8841_v44, 2  ;;  %v1924_v48 = vrot.slane %v8841_v44, 6 }
 0x264   :  { %v1604_v10 = vrot.slane %v1453_v52, 1  ;;  %7071 = vrot.lane.b32.xlu0 %v7070_v2, %s7488_s16  ;;  %v1455_v31 = vpop.f32.mrb[27].mxu1 }
 0x265   :  { %v8852_v33 = vmul.f32 0.5, %v1687_v3  ;;  %v1858_v34 = vsel %vm309_vm3, %v1855_v36, %v1857_v63  ;;  %v1792_v42 = vsel %vm175_vm2, %v1789_v56, %v1791_v37  ;;  %v1925_v0 = vsel %vm1904_vm8, %v1922_v9, %v1924_v48 }
 0x266   :  { %v1605_v53 = vsel %vm108_vm0, %v1602_v35, %v1604_v10  ;;  %v7080_v8 = vpack.i.bf16 %v1858_v34, %v1856_v39  ;;  %v7075_v4 = vpack.i.bf16 %v1792_v42, %v1790_v50  ;;  %v7085_v18 = vpack.i.bf16 %v1925_v0, %v1923_v14 }
 0x267   :  { %v1688_v60 = vadd.f32 %v1605_v53, %v1448_v38  ;;  %v1458_v61 = vpop.f32.mrb[28].mxu1  ;;  %v1859_v54 = vrot.slane %v8852_v33, 4  ;;  %v1793_v5 = vrot.slane %v8852_v33, 2  ;;  %v1926_v25 = vrot.slane %v8852_v33, 6 }
 0x268   :  { %v1606_v57 = vrot.slane %v1458_v61, 1  ;;  %7081 = vrot.lane.b32.xlu0 %v7080_v8, %s7486_s15  ;;  %7076 = vrot.lane.b32.xlu1 %v7075_v4, %s7487_s2  ;;  %v1460_v47 = vpop.f32.mrb[29].mxu1 }
 0x269   :  { %v8862_v6 = vmul.f32 0.5, %v1688_v60  ;;  %v1860_v38 = vsel %vm309_vm3, %v1857_v63, %v1859_v54  ;;  %v1794_v17 = vsel %vm175_vm2, %v1791_v37, %v1793_v5  ;;  %v1927_v37 = vsel %vm1904_vm8, %v1924_v48, %v1926_v25 }
 0x26a   :  { %v1607_v43 = vsel %vm108_vm0, %v1604_v10, %v1606_v57 }
 0x26b   :  { %v1689_v30 = vadd.f32 %v1607_v43, %v1453_v52  ;;  %v1463_v16 = vpop.f32.mrb[30].mxu1  ;;  %v1861_v23 = vrot.slane %v8862_v6, 4  ;;  %v1795_v24 = vrot.slane %v8862_v6, 2  ;;  %v1928_v40 = vrot.slane %v8862_v6, 6 }
 0x26c   :  { %v1608_v19 = vrot.slane %v1463_v16, 1  ;;  %7086 = vrot.lane.b32.xlu1 %v7085_v18, %s7488_s16  ;;  %v1465_v32 = vpop.f32.mrb[31].mxu1 }
 0x26d   :  { %v8873_v26 = vmul.f32 0.5, %v1689_v30  ;;  %v1862_v35 = vsel %vm309_vm3, %v1859_v54, %v1861_v23  ;;  %v1796_v36 = vsel %vm175_vm2, %v1793_v5, %v1795_v24  ;;  %v1929_v52 = vsel %vm1904_vm8, %v1926_v25, %v1928_v40 }
 0x26e   :  { %v1609_v11 = vsel %vm108_vm0, %v1606_v57, %v1608_v19  ;;  %v7095_v56 = vpack.i.bf16 %v1862_v35, %v1860_v38  ;;  %v7090_v29 = vpack.i.bf16 %v1796_v36, %v1794_v17  ;;  %v7100_v50 = vpack.i.bf16 %v1929_v52, %v1927_v37 }
 0x26f   :  { %v1690_v2 = vadd.f32 %v1609_v11, %v1458_v61  ;;  %v1468_v3 = vpop.f32.mrb[32].mxu1  ;;  %v1863_v31 = vrot.slane %v8873_v26, 4  ;;  %v1797_v9 = vrot.slane %v8873_v26, 2  ;;  %v1930_v48 = vrot.slane %v8873_v26, 6 }
 0x270   :  { %v1610_v10 = vrot.slane %v1468_v3, 1  ;;  %7096 = vrot.lane.b32.xlu1 %v7095_v56, %s7486_s15  ;;  %7091 = vrot.lane.b32.xlu0 %v7090_v29, %s7487_s2  ;;  %v1470_v63 = vpop.f32.mrb[33].mxu1 }
 0x271   :  { %v8883_v39 = vmul.f32 0.5, %v1690_v2  ;;  %v1864_v57 = vsel %vm309_vm3, %v1861_v23, %v1863_v31  ;;  %v1798_v14 = vsel %vm175_vm2, %v1795_v24, %v1797_v9  ;;  %v1931_v24 = vsel %vm1904_vm8, %v1928_v40, %v1930_v48 }
 0x272   :  { %v1611_v34 = vsel %vm108_vm0, %v1608_v19, %v1610_v10 }
 0x273   :  { %v1691_v42 = vadd.f32 %v1611_v34, %v1463_v16  ;;  %v1473_v53 = vpop.f32.mrb[34].mxu1  ;;  %v1865_v8 = vrot.slane %v8883_v39, 4  ;;  %v1799_v4 = vrot.slane %v8883_v39, 2  ;;  %v1932_v60 = vrot.slane %v8883_v39, 6 }
 0x274   :  { %v1612_v61 = vrot.slane %v1473_v53, 1  ;;  %7101 = vrot.lane.b32.xlu0 %v7100_v50, %s7488_s16  ;;  %v1475_v0 = vpop.f32.mrb[35].mxu1 }
 0x275   :  { %v8894_v47 = vmul.f32 0.5, %v1691_v42  ;;  %v1866_v54 = vsel %vm309_vm3, %v1863_v31, %v1865_v8  ;;  %v1800_v5 = vsel %vm175_vm2, %v1797_v9, %v1799_v4  ;;  %v1933_v32 = vsel %vm1904_vm8, %v1930_v48, %v1932_v60 }
 0x276   :  { %v1613_v43 = vsel %vm108_vm0, %v1610_v10, %v1612_v61  ;;  %v7110_v18 = vpack.i.bf16 %v1866_v54, %v1864_v57  ;;  %v7105_v30 = vpack.i.bf16 %v1800_v5, %v1798_v14  ;;  %v7115_v11 = vpack.i.bf16 %v1933_v32, %v1931_v24 }
 0x277   :  { %v1692_v16 = vadd.f32 %v1613_v43, %v1468_v3  ;;  %v1478_v19 = vpop.f32.mrb[36].mxu1  ;;  %v1867_v25 = vrot.slane %v8894_v47, 4  ;;  %v1801_v17 = vrot.slane %v8894_v47, 2  ;;  %v1934_v40 = vrot.slane %v8894_v47, 6 }
 0x278   :  { %v1614_v38 = vrot.slane %v1478_v19, 1  ;;  %7111 = vrot.lane.b32.xlu0 %v7110_v18, %s7486_s15  ;;  %7106 = vrot.lane.b32.xlu1 %v7105_v30, %s7487_s2  ;;  %v1480_v23 = vpop.f32.mrb[37].mxu1 }
 0x279   :  { %v8904_v35 = vmul.f32 0.5, %v1692_v16  ;;  %v1868_v31 = vsel %vm309_vm3, %v1865_v8, %v1867_v25  ;;  %v1802_v34 = vsel %vm175_vm2, %v1799_v4, %v1801_v17  ;;  %v1935_v4 = vsel %vm1904_vm8, %v1932_v60, %v1934_v40 }
 0x27a   :  { %v1615_v36 = vsel %vm108_vm0, %v1612_v61, %v1614_v38 }
 0x27b   :  { %v1693_v56 = vadd.f32 %v1615_v36, %v1473_v53  ;;  %v1483_v29 = vpop.f32.mrb[38].mxu1  ;;  %v1869_v2 = vrot.slane %v8904_v35, 4  ;;  %v1803_v3 = vrot.slane %v8904_v35, 2  ;;  %v1936_v52 = vrot.slane %v8904_v35, 6 }
 0x27c   :  { %v1616_v10 = vrot.slane %v1483_v29, 1  ;;  %7116 = vrot.lane.b32.xlu1 %v7115_v11, %s7488_s16  ;;  %v1485_v63 = vpop.f32.mrb[39].mxu1 }
 0x27d   :  { %v8915_v37 = vmul.f32 0.5, %v1693_v56  ;;  %v1870_v9 = vsel %vm309_vm3, %v1867_v25, %v1869_v2  ;;  %v1804_v50 = vsel %vm175_vm2, %v1801_v17, %v1803_v3  ;;  %v1937_v48 = vsel %vm1904_vm8, %v1934_v40, %v1936_v52 }
 0x27e   :  { %v1617_v42 = vsel %vm108_vm0, %v1614_v38, %v1616_v10  ;;  %v7125_v53 = vpack.i.bf16 %v1870_v9, %v1868_v31  ;;  %v7120_v61 = vpack.i.bf16 %v1804_v50, %v1802_v34  ;;  %v7130_v30 = vpack.i.bf16 %v1937_v48, %v1935_v4 }
 0x27f   :  { %v1694_v0 = vadd.f32 %v1617_v42, %v1478_v19  ;;  %v1488_v57 = vpop.f32.mrb[40].mxu1  ;;  %v1871_v14 = vrot.slane %v8915_v37, 4  ;;  %v1805_v43 = vrot.slane %v8915_v37, 2  ;;  %v1938_v60 = vrot.slane %v8915_v37, 6 }
 0x280   :  { %v1618_v54 = vrot.slane %v1488_v57, 1  ;;  %7126 = vrot.lane.b32.xlu1 %v7125_v53, %s7486_s15  ;;  %7121 = vrot.lane.b32.xlu0 %v7120_v61, %s7487_s2  ;;  %v1490_v8 = vpop.f32.mrb[41].mxu1 }
 0x281   :  { %v8925_v5 = vmul.f32 0.5, %v1694_v0  ;;  %v1872_v17 = vsel %vm309_vm3, %v1869_v2, %v1871_v14  ;;  %v1806_v56 = vsel %vm175_vm2, %v1803_v3, %v1805_v43  ;;  %v1939_v3 = vsel %vm1904_vm8, %v1936_v52, %v1938_v60 }
 0x282   :  { %v1619_v18 = vsel %vm108_vm0, %v1616_v10, %v1618_v54 }
 0x283   :  { %v1695_v16 = vadd.f32 %v1619_v18, %v1483_v29  ;;  %v1493_v19 = vpop.f32.mrb[42].mxu1  ;;  %v1873_v32 = vrot.slane %v8925_v5, 4  ;;  %v1807_v38 = vrot.slane %v8925_v5, 2  ;;  %v1940_v23 = vrot.slane %v8925_v5, 6 }
 0x284   :  { %v1620_v25 = vrot.slane %v1493_v19, 1  ;;  %7131 = vrot.lane.b32.xlu0 %v7130_v30, %s7488_s16  ;;  %v1495_v24 = vpop.f32.mrb[43].mxu1 }
 0x285   :  { %v8936_v36 = vmul.f32 0.5, %v1695_v16  ;;  %v1874_v11 = vsel %vm309_vm3, %v1871_v14, %v1873_v32  ;;  %v1808_v29 = vsel %vm175_vm2, %v1805_v43, %v1807_v38  ;;  %v1941_v34 = vsel %vm1904_vm8, %v1938_v60, %v1940_v23 }
 0x286   :  { %v1621_v10 = vsel %vm108_vm0, %v1618_v54, %v1620_v25  ;;  %v7140_v63 = vpack.i.bf16 %v1874_v11, %v1872_v17  ;;  %v7135_v31 = vpack.i.bf16 %v1808_v29, %v1806_v56 }
 0x287   :  { %v1696_v40 = vadd.f32 %v1621_v10, %v1488_v57  ;;  %v1498_v9 = vpop.f32.mrb[44].mxu1  ;;  %v1875_v42 = vrot.slane %v8936_v36, 4  ;;  %v1809_v61 = vrot.slane %v8936_v36, 2  ;;  %v7145_v57 = vpack.i.bf16 %v1941_v34, %v1939_v3 }
 0x288   :  { %v1622_v50 = vrot.slane %v1498_v9, 1  ;;  %7141 = vrot.lane.b32.xlu0 %v7140_v63, %s7486_s15  ;;  %7136 = vrot.lane.b32.xlu1 %v7135_v31, %s7487_s2  ;;  %v1500_v2 = vpop.f32.mrb[45].mxu1  ;;  %v1942_v52 = vrot.slane %v8936_v36, 6 }
 0x289   :  { %v8946_v53 = vmul.f32 0.5, %v1696_v40  ;;  %v1876_v30 = vsel %vm309_vm3, %v1873_v32, %v1875_v42 }
 0x28a   :  { %v1623_v0 = vsel %vm108_vm0, %v1620_v25, %v1622_v50 }
 0x28b   :  { %v1697_v48 = vadd.f32 %v1623_v0, %v1493_v19  ;;  %v1503_v54 = vpop.f32.mrb[46].mxu1  ;;  %v1877_v8 = vrot.slane %v8946_v53, 4  ;;  %v1811_v14 = vrot.slane %v8946_v53, 2  ;;  %v1944_v4 = vrot.slane %v8946_v53, 6 }
 0x28c   :  { %v1624_v43 = vrot.slane %v1503_v54, 1  ;;  %7146 = vrot.lane.b32.xlu1 %v7145_v57, %s7488_s16  ;;  %v1505_v18 = vpop.f32.mrb[47].mxu1  ;;  %v1810_v19 = vsel %vm175_vm2, %v1807_v38, %v1809_v61  ;;  %v1943_v38 = vsel %vm1904_vm8, %v1940_v23, %v1942_v52 }
 0x28d   :  { %v8957_v16 = vmul.f32 0.5, %v1697_v48  ;;  %v1878_v25 = vsel %vm309_vm3, %v1875_v42, %v1877_v8  ;;  %v1812_v24 = vsel %vm175_vm2, %v1809_v61, %v1811_v14  ;;  %v1945_v10 = vsel %vm1904_vm8, %v1942_v52, %v1944_v4 }
 0x28e   :  { %v1625_v17 = vsel %vm108_vm0, %v1622_v50, %v1624_v43  ;;  %v7155_v60 = vpack.i.bf16 %v1878_v25, %v1876_v30  ;;  %v7150_v11 = vpack.i.bf16 %v1812_v24, %v1810_v19 }
 0x28f   :  { %v1698_v56 = vadd.f32 %v1625_v17, %v1498_v9  ;;  %v1508_v29 = vpop.f32.mrb[48].mxu1  ;;  %v1879_v31 = vrot.slane %v8957_v16, 4  ;;  %v1813_v34 = vrot.slane %v8957_v16, 2  ;;  %v7160_v9 = vpack.i.bf16 %v1945_v10, %v1943_v38 }
 0x290   :  { %v1626_v63 = vrot.slane %v1508_v29, 1  ;;  %7156 = vrot.lane.b32.xlu1 %v7155_v60, %s7486_s15  ;;  %7151 = vrot.lane.b32.xlu0 %v7150_v11, %s7487_s2  ;;  %v1510_v32 = vpop.f32.mrb[49].mxu1  ;;  %v1946_v23 = vrot.slane %v8957_v16, 6 }
 0x291   :  { %v8967_v40 = vmul.f32 0.5, %v1698_v56  ;;  %v1880_v18 = vsel %vm309_vm3, %v1877_v8, %v1879_v31 }
 0x292   :  { %v1627_v50 = vsel %vm108_vm0, %v1624_v43, %v1626_v63 }
 0x293   :  { %v1699_v2 = vadd.f32 %v1627_v50, %v1503_v54  ;;  %v1513_v42 = vpop.f32.mrb[50].mxu1  ;;  %v1881_v3 = vrot.slane %v8967_v40, 4  ;;  %v1815_v61 = vrot.slane %v8967_v40, 2  ;;  %v1948_v0 = vrot.slane %v8967_v40, 6 }
 0x294   :  { %v1628_v57 = vrot.slane %v1513_v42, 1  ;;  %7161 = vrot.lane.b32.xlu0 %v7160_v9, %s7488_s16  ;;  %v1515_v48 = vpop.f32.mrb[51].mxu1  ;;  %v1814_v54 = vsel %vm175_vm2, %v1811_v14, %v1813_v34  ;;  %v1947_v14 = vsel %vm1904_vm8, %v1944_v4, %v1946_v23 }
 0x295   :  { %v8978_v30 = vmul.f32 0.5, %v1699_v2  ;;  %v1882_v43 = vsel %vm309_vm3, %v1879_v31, %v1881_v3  ;;  %v1816_v52 = vsel %vm175_vm2, %v1813_v34, %v1815_v61  ;;  %v1949_v11 = vsel %vm1904_vm8, %v1946_v23, %v1948_v0 }
 0x296   :  { %v1629_v25 = vsel %vm108_vm0, %v1626_v63, %v1628_v57  ;;  %v7170_v19 = vpack.i.bf16 %v1882_v43, %v1880_v18  ;;  %v7165_v24 = vpack.i.bf16 %v1816_v52, %v1814_v54 }
 0x297   :  { %v1700_v17 = vadd.f32 %v1629_v25, %v1508_v29  ;;  %v1518_v60 = vpop.f32.mrb[52].mxu1  ;;  %v1883_v10 = vrot.slane %v8978_v30, 4  ;;  %v1817_v63 = vrot.slane %v8978_v30, 2  ;;  %v7175_v29 = vpack.i.bf16 %v1949_v11, %v1947_v14 }
 0x298   :  { %v1630_v56 = vrot.slane %v1518_v60, 1  ;;  %7171 = vrot.lane.b32.xlu0 %v7170_v19, %s7486_s15  ;;  %7166 = vrot.lane.b32.xlu1 %v7165_v24, %s7487_s2  ;;  %v1520_v8 = vpop.f32.mrb[53].mxu1  ;;  %v1950_v4 = vrot.slane %v8978_v30, 6 }
 0x299   :  { %v8988_v32 = vmul.f32 0.5, %v1700_v17  ;;  %v1884_v43 = vsel %vm309_vm3, %v1881_v3, %v1883_v10 }
 0x29a   :  { %v1631_v31 = vsel %vm108_vm0, %v1628_v57, %v1630_v56 }
 0x29b   :  { %v1701_v38 = vadd.f32 %v1631_v31, %v1513_v42  ;;  %v1523_v34 = vpop.f32.mrb[54].mxu1  ;;  %v1885_v50 = vrot.slane %v8988_v32, 4  ;;  %v1819_v9 = vrot.slane %v8988_v32, 2  ;;  %v1952_v2 = vrot.slane %v8988_v32, 6 }
 0x29c   :  { %v1632_v48 = vrot.slane %v1523_v34, 1  ;;  %7176 = vrot.lane.b32.xlu1 %v7175_v29, %s7488_s16  ;;  %v1525_v18 = vpop.f32.mrb[55].mxu1  ;;  %v1818_v42 = vsel %vm175_vm2, %v1815_v61, %v1817_v63  ;;  %v1951_v61 = vsel %vm1904_vm8, %v1948_v0, %v1950_v4 }
 0x29d   :  { %v8999_v23 = vmul.f32 0.5, %v1701_v38  ;;  %v1886_v57 = vsel %vm309_vm3, %v1883_v10, %v1885_v50  ;;  %v1820_v54 = vsel %vm175_vm2, %v1817_v63, %v1819_v9  ;;  %v1953_v11 = vsel %vm1904_vm8, %v1950_v4, %v1952_v2 }
 0x29e   :  { %v1633_v52 = vsel %vm108_vm0, %v1630_v56, %v1632_v48  ;;  %v7185_v25 = vpack.i.bf16 %v1886_v57, %v1884_v43  ;;  %v7180_v19 = vpack.i.bf16 %v1820_v54, %v1818_v42 }
 0x29f   :  { %v1702_v24 = vadd.f32 %v1633_v52, %v1518_v60  ;;  %v1528_v17 = vpop.f32.mrb[56].mxu1  ;;  %v1887_v10 = vrot.slane %v8999_v23, 4  ;;  %v1821_v56 = vrot.slane %v8999_v23, 2  ;;  %v7190_v60 = vpack.i.bf16 %v1953_v11, %v1951_v61 }
 0x2a0   :  { %v1634_v8 = vrot.slane %v1528_v17, 1  ;;  %7186 = vrot.lane.b32.xlu1 %v7185_v25, %s7486_s15  ;;  %7181 = vrot.lane.b32.xlu0 %v7180_v19, %s7487_s2  ;;  %v1530_v3 = vpop.f32.mrb[57].mxu1  ;;  %v1954_v0 = vrot.slane %v8999_v23, 6 }
 0x2a1   :  { %v9009_v14 = vmul.f32 0.5, %v1702_v24  ;;  %v1888_v54 = vsel %vm309_vm3, %v1885_v50, %v1887_v10 }
 0x2a2   :  { %v1635_v63 = vsel %vm108_vm0, %v1632_v48, %v1634_v8 }
 0x2a3   :  { %v1703_v31 = vadd.f32 %v1635_v63, %v1523_v34  ;;  %v1533_v29 = vpop.f32.mrb[58].mxu1  ;;  %v1889_v38 = vrot.slane %v9009_v14, 4  ;;  %v1823_v18 = vrot.slane %v9009_v14, 2  ;;  %v1956_v43 = vrot.slane %v9009_v14, 6 }
 0x2a4   :  { %v1636_v57 = vrot.slane %v1533_v29, 1  ;;  %7191 = vrot.lane.b32.xlu0 %v7190_v60, %s7488_s16  ;;  %v1535_v42 = vpop.f32.mrb[59].mxu1  ;;  %v1822_v34 = vsel %vm175_vm2, %v1819_v9, %v1821_v56  ;;  %v1955_v9 = vsel %vm1904_vm8, %v1952_v2, %v1954_v0 }
 0x2a5   :  { %v9020_v4 = vmul.f32 0.5, %v1703_v31  ;;  %v1890_v48 = vsel %vm309_vm3, %v1887_v10, %v1889_v38  ;;  %v1824_v52 = vsel %vm175_vm2, %v1821_v56, %v1823_v18  ;;  %v1957_v61 = vsel %vm1904_vm8, %v1954_v0, %v1956_v43 }
 0x2a6   :  { %v1637_v25 = vsel %vm108_vm0, %v1634_v8, %v1636_v57  ;;  %v7200_v19 = vpack.i.bf16 %v1890_v48, %v1888_v54  ;;  %v7195_v24 = vpack.i.bf16 %v1824_v52, %v1822_v34 }
 0x2a7   :  { %v1704_v11 = vadd.f32 %v1637_v25, %v1528_v17  ;;  %v1538_v3 = vpop.f32.mrb[60].mxu1  ;;  %v1891_v10 = vrot.slane %v9020_v4, 4  ;;  %v1825_v8 = vrot.slane %v9020_v4, 2  ;;  %v7205_v17 = vpack.i.bf16 %v1957_v61, %v1955_v9 }
 0x2a8   :  { %v1638_v63 = vrot.slane %v1538_v3, 1  ;;  %7201 = vrot.lane.b32.xlu0 %v7200_v19, %s7486_s15  ;;  %7196 = vrot.lane.b32.xlu1 %v7195_v24, %s7487_s2  ;;  %v1540_v50 = vpop.f32.mrb[61].mxu1  ;;  %v1958_v2 = vrot.slane %v9020_v4, 6 }
 0x2a9   :  { %v9030_v60 = vmul.f32 0.5, %v1704_v11  ;;  %v1892_v19 = vsel %vm309_vm3, %v1889_v38, %v1891_v10 }
 0x2aa   :  { %v1639_v56 = vsel %vm108_vm0, %v1636_v57, %v1638_v63 }
 0x2ab   :  { %v1705_v31 = vadd.f32 %v1639_v56, %v1533_v29  ;;  %v1543_v42 = vpop.f32.mrb[62].mxu1  ;;  %v1893_v54 = vrot.slane %v9030_v60, 4  ;;  %v1827_v48 = vrot.slane %v9030_v60, 2  ;;  %v1960_v34 = vrot.slane %v9030_v60, 6 }
 0x2ac   :  { %v1640_v52 = vrot.slane %v1543_v42, 1  ;;  %7206 = vrot.lane.b32.xlu1 %v7205_v17, %s7488_s16  ;;  %v1545_v25 = vpop.f32.mrb[63].mxu1  ;;  %v1826_v29 = vsel %vm175_vm2, %v1823_v18, %v1825_v8  ;;  %v1959_v18 = vsel %vm1904_vm8, %v1956_v43, %v1958_v2 }
 0x2ad   :  { %v9041_v0 = vmul.f32 0.5, %v1705_v31  ;;  %v1894_v57 = vsel %vm309_vm3, %v1891_v10, %v1893_v54  ;;  %v1828_v24 = vsel %vm175_vm2, %v1825_v8, %v1827_v48  ;;  %v1961_v17 = vsel %vm1904_vm8, %v1958_v2, %v1960_v34 }
 0x2ae   :  { %v1641_v11 = vsel %vm108_vm0, %v1638_v63, %v1640_v52  ;;  %v1675_v61 = vsel %vm108_vm0, %v1640_v52, %v1579_v28  ;;  %v7215_v50 = vpack.i.bf16 %v1894_v57, %v1892_v19  ;;  %v7210_v9 = vpack.i.bf16 %v1828_v24, %v1826_v29 }
 0x2af   :  { %v1706_v56 = vadd.f32 %v1641_v11, %v1538_v3  ;;  %v1707_v38 = vadd.f32 %v1675_v61, %v1543_v42  ;;  %v1895_v21 = vrot.slane %v9041_v0, 4  ;;  %v1829_v28 = vrot.slane %v9041_v0, 2 }
 0x2b0   :  { %7216 = vrot.lane.b32.xlu1 %v7215_v50, %s7486_s15  ;;  %7211 = vrot.lane.b32.xlu0 %v7210_v9, %s7487_s2  ;;  %v7220_v63 = vpack.i.bf16 %v1961_v17, %v1959_v18  ;;  %v1962_v43 = vrot.slane %v9041_v0, 6  ;;  %vm5724_vm0 = vcmask 80896  }
 0x2b1   :  { %v9054_v10 = vmul.f32 0.5, %v1706_v56  ;;  %v9056_v8 = vmul.f32 0.5, %v1707_v38  ;;  %v1896_v25 = vsel %vm309_vm3, %v1893_v54, %v1895_v21  ;;  %v1830_v2 = vsel %vm175_vm2, %v1827_v48, %v1829_v28 }
 0x2b2   :  { %v1963_v54 = vsel %vm1904_vm8, %v1960_v34, %v1962_v43  ;;  %v2555_v34 = vld [vmem:[%s11104_s4 + $0x210] sm:$0xff] }
 0x2b3   :  { %v1897_v3 = vrot.slane %v9054_v10, 4  ;;  %v1831_v31 = vrot.slane %v9054_v10, 2  ;;  %v1833_v42 = vrot.slane %v9056_v8, 2  ;;  %v1964_v52 = vrot.slane %v9054_v10, 6 }
 0x2b4   :  { %7221 = vrot.lane.b32.xlu0 %v7220_v63, %s7488_s16  ;;  %v1966_v17 = vrot.slane %v9056_v8, 6  ;;  %v1899_v18 = vrot.slane %v9056_v8, 4 }
 0x2b5   :  { %v1898_v19 = vsel %vm309_vm3, %v1895_v21, %v1897_v3  ;;  %v1832_v57 = vsel %vm175_vm2, %v1829_v28, %v1831_v31  ;;  %v1834_v11 = vsel %vm175_vm2, %v1831_v31, %v1833_v42  ;;  %v1837_v61 = vsel %vm175_vm2, %v1833_v42, %v1772_v20  ;;  %v2553_v20 = vld [vmem:[%s11104_s4 + $0x200] sm:$0xff] }
 0x2b6   :  { %v7230_v29 = vpack.i.bf16 %v1898_v19, %v1896_v25  ;;  %v7225_v24 = vpack.i.bf16 %v1832_v57, %v1830_v2  ;;  %v1965_v50 = vsel %vm1904_vm8, %v1962_v43, %v1964_v52  ;;  %v7240_v56 = vpack.i.bf16 %v1837_v61, %v1834_v11  ;;  %v2558_v57 = vld [vmem:[%s11104_s4 + $0x228] sm:$0xff] }
 0x2b7   :  { %v7235_v38 = vpack.i.bf16 %v1965_v50, %v1963_v54  ;;  %v1967_v19 = vsel %vm1904_vm8, %v1964_v52, %v1966_v17  ;;  %v1900_v2 = vsel %vm309_vm3, %v1897_v3, %v1899_v18  ;;  %v6365_v11 = vpack.c.bf16 %v2555_v34, %v2553_v20  ;;  %v2557_v52 = vld [vmem:[%s11104_s4 + $0x220] sm:$0xff]  ;;  %v2559_v3 = vld [vmem:[%s11104_s4 + $0x230] sm:$0xff]  ;;  %v2562_v20 = vld [vmem:[%s11104_s4 + $0x248] sm:$0xff] }
 0x2b8   :  { %7231 = vrot.lane.b32.xlu0 %v7230_v29, %s7486_s15  ;;  %7226 = vrot.lane.b32.xlu1 %v7225_v24, %s7487_s2  ;;  %v2560_v29 = vld [vmem:[%s11104_s4 + $0x238] sm:$0xff] }
 0x2b9   :  { %v2564_v34 = vld [vmem:[%s11104_s4 + $0x258] sm:$0xff] }
 0x2ba   :  { %v7022_v9 = vpop.permute.xlu0 %7021  ;;  %v7017_v48 = vpop.permute.xlu1 %7016 }
 0x2bb   :  { %v7023_v21 = vunpack.i.l.bf16 %v7022_v9  ;;  %v7018_v28 = vunpack.i.l.bf16 %v7017_v48  ;;  %v7024_v63 = vunpack.i.h.bf16 %v7022_v9  ;;  %v7019_v31 = vunpack.i.h.bf16 %v7017_v48 }
 0x2bc   :  { %7241 = vrot.lane.b32.xlu0 %v7240_v56, %s7487_s2  ;;  %7236 = vrot.lane.b32.xlu1 %v7235_v38, %s7488_s16  ;;  %v6367_v56 = vpack.c.bf16 %v2560_v29, %v2558_v57  ;;  %v2561_v57 = vld [vmem:[%s11104_s4 + $0x240] sm:$0xff]  ;;  %v2563_v29 = vld [vmem:[%s11104_s4 + $0x250] sm:$0xff] }
 0x2bd   :  { %v2391_v24 = vsel %vm1225_vm7, %v7018_v28, %v7023_v21  ;;  %v2359_v9 = vsel %vm2358_vm10, %v8740_v62, %v7018_v28  ;;  %v2392_v48 = vsel %vm1225_vm7, %v7019_v31, %v7024_v63  ;;  %v6369_v21 = vpack.c.bf16 %v2559_v3, %v2557_v52  ;;  %v2566_v3 = vld [vmem:[%s11104_s4 + $0x268] sm:$0xff] }
 0x2be   :  { %v9088_v42 = vpop.permute.xlu1 %7026  ;;  %v1970_v63 = vsel %vm1904_vm8, %v1966_v17, %v1905_v45  ;;  %v6371_v17 = vpack.c.bf16 %v2564_v34, %v2562_v20 }
 0x2bf   :  { %v7029_v43 = vunpack.i.h.bf16 %v9088_v42  ;;  %v7028_v25 = vunpack.i.l.bf16 %v9088_v42 }
 0x2c0   :  { %2226 = vrot.lane.b32.xlu0 %v1967_v19, %s7488_s16  ;;  %2129 = vrot.lane.b32.xlu1 %v1900_v2, %s7486_s15  ;;  %v1903_v2 = vsel %vm309_vm3, %v1899_v18, %v1838_v51  ;;  %v2360_v51 = vsel %vm2358_vm10, %v8738_v55, %v7019_v31 }
 0x2c1   :  { %v2424_v61 = vsel %vm2423_vm9, %v2391_v24, %v7028_v25  ;;  %v2425_v38 = vsel %vm2423_vm9, %v2392_v48, %v7029_v43  ;;  %v2567_v48 = vld [vmem:[%s11104_s4 + $0x270] sm:$0xff] }
 0x2c2   :  { %2742 = vmatprep.mubr.f32.mxu0 %v2424_v61  ;;  %v7037_v50 = vpop.permute.xlu1 %7036  ;;  %v9112_v54 = vpop.permute.xlu0 %7031  ;;  %v2568_v61 = vld [vmem:[%s11104_s4 + $0x278] sm:$0xff] }
 0x2c3   :  { %2743 = vmatmul.mubr.f32.vlgmr.msra.gmra.mrb[64].mxu0 %v2359_v9  ;;  %v7038_v19 = vunpack.i.l.bf16 %v7037_v50  ;;  %v7033_v28 = vunpack.i.l.bf16 %v9112_v54  ;;  %v7039_v24 = vunpack.i.h.bf16 %v7037_v50  ;;  %v2565_v9 = vld [vmem:[%s11104_s4 + $0x260] sm:$0xff]  ;;  %v6375_v20 = vpack.c.bf16 %v2568_v61, %v2566_v3 }
 0x2c4   :  { %6366 = vmatpush1.bf16.msra.mxu0 %v6365_v11  ;;  %2748 = vmatprep.mubr.f32.mxu0 %v2425_v38  ;;  %v7034_v11 = vunpack.i.h.bf16 %v9112_v54  ;;  %v6373_v54 = vpack.c.bf16 %v2563_v29, %v2561_v57  ;;  %v2571_v29 = vld [vmem:[%s11104_s4 + $0x290] sm:$0xff] }
 0x2c5   :  { %2228 = vrot.lane.b32.xlu0 %v1970_v63, %s7488_s16  ;;  %2131 = vrot.lane.b32.xlu1 %v1903_v2, %s7486_s15  ;;  %v2393_v50 = vsel %vm1225_vm7, %v7033_v28, %v7038_v19  ;;  %v2570_v19 = vld [vmem:[%s11104_s4 + $0x288] sm:$0xff]  ;;  %v2572_v63 = vld [vmem:[%s11104_s4 + $0x298] sm:$0xff] }
 0x2c6   :  { %v9142_v45 = vpop.permute.xlu0 %7041  ;;  %6368 = vmatprep.subr.bf16.mxu0 %v6367_v56  ;;  %v2362_v3 = vsel %vm2358_vm10, %v8763_v49, %v7034_v11  ;;  %v6379_v61 = vpack.c.bf16 %v2572_v63, %v2570_v19 }
 0x2c7   :  { %v7044_v18 = vunpack.i.h.bf16 %v9142_v45  ;;  %v7043_v52 = vunpack.i.l.bf16 %v9142_v45  ;;  %2749 = vmatmul.mubr.f32.gmra.mrb[66].mxu0 %v2360_v51 }
 0x2c8   :  { %6370 = vmatpush1.bf16.msra.mxu0 %v6369_v21  ;;  %v2361_v21 = vsel %vm2358_vm10, %v8744_v12, %v7033_v28  ;;  %v2569_v28 = vld [vmem:[%s11104_s4 + $0x280] sm:$0xff] }
 0x2c9   :  { %2264 = vrot.lane.b32.xlu0 %v8744_v12, %s7489_s1  ;;  %2262 = vrot.lane.b32.xlu1 %v8738_v55, %s7489_s1  ;;  %v2426_v31 = vsel %vm2423_vm9, %v2393_v50, %v7043_v52  ;;  %v2394_v55 = vsel %vm1225_vm7, %v7034_v11, %v7039_v24  ;;  %v6377_v12 = vpack.c.bf16 %v2567_v48, %v2565_v9  ;;  %v2576_v9 = vld [vmem:[%s11104_s4 + $0x2b8] sm:$0xff]  ;;  %v2573_v11 = vld [vmem:[%s11104_s4 + $0x2a0] sm:$0xff] }
 0x2ca   :  { %2754 = vmatprep.mubr.f32.mxu0 %v2426_v31  ;;  %v7052_v56 = vpop.permute.xlu0 %7051  ;;  %v7047_v38 = vpop.permute.xlu1 %7046  ;;  %6372 = vmatprep.subr.bf16.mxu0 %v6371_v17  ;;  %v2427_v34 = vsel %vm2423_vm9, %v2394_v55, %v7044_v18  ;;  %v2574_v31 = vld [vmem:[%s11104_s4 + $0x2a8] sm:$0xff] }
 0x2cb   :  { %2755 = vmatmul.mubr.f32.gmra.mrb[68].mxu0 %v2361_v21  ;;  %v7053_v2 = vunpack.i.l.bf16 %v7052_v56  ;;  %v7048_v57 = vunpack.i.l.bf16 %v7047_v38  ;;  %v7054_v24 = vunpack.i.h.bf16 %v7052_v56  ;;  %v7049_v51 = vunpack.i.h.bf16 %v7047_v38  ;;  %v2575_v38 = vld [vmem:[%s11104_s4 + $0x2b0] sm:$0xff] }
 0x2cc   :  { %2760 = vmatprep.mubr.f32.mxu0 %v2427_v34  ;;  %6374 = vmatpush1.bf16.msra.mxu0 %v6373_v54  ;;  %v6381_v56 = vpack.c.bf16 %v2571_v29, %v2569_v28  ;;  %v6383_v19 = vpack.c.bf16 %v2576_v9, %v2574_v31 }
 0x2cd   :  { %2268 = vrot.lane.b32.xlu0 %v8776_v46, %s7489_s1  ;;  %2266 = vrot.lane.b32.xlu1 %v8763_v49, %s7489_s1  ;;  %v2395_v48 = vsel %vm1225_vm7, %v7048_v57, %v7053_v2  ;;  %v2396_v34 = vsel %vm1225_vm7, %v7049_v51, %v7054_v24  ;;  %v2578_v2 = vld [vmem:[%s11104_s4 + $0x2c8] sm:$0xff]  ;;  %v2579_v24 = vld [vmem:[%s11104_s4 + $0x2d0] sm:$0xff]  ;;  %v2364_v9 = vsel %vm2358_vm10, %v8789_v59, %v7049_v51 }
 0x2ce   :  { %v9190_v17 = vpop.permute.xlu1 %7056  ;;  %6376 = vmatprep.subr.bf16.mxu0 %v6375_v20  ;;  %v2363_v20 = vsel %vm2358_vm10, %v8776_v46, %v7048_v57  ;;  %v6385_v46 = vpack.c.bf16 %v2575_v38, %v2573_v11  ;;  %v2577_v57 = vld [vmem:[%s11104_s4 + $0x2c0] sm:$0xff]  ;;  %v2582_v11 = vld [vmem:[%s11104_s4 + $0x2e8] sm:$0xff]  ;;  %v2584_v38 = vld [vmem:[%s11104_s4 + $0x2f8] sm:$0xff] }
 0x2cf   :  { %v7059_v50 = vunpack.i.h.bf16 %v9190_v17  ;;  %v7058_v54 = vunpack.i.l.bf16 %v9190_v17  ;;  %2761 = vmatmul.mubr.f32.gmra.mrb[70].mxu0 %v2362_v3  ;;  %v2581_v51 = vld [vmem:[%s11104_s4 + $0x2e0] sm:$0xff] }
 0x2d0   :  { %6378 = vmatpush1.bf16.msra.mxu0 %v6377_v12  ;;  %v2580_v12 = vld [vmem:[%s11104_s4 + $0x2d8] sm:$0xff] }
 0x2d1   :  { %2272 = vrot.lane.b32.xlu0 %v8799_v1, %s7489_s1  ;;  %2270 = vrot.lane.b32.xlu1 %v8789_v59, %s7489_s1  ;;  %v2428_v49 = vsel %vm2423_vm9, %v2395_v48, %v7058_v54  ;;  %v2429_v63 = vsel %vm2423_vm9, %v2396_v34, %v7059_v50  ;;  %v6387_v48 = vpack.c.bf16 %v2580_v12, %v2578_v2 }
 0x2d2   :  { %2766 = vmatprep.mubr.f32.mxu0 %v2428_v49  ;;  %v7067_v21 = vpop.permute.xlu1 %7066  ;;  %v7062_v55 = vpop.permute.xlu0 %7061  ;;  %6380 = vmatprep.subr.bf16.mxu0 %v6379_v61  ;;  %v6391_v12 = vpack.c.bf16 %v2584_v38, %v2582_v11 }
 0x2d3   :  { %2767 = vmatmul.mubr.f32.gmra.mrb[72].mxu0 %v2363_v20  ;;  %v7068_v28 = vunpack.i.l.bf16 %v7067_v21  ;;  %v7063_v29 = vunpack.i.l.bf16 %v7062_v55  ;;  %v7069_v3 = vunpack.i.h.bf16 %v7067_v21  ;;  %v7064_v61 = vunpack.i.h.bf16 %v7062_v55  ;;  %v2583_v20 = vld [vmem:[%s11104_s4 + $0x2f0] sm:$0xff] }
 0x2d4   :  { %2772 = vmatprep.mubr.f32.mxu0 %v2429_v63  ;;  %6382 = vmatpush1.bf16.msra.mxu0 %v6381_v56  ;;  %v6389_v55 = vpack.c.bf16 %v2579_v24, %v2577_v57  ;;  %v2588_v57 = vld [vmem:[%s11104_s4 + $0x318] sm:$0xff] }
 0x2d5   :  { %2276 = vrot.lane.b32.xlu0 %v8820_v7, %s7489_s1  ;;  %2274 = vrot.lane.b32.xlu1 %v8810_v41, %s7489_s1  ;;  %v2397_v21 = vsel %vm1225_vm7, %v7063_v29, %v7068_v28  ;;  %v2365_v63 = vsel %vm2358_vm10, %v8799_v1, %v7063_v29  ;;  %v2398_v2 = vsel %vm1225_vm7, %v7064_v61, %v7069_v3  ;;  %v2585_v29 = vld [vmem:[%s11104_s4 + $0x300] sm:$0xff]  ;;  %v2587_v3 = vld [vmem:[%s11104_s4 + $0x310] sm:$0xff] }
 0x2d6   :  { %v9238_v31 = vpop.permute.xlu0 %7071  ;;  %6384 = vmatprep.subr.bf16.mxu0 %v6383_v19  ;;  %v6393_v1 = vpack.c.bf16 %v2583_v20, %v2581_v51  ;;  %v2590_v20 = vld [vmem:[%s11104_s4 + $0x328] sm:$0xff] }
 0x2d7   :  { %v7074_v56 = vunpack.i.h.bf16 %v9238_v31  ;;  %v7073_v49 = vunpack.i.l.bf16 %v9238_v31  ;;  %2773 = vmatmul.mubr.f32.gmra.mrb[74].mxu0 %v2364_v9 }
 0x2d8   :  { %6386 = vmatpush1.bf16.msra.mxu0 %v6385_v46  ;;  %v2586_v46 = vld [vmem:[%s11104_s4 + $0x308] sm:$0xff] }
 0x2d9   :  { %2280 = vrot.lane.b32.xlu0 %v8841_v44, %s7489_s1  ;;  %2278 = vrot.lane.b32.xlu1 %v8831_v58, %s7489_s1  ;;  %v2430_v59 = vsel %vm2423_vm9, %v2397_v21, %v7073_v49  ;;  %v2431_v28 = vsel %vm2423_vm9, %v2398_v2, %v7074_v56  ;;  %v2366_v21 = vsel %vm2358_vm10, %v8810_v41, %v7064_v61  ;;  %v2589_v61 = vld [vmem:[%s11104_s4 + $0x320] sm:$0xff]  ;;  %v2591_v2 = vld [vmem:[%s11104_s4 + $0x330] sm:$0xff] }
 0x2da   :  { %2778 = vmatprep.mubr.f32.mxu0 %v2430_v59  ;;  %v7082_v34 = vpop.permute.xlu0 %7081  ;;  %v7077_v19 = vpop.permute.xlu1 %7076  ;;  %6388 = vmatprep.subr.bf16.mxu0 %v6387_v48 }
 0x2db   :  { %2779 = vmatmul.mubr.f32.gmra.mrb[76].mxu0 %v2365_v63  ;;  %v7083_v24 = vunpack.i.l.bf16 %v7082_v34  ;;  %v7078_v9 = vunpack.i.l.bf16 %v7077_v19  ;;  %v7084_v48 = vunpack.i.h.bf16 %v7082_v34  ;;  %v7079_v11 = vunpack.i.h.bf16 %v7077_v19  ;;  %v2592_v34 = vld [vmem:[%s11104_s4 + $0x338] sm:$0xff] }
 0x2dc   :  { %2784 = vmatprep.mubr.f32.mxu0 %v2431_v28  ;;  %6390 = vmatpush1.bf16.msra.mxu0 %v6389_v55  ;;  %v6395_v55 = vpack.c.bf16 %v2588_v57, %v2586_v46  ;;  %v6397_v63 = vpack.c.bf16 %v2587_v3, %v2585_v29 }
 0x2dd   :  { %2284 = vrot.lane.b32.xlu0 %v8862_v6, %s7489_s1  ;;  %2282 = vrot.lane.b32.xlu1 %v8852_v33, %s7489_s1  ;;  %v2399_v19 = vsel %vm1225_vm7, %v7078_v9, %v7083_v24  ;;  %v2367_v46 = vsel %vm2358_vm10, %v8820_v7, %v7078_v9  ;;  %v2400_v57 = vsel %vm1225_vm7, %v7079_v11, %v7084_v48 }
 0x2de   :  { %v9286_v38 = vpop.permute.xlu1 %7086  ;;  %6392 = vmatprep.subr.bf16.mxu0 %v6391_v12  ;;  %v6399_v24 = vpack.c.bf16 %v2592_v34, %v2590_v20 }
 0x2df   :  { %v7089_v59 = vunpack.i.h.bf16 %v9286_v38  ;;  %v7088_v51 = vunpack.i.l.bf16 %v9286_v38  ;;  %2785 = vmatmul.mubr.f32.gmra.mrb[78].mxu0 %v2366_v21  ;;  %v6401_v21 = vpack.c.bf16 %v2591_v2, %v2589_v61 }
 0x2e0   :  { %6394 = vmatpush1.bf16.msra.mxu0 %v6393_v1 }
 0x2e1   :  { %2288 = vrot.lane.b32.xlu0 %v8883_v39, %s7489_s1  ;;  %2286 = vrot.lane.b32.xlu1 %v8873_v26, %s7489_s1  ;;  %v2432_v41 = vsel %vm2423_vm9, %v2399_v19, %v7088_v51  ;;  %v2433_v1 = vsel %vm2423_vm9, %v2400_v57, %v7089_v59  ;;  %v2594_v19 = vld [vmem:[%s11104_s4 + $0x348] sm:$0xf] }
 0x2e2   :  { %2790 = vmatprep.mubr.f32.mxu0 %v2432_v41  ;;  %v7097_v12 = vpop.permute.xlu1 %7096  ;;  %v7092_v28 = vpop.permute.xlu0 %7091  ;;  %6396 = vmatprep.subr.bf16.mxu0 %v6395_v55  ;;  %v2368_v55 = vsel %vm2358_vm10, %v8831_v58, %v7079_v11  ;;  %v2593_v11 = vld [vmem:[%s11104_s4 + $0x340] sm:$0xf] }
 0x2e3   :  { %2791 = vmatmul.mubr.f32.gmra.mrb[80].mxu0 %v2367_v46  ;;  %v7098_v29 = vunpack.i.l.bf16 %v7097_v12  ;;  %v7093_v3 = vunpack.i.l.bf16 %v7092_v28  ;;  %v7099_v7 = vunpack.i.h.bf16 %v7097_v12  ;;  %v7094_v9 = vunpack.i.h.bf16 %v7092_v28 }
 0x2e4   :  { %2796 = vmatprep.mubr.f32.mxu0 %v2433_v1  ;;  %6398 = vmatpush1.bf16.msra.mxu0 %v6397_v63 }
 0x2e5   :  { %2292 = vrot.lane.b32.xlu0 %v8904_v35, %s7489_s1  ;;  %2290 = vrot.lane.b32.xlu1 %v8894_v47, %s7489_s1  ;;  %v2401_v63 = vsel %vm1225_vm7, %v7093_v3, %v7098_v29  ;;  %v2369_v2 = vsel %vm2358_vm10, %v8841_v44, %v7093_v3  ;;  %v2402_v12 = vsel %vm1225_vm7, %v7094_v9, %v7099_v7 }
 0x2e6   :  { %v9322_v48 = vpop.permute.xlu0 %7101  ;;  %6400 = vmatprep.subr.bf16.mxu0 %v6399_v24  ;;  %v2370_v29 = vsel %vm2358_vm10, %v8852_v33, %v7094_v9 }
 0x2e7   :  { %v7104_v20 = vunpack.i.h.bf16 %v9322_v48  ;;  %v7103_v34 = vunpack.i.l.bf16 %v9322_v48  ;;  %2797 = vmatmul.mubr.f32.gmra.mrb[82].mxu0 %v2368_v55 }
 0x2e8   :  { %6402 = vmatpush1.bf16.msra.mxu0 %v6401_v21 }
 0x2e9   :  { %2296 = vrot.lane.b32.xlu0 %v8925_v5, %s7489_s1  ;;  %2294 = vrot.lane.b32.xlu1 %v8915_v37, %s7489_s1  ;;  %v2434_v58 = vsel %vm2423_vm9, %v2401_v63, %v7103_v34  ;;  %v2435_v28 = vsel %vm2423_vm9, %v2402_v12, %v7104_v20 }
 0x2ea   :  { %2802 = vmatprep.mubr.f32.mxu0 %v2434_v58  ;;  %v7112_v41 = vpop.permute.xlu0 %7111  ;;  %v7107_v61 = vpop.permute.xlu1 %7106  ;;  %5825 = vmatprep.subr.msk.mxu0 %vm309_vm3, %v2594_v19 }
 0x2eb   :  { %2803 = vmatmul.mubr.f32.gmra.mrb[84].mxu0 %v2369_v2  ;;  %v7113_v46 = vunpack.i.l.bf16 %v7112_v41  ;;  %v7108_v57 = vunpack.i.l.bf16 %v7107_v61  ;;  %v7114_v44 = vunpack.i.h.bf16 %v7112_v41  ;;  %v7109_v24 = vunpack.i.h.bf16 %v7107_v61 }
 0x2ec   :  { %2808 = vmatprep.mubr.f32.mxu0 %v2435_v28  ;;  %5826 = vmatpush1.msk.msra.mxu0 %vm309_vm3, %v2593_v11 }
 0x2ed   :  { %2300 = vrot.lane.b32.xlu0 %v8946_v53, %s7489_s1  ;;  %2298 = vrot.lane.b32.xlu1 %v8936_v36, %s7489_s1  ;;  %v2403_v7 = vsel %vm1225_vm7, %v7108_v57, %v7113_v46  ;;  %v2371_v9 = vsel %vm2358_vm10, %v8862_v6, %v7108_v57  ;;  %v2404_v63 = vsel %vm1225_vm7, %v7109_v24, %v7114_v44 }
 0x2ee   :  { %v9354_v1 = vpop.permute.xlu1 %7116  ;;  %v2372_v6 = vsel %vm2358_vm10, %v8873_v26, %v7109_v24 }
 0x2ef   :  { %v7119_v3 = vunpack.i.h.bf16 %v9354_v1  ;;  %v7118_v21 = vunpack.i.l.bf16 %v9354_v1  ;;  %2809 = vmatmul.mubr.f32.gmra.mrb[86].mxu0 %v2370_v29 }
 0x2f1   :  { %2304 = vrot.lane.b32.xlu0 %v8967_v40, %s7489_s1  ;;  %2302 = vrot.lane.b32.xlu1 %v8957_v16, %s7489_s1  ;;  %v2436_v55 = vsel %vm2423_vm9, %v2403_v7, %v7118_v21  ;;  %v2437_v58 = vsel %vm2423_vm9, %v2404_v63, %v7119_v3 }
 0x2f2   :  { %2814 = vmatprep.mubr.f32.mxu0 %v2436_v55  ;;  %v7127_v19 = vpop.permute.xlu1 %7126  ;;  %v7122_v33 = vpop.permute.xlu0 %7121 }
 0x2f3   :  { %2815 = vmatmul.mubr.f32.gmra.mrb[88].mxu0 %v2371_v9  ;;  %v7128_v11 = vunpack.i.l.bf16 %v7127_v19  ;;  %v7123_v41 = vunpack.i.l.bf16 %v7122_v33  ;;  %v7129_v61 = vunpack.i.h.bf16 %v7127_v19  ;;  %v7124_v2 = vunpack.i.h.bf16 %v7122_v33 }
 0x2f4   :  { %2820 = vmatprep.mubr.f32.mxu0 %v2437_v58 }
 0x2f5   :  { %2308 = vrot.lane.b32.xlu0 %v8988_v32, %s7489_s1  ;;  %2306 = vrot.lane.b32.xlu1 %v8978_v30, %s7489_s1  ;;  %v2405_v57 = vsel %vm1225_vm7, %v7123_v41, %v7128_v11  ;;  %v2373_v24 = vsel %vm2358_vm10, %v8883_v39, %v7123_v41  ;;  %v2406_v7 = vsel %vm1225_vm7, %v7124_v2, %v7129_v61 }
 0x2f6   :  { %v9378_v12 = vpop.permute.xlu0 %7131  ;;  %v2374_v39 = vsel %vm2358_vm10, %v8894_v47, %v7124_v2 }
 0x2f7   :  { %v7134_v28 = vunpack.i.h.bf16 %v9378_v12  ;;  %v7133_v46 = vunpack.i.l.bf16 %v9378_v12  ;;  %2821 = vmatmul.mubr.f32.gmra.mrb[90].mxu0 %v2372_v6 }
 0x2f9   :  { %2312 = vrot.lane.b32.xlu0 %v9009_v14, %s7489_s1  ;;  %2310 = vrot.lane.b32.xlu1 %v8999_v23, %s7489_s1  ;;  %v2438_v44 = vsel %vm2423_vm9, %v2405_v57, %v7133_v46  ;;  %v2439_v55 = vsel %vm2423_vm9, %v2406_v7, %v7134_v28 }
 0x2fa   :  { %2826 = vmatprep.mubr.f32.mxu0 %v2438_v44  ;;  %v7142_v29 = vpop.permute.xlu0 %7141  ;;  %v7137_v26 = vpop.permute.xlu1 %7136 }
 0x2fb   :  { %2827 = vmatmul.mubr.f32.gmra.mrb[92].mxu0 %v2373_v24  ;;  %v7143_v19 = vunpack.i.l.bf16 %v7142_v29  ;;  %v7138_v33 = vunpack.i.l.bf16 %v7137_v26  ;;  %v7144_v9 = vunpack.i.h.bf16 %v7142_v29  ;;  %v7139_v63 = vunpack.i.h.bf16 %v7137_v26 }
 0x2fc   :  { %2832 = vmatprep.mubr.f32.mxu0 %v2439_v55 }
 0x2fd   :  { %2316 = vrot.lane.b32.xlu0 %v9030_v60, %s7489_s1  ;;  %2314 = vrot.lane.b32.xlu1 %v9020_v4, %s7489_s1  ;;  %v2407_v61 = vsel %vm1225_vm7, %v7138_v33, %v7143_v19  ;;  %v2375_v2 = vsel %vm2358_vm10, %v8904_v35, %v7138_v33  ;;  %v2408_v44 = vsel %vm1225_vm7, %v7139_v63, %v7144_v9 }
 0x2fe   :  { %v9402_v58 = vpop.permute.xlu1 %7146  ;;  %v2376_v35 = vsel %vm2358_vm10, %v8915_v37, %v7139_v63 }
 0x2ff   :  { %v7149_v11 = vunpack.i.h.bf16 %v9402_v58  ;;  %v7148_v41 = vunpack.i.l.bf16 %v9402_v58  ;;  %2833 = vmatmul.mubr.f32.gmra.mrb[94].mxu0 %v2374_v39 }
 0x301   :  { %2320 = vrot.lane.b32.xlu0 %v9054_v10, %s7489_s1  ;;  %2318 = vrot.lane.b32.xlu1 %v9041_v0, %s7489_s1  ;;  %v2440_v6 = vsel %vm2423_vm9, %v2407_v61, %v7148_v41  ;;  %v2441_v29 = vsel %vm2423_vm9, %v2408_v44, %v7149_v11 }
 0x302   :  { %2838 = vmatprep.mubr.f32.mxu0 %v2440_v6  ;;  %v7157_v57 = vpop.permute.xlu1 %7156  ;;  %v7152_v47 = vpop.permute.xlu0 %7151 }
 0x303   :  { %2839 = vmatmul.mubr.f32.gmra.mrb[96].mxu0 %v2375_v2  ;;  %v7158_v26 = vunpack.i.l.bf16 %v7157_v57  ;;  %v7153_v24 = vunpack.i.l.bf16 %v7152_v47  ;;  %v7159_v7 = vunpack.i.h.bf16 %v7157_v57  ;;  %v7154_v55 = vunpack.i.h.bf16 %v7152_v47 }
 0x304   :  { %2844 = vmatprep.mubr.f32.mxu0 %v2441_v29 }
 0x305   :  { %2324 = vrot.lane.b32.xlu0 %v8740_v62, %s7489_s1  ;;  %2322 = vrot.lane.b32.xlu1 %v9056_v8, %s7489_s1  ;;  %v2409_v39 = vsel %vm1225_vm7, %v7153_v24, %v7158_v26  ;;  %v2377_v57 = vsel %vm2358_vm10, %v8925_v5, %v7153_v24  ;;  %v2410_v47 = vsel %vm1225_vm7, %v7154_v55, %v7159_v7 }
 0x306   :  { %v9426_v19 = vpop.permute.xlu0 %7161 }
 0x307   :  { %v7164_v33 = vunpack.i.h.bf16 %v9426_v19  ;;  %v7163_v9 = vunpack.i.l.bf16 %v9426_v19  ;;  %2845 = vmatmul.mubr.f32.gmra.mrb[98].mxu0 %v2376_v35  ;;  %v2378_v35 = vsel %vm2358_vm10, %v8936_v36, %v7154_v55 }
 0x309   :  { %v2442_v62 = vsel %vm2423_vm9, %v2409_v39, %v7163_v9  ;;  %v2443_v37 = vsel %vm2423_vm9, %v2410_v47, %v7164_v33 }
 0x30a   :  { %2850 = vmatprep.mubr.f32.mxu0 %v2442_v62  ;;  %v7172_v61 = vpop.permute.xlu0 %7171  ;;  %v7167_v6 = vpop.permute.xlu1 %7166 }
 0x30b   :  { %2851 = vmatmul.mubr.f32.gmra.mrb[100].mxu0 %v2377_v57  ;;  %v7173_v63 = vunpack.i.l.bf16 %v7172_v61  ;;  %v7168_v2 = vunpack.i.l.bf16 %v7167_v6  ;;  %v7174_v44 = vunpack.i.h.bf16 %v7172_v61  ;;  %v7169_v29 = vunpack.i.h.bf16 %v7167_v6 }
 0x30c   :  { %2856 = vmatprep.mubr.f32.mxu0 %v2443_v37 }
 0x30d   :  { %v2411_v24 = vsel %vm1225_vm7, %v7168_v2, %v7173_v63  ;;  %v2379_v6 = vsel %vm2358_vm10, %v8946_v53, %v7168_v2  ;;  %v2412_v57 = vsel %vm1225_vm7, %v7169_v29, %v7174_v44 }
 0x30e   :  { %v9442_v26 = vpop.permute.xlu1 %7176 }
 0x30f   :  { %v7179_v39 = vunpack.i.h.bf16 %v9442_v26  ;;  %v7178_v5 = vunpack.i.l.bf16 %v9442_v26  ;;  %2857 = vmatmul.mubr.f32.gmra.mrb[102].mxu0 %v2378_v35 }
 0x311   :  { %v2444_v7 = vsel %vm2423_vm9, %v2411_v24, %v7178_v5  ;;  %v2445_v36 = vsel %vm2423_vm9, %v2412_v57, %v7179_v39  ;;  %v2380_v24 = vsel %vm2358_vm10, %v8957_v16, %v7169_v29 }
 0x312   :  { %2862 = vmatprep.mubr.f32.mxu0 %v2444_v7  ;;  %v7187_v62 = vpop.permute.xlu1 %7186  ;;  %v7182_v61 = vpop.permute.xlu0 %7181 }
 0x313   :  { %2863 = vmatmul.mubr.f32.gmra.mrb[104].mxu0 %v2379_v6  ;;  %v7188_v55 = vunpack.i.l.bf16 %v7187_v62  ;;  %v7183_v47 = vunpack.i.l.bf16 %v7182_v61  ;;  %v7189_v37 = vunpack.i.h.bf16 %v7187_v62  ;;  %v7184_v63 = vunpack.i.h.bf16 %v7182_v61 }
 0x314   :  { %2868 = vmatprep.mubr.f32.mxu0 %v2445_v36 }
 0x315   :  { %v2413_v2 = vsel %vm1225_vm7, %v7183_v47, %v7188_v55  ;;  %v2381_v61 = vsel %vm2358_vm10, %v8967_v40, %v7183_v47  ;;  %v2414_v57 = vsel %vm1225_vm7, %v7184_v63, %v7189_v37  ;;  %v3256_v55 = vld [vmem:[%s11105_s6] sm:$0xff]  ;;  %v2382_v37 = vsel %vm2358_vm10, %v8978_v30, %v7184_v63 }
 0x316   :  { %v9458_v35 = vpop.permute.xlu0 %7191 }
 0x317   :  { %v7194_v7 = vunpack.i.h.bf16 %v9458_v35  ;;  %v7193_v53 = vunpack.i.l.bf16 %v9458_v35  ;;  %2869 = vmatmul.mubr.f32.gmra.mrb[106].mxu0 %v2380_v24  ;;  %v3257_v24 = vld [vmem:[%s11105_s6 + $0x8] sm:$0xff] }
 0x319   :  { %v2446_v44 = vsel %vm2423_vm9, %v2413_v2, %v7193_v53  ;;  %v2447_v16 = vsel %vm2423_vm9, %v2414_v57, %v7194_v7 }
 0x31a   :  { %2874 = vmatprep.mubr.f32.mxu0 %v2446_v44  ;;  %v7202_v6 = vpop.permute.xlu0 %7201  ;;  %v7197_v62 = vpop.permute.xlu1 %7196  ;;  %v6404_v44 = vpack.c.bf16 %v3257_v24, %v3256_v55 }
 0x31b   :  { %2875 = vmatmul.mubr.f32.gmra.mrb[108].mxu0 %v2381_v61  ;;  %v7203_v29 = vunpack.i.l.bf16 %v7202_v6  ;;  %v7198_v36 = vunpack.i.l.bf16 %v7197_v62  ;;  %v7204_v2 = vunpack.i.h.bf16 %v7202_v6  ;;  %v7199_v40 = vunpack.i.h.bf16 %v7197_v62 }
 0x31c   :  { %2880 = vmatprep.mubr.f32.mxu0 %v2447_v16  ;;  %6405 = vmatpush1.bf16.msra.mxu1 %v6404_v44 }
 0x31d   :  { %v2415_v16 = vsel %vm1225_vm7, %v7198_v36, %v7203_v29  ;;  %6406 = vmatprep.subr.bf16.mxu1 %v7484_v15  ;;  %v2383_v30 = vsel %vm2358_vm10, %v8988_v32, %v7198_v36  ;;  %v2416_v63 = vsel %vm1225_vm7, %v7199_v40, %v7204_v2  ;;  %v3258_v2 = vld [vmem:[%s11105_s6 + $0x10] sm:$0xff] }
 0x31e   :  { %v9480_v47 = vpop.permute.xlu1 %7206 }
 0x31f   :  { %v11116_v61 = vunpack.i.h.bf16 %v9480_v47  ;;  %v7208_v57 = vunpack.i.l.bf16 %v9480_v47  ;;  %2881 = vmatmul.mubr.f32.gmra.mrb[110].mxu0 %v2382_v37 }
 0x321   :  { %v2448_v27 = vsel %vm2423_vm9, %v2415_v16, %v7208_v57  ;;  %v2449_v29 = vsel %vm2423_vm9, %v2416_v63, %v11116_v61 }
 0x322   :  { %2886 = vmatprep.mubr.f32.mxu0 %v2448_v27  ;;  %v7217_v6 = vpop.permute.xlu1 %7216  ;;  %v7212_v62 = vpop.permute.xlu0 %7211  ;;  %v2384_v27 = vsel %vm2358_vm10, %v8999_v23, %v7199_v40 }
 0x323   :  { %2887 = vmatmul.mubr.f32.gmra.mrb[112].mxu0 %v2383_v30  ;;  %v7218_v55 = vunpack.i.l.bf16 %v7217_v6  ;;  %v7213_v24 = vunpack.i.l.bf16 %v7212_v62  ;;  %v7219_v37 = vunpack.i.h.bf16 %v7217_v6  ;;  %v7214_v44 = vunpack.i.h.bf16 %v7212_v62  ;;  %v3259_v6 = vld [vmem:[%s11105_s6 + $0x18] sm:$0xff] }
 0x324   :  { %2892 = vmatprep.mubr.f32.mxu0 %v2449_v29  ;;  %v6407_v23 = vpack.c.bf16 %v3259_v6, %v3258_v2 }
 0x325   :  { %v2417_v36 = vsel %vm1225_vm7, %v7213_v24, %v7218_v55  ;;  %v2385_v63 = vsel %vm2358_vm10, %v9009_v14, %v7213_v24  ;;  %v2418_v29 = vsel %vm1225_vm7, %v7214_v44, %v7219_v37  ;;  %v2386_v14 = vsel %vm2358_vm10, %v9020_v4, %v7214_v44 }
 0x326   :  { %v9497_v16 = vpop.permute.xlu0 %7221  ;;  %6408 = vmatpush1.bf16.msra.mxu1 %v6407_v23 }
 0x327   :  { %v7224_v13 = vunpack.i.h.bf16 %v9497_v16  ;;  %v7223_v32 = vunpack.i.l.bf16 %v9497_v16  ;;  %2893 = vmatmul.mubr.f32.gmra.mrb[114].mxu0 %v2384_v27  ;;  %6409 = vmatprep.subr.bf16.mxu1 %v7484_v15 }
 0x329   :  { %v2450_v62 = vsel %vm2423_vm9, %v2417_v36, %v7223_v32  ;;  %v2451_v55 = vsel %vm2423_vm9, %v2418_v29, %v7224_v13 }
 0x32a   :  { %2898 = vmatprep.mubr.f32.mxu0 %v2450_v62  ;;  %v7232_v40 = vpop.permute.xlu0 %7231  ;;  %v7227_v30 = vpop.permute.xlu1 %7226 }
 0x32b   :  { %2899 = vmatmul.mubr.f32.gmra.mrb[116].mxu0 %v2385_v63  ;;  %v7233_v27 = vunpack.i.l.bf16 %v7232_v40  ;;  %v7228_v61 = vunpack.i.l.bf16 %v7227_v30  ;;  %v7234_v36 = vunpack.i.h.bf16 %v7232_v40  ;;  %v7229_v2 = vunpack.i.h.bf16 %v7227_v30 }
 0x32c   :  { %2904 = vmatprep.mubr.f32.mxu0 %v2451_v55 }
 0x32d   :  { %v2419_v23 = vsel %vm1225_vm7, %v7228_v61, %v7233_v27  ;;  %v2387_v55 = vsel %vm2358_vm10, %v9030_v60, %v7228_v61  ;;  %v2420_v4 = vsel %vm1225_vm7, %v7229_v2, %v7234_v36  ;;  %v3260_v60 = vld [vmem:[%s11105_s6 + $0x20] sm:$0xff]  ;;  %v3261_v61 = vld [vmem:[%s11105_s6 + $0x28] sm:$0xff] }
 0x32e   :  { %v7242_v6 = vpop.permute.xlu0 %7241  ;;  %v9520_v62 = vpop.permute.xlu1 %7236 }
 0x32f   :  { %v7239_v24 = vunpack.i.h.bf16 %v9520_v62  ;;  %v11117_v37 = vunpack.i.l.bf16 %v9520_v62  ;;  %2905 = vmatmul.mubr.f32.gmra.mrb[118].mxu0 %v2386_v14  ;;  %v7243_v29 = vunpack.i.l.bf16 %v7242_v6  ;;  %v7244_v14 = vunpack.i.h.bf16 %v7242_v6 }
 0x331   :  { %v2452_v63 = vsel %vm2423_vm9, %v2419_v23, %v11117_v37  ;;  %v2453_v44 = vsel %vm2423_vm9, %v2420_v4, %v7239_v24  ;;  %v2388_v23 = vsel %vm2358_vm10, %v9041_v0, %v7229_v2  ;;  %v2389_v0 = vsel %vm2358_vm10, %v9054_v10, %v7243_v29  ;;  %v3263_v10 = vld [vmem:[%s11105_s6 + $0x38] sm:$0xff] }
 0x332   :  { %v9530_v40 = vpop.permute.xlu0 %2226  ;;  %v2130_v30 = vpop.permute.xlu1 %2129  ;;  %2910 = vmatprep.mubr.f32.mxu0 %v2452_v63 }
 0x333   :  { %2911 = vmatmul.mubr.f32.gmra.mrb[120].mxu0 %v2387_v55  ;;  %v2421_v27 = vsel %vm1225_vm7, %v7243_v29, %v2130_v30  ;;  %v6410_v30 = vpack.c.bf16 %v3261_v61, %v3260_v60  ;;  %v2390_v55 = vsel %vm2358_vm10, %v9056_v8, %v7244_v14  ;;  %v3264_v29 = vld [vmem:[%s11105_s6 + $0x40] sm:$0xff]  ;;  %v3265_v8 = vld [vmem:[%s11105_s6 + $0x48] sm:$0xff]  ;;  %v3267_v60 = vld [vmem:[%s11105_s6 + $0x58] sm:$0xff] }
 0x334   :  { %2916 = vmatprep.mubr.f32.mxu0 %v2453_v44  ;;  %v2454_v63 = vsel %vm2423_vm9, %v2421_v27, %v9530_v40 }
 0x335   :  { %6411 = vmatpush1.bf16.msra.mxu1 %v6410_v30  ;;  %v3268_v30 = vld [vmem:[%s11105_s6 + $0x60] sm:$0xff] }
 0x336   :  { %6412 = vmatprep.subr.bf16.mxu1 %v7484_v15 }
 0x337   :  { %v2132_v37 = vpop.permute.xlu1 %2131  ;;  %2917 = vmatmul.mubr.f32.gmra.mrb[122].mxu0 %v2388_v23  ;;  %v9549_v36 = vpop.permute.xlu0 %2228 }
 0x338   :  { %v2422_v6 = vsel %vm1225_vm7, %v7244_v14, %v2132_v37  ;;  %2922 = vmatprep.mubr.f32.mxu0 %v2454_v63  ;;  %v3262_v37 = vld [vmem:[%s11105_s6 + $0x30] sm:$0xff]  ;;  %v6416_v14 = vpack.c.bf16 %v3265_v8, %v3264_v29  ;;  %v3272_v29 = vld [vmem:[%s11105_s6 + $0x80] sm:$0xff] }
 0x339   :  { %v2455_v2 = vsel %vm2423_vm9, %v2422_v6, %v9549_v36  ;;  %v6413_v44 = vpack.c.bf16 %v3263_v10, %v3262_v37  ;;  %v3266_v63 = vld [vmem:[%s11105_s6 + $0x50] sm:$0xff] }
 0x33a   :  { %v6419_v61 = vpack.c.bf16 %v3267_v60, %v3266_v63 }
 0x33b   :  { %2923 = vmatmul.mubr.f32.gmra.mrb[124].mxu0 %v2389_v0  ;;  %v2263_v4 = vpop.permute.xlu1 %2262  ;;  %6414 = vmatpush1.bf16.msra.mxu1 %v6413_v44  ;;  %v2265_v23 = vpop.permute.xlu0 %2264  ;;  %v3269_v0 = vld [vmem:[%s11105_s6 + $0x68] sm:$0xff] }
 0x33c   :  { %2928 = vmatprep.mubr.f32.mxu0 %v2455_v2  ;;  %v2457_v27 = vsel %vm2456_vm12, %v7028_v25, %v2263_v4  ;;  %6415 = vmatprep.subr.bf16.mxu1 %v7484_v15  ;;  %v2458_v25 = vsel %vm2456_vm12, %v7029_v43, %v2265_v23  ;;  %v6422_v43 = vpack.c.bf16 %v3269_v0, %v3268_v30  ;;  %v3273_v44 = vld [vmem:[%s11105_s6 + $0x88] sm:$0xff] }
 0x33f   :  { %2929 = vmatmul.mubr.f32.gmra.mrb[126].mxu0 %v2390_v55  ;;  %6417 = vmatpush1.bf16.msra.mxu1 %v6416_v14  ;;  %v2267_v6 = vpop.permute.xlu1 %2266  ;;  %v2269_v2 = vpop.permute.xlu0 %2268  ;;  %v3270_v55 = vld [vmem:[%s11105_s6 + $0x70] sm:$0xff]  ;;  %v3275_v14 = vld [vmem:[%s11105_s6 + $0x98] sm:$0xff] }
 0x340   :  { %5827 = vmatprep.mubr.msk.f32.mxu0 %vm2607_vm11, %v2263_v4  ;;  %6418 = vmatprep.subr.bf16.mxu1 %v7484_v15  ;;  %v2459_v42 = vsel %vm2456_vm12, %v7043_v52, %v2267_v6  ;;  %v3271_v4 = vld [vmem:[%s11105_s6 + $0x78] sm:$0xff]  ;;  %v2460_v52 = vsel %vm2456_vm12, %v7044_v18, %v2269_v2  ;;  %v6428_v18 = vpack.c.bf16 %v3273_v44, %v3272_v29 }
 0x341   :  { %v6425_v37 = vpack.c.bf16 %v3271_v4, %v3270_v55 }
 0x343   :  { %3000 = vmatmul.mubr.f32.vlgmr.msra.gmra.mrb[64].mxu0 %v2457_v27  ;;  %6420 = vmatpush1.bf16.msra.mxu1 %v6419_v61  ;;  %v2271_v10 = vpop.permute.xlu1 %2270  ;;  %v2273_v8 = vpop.permute.xlu0 %2272  ;;  %v3274_v27 = vld [vmem:[%s11105_s6 + $0x90] sm:$0xff] }
 0x344   :  { %5828 = vmatprep.mubr.msk.f32.mxu0 %vm2607_vm11, %v2265_v23  ;;  %6421 = vmatprep.subr.bf16.mxu1 %v7484_v15  ;;  %v2461_v45 = vsel %vm2456_vm12, %v7058_v54, %v2271_v10  ;;  %v2462_v54 = vsel %vm2456_vm12, %v7059_v50, %v2273_v8  ;;  %v6431_v23 = vpack.c.bf16 %v3275_v14, %v3274_v27  ;;  %v11121_v14 = vsub.s32 1, %v8427_v22 }
 0x347   :  { %3006 = vmatmul.mubr.f32.gmra.mrb[66].mxu0 %v2458_v25  ;;  %6423 = vmatpush1.bf16.msra.mxu1 %v6422_v43  ;;  %v2275_v63 = vpop.permute.xlu1 %2274  ;;  %v2277_v25 = vpop.permute.xlu0 %2276 }
 0x348   :  { %5829 = vmatprep.mubr.msk.f32.mxu0 %vm2607_vm11, %v2267_v6  ;;  %6424 = vmatprep.subr.bf16.mxu1 %v7484_v15  ;;  %v2463_v60 = vsel %vm2456_vm12, %v7073_v49, %v2275_v63  ;;  %v2464_v17 = vsel %vm2456_vm12, %v7074_v56, %v2277_v25 }
 0x34b   :  { %3012 = vmatmul.mubr.f32.gmra.mrb[68].mxu0 %v2459_v42  ;;  %6426 = vmatpush1.bf16.msra.mxu1 %v6425_v37  ;;  %v2279_v50 = vpop.permute.xlu1 %2278  ;;  %v2281_v49 = vpop.permute.xlu0 %2280 }
 0x34c   :  { %5830 = vmatprep.mubr.msk.f32.mxu0 %vm2607_vm11, %v2269_v2  ;;  %6427 = vmatprep.subr.bf16.mxu1 %v7484_v15  ;;  %v2465_v61 = vsel %vm2456_vm12, %v7088_v51, %v2279_v50  ;;  %v2466_v6 = vsel %vm2456_vm12, %v7089_v59, %v2281_v49 }
 0x34f   :  { %3018 = vmatmul.mubr.f32.gmra.mrb[70].mxu0 %v2460_v52  ;;  %6429 = vmatpush1.bf16.msra.mxu1 %v6428_v18  ;;  %v2283_v30 = vpop.permute.xlu1 %2282  ;;  %v2285_v56 = vpop.permute.xlu0 %2284 }
 0x350   :  { %5831 = vmatprep.mubr.msk.f32.mxu0 %vm2607_vm11, %v2271_v10  ;;  %6430 = vmatprep.subr.bf16.mxu1 %v7484_v15  ;;  %v2467_v31 = vsel %vm2456_vm12, %v7103_v34, %v2283_v30  ;;  %v2468_v51 = vsel %vm2456_vm12, %v7104_v20, %v2285_v56 }
 0x353   :  { %3024 = vmatmul.mubr.f32.gmra.mrb[72].mxu0 %v2461_v45  ;;  %6432 = vmatpush1.bf16.msra.mxu1 %v6431_v23  ;;  %v2287_v0 = vpop.permute.xlu1 %2286  ;;  %v2289_v59 = vpop.permute.xlu0 %2288 }
 0x354   :  { %5832 = vmatprep.mubr.msk.f32.mxu0 %vm2607_vm11, %v2273_v8  ;;  %6433 = vmatprep.subr.bf16.mxu1 %v7484_v15  ;;  %v2469_v38 = vsel %vm2456_vm12, %v7118_v21, %v2287_v0  ;;  %v2470_v34 = vsel %vm2456_vm12, %v7119_v3, %v2289_v59 }
 0x357   :  { %3030 = vmatmul.mubr.f32.gmra.mrb[74].mxu0 %v2462_v54  ;;  %v2291_v42 = vpop.permute.xlu1 %2290  ;;  %v2293_v20 = vpop.permute.xlu0 %2292 }
 0x358   :  { %5833 = vmatprep.mubr.msk.f32.mxu0 %vm2607_vm11, %v2275_v63  ;;  %v2471_v48 = vsel %vm2456_vm12, %v7133_v46, %v2291_v42  ;;  %v2472_v21 = vsel %vm2456_vm12, %v7134_v28, %v2293_v20 }
 0x35b   :  { %3036 = vmatmul.mubr.f32.gmra.mrb[76].mxu0 %v2463_v60  ;;  %v2295_v43 = vpop.permute.xlu1 %2294  ;;  %v2297_v3 = vpop.permute.xlu0 %2296 }
 0x35c   :  { %5834 = vmatprep.mubr.msk.f32.mxu0 %vm2607_vm11, %v2277_v25  ;;  %v2473_v1 = vsel %vm2456_vm12, %v7148_v41, %v2295_v43  ;;  %v2474_v46 = vsel %vm2456_vm12, %v7149_v11, %v2297_v3 }
 0x35f   :  { %3042 = vmatmul.mubr.f32.gmra.mrb[78].mxu0 %v2464_v17  ;;  %v2299_v2 = vpop.permute.xlu1 %2298  ;;  %v2301_v28 = vpop.permute.xlu0 %2300 }
 0x360   :  { %5835 = vmatprep.mubr.msk.f32.mxu0 %vm2607_vm11, %v2279_v50  ;;  %v2475_v12 = vsel %vm2456_vm12, %v7163_v9, %v2299_v2  ;;  %v2476_v41 = vsel %vm2456_vm12, %v7164_v33, %v2301_v28 }
 0x363   :  { %3048 = vmatmul.mubr.f32.gmra.mrb[80].mxu0 %v2465_v61  ;;  %v2303_v55 = vpop.permute.xlu1 %2302  ;;  %v2305_v11 = vpop.permute.xlu0 %2304 }
 0x364   :  { %5836 = vmatprep.mubr.msk.f32.mxu0 %vm2607_vm11, %v2281_v49  ;;  %v2477_v58 = vsel %vm2456_vm12, %v7178_v5, %v2303_v55  ;;  %v2478_v9 = vsel %vm2456_vm12, %v7179_v39, %v2305_v11 }
 0x367   :  { %3054 = vmatmul.mubr.f32.gmra.mrb[82].mxu0 %v2466_v6  ;;  %v2307_v4 = vpop.permute.xlu1 %2306  ;;  %v2309_v33 = vpop.permute.xlu0 %2308 }
 0x368   :  { %5837 = vmatprep.mubr.msk.f32.mxu0 %vm2607_vm11, %v2283_v30  ;;  %v2479_v19 = vsel %vm2456_vm12, %v7193_v53, %v2307_v4  ;;  %v2480_v5 = vsel %vm2456_vm12, %v7194_v7, %v2309_v33  ;;  %v11118_v53 = vunpack.i.h.bf16 %v9480_v47  ;;  %v11119_v47 = vunpack.i.l.bf16 %v9520_v62  ;;  %v2595_v62 = vld [vmem:[%s11106_s5] sm:$0x3] }
 0x369   :  { %v9743_v54 = vrot.slane %v2595_v62, %v11121_v14 }
 0x36b   :  { %3060 = vmatmul.mubr.f32.gmra.mrb[84].mxu0 %v2467_v31  ;;  %v2311_v52 = vpop.permute.xlu1 %2310  ;;  %v2313_v39 = vpop.permute.xlu0 %2312 }
 0x36c   :  { %5838 = vmatprep.mubr.msk.f32.mxu0 %vm2607_vm11, %v2285_v56  ;;  %v2481_v26 = vsel %vm2456_vm12, %v7208_v57, %v2311_v52  ;;  %v2482_v37 = vsel %vm2456_vm12, %v11118_v53, %v2313_v39 }
 0x36f   :  { %3066 = vmatmul.mubr.f32.gmra.mrb[86].mxu0 %v2468_v51  ;;  %v2315_v10 = vpop.permute.xlu1 %2314  ;;  %v2317_v7 = vpop.permute.xlu0 %2316 }
 0x370   :  { %5839 = vmatprep.mubr.msk.f32.mxu0 %vm2607_vm11, %v2287_v0  ;;  %v2483_v35 = vsel %vm2456_vm12, %v7223_v32, %v2315_v10  ;;  %v2484_v57 = vsel %vm2456_vm12, %v7224_v13, %v2317_v7 }
 0x373   :  { %3072 = vmatmul.mubr.f32.gmra.mrb[88].mxu0 %v2469_v38  ;;  %v2319_v29 = vpop.permute.xlu1 %2318  ;;  %v2321_v45 = vpop.permute.xlu0 %2320 }
 0x374   :  { %5840 = vmatprep.mubr.msk.f32.mxu0 %vm2607_vm11, %v2289_v59  ;;  %v2485_v44 = vsel %vm2456_vm12, %v11119_v47, %v2319_v29  ;;  %v2486_v32 = vsel %vm2456_vm12, %v7239_v24, %v2321_v45  ;;  %v11120_v24 = vsub.s32 0, %v8427_v22 }
 0x376   :  { %v9739_v27 = vrot.slane %v2595_v62, %v11120_v24 }
 0x377   :  { %3078 = vmatmul.mubr.f32.gmra.mrb[90].mxu0 %v2470_v34  ;;  %v2323_v18 = vpop.permute.xlu1 %2322  ;;  %v2325_v16 = vpop.permute.xlu0 %2324 }
 0x378   :  { %5841 = vmatprep.mubr.msk.f32.mxu0 %vm2607_vm11, %v2291_v42  ;;  %v2487_v13 = vsel %vm2456_vm12, %v9530_v40, %v2323_v18  ;;  %v2488_v8 = vsel %vm2456_vm12, %v9549_v36, %v2325_v16 }
 0x37b   :  { %3084 = vmatmul.mubr.f32.gmra.mrb[92].mxu0 %v2471_v48 }
 0x37c   :  { %5842 = vmatprep.mubr.msk.f32.mxu0 %vm2607_vm11, %v2293_v20 }
 0x37f   :  { %3090 = vmatmul.mubr.f32.gmra.mrb[94].mxu0 %v2472_v21 }
 0x380   :  { %5843 = vmatprep.mubr.msk.f32.mxu0 %vm2607_vm11, %v2295_v43 }
 0x383   :  { %3096 = vmatmul.mubr.f32.gmra.mrb[96].mxu0 %v2473_v1 }
 0x384   :  { %5844 = vmatprep.mubr.msk.f32.mxu0 %vm2607_vm11, %v2297_v3 }
 0x387   :  { %3102 = vmatmul.mubr.f32.gmra.mrb[98].mxu0 %v2474_v46 }
 0x388   :  { %5845 = vmatprep.mubr.msk.f32.mxu0 %vm2607_vm11, %v2299_v2 }
 0x38b   :  { %3108 = vmatmul.mubr.f32.gmra.mrb[100].mxu0 %v2475_v12 }
 0x38c   :  { %5846 = vmatprep.mubr.msk.f32.mxu0 %vm2607_vm11, %v2301_v28 }
 0x38f   :  { %3114 = vmatmul.mubr.f32.gmra.mrb[102].mxu0 %v2476_v41 }
 0x390   :  { %5847 = vmatprep.mubr.msk.f32.mxu0 %vm2607_vm11, %v2303_v55 }
 0x393   :  { %3120 = vmatmul.mubr.f32.gmra.mrb[104].mxu0 %v2477_v58 }
 0x394   :  { %5848 = vmatprep.mubr.msk.f32.mxu0 %vm2607_vm11, %v2305_v11 }
 0x397   :  { %3126 = vmatmul.mubr.f32.gmra.mrb[106].mxu0 %v2478_v9 }
 0x398   :  { %5849 = vmatprep.mubr.msk.f32.mxu0 %vm2607_vm11, %v2307_v4 }
 0x39b   :  { %3132 = vmatmul.mubr.f32.gmra.mrb[108].mxu0 %v2479_v19 }
 0x39c   :  { %5850 = vmatprep.mubr.msk.f32.mxu0 %vm2607_vm11, %v2309_v33 }
 0x39f   :  { %3138 = vmatmul.mubr.f32.gmra.mrb[110].mxu0 %v2480_v5 }
 0x3a0   :  { %5851 = vmatprep.mubr.msk.f32.mxu0 %vm2607_vm11, %v2311_v52 }
 0x3a3   :  { %3144 = vmatmul.mubr.f32.gmra.mrb[112].mxu0 %v2481_v26 }
 0x3a4   :  { %5852 = vmatprep.mubr.msk.f32.mxu0 %vm2607_vm11, %v2313_v39 }
 0x3a7   :  { %3150 = vmatmul.mubr.f32.gmra.mrb[114].mxu0 %v2482_v37 }
 0x3a8   :  { %5853 = vmatprep.mubr.msk.f32.mxu0 %vm2607_vm11, %v2315_v10 }
 0x3ab   :  { %3156 = vmatmul.mubr.f32.gmra.mrb[116].mxu0 %v2483_v35 }
 0x3ac   :  { %5854 = vmatprep.mubr.msk.f32.mxu0 %vm2607_vm11, %v2317_v7 }
 0x3af   :  { %3162 = vmatmul.mubr.f32.gmra.mrb[118].mxu0 %v2484_v57 }
 0x3b0   :  { %5855 = vmatprep.mubr.msk.f32.mxu0 %vm2607_vm11, %v2319_v29 }
 0x3b3   :  { %3168 = vmatmul.mubr.f32.gmra.mrb[120].mxu0 %v2485_v44 }
 0x3b4   :  { %5856 = vmatprep.mubr.msk.f32.mxu0 %vm2607_vm11, %v2321_v45 }
 0x3b7   :  { %3174 = vmatmul.mubr.f32.gmra.mrb[122].mxu0 %v2486_v32 }
 0x3b8   :  { %5857 = vmatprep.mubr.msk.f32.mxu0 %vm2607_vm11, %v2323_v18 }
 0x3bb   :  { %3180 = vmatmul.mubr.f32.gmra.mrb[124].mxu0 %v2487_v13 }
 0x3bc   :  { %5858 = vmatprep.mubr.msk.f32.mxu0 %vm2607_vm11, %v2325_v16 }
 0x3bf   :  { %3186 = vmatmul.mubr.f32.gmra.mrb[126].mxu0 %v2488_v8 }
 0x416   :  { %v3001_v40 = vpop.f32.mrb[64].mxu0 }
 0x417   :  { %v6556_v23 = vadd.f32 %v3001_v40, %v9739_v27  ;;  %v3003_v63 = vpop.f32.mrb[65].mxu0 }
 0x418   :  { %v6557_v60 = vadd.f32 %v3003_v63, %v9743_v54 }
 0x419   :  { %v3192_v17 = vmax.f32 %v6556_v23, 0.0 }
 0x41a   :  { %v3193_v36 = vmax.f32 %v6557_v60, 0.0  ;;  %v3007_v25 = vpop.f32.mrb[66].mxu0 }
 0x41b   :  { %v6558_v50 = vadd.f32 %v3007_v25, %v9739_v27  ;;  %v3009_v61 = vpop.f32.mrb[67].mxu0 }
 0x41c   :  { %v6559_v49 = vadd.f32 %v3009_v61, %v9743_v54  ;;  %5859 = vmatprep.mubr.msk.f32.mxu1 %vm667_vm4, %v3193_v36 }
 0x41d   :  { %3437 = vmatmul.mubr.f32.vlgmr.msra.gmra.mrb[64].mxu1 %v3192_v17  ;;  %v3194_v30 = vmax.f32 %v6558_v50, 0.0 }
 0x41e   :  { %v3195_v22 = vmax.f32 %v6559_v49, 0.0  ;;  %v3013_v6 = vpop.f32.mrb[68].mxu0 }
 0x41f   :  { %v6560_v31 = vadd.f32 %v3013_v6, %v9739_v27  ;;  %v3015_v56 = vpop.f32.mrb[69].mxu0 }
 0x420   :  { %v6561_v51 = vadd.f32 %v3015_v56, %v9743_v54  ;;  %5860 = vmatprep.mubr.msk.f32.mxu1 %vm667_vm4, %v3195_v22 }
 0x421   :  { %3442 = vmatmul.mubr.f32.gmra.mrb[66].mxu1 %v3194_v30  ;;  %v3196_v59 = vmax.f32 %v6560_v31, 0.0 }
 0x422   :  { %v3197_v0 = vmax.f32 %v6561_v51, 0.0  ;;  %v3019_v38 = vpop.f32.mrb[70].mxu0 }
 0x423   :  { %v6562_v34 = vadd.f32 %v3019_v38, %v9739_v27  ;;  %v3021_v42 = vpop.f32.mrb[71].mxu0 }
 0x424   :  { %v6563_v48 = vadd.f32 %v3021_v42, %v9743_v54  ;;  %5861 = vmatprep.mubr.msk.f32.mxu1 %vm667_vm4, %v3197_v0 }
 0x425   :  { %3447 = vmatmul.mubr.f32.gmra.mrb[68].mxu1 %v3196_v59  ;;  %v3198_v43 = vmax.f32 %v6562_v34, 0.0 }
 0x426   :  { %v3199_v20 = vmax.f32 %v6563_v48, 0.0  ;;  %v3025_v21 = vpop.f32.mrb[72].mxu0 }
 0x427   :  { %v6564_v1 = vadd.f32 %v3025_v21, %v9739_v27  ;;  %v3027_v3 = vpop.f32.mrb[73].mxu0 }
 0x428   :  { %v6565_v46 = vadd.f32 %v3027_v3, %v9743_v54  ;;  %5862 = vmatprep.mubr.msk.f32.mxu1 %vm667_vm4, %v3199_v20 }
 0x429   :  { %3452 = vmatmul.mubr.f32.gmra.mrb[70].mxu1 %v3198_v43  ;;  %v3200_v28 = vmax.f32 %v6564_v1, 0.0 }
 0x42a   :  { %v3201_v2 = vmax.f32 %v6565_v46, 0.0  ;;  %v3031_v12 = vpop.f32.mrb[74].mxu0 }
 0x42b   :  { %v6566_v41 = vadd.f32 %v3031_v12, %v9739_v27  ;;  %v3033_v55 = vpop.f32.mrb[75].mxu0 }
 0x42c   :  { %v6567_v58 = vadd.f32 %v3033_v55, %v9743_v54  ;;  %5863 = vmatprep.mubr.msk.f32.mxu1 %vm667_vm4, %v3201_v2 }
 0x42d   :  { %3457 = vmatmul.mubr.f32.gmra.mrb[72].mxu1 %v3200_v28  ;;  %v3202_v4 = vmax.f32 %v6566_v41, 0.0 }
 0x42e   :  { %v3203_v11 = vmax.f32 %v6567_v58, 0.0  ;;  %v3037_v9 = vpop.f32.mrb[76].mxu0 }
 0x42f   :  { %v6568_v19 = vadd.f32 %v3037_v9, %v9739_v27  ;;  %v3039_v33 = vpop.f32.mrb[77].mxu0 }
 0x430   :  { %v6569_v5 = vadd.f32 %v3039_v33, %v9743_v54  ;;  %5864 = vmatprep.mubr.msk.f32.mxu1 %vm667_vm4, %v3203_v11 }
 0x431   :  { %3462 = vmatmul.mubr.f32.gmra.mrb[74].mxu1 %v3202_v4  ;;  %v3204_v39 = vmax.f32 %v6568_v19, 0.0 }
 0x432   :  { %v3205_v52 = vmax.f32 %v6569_v5, 0.0  ;;  %v3043_v26 = vpop.f32.mrb[78].mxu0 }
 0x433   :  { %v6570_v53 = vadd.f32 %v3043_v26, %v9739_v27  ;;  %v3045_v37 = vpop.f32.mrb[79].mxu0 }
 0x434   :  { %v6571_v10 = vadd.f32 %v3045_v37, %v9743_v54  ;;  %5865 = vmatprep.mubr.msk.f32.mxu1 %vm667_vm4, %v3205_v52 }
 0x435   :  { %3467 = vmatmul.mubr.f32.gmra.mrb[76].mxu1 %v3204_v39  ;;  %v3206_v57 = vmax.f32 %v6570_v53, 0.0 }
 0x436   :  { %v3207_v35 = vmax.f32 %v6571_v10, 0.0  ;;  %v3049_v7 = vpop.f32.mrb[80].mxu0 }
 0x437   :  { %v6572_v29 = vadd.f32 %v3049_v7, %v9739_v27  ;;  %v3051_v47 = vpop.f32.mrb[81].mxu0 }
 0x438   :  { %v6573_v44 = vadd.f32 %v3051_v47, %v9743_v54  ;;  %5866 = vmatprep.mubr.msk.f32.mxu1 %vm667_vm4, %v3207_v35 }
 0x439   :  { %3472 = vmatmul.mubr.f32.gmra.mrb[78].mxu1 %v3206_v57  ;;  %v3208_v18 = vmax.f32 %v6572_v29, 0.0 }
 0x43a   :  { %v3209_v45 = vmax.f32 %v6573_v44, 0.0  ;;  %v3055_v32 = vpop.f32.mrb[82].mxu0 }
 0x43b   :  { %v6574_v13 = vadd.f32 %v3055_v32, %v9739_v27  ;;  %v3057_v16 = vpop.f32.mrb[83].mxu0 }
 0x43c   :  { %v6575_v8 = vadd.f32 %v3057_v16, %v9743_v54  ;;  %5867 = vmatprep.mubr.msk.f32.mxu1 %vm667_vm4, %v3209_v45 }
 0x43d   :  { %3477 = vmatmul.mubr.f32.gmra.mrb[80].mxu1 %v3208_v18  ;;  %v3210_v14 = vmax.f32 %v6574_v13, 0.0 }
 0x43e   :  { %v3211_v62 = vmax.f32 %v6575_v8, 0.0  ;;  %v3061_v24 = vpop.f32.mrb[84].mxu0 }
 0x43f   :  { %v6576_v40 = vadd.f32 %v3061_v24, %v9739_v27  ;;  %v3063_v23 = vpop.f32.mrb[85].mxu0 }
 0x440   :  { %v6577_v63 = vadd.f32 %v3063_v23, %v9743_v54  ;;  %5868 = vmatprep.mubr.msk.f32.mxu1 %vm667_vm4, %v3211_v62 }
 0x441   :  { %3482 = vmatmul.mubr.f32.gmra.mrb[82].mxu1 %v3210_v14  ;;  %v3212_v25 = vmax.f32 %v6576_v40, 0.0 }
 0x442   :  { %v3213_v60 = vmax.f32 %v6577_v63, 0.0  ;;  %v3067_v36 = vpop.f32.mrb[86].mxu0 }
 0x443   :  { %v6578_v17 = vadd.f32 %v3067_v36, %v9739_v27  ;;  %v3069_v50 = vpop.f32.mrb[87].mxu0 }
 0x444   :  { %v6579_v61 = vadd.f32 %v3069_v50, %v9743_v54  ;;  %5869 = vmatprep.mubr.msk.f32.mxu1 %vm667_vm4, %v3213_v60 }
 0x445   :  { %3487 = vmatmul.mubr.f32.gmra.mrb[84].mxu1 %v3212_v25  ;;  %v3214_v6 = vmax.f32 %v6578_v17, 0.0 }
 0x446   :  { %v3215_v49 = vmax.f32 %v6579_v61, 0.0  ;;  %v3073_v22 = vpop.f32.mrb[88].mxu0 }
 0x447   :  { %v6580_v30 = vadd.f32 %v3073_v22, %v9739_v27  ;;  %v3075_v31 = vpop.f32.mrb[89].mxu0 }
 0x448   :  { %v6581_v56 = vadd.f32 %v3075_v31, %v9743_v54  ;;  %5870 = vmatprep.mubr.msk.f32.mxu1 %vm667_vm4, %v3215_v49 }
 0x449   :  { %3492 = vmatmul.mubr.f32.gmra.mrb[86].mxu1 %v3214_v6  ;;  %v3216_v38 = vmax.f32 %v6580_v30, 0.0 }
 0x44a   :  { %v3217_v51 = vmax.f32 %v6581_v56, 0.0  ;;  %v3079_v0 = vpop.f32.mrb[90].mxu0 }
 0x44b   :  { %v6582_v59 = vadd.f32 %v3079_v0, %v9739_v27  ;;  %v3081_v34 = vpop.f32.mrb[91].mxu0 }
 0x44c   :  { %v6583_v42 = vadd.f32 %v3081_v34, %v9743_v54  ;;  %5871 = vmatprep.mubr.msk.f32.mxu1 %vm667_vm4, %v3217_v51 }
 0x44d   :  { %3497 = vmatmul.mubr.f32.gmra.mrb[88].mxu1 %v3216_v38  ;;  %v3218_v21 = vmax.f32 %v6582_v59, 0.0 }
 0x44e   :  { %v3219_v48 = vmax.f32 %v6583_v42, 0.0  ;;  %v3085_v20 = vpop.f32.mrb[92].mxu0 }
 0x44f   :  { %v6584_v43 = vadd.f32 %v3085_v20, %v9739_v27  ;;  %v3087_v1 = vpop.f32.mrb[93].mxu0 }
 0x450   :  { %v6585_v3 = vadd.f32 %v3087_v1, %v9743_v54  ;;  %5872 = vmatprep.mubr.msk.f32.mxu1 %vm667_vm4, %v3219_v48 }
 0x451   :  { %3502 = vmatmul.mubr.f32.gmra.mrb[90].mxu1 %v3218_v21  ;;  %v3220_v12 = vmax.f32 %v6584_v43, 0.0 }
 0x452   :  { %v3221_v46 = vmax.f32 %v6585_v3, 0.0  ;;  %v3091_v2 = vpop.f32.mrb[94].mxu0 }
 0x453   :  { %v6586_v28 = vadd.f32 %v3091_v2, %v9739_v27  ;;  %v3093_v41 = vpop.f32.mrb[95].mxu0 }
 0x454   :  { %v6587_v55 = vadd.f32 %v3093_v41, %v9743_v54  ;;  %5873 = vmatprep.mubr.msk.f32.mxu1 %vm667_vm4, %v3221_v46 }
 0x455   :  { %3507 = vmatmul.mubr.f32.gmra.mrb[92].mxu1 %v3220_v12  ;;  %v3222_v9 = vmax.f32 %v6586_v28, 0.0 }
 0x456   :  { %v3223_v58 = vmax.f32 %v6587_v55, 0.0  ;;  %v3097_v11 = vpop.f32.mrb[96].mxu0 }
 0x457   :  { %v6588_v4 = vadd.f32 %v3097_v11, %v9739_v27  ;;  %v3099_v19 = vpop.f32.mrb[97].mxu0 }
 0x458   :  { %v6589_v33 = vadd.f32 %v3099_v19, %v9743_v54  ;;  %5874 = vmatprep.mubr.msk.f32.mxu1 %vm667_vm4, %v3223_v58 }
 0x459   :  { %3512 = vmatmul.mubr.f32.gmra.mrb[94].mxu1 %v3222_v9  ;;  %v3224_v26 = vmax.f32 %v6588_v4, 0.0 }
 0x45a   :  { %v3225_v5 = vmax.f32 %v6589_v33, 0.0  ;;  %v3103_v52 = vpop.f32.mrb[98].mxu0 }
 0x45b   :  { %v6590_v39 = vadd.f32 %v3103_v52, %v9739_v27  ;;  %v3105_v53 = vpop.f32.mrb[99].mxu0 }
 0x45c   :  { %v6591_v37 = vadd.f32 %v3105_v53, %v9743_v54  ;;  %5875 = vmatprep.mubr.msk.f32.mxu1 %vm667_vm4, %v3225_v5 }
 0x45d   :  { %3517 = vmatmul.mubr.f32.gmra.mrb[96].mxu1 %v3224_v26  ;;  %v3226_v7 = vmax.f32 %v6590_v39, 0.0 }
 0x45e   :  { %v3227_v10 = vmax.f32 %v6591_v37, 0.0  ;;  %v3109_v35 = vpop.f32.mrb[100].mxu0 }
 0x45f   :  { %v6592_v57 = vadd.f32 %v3109_v35, %v9739_v27  ;;  %v3111_v29 = vpop.f32.mrb[101].mxu0 }
 0x460   :  { %v6593_v47 = vadd.f32 %v3111_v29, %v9743_v54  ;;  %5876 = vmatprep.mubr.msk.f32.mxu1 %vm667_vm4, %v3227_v10 }
 0x461   :  { %3522 = vmatmul.mubr.f32.gmra.mrb[98].mxu1 %v3226_v7  ;;  %v3228_v32 = vmax.f32 %v6592_v57, 0.0 }
 0x462   :  { %v3229_v44 = vmax.f32 %v6593_v47, 0.0  ;;  %v3115_v45 = vpop.f32.mrb[102].mxu0 }
 0x463   :  { %v6594_v18 = vadd.f32 %v3115_v45, %v9739_v27  ;;  %v3117_v13 = vpop.f32.mrb[103].mxu0 }
 0x464   :  { %v6595_v16 = vadd.f32 %v3117_v13, %v9743_v54  ;;  %5877 = vmatprep.mubr.msk.f32.mxu1 %vm667_vm4, %v3229_v44  ;;  %v4402_v13 = vld [vmem:[%s11107_s7] sm:$0xff] }
 0x465   :  { %3527 = vmatmul.mubr.f32.gmra.mrb[100].mxu1 %v3228_v32  ;;  %v3230_v24 = vmax.f32 %v6594_v18, 0.0 }
 0x466   :  { %v3231_v8 = vmax.f32 %v6595_v16, 0.0  ;;  %v3121_v62 = vpop.f32.mrb[104].mxu0  ;;  %v4403_v16 = vld [vmem:[%s11107_s7 + $0x8] sm:$0xff] }
 0x467   :  { %v6596_v14 = vadd.f32 %v3121_v62, %v9739_v27  ;;  %v3123_v40 = vpop.f32.mrb[105].mxu0  ;;  %v6434_v62 = vpack.c.bf16 %v4403_v16, %v4402_v13  ;;  %v4431_v16 = vld [vmem:[%s11107_s7 + $0xe8] sm:$0xff] }
 0x468   :  { %v6597_v23 = vadd.f32 %v3123_v40, %v9743_v54  ;;  %5878 = vmatprep.mubr.msk.f32.mxu1 %vm667_vm4, %v3231_v8 }
 0x469   :  { %3532 = vmatmul.mubr.f32.gmra.mrb[102].mxu1 %v3230_v24  ;;  %v3232_v36 = vmax.f32 %v6596_v14, 0.0 }
 0x46a   :  { %v3233_v63 = vmax.f32 %v6597_v23, 0.0  ;;  %v3127_v60 = vpop.f32.mrb[106].mxu0  ;;  %6435 = vmatpush1.bf16.msra.mxu1 %v6434_v62 }
 0x46b   :  { %v6598_v25 = vadd.f32 %v3127_v60, %v9739_v27  ;;  %v3129_v17 = vpop.f32.mrb[107].mxu0  ;;  %6436 = vmatprep.subr.bf16.mxu1 %v7484_v15 }
 0x46c   :  { %v6599_v50 = vadd.f32 %v3129_v17, %v9743_v54  ;;  %5879 = vmatprep.mubr.msk.f32.mxu1 %vm667_vm4, %v3233_v63  ;;  %v4404_v17 = vld [vmem:[%s11107_s7 + $0x10] sm:$0xff] }
 0x46d   :  { %3537 = vmatmul.mubr.f32.gmra.mrb[104].mxu1 %v3232_v36  ;;  %v3234_v22 = vmax.f32 %v6598_v25, 0.0 }
 0x46e   :  { %v3235_v61 = vmax.f32 %v6599_v50, 0.0  ;;  %v3133_v49 = vpop.f32.mrb[108].mxu0  ;;  %v4405_v50 = vld [vmem:[%s11107_s7 + $0x18] sm:$0xff] }
 0x46f   :  { %v6600_v6 = vadd.f32 %v3133_v49, %v9739_v27  ;;  %v3135_v30 = vpop.f32.mrb[109].mxu0 }
 0x470   :  { %v6601_v31 = vadd.f32 %v3135_v30, %v9743_v54  ;;  %5880 = vmatprep.mubr.msk.f32.mxu1 %vm667_vm4, %v3235_v61 }
 0x471   :  { %3542 = vmatmul.mubr.f32.gmra.mrb[106].mxu1 %v3234_v22  ;;  %v3236_v0 = vmax.f32 %v6600_v6, 0.0  ;;  %v6437_v6 = vpack.c.bf16 %v4405_v50, %v4404_v17  ;;  %v4433_v17 = vld [vmem:[%s11107_s7 + $0xf8] sm:$0xff] }
 0x472   :  { %v3237_v56 = vmax.f32 %v6601_v31, 0.0  ;;  %v3139_v51 = vpop.f32.mrb[110].mxu0 }
 0x473   :  { %v6602_v38 = vadd.f32 %v3139_v51, %v9739_v27  ;;  %v3141_v59 = vpop.f32.mrb[111].mxu0  ;;  %6438 = vmatpush1.bf16.msra.mxu1 %v6437_v6  ;;  %v4406_v51 = vld [vmem:[%s11107_s7 + $0x20] sm:$0xff] }
 0x474   :  { %v6603_v34 = vadd.f32 %v3141_v59, %v9743_v54  ;;  %5881 = vmatprep.mubr.msk.f32.mxu1 %vm667_vm4, %v3237_v56  ;;  %6439 = vmatprep.subr.bf16.mxu1 %v7484_v15 }
 0x475   :  { %3547 = vmatmul.mubr.f32.gmra.mrb[108].mxu1 %v3236_v0  ;;  %v3238_v20 = vmax.f32 %v6602_v38, 0.0  ;;  %v4408_v0 = vld [vmem:[%s11107_s7 + $0x30] sm:$0xff]  ;;  %v4409_v38 = vld [vmem:[%s11107_s7 + $0x38] sm:$0xff] }
 0x476   :  { %v3239_v42 = vmax.f32 %v6603_v34, 0.0  ;;  %v3145_v48 = vpop.f32.mrb[112].mxu0  ;;  %v6443_v59 = vpack.c.bf16 %v4409_v38, %v4408_v0  ;;  %v4410_v34 = vld [vmem:[%s11107_s7 + $0x40] sm:$0xff] }
 0x477   :  { %v6604_v21 = vadd.f32 %v3145_v48, %v9739_v27  ;;  %v3147_v43 = vpop.f32.mrb[113].mxu0 }
 0x478   :  { %v6605_v1 = vadd.f32 %v3147_v43, %v9743_v54  ;;  %5882 = vmatprep.mubr.msk.f32.mxu1 %vm667_vm4, %v3239_v42  ;;  %v4411_v42 = vld [vmem:[%s11107_s7 + $0x48] sm:$0xff] }
 0x479   :  { %3552 = vmatmul.mubr.f32.gmra.mrb[110].mxu1 %v3238_v20  ;;  %v3240_v2 = vmax.f32 %v6604_v21, 0.0  ;;  %v6446_v48 = vpack.c.bf16 %v4411_v42, %v4410_v34  ;;  %v4412_v20 = vld [vmem:[%s11107_s7 + $0x50] sm:$0xff]  ;;  %v4413_v21 = vld [vmem:[%s11107_s7 + $0x58] sm:$0xff] }
 0x47a   :  { %v3241_v3 = vmax.f32 %v6605_v1, 0.0  ;;  %v3151_v46 = vpop.f32.mrb[114].mxu0  ;;  %v6449_v43 = vpack.c.bf16 %v4413_v21, %v4412_v20  ;;  %v4414_v1 = vld [vmem:[%s11107_s7 + $0x60] sm:$0xff] }
 0x47b   :  { %v6606_v12 = vadd.f32 %v3151_v46, %v9739_v27  ;;  %v3153_v28 = vpop.f32.mrb[115].mxu0 }
 0x47c   :  { %v6607_v41 = vadd.f32 %v3153_v28, %v9743_v54  ;;  %5883 = vmatprep.mubr.msk.f32.mxu1 %vm667_vm4, %v3241_v3  ;;  %v4415_v3 = vld [vmem:[%s11107_s7 + $0x68] sm:$0xff] }
 0x47d   :  { %3557 = vmatmul.mubr.f32.gmra.mrb[112].mxu1 %v3240_v2  ;;  %v3242_v11 = vmax.f32 %v6606_v12, 0.0  ;;  %v6452_v46 = vpack.c.bf16 %v4415_v3, %v4414_v1  ;;  %v4416_v2 = vld [vmem:[%s11107_s7 + $0x70] sm:$0xff]  ;;  %v4417_v12 = vld [vmem:[%s11107_s7 + $0x78] sm:$0xff] }
 0x47e   :  { %v3243_v55 = vmax.f32 %v6607_v41, 0.0  ;;  %v3157_v58 = vpop.f32.mrb[116].mxu0  ;;  %v6455_v28 = vpack.c.bf16 %v4417_v12, %v4416_v2  ;;  %v4418_v41 = vld [vmem:[%s11107_s7 + $0x80] sm:$0xff] }
 0x47f   :  { %v6608_v9 = vadd.f32 %v3157_v58, %v9739_v27  ;;  %v3159_v4 = vpop.f32.mrb[117].mxu0 }
 0x480   :  { %v6609_v19 = vadd.f32 %v3159_v4, %v9743_v54  ;;  %5884 = vmatprep.mubr.msk.f32.mxu1 %vm667_vm4, %v3243_v55  ;;  %v4419_v55 = vld [vmem:[%s11107_s7 + $0x88] sm:$0xff] }
 0x481   :  { %3562 = vmatmul.mubr.f32.gmra.mrb[114].mxu1 %v3242_v11  ;;  %v3244_v52 = vmax.f32 %v6608_v9, 0.0  ;;  %v6458_v58 = vpack.c.bf16 %v4419_v55, %v4418_v41  ;;  %v4420_v11 = vld [vmem:[%s11107_s7 + $0x90] sm:$0xff]  ;;  %v4421_v9 = vld [vmem:[%s11107_s7 + $0x98] sm:$0xff] }
 0x482   :  { %v3245_v33 = vmax.f32 %v6609_v19, 0.0  ;;  %v3163_v5 = vpop.f32.mrb[118].mxu0  ;;  %v6461_v4 = vpack.c.bf16 %v4421_v9, %v4420_v11  ;;  %v4422_v19 = vld [vmem:[%s11107_s7 + $0xa0] sm:$0xff] }
 0x483   :  { %v6610_v26 = vadd.f32 %v3163_v5, %v9739_v27  ;;  %v3165_v39 = vpop.f32.mrb[119].mxu0 }
 0x484   :  { %v6611_v53 = vadd.f32 %v3165_v39, %v9743_v54  ;;  %5885 = vmatprep.mubr.msk.f32.mxu1 %vm667_vm4, %v3245_v33  ;;  %v4423_v33 = vld [vmem:[%s11107_s7 + $0xa8] sm:$0xff] }
 0x485   :  { %3567 = vmatmul.mubr.f32.gmra.mrb[116].mxu1 %v3244_v52  ;;  %v3246_v35 = vmax.f32 %v6610_v26, 0.0  ;;  %v6464_v5 = vpack.c.bf16 %v4423_v33, %v4422_v19  ;;  %v4424_v52 = vld [vmem:[%s11107_s7 + $0xb0] sm:$0xff]  ;;  %v4425_v26 = vld [vmem:[%s11107_s7 + $0xb8] sm:$0xff] }
 0x486   :  { %v3247_v37 = vmax.f32 %v6611_v53, 0.0  ;;  %v3169_v10 = vpop.f32.mrb[120].mxu0  ;;  %v6467_v39 = vpack.c.bf16 %v4425_v26, %v4424_v52  ;;  %v4426_v53 = vld [vmem:[%s11107_s7 + $0xc0] sm:$0xff] }
 0x487   :  { %v6612_v7 = vadd.f32 %v3169_v10, %v9739_v27  ;;  %v3171_v57 = vpop.f32.mrb[121].mxu0 }
 0x488   :  { %v6613_v29 = vadd.f32 %v3171_v57, %v9743_v54  ;;  %5886 = vmatprep.mubr.msk.f32.mxu1 %vm667_vm4, %v3247_v37  ;;  %v4427_v37 = vld [vmem:[%s11107_s7 + $0xc8] sm:$0xff] }
 0x489   :  { %3572 = vmatmul.mubr.f32.gmra.mrb[118].mxu1 %v3246_v35  ;;  %v3248_v45 = vmax.f32 %v6612_v7, 0.0  ;;  %v6470_v10 = vpack.c.bf16 %v4427_v37, %v4426_v53 }
 0x48a   :  { %v3249_v47 = vmax.f32 %v6613_v29, 0.0  ;;  %v3175_v44 = vpop.f32.mrb[122].mxu0  ;;  %v4428_v29 = vld [vmem:[%s11107_s7 + $0xd0] sm:$0xff] }
 0x48b   :  { %v6614_v32 = vadd.f32 %v3175_v44, %v9739_v27  ;;  %v3177_v18 = vpop.f32.mrb[123].mxu0  ;;  %v4430_v44 = vld [vmem:[%s11107_s7 + $0xe0] sm:$0xff] }
 0x48c   :  { %v6615_v8 = vadd.f32 %v3177_v18, %v9743_v54  ;;  %5887 = vmatprep.mubr.msk.f32.mxu1 %vm667_vm4, %v3249_v47  ;;  %v4429_v47 = vld [vmem:[%s11107_s7 + $0xd8] sm:$0xff]  ;;  %v6476_v62 = vpack.c.bf16 %v4431_v16, %v4430_v44 }
 0x48d   :  { %3577 = vmatmul.mubr.f32.gmra.mrb[120].mxu1 %v3248_v45  ;;  %v3250_v40 = vmax.f32 %v6614_v32, 0.0  ;;  %v6473_v13 = vpack.c.bf16 %v4429_v47, %v4428_v29 }
 0x48e   :  { %v3251_v24 = vmax.f32 %v6615_v8, 0.0  ;;  %v3181_v14 = vpop.f32.mrb[124].mxu0 }
 0x48f   :  { %v6616_v23 = vadd.f32 %v3181_v14, %v9739_v27  ;;  %v3183_v63 = vpop.f32.mrb[125].mxu0 }
 0x490   :  { %v6617_v60 = vadd.f32 %v3183_v63, %v9743_v54  ;;  %5888 = vmatprep.mubr.msk.f32.mxu1 %vm667_vm4, %v3251_v24 }
 0x491   :  { %3582 = vmatmul.mubr.f32.gmra.mrb[122].mxu1 %v3250_v40  ;;  %v3252_v61 = vmax.f32 %v6616_v23, 0.0 }
 0x492   :  { %v3253_v36 = vmax.f32 %v6617_v60, 0.0  ;;  %v3187_v25 = vpop.f32.mrb[126].mxu0 }
 0x493   :  { %v6618_v49 = vadd.f32 %v3187_v25, %v9739_v27  ;;  %v3189_v22 = vpop.f32.mrb[127].mxu0  ;;  %v4407_v27 = vld [vmem:[%s11107_s7 + $0x28] sm:$0xff]  ;;  %v4432_v25 = vld [vmem:[%s11107_s7 + $0xf0] sm:$0xff] }
 0x494   :  { %v6619_v30 = vadd.f32 %v3189_v22, %v9743_v54  ;;  %5889 = vmatprep.mubr.msk.f32.mxu1 %vm667_vm4, %v3253_v36  ;;  %v6440_v54 = vpack.c.bf16 %v4407_v27, %v4406_v51 }
 0x495   :  { %3587 = vmatmul.mubr.f32.gmra.mrb[124].mxu1 %v3252_v61  ;;  %v3254_v56 = vmax.f32 %v6618_v49, 0.0  ;;  %v6479_v49 = vpack.c.bf16 %v4433_v17, %v4432_v25 }
 0x496   :  { %v3255_v31 = vmax.f32 %v6619_v30, 0.0  ;;  %6441 = vmatpush1.bf16.msra.mxu1 %v6440_v54 }
 0x497   :  { %6442 = vmatprep.subr.bf16.mxu1 %v7484_v15 }
 0x498   :  { %5890 = vmatprep.mubr.msk.f32.mxu1 %vm667_vm4, %v3255_v31 }
 0x499   :  { %3592 = vmatmul.mubr.f32.gmra.mrb[126].mxu1 %v3254_v56 }
 0x49a   :  { %6444 = vmatpush1.bf16.msra.mxu1 %v6443_v59 }
 0x49b   :  { %6445 = vmatprep.subr.bf16.mxu1 %v7484_v15 }
 0x49e   :  { %6447 = vmatpush1.bf16.msra.mxu1 %v6446_v48 }
 0x49f   :  { %6448 = vmatprep.subr.bf16.mxu1 %v7484_v15 }
 0x4a2   :  { %6450 = vmatpush1.bf16.msra.mxu1 %v6449_v43 }
 0x4a3   :  { %6451 = vmatprep.subr.bf16.mxu1 %v7484_v15 }
 0x4a6   :  { %6453 = vmatpush1.bf16.msra.mxu1 %v6452_v46 }
 0x4a7   :  { %6454 = vmatprep.subr.bf16.mxu1 %v7484_v15 }
 0x4aa   :  { %6456 = vmatpush1.bf16.msra.mxu1 %v6455_v28 }
 0x4ab   :  { %6457 = vmatprep.subr.bf16.mxu1 %v7484_v15 }
 0x4ae   :  { %6459 = vmatpush1.bf16.msra.mxu1 %v6458_v58 }
 0x4af   :  { %6460 = vmatprep.subr.bf16.mxu1 %v7484_v15 }
 0x4b2   :  { %6462 = vmatpush1.bf16.msra.mxu1 %v6461_v4 }
 0x4b3   :  { %6463 = vmatprep.subr.bf16.mxu1 %v7484_v15 }
 0x4b6   :  { %6465 = vmatpush1.bf16.msra.mxu1 %v6464_v5 }
 0x4b7   :  { %6466 = vmatprep.subr.bf16.mxu1 %v7484_v15 }
 0x4ba   :  { %6468 = vmatpush1.bf16.msra.mxu1 %v6467_v39 }
 0x4bb   :  { %6469 = vmatprep.subr.bf16.mxu1 %v7484_v15 }
 0x4be   :  { %6471 = vmatpush1.bf16.msra.mxu1 %v6470_v10 }
 0x4bf   :  { %6472 = vmatprep.subr.bf16.mxu1 %v7484_v15 }
 0x4c2   :  { %6474 = vmatpush1.bf16.msra.mxu1 %v6473_v13 }
 0x4c3   :  { %6475 = vmatprep.subr.bf16.mxu1 %v7484_v15 }
 0x4c6   :  { %6477 = vmatpush1.bf16.msra.mxu1 %v6476_v62 }
 0x4c7   :  { %6478 = vmatprep.subr.bf16.mxu1 %v7484_v15 }
 0x4ca   :  { %6480 = vmatpush1.bf16.msra.mxu1 %v6479_v49 }
 0x4cb   :  { %6481 = vmatprep.subr.bf16.mxu1 %v7484_v15 }
 0x4f0   :  { %v9932_v35 = vpop.f32.mrb[64].mxu1 }
 0x4f1   :  { %v3440_v7 = vpop.f32.mrb[65].mxu1  ;;  %v3629_v45 = vrot.slane %v9932_v35, 2 }
 0x4f4   :  { %v3443_v57 = vpop.f32.mrb[66].mxu1 }
 0x4f5   :  { %v3630_v32 = vrot.slane %v3443_v57, 2  ;;  %v3445_v18 = vpop.f32.mrb[67].mxu1 }
 0x4f7   :  { %v3631_v8 = vsel %vm175_vm2, %v3629_v45, %v3630_v32 }
 0x4f8   :  { %v3726_v24 = vadd.f32 %v3631_v8, %v9932_v35  ;;  %v3448_v14 = vpop.f32.mrb[68].mxu1 }
 0x4f9   :  { %v3632_v40 = vrot.slane %v3448_v14, 2  ;;  %v3450_v23 = vpop.f32.mrb[69].mxu1 }
 0x4fa   :  { %v9963_v30 = vmul.f32 0.5, %v3726_v24 }
 0x4fb   :  { %v3633_v63 = vsel %vm175_vm2, %v3630_v32, %v3632_v40 }
 0x4fc   :  { %v3727_v60 = vadd.f32 %v3633_v63, %v3443_v57  ;;  %v3453_v36 = vpop.f32.mrb[70].mxu1  ;;  %v3822_v48 = vrot.slane %v9963_v30, 4 }
 0x4fd   :  { %v3634_v50 = vrot.slane %v3453_v36, 2  ;;  %v3455_v61 = vpop.f32.mrb[71].mxu1 }
 0x4fe   :  { %v9960_v22 = vmul.f32 0.5, %v3727_v60 }
 0x4ff   :  { %v3635_v6 = vsel %vm175_vm2, %v3632_v40, %v3634_v50 }
 0x500   :  { %v3728_v31 = vadd.f32 %v3635_v6, %v3448_v14  ;;  %v3458_v56 = vpop.f32.mrb[72].mxu1  ;;  %v3823_v0 = vrot.slane %v9960_v22, 4 }
 0x501   :  { %v3636_v51 = vrot.slane %v3458_v56, 2  ;;  %v3460_v27 = vpop.f32.mrb[73].mxu1 }
 0x502   :  { %v9966_v54 = vmul.f32 0.5, %v3728_v31  ;;  %v9980_v3 = vsel %vm309_vm3, %v3822_v48, %v3823_v0 }
 0x503   :  { %v3637_v38 = vsel %vm175_vm2, %v3634_v50, %v3636_v51 }
 0x504   :  { %v3729_v59 = vadd.f32 %v3637_v38, %v3453_v36  ;;  %v3463_v34 = vpop.f32.mrb[74].mxu1  ;;  %v7245_v42 = vpack.i.bf16 %v9966_v54, %v9960_v22  ;;  %v3825_v20 = vrot.slane %v9966_v54, 4 }
 0x505   :  { %v3638_v21 = vrot.slane %v3463_v34, 2  ;;  %v3465_v43 = vpop.f32.mrb[75].mxu1 }
 0x506   :  { %v9974_v1 = vmul.f32 0.5, %v3729_v59  ;;  %7246 = vrot.lane.b32.xlu0 %v7245_v42, %s7481_s22  ;;  %v3826_v46 = vsel %vm309_vm3, %v3823_v0, %v3825_v20 }
 0x507   :  { %v3639_v2 = vsel %vm175_vm2, %v3636_v51, %v3638_v21  ;;  %v7250_v12 = vpack.i.bf16 %v3826_v46, %v9980_v3 }
 0x508   :  { %v3730_v28 = vadd.f32 %v3639_v2, %v3458_v56  ;;  %v3468_v41 = vpop.f32.mrb[76].mxu1  ;;  %v3827_v55 = vrot.slane %v9974_v1, 4 }
 0x509   :  { %v3640_v58 = vrot.slane %v3468_v41, 2  ;;  %7251 = vrot.lane.b32.xlu1 %v7250_v12, %s7489_s1  ;;  %v3470_v11 = vpop.f32.mrb[77].mxu1 }
 0x50a   :  { %v9987_v9 = vmul.f32 0.5, %v3730_v28  ;;  %v3828_v4 = vsel %vm309_vm3, %v3825_v20, %v3827_v55 }
 0x50b   :  { %v3641_v19 = vsel %vm175_vm2, %v3638_v21, %v3640_v58  ;;  %v7255_v33 = vpack.i.bf16 %v3828_v4, %v3826_v46 }
 0x50c   :  { %v3731_v5 = vadd.f32 %v3641_v19, %v3463_v34  ;;  %v3473_v52 = vpop.f32.mrb[78].mxu1  ;;  %v3829_v26 = vrot.slane %v9987_v9, 4  ;;  %v7260_v57 = vpack.i.bf16 %v9987_v9, %v9974_v1 }
 0x50d   :  { %v3642_v39 = vrot.slane %v3473_v52, 2  ;;  %7256 = vrot.lane.b32.xlu1 %v7255_v33, %s7490_s27  ;;  %v3475_v53 = vpop.f32.mrb[79].mxu1 }
 0x50e   :  { %v9993_v37 = vmul.f32 0.5, %v3731_v5  ;;  %v3830_v10 = vsel %vm309_vm3, %v3827_v55, %v3829_v26 }
 0x50f   :  { %v3643_v7 = vsel %vm175_vm2, %v3640_v58, %v3642_v39  ;;  %v7265_v29 = vpack.i.bf16 %v3830_v10, %v3828_v4 }
 0x510   :  { %v3732_v47 = vadd.f32 %v3643_v7, %v3468_v41  ;;  %v3478_v44 = vpop.f32.mrb[80].mxu1  ;;  %v3831_v32 = vrot.slane %v9993_v37, 4 }
 0x511   :  { %v3644_v18 = vrot.slane %v3478_v44, 2  ;;  %7261 = vrot.lane.b32.xlu1 %v7260_v57, %s7481_s22  ;;  %7266 = vrot.lane.b32.xlu0 %v7265_v29, %s7489_s1  ;;  %v3480_v13 = vpop.f32.mrb[81].mxu1 }
 0x512   :  { %v10002_v16 = vmul.f32 0.5, %v3732_v47  ;;  %v3832_v8 = vsel %vm309_vm3, %v3829_v26, %v3831_v32 }
 0x513   :  { %v3645_v62 = vsel %vm175_vm2, %v3642_v39, %v3644_v18  ;;  %v7270_v24 = vpack.i.bf16 %v3832_v8, %v3830_v10 }
 0x514   :  { %v3733_v14 = vadd.f32 %v3645_v62, %v3473_v52  ;;  %v3483_v40 = vpop.f32.mrb[82].mxu1  ;;  %v3833_v23 = vrot.slane %v10002_v16, 4  ;;  %v7275_v50 = vpack.i.bf16 %v10002_v16, %v9993_v37 }
 0x515   :  { %v3646_v63 = vrot.slane %v3483_v40, 2  ;;  %7271 = vrot.lane.b32.xlu0 %v7270_v24, %s7490_s27  ;;  %v3485_v60 = vpop.f32.mrb[83].mxu1 }
 0x516   :  { %v10008_v36 = vmul.f32 0.5, %v3733_v14  ;;  %v3834_v25 = vsel %vm309_vm3, %v3831_v32, %v3833_v23 }
 0x517   :  { %v3647_v17 = vsel %vm175_vm2, %v3644_v18, %v3646_v63  ;;  %v7280_v61 = vpack.i.bf16 %v3834_v25, %v3832_v8 }
 0x518   :  { %v3734_v49 = vadd.f32 %v3647_v17, %v3478_v44  ;;  %v3488_v6 = vpop.f32.mrb[84].mxu1  ;;  %v3835_v31 = vrot.slane %v10008_v36, 4 }
 0x519   :  { %v3648_v56 = vrot.slane %v3488_v6, 2  ;;  %7276 = vrot.lane.b32.xlu0 %v7275_v50, %s7481_s22  ;;  %7281 = vrot.lane.b32.xlu1 %v7280_v61, %s7489_s1  ;;  %v3490_v51 = vpop.f32.mrb[85].mxu1 }
 0x51a   :  { %v10017_v27 = vmul.f32 0.5, %v3734_v49  ;;  %v3836_v0 = vsel %vm309_vm3, %v3833_v23, %v3835_v31 }
 0x51b   :  { %v3649_v38 = vsel %vm175_vm2, %v3646_v63, %v3648_v56  ;;  %v7285_v59 = vpack.i.bf16 %v3836_v0, %v3834_v25 }
 0x51c   :  { %v3735_v34 = vadd.f32 %v3649_v38, %v3483_v40  ;;  %v3493_v42 = vpop.f32.mrb[86].mxu1  ;;  %v3837_v20 = vrot.slane %v10017_v27, 4  ;;  %v7290_v28 = vpack.i.bf16 %v10017_v27, %v10008_v36 }
 0x51d   :  { %v3650_v21 = vrot.slane %v3493_v42, 2  ;;  %7286 = vrot.lane.b32.xlu1 %v7285_v59, %s7490_s27  ;;  %v3495_v43 = vpop.f32.mrb[87].mxu1 }
 0x51e   :  { %v10023_v46 = vmul.f32 0.5, %v3735_v34  ;;  %v3838_v2 = vsel %vm309_vm3, %v3835_v31, %v3837_v20 }
 0x51f   :  { %v3651_v12 = vsel %vm175_vm2, %v3648_v56, %v3650_v21  ;;  %v7295_v41 = vpack.i.bf16 %v3838_v2, %v3836_v0 }
 0x520   :  { %v3736_v55 = vadd.f32 %v3651_v12, %v3488_v6  ;;  %v3498_v58 = vpop.f32.mrb[88].mxu1  ;;  %v3839_v11 = vrot.slane %v10023_v46, 4 }
 0x521   :  { %v3652_v4 = vrot.slane %v3498_v58, 2  ;;  %7291 = vrot.lane.b32.xlu1 %v7290_v28, %s7481_s22  ;;  %7296 = vrot.lane.b32.xlu0 %v7295_v41, %s7489_s1  ;;  %v3500_v19 = vpop.f32.mrb[89].mxu1 }
 0x522   :  { %v10032_v33 = vmul.f32 0.5, %v3736_v55  ;;  %v3840_v5 = vsel %vm309_vm3, %v3837_v20, %v3839_v11 }
 0x523   :  { %v3653_v52 = vsel %vm175_vm2, %v3650_v21, %v3652_v4  ;;  %v7300_v26 = vpack.i.bf16 %v3840_v5, %v3838_v2 }
 0x524   :  { %v3737_v39 = vadd.f32 %v3653_v52, %v3493_v42  ;;  %v3503_v53 = vpop.f32.mrb[90].mxu1  ;;  %v3841_v10 = vrot.slane %v10032_v33, 4  ;;  %v7305_v32 = vpack.i.bf16 %v10032_v33, %v10023_v46 }
 0x525   :  { %v3654_v7 = vrot.slane %v3503_v53, 2  ;;  %7301 = vrot.lane.b32.xlu0 %v7300_v26, %s7490_s27  ;;  %v3505_v57 = vpop.f32.mrb[91].mxu1 }
 0x526   :  { %v10038_v29 = vmul.f32 0.5, %v3737_v39  ;;  %v3842_v47 = vsel %vm309_vm3, %v3839_v11, %v3841_v10 }
 0x527   :  { %v3655_v44 = vsel %vm175_vm2, %v3652_v4, %v3654_v7  ;;  %v7310_v18 = vpack.i.bf16 %v3842_v47, %v3840_v5 }
 0x528   :  { %v3738_v13 = vadd.f32 %v3655_v44, %v3498_v58  ;;  %v3508_v8 = vpop.f32.mrb[92].mxu1  ;;  %v3843_v62 = vrot.slane %v10038_v29, 4 }
 0x529   :  { %v3656_v24 = vrot.slane %v3508_v8, 2  ;;  %7306 = vrot.lane.b32.xlu0 %v7305_v32, %s7481_s22  ;;  %7311 = vrot.lane.b32.xlu1 %v7310_v18, %s7489_s1  ;;  %v3510_v14 = vpop.f32.mrb[93].mxu1 }
 0x52a   :  { %v10047_v40 = vmul.f32 0.5, %v3738_v13  ;;  %v3844_v23 = vsel %vm309_vm3, %v3841_v10, %v3843_v62 }
 0x52b   :  { %v3657_v63 = vsel %vm175_vm2, %v3654_v7, %v3656_v24  ;;  %v7315_v60 = vpack.i.bf16 %v3844_v23, %v3842_v47 }
 0x52c   :  { %v3739_v25 = vadd.f32 %v3657_v63, %v3503_v53  ;;  %v3513_v17 = vpop.f32.mrb[94].mxu1  ;;  %v3845_v50 = vrot.slane %v10047_v40, 4  ;;  %v7320_v51 = vpack.i.bf16 %v10047_v40, %v10038_v29 }
 0x52d   :  { %v3658_v61 = vrot.slane %v3513_v17, 2  ;;  %7316 = vrot.lane.b32.xlu1 %v7315_v60, %s7490_s27  ;;  %v3515_v49 = vpop.f32.mrb[95].mxu1 }
 0x52e   :  { %v10053_v6 = vmul.f32 0.5, %v3739_v25  ;;  %v3846_v31 = vsel %vm309_vm3, %v3843_v62, %v3845_v50 }
 0x52f   :  { %v3659_v56 = vsel %vm175_vm2, %v3656_v24, %v3658_v61  ;;  %v7325_v0 = vpack.i.bf16 %v3846_v31, %v3844_v23 }
 0x530   :  { %v3740_v38 = vadd.f32 %v3659_v56, %v3508_v8  ;;  %v3518_v59 = vpop.f32.mrb[96].mxu1  ;;  %v3847_v34 = vrot.slane %v10053_v6, 4 }
 0x531   :  { %v3660_v42 = vrot.slane %v3518_v59, 2  ;;  %7321 = vrot.lane.b32.xlu1 %v7320_v51, %s7481_s22  ;;  %7326 = vrot.lane.b32.xlu0 %v7325_v0, %s7489_s1  ;;  %v3520_v20 = vpop.f32.mrb[97].mxu1 }
 0x532   :  { %v10062_v21 = vmul.f32 0.5, %v3740_v38  ;;  %v3848_v43 = vsel %vm309_vm3, %v3845_v50, %v3847_v34 }
 0x533   :  { %v3661_v2 = vsel %vm175_vm2, %v3658_v61, %v3660_v42  ;;  %v7330_v12 = vpack.i.bf16 %v3848_v43, %v3846_v31 }
 0x534   :  { %v3741_v28 = vadd.f32 %v3661_v2, %v3513_v17  ;;  %v3523_v41 = vpop.f32.mrb[98].mxu1  ;;  %v3849_v55 = vrot.slane %v10062_v21, 4  ;;  %v7335_v52 = vpack.i.bf16 %v10062_v21, %v10053_v6 }
 0x535   :  { %v3662_v58 = vrot.slane %v3523_v41, 2  ;;  %7331 = vrot.lane.b32.xlu0 %v7330_v12, %s7490_s27  ;;  %v3525_v11 = vpop.f32.mrb[99].mxu1 }
 0x536   :  { %v10068_v4 = vmul.f32 0.5, %v3741_v28  ;;  %v3850_v19 = vsel %vm309_vm3, %v3847_v34, %v3849_v55 }
 0x537   :  { %v3663_v5 = vsel %vm175_vm2, %v3660_v42, %v3662_v58  ;;  %v7340_v26 = vpack.i.bf16 %v3850_v19, %v3848_v43 }
 0x538   :  { %v3742_v39 = vadd.f32 %v3663_v5, %v3518_v59  ;;  %v3528_v53 = vpop.f32.mrb[100].mxu1  ;;  %v3851_v10 = vrot.slane %v10068_v4, 4 }
 0x539   :  { %v3664_v7 = vrot.slane %v3528_v53, 2  ;;  %7336 = vrot.lane.b32.xlu0 %v7335_v52, %s7481_s22  ;;  %7341 = vrot.lane.b32.xlu1 %v7340_v26, %s7489_s1  ;;  %v3530_v57 = vpop.f32.mrb[101].mxu1 }
 0x53a   :  { %v10077_v47 = vmul.f32 0.5, %v3742_v39  ;;  %v3852_v44 = vsel %vm309_vm3, %v3849_v55, %v3851_v10 }
 0x53b   :  { %v3665_v32 = vsel %vm175_vm2, %v3662_v58, %v3664_v7  ;;  %v7345_v18 = vpack.i.bf16 %v3852_v44, %v3850_v19 }
 0x53c   :  { %v3743_v13 = vadd.f32 %v3665_v32, %v3523_v41  ;;  %v3533_v8 = vpop.f32.mrb[102].mxu1  ;;  %v3853_v62 = vrot.slane %v10077_v47, 4  ;;  %v7350_v25 = vpack.i.bf16 %v10077_v47, %v10068_v4 }
 0x53d   :  { %v3666_v24 = vrot.slane %v3533_v8, 2  ;;  %7346 = vrot.lane.b32.xlu1 %v7345_v18, %s7490_s27  ;;  %v3535_v14 = vpop.f32.mrb[103].mxu1 }
 0x53e   :  { %v10083_v23 = vmul.f32 0.5, %v3743_v13  ;;  %v3854_v63 = vsel %vm309_vm3, %v3851_v10, %v3853_v62 }
 0x53f   :  { %v3667_v60 = vsel %vm175_vm2, %v3664_v7, %v3666_v24  ;;  %v7355_v17 = vpack.i.bf16 %v3854_v63, %v3852_v44 }
 0x540   :  { %v3744_v50 = vadd.f32 %v3667_v60, %v3528_v53  ;;  %v3538_v61 = vpop.f32.mrb[104].mxu1  ;;  %v3855_v49 = vrot.slane %v10083_v23, 4 }
 0x541   :  { %v3668_v31 = vrot.slane %v3538_v61, 2  ;;  %7351 = vrot.lane.b32.xlu1 %v7350_v25, %s7481_s22  ;;  %7356 = vrot.lane.b32.xlu0 %v7355_v17, %s7489_s1  ;;  %v3540_v56 = vpop.f32.mrb[105].mxu1 }
 0x542   :  { %v10092_v51 = vmul.f32 0.5, %v3744_v50  ;;  %v3856_v0 = vsel %vm309_vm3, %v3853_v62, %v3855_v49 }
 0x543   :  { %v3669_v38 = vsel %vm175_vm2, %v3666_v24, %v3668_v31  ;;  %v7360_v59 = vpack.i.bf16 %v3856_v0, %v3854_v63 }
 0x544   :  { %v3745_v34 = vadd.f32 %v3669_v38, %v3533_v8  ;;  %v3543_v42 = vpop.f32.mrb[106].mxu1  ;;  %v3857_v20 = vrot.slane %v10092_v51, 4  ;;  %v7365_v55 = vpack.i.bf16 %v10092_v51, %v10083_v23 }
 0x545   :  { %v3670_v43 = vrot.slane %v3543_v42, 2  ;;  %7361 = vrot.lane.b32.xlu0 %v7360_v59, %s7490_s27  ;;  %v3545_v2 = vpop.f32.mrb[107].mxu1 }
 0x546   :  { %v10098_v12 = vmul.f32 0.5, %v3745_v34  ;;  %v3858_v28 = vsel %vm309_vm3, %v3855_v49, %v3857_v20 }
 0x547   :  { %v3671_v41 = vsel %vm175_vm2, %v3668_v31, %v3670_v43  ;;  %v7370_v58 = vpack.i.bf16 %v3858_v28, %v3856_v0 }
 0x548   :  { %v3746_v11 = vadd.f32 %v3671_v41, %v3538_v61  ;;  %v3548_v19 = vpop.f32.mrb[108].mxu1  ;;  %v3859_v5 = vrot.slane %v10098_v12, 4 }
 0x549   :  { %v3672_v52 = vrot.slane %v3548_v19, 2  ;;  %7366 = vrot.lane.b32.xlu0 %v7365_v55, %s7481_s22  ;;  %7371 = vrot.lane.b32.xlu1 %v7370_v58, %s7489_s1  ;;  %v3550_v26 = vpop.f32.mrb[109].mxu1 }
 0x54a   :  { %v10107_v39 = vmul.f32 0.5, %v3746_v11  ;;  %v3860_v53 = vsel %vm309_vm3, %v3857_v20, %v3859_v5 }
 0x54b   :  { %v3673_v10 = vsel %vm175_vm2, %v3670_v43, %v3672_v52  ;;  %v7375_v7 = vpack.i.bf16 %v3860_v53, %v3858_v28 }
 0x54c   :  { %v3747_v57 = vadd.f32 %v3673_v10, %v3543_v42  ;;  %v3553_v44 = vpop.f32.mrb[110].mxu1  ;;  %v3861_v32 = vrot.slane %v10107_v39, 4  ;;  %v7380_v14 = vpack.i.bf16 %v10107_v39, %v10098_v12 }
 0x54d   :  { %v3674_v18 = vrot.slane %v3553_v44, 2  ;;  %7376 = vrot.lane.b32.xlu1 %v7375_v7, %s7490_s27  ;;  %v3555_v13 = vpop.f32.mrb[111].mxu1 }
 0x54e   :  { %v10113_v8 = vmul.f32 0.5, %v3747_v57  ;;  %v3862_v62 = vsel %vm309_vm3, %v3859_v5, %v3861_v32 }
 0x54f   :  { %v3675_v24 = vsel %vm175_vm2, %v3672_v52, %v3674_v18  ;;  %v7385_v63 = vpack.i.bf16 %v3862_v62, %v3860_v53 }
 0x550   :  { %v3748_v60 = vadd.f32 %v3675_v24, %v3548_v19  ;;  %v3558_v25 = vpop.f32.mrb[112].mxu1  ;;  %v3863_v17 = vrot.slane %v10113_v8, 4 }
 0x551   :  { %v3676_v50 = vrot.slane %v3558_v25, 2  ;;  %7381 = vrot.lane.b32.xlu1 %v7380_v14, %s7481_s22  ;;  %7386 = vrot.lane.b32.xlu0 %v7385_v63, %s7489_s1  ;;  %v3560_v61 = vpop.f32.mrb[113].mxu1 }
 0x552   :  { %v10122_v49 = vmul.f32 0.5, %v3748_v60  ;;  %v3864_v31 = vsel %vm309_vm3, %v3861_v32, %v3863_v17 }
 0x553   :  { %v3677_v56 = vsel %vm175_vm2, %v3674_v18, %v3676_v50  ;;  %v7390_v0 = vpack.i.bf16 %v3864_v31, %v3862_v62 }
 0x554   :  { %v3749_v38 = vadd.f32 %v3677_v56, %v3553_v44  ;;  %v3563_v59 = vpop.f32.mrb[114].mxu1  ;;  %v3865_v34 = vrot.slane %v10122_v49, 4  ;;  %v7395_v41 = vpack.i.bf16 %v10122_v49, %v10113_v8 }
 0x555   :  { %v3678_v42 = vrot.slane %v3563_v59, 2  ;;  %7391 = vrot.lane.b32.xlu0 %v7390_v0, %s7490_s27  ;;  %v3565_v20 = vpop.f32.mrb[115].mxu1 }
 0x556   :  { %v10128_v43 = vmul.f32 0.5, %v3749_v38  ;;  %v3866_v2 = vsel %vm309_vm3, %v3863_v17, %v3865_v34 }
 0x557   :  { %v3679_v28 = vsel %vm175_vm2, %v3676_v50, %v3678_v42  ;;  %v7400_v55 = vpack.i.bf16 %v3866_v2, %v3864_v31 }
 0x558   :  { %v3750_v58 = vadd.f32 %v3679_v28, %v3558_v25  ;;  %v3568_v11 = vpop.f32.mrb[116].mxu1  ;;  %v3867_v19 = vrot.slane %v10128_v43, 4 }
 0x559   :  { %v3680_v5 = vrot.slane %v3568_v11, 2  ;;  %7396 = vrot.lane.b32.xlu0 %v7395_v41, %s7481_s22  ;;  %7401 = vrot.lane.b32.xlu1 %v7400_v55, %s7489_s1  ;;  %v3570_v52 = vpop.f32.mrb[117].mxu1 }
 0x55a   :  { %v10137_v26 = vmul.f32 0.5, %v3750_v58  ;;  %v3868_v53 = vsel %vm309_vm3, %v3865_v34, %v3867_v19 }
 0x55b   :  { %v3681_v10 = vsel %vm175_vm2, %v3678_v42, %v3680_v5  ;;  %v7405_v7 = vpack.i.bf16 %v3868_v53, %v3866_v2 }
 0x55c   :  { %v3751_v57 = vadd.f32 %v3681_v10, %v3563_v59  ;;  %v3573_v44 = vpop.f32.mrb[118].mxu1  ;;  %v3869_v32 = vrot.slane %v10137_v26, 4  ;;  %v7410_v63 = vpack.i.bf16 %v10137_v26, %v10128_v43 }
 0x55d   :  { %v3682_v18 = vrot.slane %v3573_v44, 2  ;;  %7406 = vrot.lane.b32.xlu1 %v7405_v7, %s7490_s27  ;;  %v3575_v13 = vpop.f32.mrb[119].mxu1 }
 0x55e   :  { %v10143_v62 = vmul.f32 0.5, %v3751_v57  ;;  %v3870_v24 = vsel %vm309_vm3, %v3867_v19, %v3869_v32 }
 0x55f   :  { %v3683_v14 = vsel %vm175_vm2, %v3680_v5, %v3682_v18  ;;  %v7415_v60 = vpack.i.bf16 %v3870_v24, %v3868_v53 }
 0x560   :  { %v3752_v25 = vadd.f32 %v3683_v14, %v3568_v11  ;;  %v3578_v17 = vpop.f32.mrb[120].mxu1  ;;  %v3871_v50 = vrot.slane %v10143_v62, 4 }
 0x561   :  { %v3684_v61 = vrot.slane %v3578_v17, 2  ;;  %7411 = vrot.lane.b32.xlu1 %v7410_v63, %s7481_s22  ;;  %7416 = vrot.lane.b32.xlu0 %v7415_v60, %s7489_s1  ;;  %v3580_v31 = vpop.f32.mrb[121].mxu1 }
 0x562   :  { %v10152_v56 = vmul.f32 0.5, %v3752_v25  ;;  %v3872_v0 = vsel %vm309_vm3, %v3869_v32, %v3871_v50 }
 0x563   :  { %v3685_v38 = vsel %vm175_vm2, %v3682_v18, %v3684_v61  ;;  %v7420_v59 = vpack.i.bf16 %v3872_v0, %v3870_v24 }
 0x564   :  { %v3753_v34 = vadd.f32 %v3685_v38, %v3573_v44  ;;  %v3583_v42 = vpop.f32.mrb[122].mxu1  ;;  %v3873_v20 = vrot.slane %v10152_v56, 4  ;;  %v7425_v11 = vpack.i.bf16 %v10152_v56, %v10143_v62 }
 0x565   :  { %v3686_v2 = vrot.slane %v3583_v42, 2  ;;  %7421 = vrot.lane.b32.xlu0 %v7420_v59, %s7490_s27  ;;  %v3585_v28 = vpop.f32.mrb[123].mxu1 }
 0x566   :  { %v10158_v41 = vmul.f32 0.5, %v3753_v34  ;;  %v3874_v55 = vsel %vm309_vm3, %v3871_v50, %v3873_v20 }
 0x567   :  { %v3687_v58 = vsel %vm175_vm2, %v3684_v61, %v3686_v2  ;;  %v7430_v19 = vpack.i.bf16 %v3874_v55, %v3872_v0 }
 0x568   :  { %v3754_v5 = vadd.f32 %v3687_v58, %v3578_v17  ;;  %v3588_v52 = vpop.f32.mrb[124].mxu1  ;;  %v3875_v53 = vrot.slane %v10158_v41, 4 }
 0x569   :  { %v3688_v10 = vrot.slane %v3588_v52, 2  ;;  %7426 = vrot.lane.b32.xlu0 %v7425_v11, %s7481_s22  ;;  %7431 = vrot.lane.b32.xlu1 %v7430_v19, %s7489_s1  ;;  %v3590_v7 = vpop.f32.mrb[125].mxu1 }
 0x56a   :  { %v10167_v57 = vmul.f32 0.5, %v3754_v5  ;;  %v3876_v44 = vsel %vm309_vm3, %v3873_v20, %v3875_v53 }
 0x56b   :  { %v3689_v32 = vsel %vm175_vm2, %v3686_v2, %v3688_v10  ;;  %v7435_v18 = vpack.i.bf16 %v3876_v44, %v3874_v55 }
 0x56c   :  { %v3755_v13 = vadd.f32 %v3689_v32, %v3583_v42  ;;  %v3593_v24 = vpop.f32.mrb[126].mxu1  ;;  %v3877_v14 = vrot.slane %v10167_v57, 4  ;;  %v7440_v31 = vpack.i.bf16 %v10167_v57, %v10158_v41  ;;  %v4434_v32 = vld [vmem:[%s11107_s7 + $0x100] sm:$0xff] }
 0x56d   :  { %v3690_v63 = vrot.slane %v3593_v24, 2  ;;  %7436 = vrot.lane.b32.xlu1 %v7435_v18, %s7490_s27  ;;  %v3595_v60 = vpop.f32.mrb[127].mxu1 }
 0x56e   :  { %v10173_v25 = vmul.f32 0.5, %v3755_v13  ;;  %v3878_v17 = vsel %vm309_vm3, %v3875_v53, %v3877_v14 }
 0x56f   :  { %v3691_v50 = vsel %vm175_vm2, %v3688_v10, %v3690_v63  ;;  %v3725_v61 = vsel %vm175_vm2, %v3690_v63, %v3629_v45  ;;  %v7445_v0 = vpack.i.bf16 %v3878_v17, %v3876_v44 }
 0x570   :  { %v3756_v38 = vadd.f32 %v3691_v50, %v3588_v52  ;;  %v3757_v59 = vadd.f32 %v3725_v61, %v3593_v24  ;;  %v3879_v34 = vrot.slane %v10173_v25, 4 }
 0x571   :  { %7441 = vrot.lane.b32.xlu1 %v7440_v31, %s7481_s22  ;;  %7446 = vrot.lane.b32.xlu0 %v7445_v0, %s7489_s1  ;;  %v4436_v31 = vld [vmem:[%s11107_s7 + $0x110] sm:$0xff]  ;;  %v4437_v0 = vld [vmem:[%s11107_s7 + $0x118] sm:$0xff] }
 0x572   :  { %v10185_v42 = vmul.f32 0.5, %v3756_v38  ;;  %v10187_v20 = vmul.f32 0.5, %v3757_v59  ;;  %v3880_v35 = vsel %vm309_vm3, %v3877_v14, %v3879_v34 }
 0x573   :  { %v7450_v2 = vpack.i.bf16 %v3880_v35, %v3878_v17 }
 0x574   :  { %v3883_v45 = vrot.slane %v10187_v20, 4  ;;  %v3881_v28 = vrot.slane %v10185_v42, 4  ;;  %v7455_v58 = vpack.i.bf16 %v10185_v42, %v10173_v25 }
 0x575   :  { %7451 = vrot.lane.b32.xlu0 %v7450_v2, %s7490_s27 }
 0x576   :  { %v3882_v55 = vsel %vm309_vm3, %v3879_v34, %v3881_v28  ;;  %v3884_v19 = vsel %vm309_vm3, %v3881_v28, %v3883_v45  ;;  %v3887_v5 = vsel %vm309_vm3, %v3883_v45, %v3822_v48  ;;  %v4435_v48 = vld [vmem:[%s11107_s7 + $0x108] sm:$0xff] }
 0x577   :  { %v7460_v11 = vpack.i.bf16 %v3882_v55, %v3880_v35  ;;  %v7470_v53 = vpack.i.bf16 %v3887_v5, %v3884_v19  ;;  %v7465_v10 = vpack.i.bf16 %v3884_v19, %v3882_v55  ;;  %v6482_v50 = vpack.c.bf16 %v4435_v48, %v4434_v32  ;;  %v4440_v48 = vld [vmem:[%s11107_s7 + $0x130] sm:$0xff] }
 0x578   :  { %v7247_v7 = vpop.permute.xlu0 %7246  ;;  %v6485_v55 = vpack.c.bf16 %v4437_v0, %v4436_v31 }
 0x579   :  { %7456 = vrot.lane.b32.xlu0 %v7455_v58, %s7481_s22  ;;  %7461 = vrot.lane.b32.xlu1 %v7460_v11, %s7489_s1  ;;  %v7248_v18 = vunpack.i.l.bf16 %v7247_v7  ;;  %v7249_v60 = vunpack.i.h.bf16 %v7247_v7  ;;  %v4438_v58 = vld [vmem:[%s11107_s7 + $0x120] sm:$0xff]  ;;  %v4439_v11 = vld [vmem:[%s11107_s7 + $0x128] sm:$0xff] }
 0x57b   :  { %v7252_v52 = vpop.permute.xlu1 %7251 }
 0x57c   :  { %v7253_v44 = vunpack.i.l.bf16 %v7252_v52  ;;  %v7254_v13 = vunpack.i.h.bf16 %v7252_v52 }
 0x57d   :  { %7471 = vrot.lane.b32.xlu0 %v7470_v53, %s7489_s1  ;;  %7466 = vrot.lane.b32.xlu1 %v7465_v10, %s7490_s27 }
 0x57e   :  { %v4305_v17 = vsel %vm667_vm4, %v7253_v44, %v7248_v18  ;;  %v4273_v34 = vsel %vm2456_vm12, %v9963_v30, %v7253_v44  ;;  %v4306_v35 = vsel %vm667_vm4, %v7254_v13, %v7249_v60  ;;  %v4274_v53 = vsel %vm2456_vm12, %v9960_v22, %v7254_v13  ;;  %v4441_v18 = vld [vmem:[%s11107_s7 + $0x138] sm:$0xff] }
 0x57f   :  { %v10210_v24 = vpop.permute.xlu1 %7256  ;;  %v6488_v44 = vpack.c.bf16 %v4439_v11, %v4438_v58 }
 0x580   :  { %v7259_v14 = vunpack.i.h.bf16 %v10210_v24  ;;  %v7258_v63 = vunpack.i.l.bf16 %v10210_v24 }
 0x581   :  { %4141 = vrot.lane.b32.xlu0 %v3887_v5, %s7490_s27  ;;  %4045 = vrot.lane.b32.xlu1 %v10187_v20, %s7481_s22 }
 0x582   :  { %v4338_v61 = vsel %vm4337_vm13, %v4305_v17, %v7258_v63  ;;  %v4339_v2 = vsel %vm4337_vm13, %v4306_v35, %v7259_v14 }
 0x583   :  { %4588 = vmatprep.mubr.f32.mxu1 %v4338_v61  ;;  %v7262_v38 = vpop.permute.xlu1 %7261  ;;  %v7267_v59 = vpop.permute.xlu0 %7266 }
 0x584   :  { %4589 = vmatmul.mubr.f32.vlgmr.msra.gmra.mrb[128].mxu1 %v4273_v34  ;;  %v7263_v45 = vunpack.i.l.bf16 %v7262_v38  ;;  %v7268_v28 = vunpack.i.l.bf16 %v7267_v59  ;;  %v7264_v19 = vunpack.i.h.bf16 %v7262_v38  ;;  %v7269_v5 = vunpack.i.h.bf16 %v7267_v59  ;;  %v4443_v59 = vld [vmem:[%s11107_s7 + $0x148] sm:$0xff] }
 0x585   :  { %6483 = vmatpush1.bf16.msra.mxu1 %v6482_v50  ;;  %4593 = vmatprep.mubr.f32.mxu1 %v4339_v2  ;;  %v6491_v38 = vpack.c.bf16 %v4441_v18, %v4440_v48 }
 0x586   :  { %4143 = vrot.lane.b32.xlu0 %v9980_v3, %s7490_s27  ;;  %4047 = vrot.lane.b32.xlu1 %v9963_v30, %s7481_s22  ;;  %v4307_v7 = vsel %vm667_vm4, %v7268_v28, %v7263_v45  ;;  %v4275_v17 = vsel %vm2456_vm12, %v9966_v54, %v7268_v28  ;;  %v4308_v50 = vsel %vm667_vm4, %v7269_v5, %v7264_v19  ;;  %v4444_v19 = vld [vmem:[%s11107_s7 + $0x150] sm:$0xff] }
 0x587   :  { %v10243_v52 = vpop.permute.xlu0 %7271  ;;  %6484 = vmatprep.subr.bf16.mxu1 %v7484_v15  ;;  %v4276_v45 = vsel %vm2456_vm12, %v9974_v1, %v7269_v5  ;;  %v4445_v5 = vld [vmem:[%s11107_s7 + $0x158] sm:$0xff] }
 0x588   :  { %v7274_v3 = vunpack.i.h.bf16 %v10243_v52  ;;  %v7273_v10 = vunpack.i.l.bf16 %v10243_v52  ;;  %4594 = vmatmul.mubr.f32.gmra.mrb[130].mxu1 %v4274_v53 }
 0x589   :  { %6486 = vmatpush1.bf16.msra.mxu1 %v6485_v55 }
 0x58a   :  { %4179 = vrot.lane.b32.xlu0 %v9974_v1, %s7483_s28  ;;  %4177 = vrot.lane.b32.xlu1 %v9966_v54, %s7483_s28  ;;  %v4340_v32 = vsel %vm4337_vm13, %v4307_v7, %v7273_v10  ;;  %v4341_v61 = vsel %vm4337_vm13, %v4308_v50, %v7274_v3  ;;  %v4442_v54 = vld [vmem:[%s11107_s7 + $0x140] sm:$0xff] }
 0x58b   :  { %4598 = vmatprep.mubr.f32.mxu1 %v4340_v32  ;;  %v7277_v13 = vpop.permute.xlu0 %7276  ;;  %v7282_v60 = vpop.permute.xlu1 %7281  ;;  %6487 = vmatprep.subr.bf16.mxu1 %v7484_v15  ;;  %v6494_v11 = vpack.c.bf16 %v4443_v59, %v4442_v54 }
 0x58c   :  { %4599 = vmatmul.mubr.f32.gmra.mrb[132].mxu1 %v4275_v17  ;;  %v7278_v31 = vunpack.i.l.bf16 %v7277_v13  ;;  %v7283_v0 = vunpack.i.l.bf16 %v7282_v60  ;;  %v7279_v34 = vunpack.i.h.bf16 %v7277_v13  ;;  %v7284_v35 = vunpack.i.h.bf16 %v7282_v60  ;;  %v4447_v17 = vld [vmem:[%s11107_s7 + $0x168] sm:$0xff] }
 0x58d   :  { %4603 = vmatprep.mubr.f32.mxu1 %v4341_v61  ;;  %6489 = vmatpush1.bf16.msra.mxu1 %v6488_v44  ;;  %v6497_v60 = vpack.c.bf16 %v4445_v5, %v4444_v19 }
 0x58e   :  { %4183 = vrot.lane.b32.xlu0 %v9993_v37, %s7483_s28  ;;  %4181 = vrot.lane.b32.xlu1 %v9987_v9, %s7483_s28  ;;  %v4309_v58 = vsel %vm667_vm4, %v7283_v0, %v7278_v31  ;;  %v4277_v44 = vsel %vm2456_vm12, %v9987_v9, %v7283_v0  ;;  %v4310_v32 = vsel %vm667_vm4, %v7284_v35, %v7279_v34  ;;  %v4446_v9 = vld [vmem:[%s11107_s7 + $0x160] sm:$0xff] }
 0x58f   :  { %v10281_v2 = vpop.permute.xlu1 %7286  ;;  %6490 = vmatprep.subr.bf16.mxu1 %v7484_v15  ;;  %v4278_v0 = vsel %vm2456_vm12, %v9993_v37, %v7284_v35  ;;  %v6500_v34 = vpack.c.bf16 %v4447_v17, %v4446_v9  ;;  %v4448_v35 = vld [vmem:[%s11107_s7 + $0x170] sm:$0xff] }
 0x590   :  { %v7289_v28 = vunpack.i.h.bf16 %v10281_v2  ;;  %v7288_v55 = vunpack.i.l.bf16 %v10281_v2  ;;  %4604 = vmatmul.mubr.f32.gmra.mrb[134].mxu1 %v4276_v45  ;;  %v4449_v45 = vld [vmem:[%s11107_s7 + $0x178] sm:$0xff] }
 0x591   :  { %6492 = vmatpush1.bf16.msra.mxu1 %v6491_v38 }
 0x592   :  { %4187 = vrot.lane.b32.xlu0 %v10008_v36, %s7483_s28  ;;  %4185 = vrot.lane.b32.xlu1 %v10002_v16, %s7483_s28  ;;  %v4342_v1 = vsel %vm4337_vm13, %v4309_v58, %v7288_v55  ;;  %v4343_v48 = vsel %vm4337_vm13, %v4310_v32, %v7289_v28  ;;  %v4451_v32 = vld [vmem:[%s11107_s7 + $0x188] sm:$0xff] }
 0x593   :  { %4608 = vmatprep.mubr.f32.mxu1 %v4342_v1  ;;  %v7292_v53 = vpop.permute.xlu1 %7291  ;;  %v7297_v7 = vpop.permute.xlu0 %7296  ;;  %6493 = vmatprep.subr.bf16.mxu1 %v7484_v15 }
 0x594   :  { %4609 = vmatmul.mubr.f32.gmra.mrb[136].mxu1 %v4277_v44  ;;  %v7293_v18 = vunpack.i.l.bf16 %v7292_v53  ;;  %v7298_v13 = vunpack.i.l.bf16 %v7297_v7  ;;  %v7294_v50 = vunpack.i.h.bf16 %v7292_v53  ;;  %v7299_v61 = vunpack.i.h.bf16 %v7297_v7 }
 0x595   :  { %4613 = vmatprep.mubr.f32.mxu1 %v4343_v48  ;;  %6495 = vmatpush1.bf16.msra.mxu1 %v6494_v11  ;;  %v6503_v44 = vpack.c.bf16 %v4449_v45, %v4448_v35 }
 0x596   :  { %4191 = vrot.lane.b32.xlu0 %v10023_v46, %s7483_s28  ;;  %4189 = vrot.lane.b32.xlu1 %v10017_v27, %s7483_s28  ;;  %v4311_v59 = vsel %vm667_vm4, %v7298_v13, %v7293_v18  ;;  %v4279_v1 = vsel %vm2456_vm12, %v10002_v16, %v7298_v13  ;;  %v4312_v19 = vsel %vm667_vm4, %v7299_v61, %v7294_v50  ;;  %v4450_v16 = vld [vmem:[%s11107_s7 + $0x180] sm:$0xff] }
 0x597   :  { %v10319_v31 = vpop.permute.xlu0 %7301  ;;  %6496 = vmatprep.subr.bf16.mxu1 %v7484_v15 }
 0x598   :  { %v7304_v38 = vunpack.i.h.bf16 %v10319_v31  ;;  %v7303_v54 = vunpack.i.l.bf16 %v10319_v31  ;;  %4614 = vmatmul.mubr.f32.gmra.mrb[138].mxu1 %v4278_v0  ;;  %v6506_v0 = vpack.c.bf16 %v4451_v32, %v4450_v16 }
 0x599   :  { %6498 = vmatpush1.bf16.msra.mxu1 %v6497_v60  ;;  %v4280_v60 = vsel %vm2456_vm12, %v10008_v36, %v7299_v61 }
 0x59a   :  { %4195 = vrot.lane.b32.xlu0 %v10038_v29, %s7483_s28  ;;  %4193 = vrot.lane.b32.xlu1 %v10032_v33, %s7483_s28  ;;  %v4344_v37 = vsel %vm4337_vm13, %v4311_v59, %v7303_v54  ;;  %v4345_v5 = vsel %vm4337_vm13, %v4312_v19, %v7304_v38 }
 0x59b   :  { %4618 = vmatprep.mubr.f32.mxu1 %v4344_v37  ;;  %v7307_v58 = vpop.permute.xlu0 %7306  ;;  %v7312_v11 = vpop.permute.xlu1 %7311  ;;  %6499 = vmatprep.subr.bf16.mxu1 %v7484_v15 }
 0x59c   :  { %4619 = vmatmul.mubr.f32.gmra.mrb[140].mxu1 %v4279_v1  ;;  %v7308_v53 = vunpack.i.l.bf16 %v7307_v58  ;;  %v7313_v7 = vunpack.i.l.bf16 %v7312_v11  ;;  %v7309_v48 = vunpack.i.h.bf16 %v7307_v58  ;;  %v7314_v18 = vunpack.i.h.bf16 %v7312_v11 }
 0x59d   :  { %4623 = vmatprep.mubr.f32.mxu1 %v4345_v5  ;;  %6501 = vmatpush1.bf16.msra.mxu1 %v6500_v34 }
 0x59e   :  { %4199 = vrot.lane.b32.xlu0 %v10053_v6, %s7483_s28  ;;  %4197 = vrot.lane.b32.xlu1 %v10047_v40, %s7483_s28  ;;  %v4313_v50 = vsel %vm667_vm4, %v7313_v7, %v7308_v53  ;;  %v4281_v34 = vsel %vm2456_vm12, %v10017_v27, %v7313_v7  ;;  %v4314_v37 = vsel %vm667_vm4, %v7314_v18, %v7309_v48 }
 0x59f   :  { %v10357_v13 = vpop.permute.xlu1 %7316  ;;  %6502 = vmatprep.subr.bf16.mxu1 %v7484_v15 }
 0x5a0   :  { %v7319_v9 = vunpack.i.h.bf16 %v10357_v13  ;;  %v7318_v17 = vunpack.i.l.bf16 %v10357_v13  ;;  %4624 = vmatmul.mubr.f32.gmra.mrb[142].mxu1 %v4280_v60 }
 0x5a1   :  { %6504 = vmatpush1.bf16.msra.mxu1 %v6503_v44 }
 0x5a2   :  { %4203 = vrot.lane.b32.xlu0 %v10068_v4, %s7483_s28  ;;  %4201 = vrot.lane.b32.xlu1 %v10062_v21, %s7483_s28  ;;  %v4346_v36 = vsel %vm4337_vm13, %v4313_v50, %v7318_v17  ;;  %v4347_v35 = vsel %vm4337_vm13, %v4314_v37, %v7319_v9 }
 0x5a3   :  { %4628 = vmatprep.mubr.f32.mxu1 %v4346_v36  ;;  %v7322_v61 = vpop.permute.xlu1 %7321  ;;  %v7327_v59 = vpop.permute.xlu0 %7326  ;;  %6505 = vmatprep.subr.bf16.mxu1 %v7484_v15  ;;  %v4282_v15 = vsel %vm2456_vm12, %v10023_v46, %v7314_v18 }
 0x5a4   :  { %4629 = vmatmul.mubr.f32.gmra.mrb[144].mxu1 %v4281_v34  ;;  %v7323_v45 = vunpack.i.l.bf16 %v7322_v61  ;;  %v7328_v58 = vunpack.i.l.bf16 %v7327_v59  ;;  %v7324_v27 = vunpack.i.h.bf16 %v7322_v61  ;;  %v7329_v11 = vunpack.i.h.bf16 %v7327_v59 }
 0x5a5   :  { %4633 = vmatprep.mubr.f32.mxu1 %v4347_v35  ;;  %6507 = vmatpush1.bf16.msra.mxu1 %v6506_v0 }
 0x5a6   :  { %4207 = vrot.lane.b32.xlu0 %v10083_v23, %s7483_s28  ;;  %4205 = vrot.lane.b32.xlu1 %v10077_v47, %s7483_s28  ;;  %v4315_v53 = vsel %vm667_vm4, %v7328_v58, %v7323_v45  ;;  %v4283_v16 = vsel %vm2456_vm12, %v10032_v33, %v7328_v58  ;;  %v4316_v32 = vsel %vm667_vm4, %v7329_v11, %v7324_v27 }
 0x5a7   :  { %v10383_v1 = vpop.permute.xlu0 %7331  ;;  %v4284_v33 = vsel %vm2456_vm12, %v10038_v29, %v7329_v11 }
 0x5a8   :  { %v7334_v19 = vunpack.i.h.bf16 %v10383_v1  ;;  %v7333_v5 = vunpack.i.l.bf16 %v10383_v1  ;;  %4634 = vmatmul.mubr.f32.gmra.mrb[146].mxu1 %v4282_v15 }
 0x5aa   :  { %4211 = vrot.lane.b32.xlu0 %v10098_v12, %s7483_s28  ;;  %4209 = vrot.lane.b32.xlu1 %v10092_v51, %s7483_s28  ;;  %v4348_v7 = vsel %vm4337_vm13, %v4315_v53, %v7333_v5  ;;  %v4349_v48 = vsel %vm4337_vm13, %v4316_v32, %v7334_v19 }
 0x5ab   :  { %4638 = vmatprep.mubr.f32.mxu1 %v4348_v7  ;;  %v7337_v44 = vpop.permute.xlu0 %7336  ;;  %v7342_v46 = vpop.permute.xlu1 %7341 }
 0x5ac   :  { %4639 = vmatmul.mubr.f32.gmra.mrb[148].mxu1 %v4283_v16  ;;  %v7338_v18 = vunpack.i.l.bf16 %v7337_v44  ;;  %v7343_v60 = vunpack.i.l.bf16 %v7342_v46  ;;  %v7339_v50 = vunpack.i.h.bf16 %v7337_v44  ;;  %v7344_v0 = vunpack.i.h.bf16 %v7342_v46 }
 0x5ad   :  { %4643 = vmatprep.mubr.f32.mxu1 %v4349_v48 }
 0x5ae   :  { %4215 = vrot.lane.b32.xlu0 %v10113_v8, %s7483_s28  ;;  %4213 = vrot.lane.b32.xlu1 %v10107_v39, %s7483_s28  ;;  %v4317_v34 = vsel %vm667_vm4, %v7343_v60, %v7338_v18  ;;  %v4285_v45 = vsel %vm2456_vm12, %v10047_v40, %v7343_v60  ;;  %v4318_v58 = vsel %vm667_vm4, %v7344_v0, %v7339_v50 }
 0x5af   :  { %v10407_v36 = vpop.permute.xlu1 %7346  ;;  %v4286_v40 = vsel %vm2456_vm12, %v10053_v6, %v7344_v0 }
 0x5b0   :  { %v7349_v61 = vunpack.i.h.bf16 %v10407_v36  ;;  %v7348_v59 = vunpack.i.l.bf16 %v10407_v36  ;;  %4644 = vmatmul.mubr.f32.gmra.mrb[150].mxu1 %v4284_v33 }
 0x5b2   :  { %4219 = vrot.lane.b32.xlu0 %v10128_v43, %s7483_s28  ;;  %4217 = vrot.lane.b32.xlu1 %v10122_v49, %s7483_s28  ;;  %v4350_v37 = vsel %vm4337_vm13, %v4317_v34, %v7348_v59  ;;  %v4351_v27 = vsel %vm4337_vm13, %v4318_v58, %v7349_v61 }
 0x5b3   :  { %4648 = vmatprep.mubr.f32.mxu1 %v4350_v37  ;;  %v7352_v35 = vpop.permute.xlu1 %7351  ;;  %v7357_v29 = vpop.permute.xlu0 %7356 }
 0x5b4   :  { %4649 = vmatmul.mubr.f32.gmra.mrb[152].mxu1 %v4285_v45  ;;  %v7353_v11 = vunpack.i.l.bf16 %v7352_v35  ;;  %v7358_v15 = vunpack.i.l.bf16 %v7357_v29  ;;  %v7354_v53 = vunpack.i.h.bf16 %v7352_v35  ;;  %v7359_v7 = vunpack.i.h.bf16 %v7357_v29 }
 0x5b5   :  { %4653 = vmatprep.mubr.f32.mxu1 %v4351_v27 }
 0x5b6   :  { %4223 = vrot.lane.b32.xlu0 %v10143_v62, %s7483_s28  ;;  %4221 = vrot.lane.b32.xlu1 %v10137_v26, %s7483_s28  ;;  %v4319_v32 = vsel %vm667_vm4, %v7358_v15, %v7353_v11  ;;  %v4287_v60 = vsel %vm2456_vm12, %v10062_v21, %v7358_v15  ;;  %v4320_v50 = vsel %vm667_vm4, %v7359_v7, %v7354_v53 }
 0x5b7   :  { %v10431_v44 = vpop.permute.xlu0 %7361  ;;  %v4288_v21 = vsel %vm2456_vm12, %v10068_v4, %v7359_v7 }
 0x5b8   :  { %v7364_v46 = vunpack.i.h.bf16 %v10431_v44  ;;  %v7363_v16 = vunpack.i.l.bf16 %v10431_v44  ;;  %4654 = vmatmul.mubr.f32.gmra.mrb[154].mxu1 %v4286_v40 }
 0x5ba   :  { %4227 = vrot.lane.b32.xlu0 %v10158_v41, %s7483_s28  ;;  %4225 = vrot.lane.b32.xlu1 %v10152_v56, %s7483_s28  ;;  %v4352_v48 = vsel %vm4337_vm13, %v4319_v32, %v7363_v16  ;;  %v4353_v0 = vsel %vm4337_vm13, %v4320_v50, %v7364_v46 }
 0x5bb   :  { %4658 = vmatprep.mubr.f32.mxu1 %v4352_v48  ;;  %v7367_v18 = vpop.permute.xlu0 %7366  ;;  %v7372_v6 = vpop.permute.xlu1 %7371 }
 0x5bc   :  { %4659 = vmatmul.mubr.f32.gmra.mrb[156].mxu1 %v4287_v60  ;;  %v7368_v33 = vunpack.i.l.bf16 %v7367_v18  ;;  %v7373_v34 = vunpack.i.l.bf16 %v7372_v6  ;;  %v7369_v37 = vunpack.i.h.bf16 %v7367_v18  ;;  %v7374_v35 = vunpack.i.h.bf16 %v7372_v6 }
 0x5bd   :  { %4663 = vmatprep.mubr.f32.mxu1 %v4353_v0 }
 0x5be   :  { %4231 = vrot.lane.b32.xlu0 %v10173_v25, %s7483_s28  ;;  %4229 = vrot.lane.b32.xlu1 %v10167_v57, %s7483_s28  ;;  %v4321_v27 = vsel %vm667_vm4, %v7373_v34, %v7368_v33  ;;  %v4289_v53 = vsel %vm2456_vm12, %v10077_v47, %v7373_v34  ;;  %v4322_v7 = vsel %vm667_vm4, %v7374_v35, %v7369_v37 }
 0x5bf   :  { %v10455_v29 = vpop.permute.xlu1 %7376  ;;  %v4290_v47 = vsel %vm2456_vm12, %v10083_v23, %v7374_v35 }
 0x5c0   :  { %v7379_v45 = vunpack.i.h.bf16 %v10455_v29  ;;  %v7378_v58 = vunpack.i.l.bf16 %v10455_v29  ;;  %4664 = vmatmul.mubr.f32.gmra.mrb[158].mxu1 %v4288_v21 }
 0x5c2   :  { %4235 = vrot.lane.b32.xlu0 %v10187_v20, %s7483_s28  ;;  %4233 = vrot.lane.b32.xlu1 %v10185_v42, %s7483_s28  ;;  %v4354_v11 = vsel %vm4337_vm13, %v4321_v27, %v7378_v58  ;;  %v4355_v40 = vsel %vm4337_vm13, %v4322_v7, %v7379_v45 }
 0x5c3   :  { %4668 = vmatprep.mubr.f32.mxu1 %v4354_v11  ;;  %v7382_v15 = vpop.permute.xlu1 %7381  ;;  %v7387_v4 = vpop.permute.xlu0 %7386 }
 0x5c4   :  { %4669 = vmatmul.mubr.f32.gmra.mrb[160].mxu1 %v4289_v53  ;;  %v7383_v32 = vunpack.i.l.bf16 %v7382_v15  ;;  %v7388_v48 = vunpack.i.l.bf16 %v7387_v4  ;;  %v7384_v18 = vunpack.i.h.bf16 %v7382_v15  ;;  %v7389_v6 = vunpack.i.h.bf16 %v7387_v4 }
 0x5c5   :  { %4673 = vmatprep.mubr.f32.mxu1 %v4355_v40 }
 0x5c6   :  { %4239 = vrot.lane.b32.xlu0 %v9960_v22, %s7483_s28  ;;  %4237 = vrot.lane.b32.xlu1 %v9963_v30, %s7483_s28  ;;  %v4323_v33 = vsel %vm667_vm4, %v7388_v48, %v7383_v32  ;;  %v4291_v37 = vsel %vm2456_vm12, %v10092_v51, %v7388_v48  ;;  %v4324_v21 = vsel %vm667_vm4, %v7389_v6, %v7384_v18 }
 0x5c7   :  { %v10479_v60 = vpop.permute.xlu0 %7391  ;;  %v4292_v53 = vsel %vm2456_vm12, %v10098_v12, %v7389_v6 }
 0x5c8   :  { %v7394_v50 = vunpack.i.h.bf16 %v10479_v60  ;;  %v7393_v0 = vunpack.i.l.bf16 %v10479_v60  ;;  %4674 = vmatmul.mubr.f32.gmra.mrb[162].mxu1 %v4290_v47  ;;  %v5018_v60 = vld [vmem:[%s11108_s9 + $0x60] sm:$0xff] }
 0x5ca   :  { %v4356_v22 = vsel %vm4337_vm13, %v4323_v33, %v7393_v0  ;;  %v4357_v23 = vsel %vm4337_vm13, %v4324_v21, %v7394_v50 }
 0x5cb   :  { %4678 = vmatprep.mubr.f32.mxu1 %v4356_v22  ;;  %v7397_v30 = vpop.permute.xlu0 %7396  ;;  %v7402_v34 = vpop.permute.xlu1 %7401 }
 0x5cc   :  { %4679 = vmatmul.mubr.f32.gmra.mrb[164].mxu1 %v4291_v37  ;;  %v7398_v35 = vunpack.i.l.bf16 %v7397_v30  ;;  %v7403_v27 = vunpack.i.l.bf16 %v7402_v34  ;;  %v7399_v11 = vunpack.i.h.bf16 %v7397_v30  ;;  %v7404_v15 = vunpack.i.h.bf16 %v7402_v34 }
 0x5cd   :  { %4683 = vmatprep.mubr.f32.mxu1 %v4357_v23 }
 0x5ce   :  { %v4325_v40 = vsel %vm667_vm4, %v7403_v27, %v7398_v35  ;;  %v4293_v47 = vsel %vm2456_vm12, %v10107_v39, %v7403_v27  ;;  %v4326_v33 = vsel %vm667_vm4, %v7404_v15, %v7399_v11  ;;  %v4294_v21 = vsel %vm2456_vm12, %v10113_v8, %v7404_v15 }
 0x5cf   :  { %v10495_v4 = vpop.permute.xlu1 %7406 }
 0x5d0   :  { %v7409_v7 = vunpack.i.h.bf16 %v10495_v4  ;;  %v7408_v51 = vunpack.i.l.bf16 %v10495_v4  ;;  %4684 = vmatmul.mubr.f32.gmra.mrb[166].mxu1 %v4292_v53 }
 0x5d2   :  { %v4358_v32 = vsel %vm4337_vm13, %v4325_v40, %v7408_v51  ;;  %v4359_v12 = vsel %vm4337_vm13, %v4326_v33, %v7409_v7 }
 0x5d3   :  { %4688 = vmatprep.mubr.f32.mxu1 %v4358_v32  ;;  %v7412_v48 = vpop.permute.xlu1 %7411  ;;  %v7417_v18 = vpop.permute.xlu0 %7416 }
 0x5d4   :  { %4689 = vmatmul.mubr.f32.gmra.mrb[168].mxu1 %v4293_v47  ;;  %v7413_v6 = vunpack.i.l.bf16 %v7412_v48  ;;  %v7418_v22 = vunpack.i.l.bf16 %v7417_v18  ;;  %v7414_v30 = vunpack.i.h.bf16 %v7412_v48  ;;  %v7419_v34 = vunpack.i.h.bf16 %v7417_v18 }
 0x5d5   :  { %4693 = vmatprep.mubr.f32.mxu1 %v4359_v12 }
 0x5d6   :  { %v4327_v35 = vsel %vm667_vm4, %v7418_v22, %v7413_v6  ;;  %v4295_v40 = vsel %vm2456_vm12, %v10122_v49, %v7418_v22  ;;  %v4328_v32 = vsel %vm667_vm4, %v7419_v34, %v7414_v30  ;;  %v4296_v12 = vsel %vm2456_vm12, %v10128_v43, %v7419_v34 }
 0x5d7   :  { %v10511_v37 = vpop.permute.xlu0 %7421 }
 0x5d8   :  { %v7424_v23 = vunpack.i.h.bf16 %v10511_v37  ;;  %v7423_v39 = vunpack.i.l.bf16 %v10511_v37  ;;  %4694 = vmatmul.mubr.f32.gmra.mrb[170].mxu1 %v4294_v21 }
 0x5da   :  { %v4360_v27 = vsel %vm4337_vm13, %v4327_v35, %v7423_v39  ;;  %v4361_v8 = vsel %vm4337_vm13, %v4328_v32, %v7424_v23 }
 0x5db   :  { %4698 = vmatprep.mubr.f32.mxu1 %v4360_v27  ;;  %v7427_v11 = vpop.permute.xlu0 %7426  ;;  %v7432_v53 = vpop.permute.xlu1 %7431 }
 0x5dc   :  { %4699 = vmatmul.mubr.f32.gmra.mrb[172].mxu1 %v4295_v40  ;;  %v7428_v15 = vunpack.i.l.bf16 %v7427_v11  ;;  %v7433_v48 = vunpack.i.l.bf16 %v7432_v53  ;;  %v7429_v18 = vunpack.i.h.bf16 %v7427_v11  ;;  %v7434_v47 = vunpack.i.h.bf16 %v7432_v53 }
 0x5dd   :  { %4703 = vmatprep.mubr.f32.mxu1 %v4361_v8 }
 0x5de   :  { %v4329_v22 = vsel %vm667_vm4, %v7433_v48, %v7428_v15  ;;  %v4297_v27 = vsel %vm2456_vm12, %v10137_v26, %v7433_v48  ;;  %v4330_v11 = vsel %vm667_vm4, %v7434_v47, %v7429_v18  ;;  %v4298_v15 = vsel %vm2456_vm12, %v10143_v62, %v7434_v47 }
 0x5df   :  { %v10527_v33 = vpop.permute.xlu1 %7436 }
 0x5e0   :  { %v7439_v6 = vunpack.i.h.bf16 %v10527_v33  ;;  %v7438_v49 = vunpack.i.l.bf16 %v10527_v33  ;;  %4704 = vmatmul.mubr.f32.gmra.mrb[174].mxu1 %v4296_v12 }
 0x5e2   :  { %v4362_v30 = vsel %vm4337_vm13, %v4329_v22, %v7438_v49  ;;  %v4363_v43 = vsel %vm4337_vm13, %v4330_v11, %v7439_v6 }
 0x5e3   :  { %4708 = vmatprep.mubr.f32.mxu1 %v4362_v30  ;;  %v7442_v21 = vpop.permute.xlu1 %7441  ;;  %v7447_v35 = vpop.permute.xlu0 %7446 }
 0x5e4   :  { %4709 = vmatmul.mubr.f32.gmra.mrb[176].mxu1 %v4297_v27  ;;  %v7443_v34 = vunpack.i.l.bf16 %v7442_v21  ;;  %v7448_v53 = vunpack.i.l.bf16 %v7447_v35  ;;  %v7444_v40 = vunpack.i.h.bf16 %v7442_v21  ;;  %v7449_v32 = vunpack.i.h.bf16 %v7447_v35 }
 0x5e5   :  { %4713 = vmatprep.mubr.f32.mxu1 %v4363_v43 }
 0x5e6   :  { %v4331_v48 = vsel %vm667_vm4, %v7448_v53, %v7443_v34  ;;  %v4299_v21 = vsel %vm2456_vm12, %v10152_v56, %v7448_v53  ;;  %v4332_v35 = vsel %vm667_vm4, %v7449_v32, %v7444_v40 }
 0x5e7   :  { %v10543_v8 = vpop.permute.xlu0 %7451 }
 0x5e8   :  { %v7454_v12 = vunpack.i.h.bf16 %v10543_v8  ;;  %v7453_v26 = vunpack.i.l.bf16 %v10543_v8  ;;  %4714 = vmatmul.mubr.f32.gmra.mrb[178].mxu1 %v4298_v15 }
 0x5ea   :  { %v4364_v18 = vsel %vm4337_vm13, %v4331_v48, %v7453_v26  ;;  %v4365_v62 = vsel %vm4337_vm13, %v4332_v35, %v7454_v12  ;;  %v4300_v48 = vsel %vm2456_vm12, %v10158_v41, %v7449_v32 }
 0x5eb   :  { %4718 = vmatprep.mubr.f32.mxu1 %v4364_v18  ;;  %v7457_v22 = vpop.permute.xlu0 %7456  ;;  %v7462_v30 = vpop.permute.xlu1 %7461 }
 0x5ec   :  { %4719 = vmatmul.mubr.f32.gmra.mrb[180].mxu1 %v4299_v21  ;;  %v7458_v47 = vunpack.i.l.bf16 %v7457_v22  ;;  %v7463_v27 = vunpack.i.l.bf16 %v7462_v30  ;;  %v7459_v11 = vunpack.i.h.bf16 %v7457_v22  ;;  %v7464_v43 = vunpack.i.h.bf16 %v7462_v30 }
 0x5ed   :  { %4723 = vmatprep.mubr.f32.mxu1 %v4365_v62 }
 0x5ee   :  { %v4333_v40 = vsel %vm667_vm4, %v7463_v27, %v7458_v47  ;;  %v4301_v35 = vsel %vm2456_vm12, %v10167_v57, %v7463_v27  ;;  %v4334_v41 = vsel %vm667_vm4, %v7464_v43, %v7459_v11 }
 0x5ef   :  { %v7472_v34 = vpop.permute.xlu0 %7471  ;;  %v10559_v15 = vpop.permute.xlu1 %7466 }
 0x5f0   :  { %v7469_v56 = vunpack.i.h.bf16 %v10559_v15  ;;  %v7468_v53 = vunpack.i.l.bf16 %v10559_v15  ;;  %4724 = vmatmul.mubr.f32.gmra.mrb[182].mxu1 %v4300_v48  ;;  %v7473_v21 = vunpack.i.l.bf16 %v7472_v34  ;;  %v7474_v47 = vunpack.i.h.bf16 %v7472_v34  ;;  %v10765_v15 = vld [vmem:[%s11109_s8] ss:$0 sm:$0xff] }
 0x5f1   :  { %v4302_v48 = vsel %vm2456_vm12, %v10173_v25, %v7464_v43 }
 0x5f2   :  { %v4366_v18 = vsel %vm4337_vm13, %v4333_v40, %v7468_v53  ;;  %v4367_v32 = vsel %vm4337_vm13, %v4334_v41, %v7469_v56  ;;  %v4303_v11 = vsel %vm2456_vm12, %v10185_v42, %v7473_v21  ;;  %v4304_v25 = vsel %vm2456_vm12, %v10187_v20, %v7474_v47  ;;  %v5007_v42 = vld [vmem:[%s11108_s9 + $0x8] sm:$0xff]  ;;  %v5009_v20 = vld [vmem:[%s11108_s9 + $0x18] sm:$0xff] }
 0x5f3   :  { %v10569_v22 = vpop.permute.xlu0 %4141  ;;  %v4046_v30 = vpop.permute.xlu1 %4045  ;;  %4728 = vmatprep.mubr.f32.mxu1 %v4366_v18 }
 0x5f4   :  { %4729 = vmatmul.mubr.f32.gmra.mrb[184].mxu1 %v4301_v35  ;;  %v4335_v62 = vsel %vm667_vm4, %v7473_v21, %v4046_v30  ;;  %v5006_v30 = vld [vmem:[%s11108_s9] sm:$0xff]  ;;  %v5008_v21 = vld [vmem:[%s11108_s9 + $0x10] sm:$0xff] }
 0x5f5   :  { %4733 = vmatprep.mubr.f32.mxu1 %v4367_v32  ;;  %v4368_v18 = vsel %vm4337_vm13, %v4335_v62, %v10569_v22  ;;  %v6508_v35 = vpack.c.bf16 %v5007_v42, %v5006_v30  ;;  %v6512_v32 = vpack.c.bf16 %v5009_v20, %v5008_v21  ;;  %v5010_v62 = vld [vmem:[%s11108_s9 + $0x20] sm:$0xff]  ;;  %v5017_v21 = vld [vmem:[%s11108_s9 + $0x58] sm:$0xff] }
 0x5f7   :  { %6509 = vmatprep.subr.bf16.mxu0 %v6508_v35 }
 0x5f8   :  { %v4048_v40 = vpop.permute.xlu1 %4047  ;;  %4734 = vmatmul.mubr.f32.gmra.mrb[186].mxu1 %v4302_v48  ;;  %v10582_v57 = vpop.permute.xlu0 %4143  ;;  %6511 = vmatpush3.bf16.msra.mxu0 %v6508_v35 }
 0x5f9   :  { %v4336_v27 = vsel %vm667_vm4, %v7474_v47, %v4048_v40  ;;  %4738 = vmatprep.mubr.f32.mxu1 %v4368_v18  ;;  %v5011_v47 = vld [vmem:[%s11108_s9 + $0x28] sm:$0xff]  ;;  %6513 = vmatprep.subr.bf16.mxu0 %v6512_v32  ;;  %v5012_v18 = vld [vmem:[%s11108_s9 + $0x30] sm:$0xff] }
 0x5fa   :  { %v4369_v34 = vsel %vm4337_vm13, %v4336_v27, %v10582_v57  ;;  %v6516_v40 = vpack.c.bf16 %v5011_v47, %v5010_v62  ;;  %v5013_v27 = vld [vmem:[%s11108_s9 + $0x38] sm:$0xff] }
 0x5fc   :  { %4739 = vmatmul.mubr.f32.gmra.mrb[188].mxu1 %v4303_v11  ;;  %v4178_v43 = vpop.permute.xlu1 %4177  ;;  %v4180_v48 = vpop.permute.xlu0 %4179  ;;  %6515 = vmatpush3.bf16.msra.mxu0 %v6512_v32 }
 0x5fd   :  { %4743 = vmatprep.mubr.f32.mxu1 %v4369_v34  ;;  %v4370_v41 = vsel %vm700_vm5, %v7258_v63, %v4178_v43  ;;  %v4371_v63 = vsel %vm700_vm5, %v7259_v14, %v4180_v48  ;;  %6517 = vmatprep.subr.bf16.mxu0 %v6516_v40  ;;  %v6520_v34 = vpack.c.bf16 %v5013_v27, %v5012_v18  ;;  %v5014_v14 = vld [vmem:[%s11108_s9 + $0x40] sm:$0xff] }
 0x600   :  { %4744 = vmatmul.mubr.f32.gmra.mrb[190].mxu1 %v4304_v25  ;;  %v4182_v11 = vpop.permute.xlu1 %4181  ;;  %v5015_v25 = vld [vmem:[%s11108_s9 + $0x48] sm:$0xff]  ;;  %6519 = vmatpush3.bf16.msra.mxu0 %v6516_v40 }
 0x601   :  { %5892 = vmatprep.mubr.msk.f32.mxu1 %vm4459_vm14, %v4178_v43  ;;  %v4372_v24 = vsel %vm700_vm5, %v7273_v10, %v4182_v11  ;;  %v4184_v43 = vpop.permute.xlu0 %4183  ;;  %6521 = vmatprep.subr.bf16.mxu0 %v6520_v34  ;;  %v6524_v30 = vpack.c.bf16 %v5015_v25, %v5014_v14  ;;  %v5016_v10 = vld [vmem:[%s11108_s9 + $0x50] sm:$0xff] }
 0x602   :  { %v4373_v42 = vsel %vm700_vm5, %v7274_v3, %v4184_v43  ;;  %v6528_v20 = vpack.c.bf16 %v5017_v21, %v5016_v10 }
 0x604   :  { %4814 = vmatmul.mubr.f32.vlgmr.msra.gmra.mrb[128].mxu1 %v4370_v41  ;;  %v4186_v35 = vpop.permute.xlu1 %4185  ;;  %6523 = vmatpush3.bf16.msra.mxu0 %v6520_v34 }
 0x605   :  { %5893 = vmatprep.mubr.msk.f32.mxu1 %vm4459_vm14, %v4180_v48  ;;  %6525 = vmatprep.subr.bf16.mxu0 %v6524_v30  ;;  %v4374_v52 = vsel %vm700_vm5, %v7288_v55, %v4186_v35  ;;  %v4188_v3 = vpop.permute.xlu0 %4187 }
 0x606   :  { %v4375_v41 = vsel %vm700_vm5, %v7289_v28, %v4188_v3 }
 0x608   :  { %4819 = vmatmul.mubr.f32.gmra.mrb[130].mxu1 %v4371_v63  ;;  %6527 = vmatpush3.bf16.msra.mxu0 %v6524_v30  ;;  %v4190_v32 = vpop.permute.xlu1 %4189 }
 0x609   :  { %5894 = vmatprep.mubr.msk.f32.mxu1 %vm4459_vm14, %v4182_v11  ;;  %6529 = vmatprep.subr.bf16.mxu0 %v6528_v20  ;;  %v4376_v62 = vsel %vm700_vm5, %v7303_v54, %v4190_v32  ;;  %v4192_v55 = vpop.permute.xlu0 %4191 }
 0x60a   :  { %v4377_v47 = vsel %vm700_vm5, %v7304_v38, %v4192_v55 }
 0x60c   :  { %4824 = vmatmul.mubr.f32.gmra.mrb[132].mxu1 %v4372_v24  ;;  %6531 = vmatpush3.bf16.msra.mxu0 %v6528_v20  ;;  %v4194_v2 = vpop.permute.xlu1 %4193 }
 0x60d   :  { %5895 = vmatprep.mubr.msk.f32.mxu1 %vm4459_vm14, %v4184_v43  ;;  %v4378_v28 = vsel %vm700_vm5, %v7318_v17, %v4194_v2  ;;  %v4196_v48 = vpop.permute.xlu0 %4195 }
 0x60e   :  { %v4379_v54 = vsel %vm700_vm5, %v7319_v9, %v4196_v48 }
 0x610   :  { %4829 = vmatmul.mubr.f32.gmra.mrb[134].mxu1 %v4373_v42  ;;  %v4198_v40 = vpop.permute.xlu1 %4197 }
 0x611   :  { %5896 = vmatprep.mubr.msk.f32.mxu1 %vm4459_vm14, %v4186_v35  ;;  %v4380_v31 = vsel %vm700_vm5, %v7333_v5, %v4198_v40  ;;  %v4200_v38 = vpop.permute.xlu0 %4199 }
 0x612   :  { %v4381_v17 = vsel %vm700_vm5, %v7334_v19, %v4200_v38 }
 0x614   :  { %4834 = vmatmul.mubr.f32.gmra.mrb[136].mxu1 %v4374_v52  ;;  %v4202_v63 = vpop.permute.xlu1 %4201 }
 0x615   :  { %5897 = vmatprep.mubr.msk.f32.mxu1 %vm4459_vm14, %v4188_v3  ;;  %v4382_v13 = vsel %vm700_vm5, %v7348_v59, %v4202_v63  ;;  %v4204_v9 = vpop.permute.xlu0 %4203  ;;  %v5383_v3 = vld [vmem:[%s11110_s11 + $0x8] sm:$0xff] }
 0x616   :  { %v4383_v5 = vsel %vm700_vm5, %v7349_v61, %v4204_v9 }
 0x618   :  { %4839 = vmatmul.mubr.f32.gmra.mrb[138].mxu1 %v4375_v41  ;;  %v4206_v18 = vpop.permute.xlu1 %4205 }
 0x619   :  { %5898 = vmatprep.mubr.msk.f32.mxu1 %vm4459_vm14, %v4190_v32  ;;  %v4384_v1 = vsel %vm700_vm5, %v7363_v16, %v4206_v18  ;;  %v4208_v19 = vpop.permute.xlu0 %4207 }
 0x61a   :  { %v4385_v59 = vsel %vm700_vm5, %v7364_v46, %v4208_v19 }
 0x61c   :  { %4844 = vmatmul.mubr.f32.gmra.mrb[140].mxu1 %v4376_v62  ;;  %v4210_v27 = vpop.permute.xlu1 %4209  ;;  %v5384_v62 = vld [vmem:[%s11110_s11 + $0x10] sm:$0xff] }
 0x61d   :  { %5899 = vmatprep.mubr.msk.f32.mxu1 %vm4459_vm14, %v4192_v55  ;;  %v4386_v36 = vsel %vm700_vm5, %v7378_v58, %v4210_v27  ;;  %v4212_v61 = vpop.permute.xlu0 %4211  ;;  %v5385_v55 = vld [vmem:[%s11110_s11 + $0x18] sm:$0xff] }
 0x61e   :  { %v4387_v16 = vsel %vm700_vm5, %v7379_v45, %v4212_v61 }
 0x620   :  { %4849 = vmatmul.mubr.f32.gmra.mrb[142].mxu1 %v4377_v47  ;;  %v4214_v11 = vpop.permute.xlu1 %4213 }
 0x621   :  { %5900 = vmatprep.mubr.msk.f32.mxu1 %vm4459_vm14, %v4194_v2  ;;  %v4388_v44 = vsel %vm700_vm5, %v7393_v0, %v4214_v11  ;;  %v4216_v46 = vpop.permute.xlu0 %4215 }
 0x622   :  { %v4389_v58 = vsel %vm700_vm5, %v7394_v50, %v4216_v46  ;;  %v5019_v50 = vld [vmem:[%s11108_s9 + $0x68] sm:$0xff] }
 0x623   :  { %v6532_v14 = vpack.c.bf16 %v5019_v50, %v5018_v60 }
 0x624   :  { %4854 = vmatmul.mubr.f32.gmra.mrb[144].mxu1 %v4378_v28  ;;  %v4218_v34 = vpop.permute.xlu1 %4217 }
 0x625   :  { %5901 = vmatprep.mubr.msk.f32.mxu1 %vm4459_vm14, %v4196_v48  ;;  %v4390_v29 = vsel %vm700_vm5, %v7408_v51, %v4218_v34  ;;  %v4220_v45 = vpop.permute.xlu0 %4219  ;;  %6533 = vmatprep.subr.bf16.mxu0 %v6532_v14  ;;  %v6540_v48 = vpack.c.bf16 %v5385_v55, %v5384_v62 }
 0x626   :  { %v4391_v0 = vsel %vm700_vm5, %v7409_v7, %v4220_v45  ;;  %6535 = vmatpush3.bf16.msra.mxu0 %v6532_v14  ;;  %v5020_v7 = vld [vmem:[%s11108_s9 + $0x70] sm:$0xff] }
 0x627   :  { %6109 = vmatprep.subr.mxu0 %v5020_v7 }
 0x628   :  { %4859 = vmatmul.mubr.f32.gmra.mrb[146].mxu1 %v4379_v54  ;;  %v4222_v24 = vpop.permute.xlu1 %4221 }
 0x629   :  { %5902 = vmatprep.mubr.msk.f32.mxu1 %vm4459_vm14, %v4198_v40  ;;  %v4392_v51 = vsel %vm700_vm5, %v7423_v39, %v4222_v24  ;;  %v4224_v4 = vpop.permute.xlu0 %4223  ;;  %v5386_v40 = vld [vmem:[%s11110_s11 + $0x20] sm:$0xff] }
 0x62a   :  { %v4393_v25 = vsel %vm700_vm5, %v7424_v23, %v4224_v4  ;;  %6110 = vmatpush3.msra.mxu0 %v5020_v7 }
 0x62c   :  { %4864 = vmatmul.mubr.f32.gmra.mrb[148].mxu1 %v4380_v31  ;;  %v4226_v43 = vpop.permute.xlu1 %4225  ;;  %v5387_v31 = vld [vmem:[%s11110_s11 + $0x28] sm:$0xff] }
 0x62d   :  { %5903 = vmatprep.mubr.msk.f32.mxu1 %vm4459_vm14, %v4200_v38  ;;  %v4394_v39 = vsel %vm700_vm5, %v7438_v49, %v4226_v43  ;;  %v4228_v30 = vpop.permute.xlu0 %4227 }
 0x62e   :  { %v4395_v37 = vsel %vm700_vm5, %v7439_v6, %v4228_v30 }
 0x630   :  { %4869 = vmatmul.mubr.f32.gmra.mrb[150].mxu1 %v4381_v17  ;;  %v4230_v42 = vpop.permute.xlu1 %4229 }
 0x631   :  { %5904 = vmatprep.mubr.msk.f32.mxu1 %vm4459_vm14, %v4202_v63  ;;  %v4396_v23 = vsel %vm700_vm5, %v7453_v26, %v4230_v42  ;;  %v4232_v10 = vpop.permute.xlu0 %4231 }
 0x632   :  { %v4397_v49 = vsel %vm700_vm5, %v7454_v12, %v4232_v10 }
 0x634   :  { %4874 = vmatmul.mubr.f32.gmra.mrb[152].mxu1 %v4382_v13  ;;  %v4234_v21 = vpop.permute.xlu1 %4233  ;;  %v6544_v13 = vpack.c.bf16 %v5387_v31, %v5386_v40 }
 0x635   :  { %5905 = vmatprep.mubr.msk.f32.mxu1 %vm4459_vm14, %v4204_v9  ;;  %v4398_v33 = vsel %vm700_vm5, %v7468_v53, %v4234_v21  ;;  %v4236_v6 = vpop.permute.xlu0 %4235 }
 0x636   :  { %v4399_v26 = vsel %vm700_vm5, %v7469_v56, %v4236_v6 }
 0x638   :  { %4879 = vmatmul.mubr.f32.gmra.mrb[154].mxu1 %v4383_v5  ;;  %v4238_v35 = vpop.permute.xlu1 %4237  ;;  %v5388_v5 = vld [vmem:[%s11110_s11 + $0x30] sm:$0xff] }
 0x639   :  { %5906 = vmatprep.mubr.msk.f32.mxu1 %vm4459_vm14, %v4206_v18  ;;  %v4400_v8 = vsel %vm700_vm5, %v10569_v22, %v4238_v35  ;;  %v4240_v12 = vpop.permute.xlu0 %4239  ;;  %v5382_v22 = vld [vmem:[%s11110_s11] sm:$0xff]  ;;  %v5389_v18 = vld [vmem:[%s11110_s11 + $0x38] sm:$0xff] }
 0x63a   :  { %v4401_v53 = vsel %vm700_vm5, %v10582_v57, %v4240_v12  ;;  %v6536_v41 = vpack.c.bf16 %v5383_v3, %v5382_v22 }
 0x63c   :  { %4884 = vmatmul.mubr.f32.gmra.mrb[156].mxu1 %v4384_v1  ;;  %6537 = vmatprep.subr.bf16.mxu0 %v6536_v41 }
 0x63d   :  { %5907 = vmatprep.mubr.msk.f32.mxu1 %vm4459_vm14, %v4208_v19 }
 0x640   :  { %4889 = vmatmul.mubr.f32.gmra.mrb[158].mxu1 %v4385_v59 }
 0x641   :  { %5908 = vmatprep.mubr.msk.f32.mxu1 %vm4459_vm14, %v4210_v27  ;;  %v6548_v27 = vpack.c.bf16 %v5389_v18, %v5388_v5 }
 0x644   :  { %4894 = vmatmul.mubr.f32.gmra.mrb[160].mxu1 %v4386_v36 }
 0x645   :  { %5909 = vmatprep.mubr.msk.f32.mxu1 %vm4459_vm14, %v4212_v61 }
 0x648   :  { %4899 = vmatmul.mubr.f32.gmra.mrb[162].mxu1 %v4387_v16 }
 0x649   :  { %5910 = vmatprep.mubr.msk.f32.mxu1 %vm4459_vm14, %v4214_v11 }
 0x64c   :  { %4904 = vmatmul.mubr.f32.gmra.mrb[164].mxu1 %v4388_v44 }
 0x64d   :  { %5911 = vmatprep.mubr.msk.f32.mxu1 %vm4459_vm14, %v4216_v46 }
 0x650   :  { %4909 = vmatmul.mubr.f32.gmra.mrb[166].mxu1 %v4389_v58 }
 0x651   :  { %5912 = vmatprep.mubr.msk.f32.mxu1 %vm4459_vm14, %v4218_v34 }
 0x654   :  { %4914 = vmatmul.mubr.f32.gmra.mrb[168].mxu1 %v4390_v29 }
 0x655   :  { %5913 = vmatprep.mubr.msk.f32.mxu1 %vm4459_vm14, %v4220_v45 }
 0x658   :  { %4919 = vmatmul.mubr.f32.gmra.mrb[170].mxu1 %v4391_v0 }
 0x659   :  { %5914 = vmatprep.mubr.msk.f32.mxu1 %vm4459_vm14, %v4222_v24 }
 0x65c   :  { %4924 = vmatmul.mubr.f32.gmra.mrb[172].mxu1 %v4392_v51 }
 0x65d   :  { %5915 = vmatprep.mubr.msk.f32.mxu1 %vm4459_vm14, %v4224_v4 }
 0x660   :  { %4929 = vmatmul.mubr.f32.gmra.mrb[174].mxu1 %v4393_v25 }
 0x661   :  { %5916 = vmatprep.mubr.msk.f32.mxu1 %vm4459_vm14, %v4226_v43 }
 0x664   :  { %4934 = vmatmul.mubr.f32.gmra.mrb[176].mxu1 %v4394_v39 }
 0x665   :  { %5917 = vmatprep.mubr.msk.f32.mxu1 %vm4459_vm14, %v4228_v30 }
 0x668   :  { %4939 = vmatmul.mubr.f32.gmra.mrb[178].mxu1 %v4395_v37 }
 0x669   :  { %5918 = vmatprep.mubr.msk.f32.mxu1 %vm4459_vm14, %v4230_v42 }
 0x66c   :  { %4944 = vmatmul.mubr.f32.gmra.mrb[180].mxu1 %v4396_v23 }
 0x66d   :  { %5919 = vmatprep.mubr.msk.f32.mxu1 %vm4459_vm14, %v4232_v10 }
 0x670   :  { %4949 = vmatmul.mubr.f32.gmra.mrb[182].mxu1 %v4397_v49 }
 0x671   :  { %5920 = vmatprep.mubr.msk.f32.mxu1 %vm4459_vm14, %v4234_v21 }
 0x674   :  { %4954 = vmatmul.mubr.f32.gmra.mrb[184].mxu1 %v4398_v33 }
 0x675   :  { %5921 = vmatprep.mubr.msk.f32.mxu1 %vm4459_vm14, %v4236_v6 }
 0x678   :  { %4959 = vmatmul.mubr.f32.gmra.mrb[186].mxu1 %v4399_v26 }
 0x679   :  { %5922 = vmatprep.mubr.msk.f32.mxu1 %vm4459_vm14, %v4238_v35 }
 0x67c   :  { %4964 = vmatmul.mubr.f32.gmra.mrb[188].mxu1 %v4400_v8 }
 0x67d   :  { %5923 = vmatprep.mubr.msk.f32.mxu1 %vm4459_vm14, %v4240_v12 }
 0x680   :  { %4969 = vmatmul.mubr.f32.gmra.mrb[190].mxu1 %v4401_v53 }
 0x6d7   :  { %v4815_v56 = vpop.f32.mrb[128].mxu1 }
 0x6d8   :  { %v6620_v20 = vadd.f32 %v10765_v15, %v4815_v56  ;;  %v4817_v52 = vpop.f32.mrb[129].mxu1 }
 0x6da   :  { %v4974_v57 = vmax.f32 %v6620_v20, 0.0 }
 0x6db   :  { %v4820_v32 = vpop.f32.mrb[130].mxu1 }
 0x6dc   :  { %v6621_v47 = vadd.f32 %v10765_v15, %v4820_v32  ;;  %v4822_v2 = vpop.f32.mrb[131].mxu1  ;;  %6111 = vmatprep.mubr.msk.f32.mxu0 %vm5028_vm15, %v4974_v57 }
 0x6de   :  { %v4975_v28 = vmax.f32 %v6621_v47, 0.0 }
 0x6df   :  { %v4825_v54 = vpop.f32.mrb[132].mxu1 }
 0x6e0   :  { %v6622_v38 = vadd.f32 %v10765_v15, %v4825_v54  ;;  %v4827_v17 = vpop.f32.mrb[133].mxu1  ;;  %6112 = vmatmul.mubr.msk.f32.vlgmr.msra.gmra.mrb[128].mxu0 %vm5028_vm15, %v4975_v28 }
 0x6e1   :  { %6539 = vmatpush3.bf16.msra.mxu0 %v6536_v41 }
 0x6e2   :  { %v4976_v63 = vmax.f32 %v6622_v38, 0.0  ;;  %6541 = vmatprep.subr.bf16.mxu0 %v6540_v48 }
 0x6e3   :  { %v4830_v9 = vpop.f32.mrb[134].mxu1 }
 0x6e4   :  { %v6623_v1 = vadd.f32 %v10765_v15, %v4830_v9  ;;  %v4832_v19 = vpop.f32.mrb[135].mxu1  ;;  %6114 = vmatprep.mubr.msk.f32.mxu0 %vm5028_vm15, %v4976_v63 }
 0x6e5   :  { %6543 = vmatpush3.bf16.msra.mxu0 %v6540_v48 }
 0x6e6   :  { %v4977_v59 = vmax.f32 %v6623_v1, 0.0  ;;  %6545 = vmatprep.subr.bf16.mxu0 %v6544_v13 }
 0x6e7   :  { %v4835_v36 = vpop.f32.mrb[136].mxu1 }
 0x6e8   :  { %v6624_v61 = vadd.f32 %v10765_v15, %v4835_v36  ;;  %v4837_v16 = vpop.f32.mrb[137].mxu1  ;;  %6115 = vmatmul.mubr.msk.f32.gmra.mrb[130].mxu0 %vm5028_vm15, %v4977_v59 }
 0x6e9   :  { %6547 = vmatpush3.bf16.msra.mxu0 %v6544_v13 }
 0x6ea   :  { %v4978_v11 = vmax.f32 %v6624_v61, 0.0  ;;  %6549 = vmatprep.subr.bf16.mxu0 %v6548_v27 }
 0x6eb   :  { %v4840_v44 = vpop.f32.mrb[138].mxu1 }
 0x6ec   :  { %v6625_v46 = vadd.f32 %v10765_v15, %v4840_v44  ;;  %v4842_v58 = vpop.f32.mrb[139].mxu1  ;;  %6117 = vmatprep.mubr.msk.f32.mxu0 %vm5028_vm15, %v4978_v11 }
 0x6ed   :  { %6551 = vmatpush3.bf16.msra.mxu0 %v6548_v27 }
 0x6ee   :  { %v4979_v34 = vmax.f32 %v6625_v46, 0.0 }
 0x6ef   :  { %v4845_v29 = vpop.f32.mrb[140].mxu1 }
 0x6f0   :  { %v6626_v45 = vadd.f32 %v10765_v15, %v4845_v29  ;;  %v4847_v0 = vpop.f32.mrb[141].mxu1  ;;  %6118 = vmatmul.mubr.msk.f32.gmra.mrb[132].mxu0 %vm5028_vm15, %v4979_v34 }
 0x6f2   :  { %v4980_v24 = vmax.f32 %v6626_v45, 0.0 }
 0x6f3   :  { %v4850_v60 = vpop.f32.mrb[142].mxu1 }
 0x6f4   :  { %v6627_v50 = vadd.f32 %v10765_v15, %v4850_v60  ;;  %v4852_v51 = vpop.f32.mrb[143].mxu1  ;;  %6120 = vmatprep.mubr.msk.f32.mxu0 %vm5028_vm15, %v4980_v24 }
 0x6f6   :  { %v4981_v14 = vmax.f32 %v6627_v50, 0.0 }
 0x6f7   :  { %v4855_v4 = vpop.f32.mrb[144].mxu1 }
 0x6f8   :  { %v6628_v7 = vadd.f32 %v10765_v15, %v4855_v4  ;;  %v4857_v25 = vpop.f32.mrb[145].mxu1  ;;  %6121 = vmatmul.mubr.msk.f32.gmra.mrb[134].mxu0 %vm5028_vm15, %v4981_v14  ;;  %v5390_v4 = vld [vmem:[%s11110_s11 + $0x40] sm:$0xff] }
 0x6fa   :  { %v4982_v43 = vmax.f32 %v6628_v7, 0.0  ;;  %v5391_v7 = vld [vmem:[%s11110_s11 + $0x48] sm:$0xff] }
 0x6fb   :  { %v4860_v39 = vpop.f32.mrb[146].mxu1  ;;  %v6552_v25 = vpack.c.bf16 %v5391_v7, %v5390_v4 }
 0x6fc   :  { %v6629_v30 = vadd.f32 %v10765_v15, %v4860_v39  ;;  %v4862_v37 = vpop.f32.mrb[147].mxu1  ;;  %6123 = vmatprep.mubr.msk.f32.mxu0 %vm5028_vm15, %v4982_v43 }
 0x6fd   :  { %6553 = vmatprep.subr.bf16.mxu0 %v6552_v25 }
 0x6fe   :  { %v4983_v42 = vmax.f32 %v6629_v30, 0.0  ;;  %v5392_v30 = vld [vmem:[%s11110_s11 + $0x50] sm:$0xf]  ;;  %6555 = vmatpush3.bf16.msra.mxu0 %v6552_v25 }
 0x6ff   :  { %v4865_v23 = vpop.f32.mrb[148].mxu1  ;;  %6179 = vmatprep.subr.msk.mxu0 %vm309_vm3, %v5392_v30 }
 0x700   :  { %v6630_v10 = vadd.f32 %v10765_v15, %v4865_v23  ;;  %v4867_v49 = vpop.f32.mrb[149].mxu1  ;;  %6124 = vmatmul.mubr.msk.f32.gmra.mrb[136].mxu0 %vm5028_vm15, %v4983_v42 }
 0x702   :  { %v4984_v21 = vmax.f32 %v6630_v10, 0.0  ;;  %6180 = vmatpush3.msk.msra.mxu0 %vm309_vm3, %v5392_v30 }
 0x703   :  { %v4870_v33 = vpop.f32.mrb[150].mxu1 }
 0x704   :  { %v6631_v6 = vadd.f32 %v10765_v15, %v4870_v33  ;;  %v4872_v26 = vpop.f32.mrb[151].mxu1  ;;  %6126 = vmatprep.mubr.msk.f32.mxu0 %vm5028_vm15, %v4984_v21 }
 0x706   :  { %v4985_v35 = vmax.f32 %v6631_v6, 0.0 }
 0x707   :  { %v4875_v8 = vpop.f32.mrb[152].mxu1 }
 0x708   :  { %v6632_v12 = vadd.f32 %v10765_v15, %v4875_v8  ;;  %v4877_v53 = vpop.f32.mrb[153].mxu1  ;;  %6127 = vmatmul.mubr.msk.f32.gmra.mrb[138].mxu0 %vm5028_vm15, %v4985_v35 }
 0x70a   :  { %v4986_v56 = vmax.f32 %v6632_v12, 0.0 }
 0x70b   :  { %v4880_v20 = vpop.f32.mrb[154].mxu1 }
 0x70c   :  { %v6633_v52 = vadd.f32 %v10765_v15, %v4880_v20  ;;  %v4882_v22 = vpop.f32.mrb[155].mxu1  ;;  %6129 = vmatprep.mubr.msk.f32.mxu0 %vm5028_vm15, %v4986_v56 }
 0x70e   :  { %v4987_v3 = vmax.f32 %v6633_v52, 0.0 }
 0x70f   :  { %v4885_v57 = vpop.f32.mrb[156].mxu1 }
 0x710   :  { %v6634_v41 = vadd.f32 %v10765_v15, %v4885_v57  ;;  %v4887_v32 = vpop.f32.mrb[157].mxu1  ;;  %6130 = vmatmul.mubr.msk.f32.gmra.mrb[140].mxu0 %vm5028_vm15, %v4987_v3 }
 0x712   :  { %v4988_v62 = vmax.f32 %v6634_v41, 0.0 }
 0x713   :  { %v4890_v55 = vpop.f32.mrb[158].mxu1 }
 0x714   :  { %v6635_v47 = vadd.f32 %v10765_v15, %v4890_v55  ;;  %v4892_v2 = vpop.f32.mrb[159].mxu1  ;;  %6132 = vmatprep.mubr.msk.f32.mxu0 %vm5028_vm15, %v4988_v62 }
 0x716   :  { %v4989_v28 = vmax.f32 %v6635_v47, 0.0 }
 0x717   :  { %v4895_v48 = vpop.f32.mrb[160].mxu1 }
 0x718   :  { %v6636_v54 = vadd.f32 %v10765_v15, %v4895_v48  ;;  %v4897_v40 = vpop.f32.mrb[161].mxu1  ;;  %6133 = vmatmul.mubr.msk.f32.gmra.mrb[142].mxu0 %vm5028_vm15, %v4989_v28 }
 0x71a   :  { %v4990_v31 = vmax.f32 %v6636_v54, 0.0 }
 0x71b   :  { %v4900_v38 = vpop.f32.mrb[162].mxu1 }
 0x71c   :  { %v6637_v17 = vadd.f32 %v10765_v15, %v4900_v38  ;;  %v4902_v63 = vpop.f32.mrb[163].mxu1  ;;  %6135 = vmatprep.mubr.msk.f32.mxu0 %vm5028_vm15, %v4990_v31 }
 0x71e   :  { %v4991_v13 = vmax.f32 %v6637_v17, 0.0  ;;  %v10869_v17 = vld [vmem:[%s11111_s10] ss:$0 sm:$0xff] }
 0x71f   :  { %v4905_v9 = vpop.f32.mrb[164].mxu1 }
 0x720   :  { %v6638_v5 = vadd.f32 %v10765_v15, %v4905_v9  ;;  %v4907_v18 = vpop.f32.mrb[165].mxu1  ;;  %6136 = vmatmul.mubr.msk.f32.gmra.mrb[144].mxu0 %vm5028_vm15, %v4991_v13 }
 0x722   :  { %v4992_v1 = vmax.f32 %v6638_v5, 0.0 }
 0x723   :  { %v4910_v19 = vpop.f32.mrb[166].mxu1 }
 0x724   :  { %v6639_v59 = vadd.f32 %v10765_v15, %v4910_v19  ;;  %v4912_v27 = vpop.f32.mrb[167].mxu1  ;;  %6138 = vmatprep.mubr.msk.f32.mxu0 %vm5028_vm15, %v4992_v1 }
 0x726   :  { %v4993_v36 = vmax.f32 %v6639_v59, 0.0 }
 0x727   :  { %v4915_v61 = vpop.f32.mrb[168].mxu1 }
 0x728   :  { %v6640_v16 = vadd.f32 %v10765_v15, %v4915_v61  ;;  %v4917_v11 = vpop.f32.mrb[169].mxu1  ;;  %6139 = vmatmul.mubr.msk.f32.gmra.mrb[146].mxu0 %vm5028_vm15, %v4993_v36 }
 0x72a   :  { %v4994_v44 = vmax.f32 %v6640_v16, 0.0 }
 0x72b   :  { %v4920_v46 = vpop.f32.mrb[170].mxu1 }
 0x72c   :  { %v6641_v58 = vadd.f32 %v10765_v15, %v4920_v46  ;;  %v4922_v34 = vpop.f32.mrb[171].mxu1  ;;  %6141 = vmatprep.mubr.msk.f32.mxu0 %vm5028_vm15, %v4994_v44 }
 0x72e   :  { %v4995_v29 = vmax.f32 %v6641_v58, 0.0 }
 0x72f   :  { %v4925_v45 = vpop.f32.mrb[172].mxu1 }
 0x730   :  { %v6642_v0 = vadd.f32 %v10765_v15, %v4925_v45  ;;  %v4927_v24 = vpop.f32.mrb[173].mxu1  ;;  %6142 = vmatmul.mubr.msk.f32.gmra.mrb[148].mxu0 %vm5028_vm15, %v4995_v29 }
 0x732   :  { %v4996_v60 = vmax.f32 %v6642_v0, 0.0 }
 0x733   :  { %v4930_v50 = vpop.f32.mrb[174].mxu1 }
 0x734   :  { %v6643_v51 = vadd.f32 %v10765_v15, %v4930_v50  ;;  %v4932_v14 = vpop.f32.mrb[175].mxu1  ;;  %6144 = vmatprep.mubr.msk.f32.mxu0 %vm5028_vm15, %v4996_v60 }
 0x736   :  { %v4997_v43 = vmax.f32 %v6643_v51, 0.0 }
 0x737   :  { %v4935_v39 = vpop.f32.mrb[176].mxu1 }
 0x738   :  { %v6644_v37 = vadd.f32 %v10765_v15, %v4935_v39  ;;  %v4937_v42 = vpop.f32.mrb[177].mxu1  ;;  %6145 = vmatmul.mubr.msk.f32.gmra.mrb[150].mxu0 %vm5028_vm15, %v4997_v43 }
 0x73a   :  { %v4998_v23 = vmax.f32 %v6644_v37, 0.0 }
 0x73b   :  { %v4940_v10 = vpop.f32.mrb[178].mxu1 }
 0x73c   :  { %v6645_v49 = vadd.f32 %v10765_v15, %v4940_v10  ;;  %v4942_v21 = vpop.f32.mrb[179].mxu1  ;;  %6147 = vmatprep.mubr.msk.f32.mxu0 %vm5028_vm15, %v4998_v23 }
 0x73e   :  { %v4999_v33 = vmax.f32 %v6645_v49, 0.0 }
 0x73f   :  { %v4945_v6 = vpop.f32.mrb[180].mxu1 }
 0x740   :  { %v6646_v26 = vadd.f32 %v10765_v15, %v4945_v6  ;;  %v4947_v35 = vpop.f32.mrb[181].mxu1  ;;  %6148 = vmatmul.mubr.msk.f32.gmra.mrb[152].mxu0 %vm5028_vm15, %v4999_v33 }
 0x742   :  { %v5000_v8 = vmax.f32 %v6646_v26, 0.0 }
 0x743   :  { %v4950_v12 = vpop.f32.mrb[182].mxu1 }
 0x744   :  { %v6647_v53 = vadd.f32 %v10765_v15, %v4950_v12  ;;  %v4952_v56 = vpop.f32.mrb[183].mxu1  ;;  %6150 = vmatprep.mubr.msk.f32.mxu0 %vm5028_vm15, %v5000_v8 }
 0x746   :  { %v5001_v20 = vmax.f32 %v6647_v53, 0.0 }
 0x747   :  { %v4955_v52 = vpop.f32.mrb[184].mxu1 }
 0x748   :  { %v6648_v22 = vadd.f32 %v10765_v15, %v4955_v52  ;;  %v4957_v3 = vpop.f32.mrb[185].mxu1  ;;  %6151 = vmatmul.mubr.msk.f32.gmra.mrb[154].mxu0 %vm5028_vm15, %v5001_v20 }
 0x74a   :  { %v5002_v57 = vmax.f32 %v6648_v22, 0.0 }
 0x74b   :  { %v4960_v41 = vpop.f32.mrb[186].mxu1 }
 0x74c   :  { %v6649_v32 = vadd.f32 %v10765_v15, %v4960_v41  ;;  %v4962_v62 = vpop.f32.mrb[187].mxu1  ;;  %6153 = vmatprep.mubr.msk.f32.mxu0 %vm5028_vm15, %v5002_v57 }
 0x74e   :  { %v5003_v55 = vmax.f32 %v6649_v32, 0.0 }
 0x74f   :  { %v4965_v47 = vpop.f32.mrb[188].mxu1 }
 0x750   :  { %v6650_v2 = vadd.f32 %v10765_v15, %v4965_v47  ;;  %v4967_v28 = vpop.f32.mrb[189].mxu1  ;;  %6154 = vmatmul.mubr.msk.f32.gmra.mrb[156].mxu0 %vm5028_vm15, %v5003_v55 }
 0x752   :  { %v5004_v48 = vmax.f32 %v6650_v2, 0.0 }
 0x753   :  { %v4970_v54 = vpop.f32.mrb[190].mxu1 }
 0x754   :  { %v6651_v40 = vadd.f32 %v10765_v15, %v4970_v54  ;;  %v4972_v31 = vpop.f32.mrb[191].mxu1  ;;  %6156 = vmatprep.mubr.msk.f32.mxu0 %vm5028_vm15, %v5004_v48 }
 0x756   :  { %v5005_v38 = vmax.f32 %v6651_v40, 0.0 }
 0x758   :  { %6157 = vmatmul.mubr.msk.f32.gmra.mrb[158].mxu0 %vm5028_vm15, %v5005_v38 }
 0x7b3   :  { %v6113_v63 = vpop.f32.mrb[128].mxu0 }
 0x7b4   :  { %v5197_v13 = vadd.f32 %v6113_v63, %v10869_v17  ;;  %v5191_v9 = vpop.f32.mrb[129].mxu0 }
 0x7b5   :  { %v5192_v5 = vadd.f32 %v10869_v17, %v5191_v9 }
 0x7b6   :  { %v5351_v1 = vmax.f32 %v5197_v13, 0.0 }
 0x7b7   :  { %v5350_v18 = vmax.f32 %v5192_v5, 0.0 }
 0x7b9   :  { %6181 = vmatprep.mubr.msk.f32.mxu0 %vm2358_vm10, %v5350_v18 }
 0x7ba   :  { %6182 = vmatmul.mubr.msk.f32.vlgmr.msra.gmra.mrb[160].mxu0 %vm2358_vm10, %v5351_v1 }
 0x7bb   :  { %v6116_v15 = vpop.f32.mrb[130].mxu0 }
 0x7bc   :  { %v5207_v19 = vadd.f32 %v6116_v15, %v10869_v17  ;;  %v5201_v59 = vpop.f32.mrb[131].mxu0 }
 0x7bd   :  { %v5202_v27 = vadd.f32 %v10869_v17, %v5201_v59 }
 0x7be   :  { %v5353_v61 = vmax.f32 %v5207_v19, 0.0 }
 0x7bf   :  { %v5352_v36 = vmax.f32 %v5202_v27, 0.0 }
 0x7c1   :  { %6184 = vmatprep.mubr.msk.f32.mxu0 %vm2358_vm10, %v5352_v36 }
 0x7c2   :  { %6185 = vmatmul.mubr.msk.f32.gmra.mrb[162].mxu0 %vm2358_vm10, %v5353_v61 }
 0x7c3   :  { %v6119_v16 = vpop.f32.mrb[132].mxu0 }
 0x7c4   :  { %v5217_v11 = vadd.f32 %v6119_v16, %v10869_v17  ;;  %v5211_v44 = vpop.f32.mrb[133].mxu0 }
 0x7c5   :  { %v5212_v46 = vadd.f32 %v10869_v17, %v5211_v44 }
 0x7c6   :  { %v5355_v34 = vmax.f32 %v5217_v11, 0.0 }
 0x7c7   :  { %v5354_v58 = vmax.f32 %v5212_v46, 0.0 }
 0x7c9   :  { %6187 = vmatprep.mubr.msk.f32.mxu0 %vm2358_vm10, %v5354_v58 }
 0x7ca   :  { %6188 = vmatmul.mubr.msk.f32.gmra.mrb[164].mxu0 %vm2358_vm10, %v5355_v34 }
 0x7cb   :  { %v6122_v29 = vpop.f32.mrb[134].mxu0 }
 0x7cc   :  { %v5227_v45 = vadd.f32 %v6122_v29, %v10869_v17  ;;  %v5221_v0 = vpop.f32.mrb[135].mxu0 }
 0x7cd   :  { %v5222_v24 = vadd.f32 %v10869_v17, %v5221_v0 }
 0x7ce   :  { %v5357_v50 = vmax.f32 %v5227_v45, 0.0 }
 0x7cf   :  { %v5356_v60 = vmax.f32 %v5222_v24, 0.0 }
 0x7d1   :  { %6190 = vmatprep.mubr.msk.f32.mxu0 %vm2358_vm10, %v5356_v60 }
 0x7d2   :  { %6191 = vmatmul.mubr.msk.f32.gmra.mrb[166].mxu0 %vm2358_vm10, %v5357_v50 }
 0x7d3   :  { %v6125_v51 = vpop.f32.mrb[136].mxu0 }
 0x7d4   :  { %v5237_v14 = vadd.f32 %v6125_v51, %v10869_v17  ;;  %v5231_v4 = vpop.f32.mrb[137].mxu0 }
 0x7d5   :  { %v5232_v7 = vadd.f32 %v10869_v17, %v5231_v4 }
 0x7d6   :  { %v5359_v43 = vmax.f32 %v5237_v14, 0.0 }
 0x7d7   :  { %v5358_v25 = vmax.f32 %v5232_v7, 0.0 }
 0x7d9   :  { %6193 = vmatprep.mubr.msk.f32.mxu0 %vm2358_vm10, %v5358_v25 }
 0x7da   :  { %6194 = vmatmul.mubr.msk.f32.gmra.mrb[168].mxu0 %vm2358_vm10, %v5359_v43 }
 0x7db   :  { %v6128_v39 = vpop.f32.mrb[138].mxu0 }
 0x7dc   :  { %v5247_v30 = vadd.f32 %v6128_v39, %v10869_v17  ;;  %v5241_v37 = vpop.f32.mrb[139].mxu0 }
 0x7dd   :  { %v5242_v42 = vadd.f32 %v10869_v17, %v5241_v37 }
 0x7de   :  { %v5361_v10 = vmax.f32 %v5247_v30, 0.0 }
 0x7df   :  { %v5360_v23 = vmax.f32 %v5242_v42, 0.0  ;;  %v10938_v42 = vld [vmem:[%s11112_s12] ss:$0 sm:$0xff] }
 0x7e1   :  { %6196 = vmatprep.mubr.msk.f32.mxu0 %vm2358_vm10, %v5360_v23 }
 0x7e2   :  { %6197 = vmatmul.mubr.msk.f32.gmra.mrb[170].mxu0 %vm2358_vm10, %v5361_v10 }
 0x7e3   :  { %v6131_v49 = vpop.f32.mrb[140].mxu0 }
 0x7e4   :  { %v5257_v21 = vadd.f32 %v6131_v49, %v10869_v17  ;;  %v5251_v33 = vpop.f32.mrb[141].mxu0 }
 0x7e5   :  { %v5252_v6 = vadd.f32 %v10869_v17, %v5251_v33 }
 0x7e6   :  { %v5363_v35 = vmax.f32 %v5257_v21, 0.0 }
 0x7e7   :  { %v5362_v26 = vmax.f32 %v5252_v6, 0.0 }
 0x7e9   :  { %6199 = vmatprep.mubr.msk.f32.mxu0 %vm2358_vm10, %v5362_v26 }
 0x7ea   :  { %6200 = vmatmul.mubr.msk.f32.gmra.mrb[172].mxu0 %vm2358_vm10, %v5363_v35 }
 0x7eb   :  { %v6134_v8 = vpop.f32.mrb[142].mxu0 }
 0x7ec   :  { %v5267_v12 = vadd.f32 %v6134_v8, %v10869_v17  ;;  %v5261_v53 = vpop.f32.mrb[143].mxu0 }
 0x7ed   :  { %v5262_v56 = vadd.f32 %v10869_v17, %v5261_v53 }
 0x7ee   :  { %v5365_v52 = vmax.f32 %v5267_v12, 0.0 }
 0x7ef   :  { %v5364_v20 = vmax.f32 %v5262_v56, 0.0 }
 0x7f1   :  { %6202 = vmatprep.mubr.msk.f32.mxu0 %vm2358_vm10, %v5364_v20 }
 0x7f2   :  { %6203 = vmatmul.mubr.msk.f32.gmra.mrb[174].mxu0 %vm2358_vm10, %v5365_v52 }
 0x7f3   :  { %v6137_v22 = vpop.f32.mrb[144].mxu0 }
 0x7f4   :  { %v5277_v3 = vadd.f32 %v6137_v22, %v10869_v17  ;;  %v5271_v57 = vpop.f32.mrb[145].mxu0 }
 0x7f5   :  { %v5272_v41 = vadd.f32 %v10869_v17, %v5271_v57 }
 0x7f6   :  { %v5367_v62 = vmax.f32 %v5277_v3, 0.0 }
 0x7f7   :  { %v5366_v32 = vmax.f32 %v5272_v41, 0.0 }
 0x7f9   :  { %6205 = vmatprep.mubr.msk.f32.mxu0 %vm2358_vm10, %v5366_v32 }
 0x7fa   :  { %6206 = vmatmul.mubr.msk.f32.gmra.mrb[176].mxu0 %vm2358_vm10, %v5367_v62 }
 0x7fb   :  { %v6140_v55 = vpop.f32.mrb[146].mxu0 }
 0x7fc   :  { %v5287_v47 = vadd.f32 %v6140_v55, %v10869_v17  ;;  %v5281_v2 = vpop.f32.mrb[147].mxu0 }
 0x7fd   :  { %v5282_v28 = vadd.f32 %v10869_v17, %v5281_v2 }
 0x7fe   :  { %v5369_v54 = vmax.f32 %v5287_v47, 0.0 }
 0x7ff   :  { %v5368_v48 = vmax.f32 %v5282_v28, 0.0 }
 0x801   :  { %6208 = vmatprep.mubr.msk.f32.mxu0 %vm2358_vm10, %v5368_v48 }
 0x802   :  { %6209 = vmatmul.mubr.msk.f32.gmra.mrb[178].mxu0 %vm2358_vm10, %v5369_v54 }
 0x803   :  { %v6143_v40 = vpop.f32.mrb[148].mxu0 }
 0x804   :  { %v5297_v31 = vadd.f32 %v6143_v40, %v10869_v17  ;;  %v5291_v38 = vpop.f32.mrb[149].mxu0 }
 0x805   :  { %v5292_v63 = vadd.f32 %v10869_v17, %v5291_v38 }
 0x806   :  { %v5371_v9 = vmax.f32 %v5297_v31, 0.0 }
 0x807   :  { %v5370_v13 = vmax.f32 %v5292_v63, 0.0 }
 0x809   :  { %6211 = vmatprep.mubr.msk.f32.mxu0 %vm2358_vm10, %v5370_v13 }
 0x80a   :  { %6212 = vmatmul.mubr.msk.f32.gmra.mrb[180].mxu0 %vm2358_vm10, %v5371_v9 }
 0x80b   :  { %v6146_v5 = vpop.f32.mrb[150].mxu0 }
 0x80c   :  { %v5307_v18 = vadd.f32 %v6146_v5, %v10869_v17  ;;  %v5301_v1 = vpop.f32.mrb[151].mxu0 }
 0x80d   :  { %v5302_v15 = vadd.f32 %v10869_v17, %v5301_v1 }
 0x80e   :  { %v5373_v59 = vmax.f32 %v5307_v18, 0.0 }
 0x80f   :  { %v5372_v19 = vmax.f32 %v5302_v15, 0.0 }
 0x811   :  { %6214 = vmatprep.mubr.msk.f32.mxu0 %vm2358_vm10, %v5372_v19 }
 0x812   :  { %6215 = vmatmul.mubr.msk.f32.gmra.mrb[182].mxu0 %vm2358_vm10, %v5373_v59 }
 0x813   :  { %v6149_v27 = vpop.f32.mrb[152].mxu0 }
 0x814   :  { %v5317_v36 = vadd.f32 %v6149_v27, %v10869_v17  ;;  %v5311_v61 = vpop.f32.mrb[153].mxu0 }
 0x815   :  { %v5312_v16 = vadd.f32 %v10869_v17, %v5311_v61 }
 0x816   :  { %v5375_v44 = vmax.f32 %v5317_v36, 0.0 }
 0x817   :  { %v5374_v11 = vmax.f32 %v5312_v16, 0.0 }
 0x819   :  { %6217 = vmatprep.mubr.msk.f32.mxu0 %vm2358_vm10, %v5374_v11 }
 0x81a   :  { %6218 = vmatmul.mubr.msk.f32.gmra.mrb[184].mxu0 %vm2358_vm10, %v5375_v44 }
 0x81b   :  { %v6152_v46 = vpop.f32.mrb[154].mxu0 }
 0x81c   :  { %v5327_v58 = vadd.f32 %v6152_v46, %v10869_v17  ;;  %v5321_v34 = vpop.f32.mrb[155].mxu0 }
 0x81d   :  { %v5322_v29 = vadd.f32 %v10869_v17, %v5321_v34 }
 0x81e   :  { %v5377_v0 = vmax.f32 %v5327_v58, 0.0 }
 0x81f   :  { %v5376_v45 = vmax.f32 %v5322_v29, 0.0 }
 0x821   :  { %6220 = vmatprep.mubr.msk.f32.mxu0 %vm2358_vm10, %v5376_v45 }
 0x822   :  { %6221 = vmatmul.mubr.msk.f32.gmra.mrb[186].mxu0 %vm2358_vm10, %v5377_v0 }
 0x823   :  { %v6155_v24 = vpop.f32.mrb[156].mxu0 }
 0x824   :  { %v5337_v60 = vadd.f32 %v6155_v24, %v10869_v17  ;;  %v5331_v50 = vpop.f32.mrb[157].mxu0 }
 0x825   :  { %v5332_v51 = vadd.f32 %v10869_v17, %v5331_v50 }
 0x826   :  { %v5379_v4 = vmax.f32 %v5337_v60, 0.0 }
 0x827   :  { %v5378_v14 = vmax.f32 %v5332_v51, 0.0 }
 0x829   :  { %6223 = vmatprep.mubr.msk.f32.mxu0 %vm2358_vm10, %v5378_v14 }
 0x82a   :  { %6224 = vmatmul.mubr.msk.f32.gmra.mrb[188].mxu0 %vm2358_vm10, %v5379_v4 }
 0x82b   :  { %v6158_v7 = vpop.f32.mrb[158].mxu0 }
 0x82c   :  { %v5347_v25 = vadd.f32 %v6158_v7, %v10869_v17  ;;  %v5341_v43 = vpop.f32.mrb[159].mxu0 }
 0x82d   :  { %v5342_v39 = vadd.f32 %v10869_v17, %v5341_v43 }
 0x82e   :  { %v5381_v37 = vmax.f32 %v5347_v25, 0.0 }
 0x82f   :  { %v5380_v30 = vmax.f32 %v5342_v39, 0.0 }
 0x831   :  { %6226 = vmatprep.mubr.msk.f32.mxu0 %vm2358_vm10, %v5380_v30 }
 0x832   :  { %6227 = vmatmul.mubr.msk.f32.gmra.mrb[190].mxu0 %vm2358_vm10, %v5381_v37 }
 0x88d   :  { %v6183_v23 = vpop.f32.mrb[160].mxu0 }
 0x88e   :  { %v5571_v10 = vadd.f32 %v6183_v23, %v10938_v42  ;;  %v5565_v49 = vpop.f32.mrb[161].mxu0 }
 0x88f   :  { %v5566_v21 = vadd.f32 %v10938_v42, %v5565_v49 }
 0x890   :  { %5726 = vst.msk [vmem:[%s11113_s13 + $0x8] sm:$0xff] %vm5724_vm0, %v5571_v10 }
 0x891   :  { %5725 = vst.msk [vmem:[%s11113_s13] sm:$0xff] %vm5724_vm0, %v5566_v21 }
 0x895   :  { %v6186_v17 = vpop.f32.mrb[162].mxu0 }
 0x896   :  { %v5581_v33 = vadd.f32 %v6186_v17, %v10938_v42  ;;  %v5575_v6 = vpop.f32.mrb[163].mxu0 }
 0x897   :  { %v5576_v26 = vadd.f32 %v10938_v42, %v5575_v6 }
 0x898   :  { %5728 = vst.msk [vmem:[%s11113_s13 + $0x18] sm:$0xff] %vm5724_vm0, %v5581_v33 }
 0x899   :  { %5727 = vst.msk [vmem:[%s11113_s13 + $0x10] sm:$0xff] %vm5724_vm0, %v5576_v26 }
 0x89d   :  { %v6189_v35 = vpop.f32.mrb[164].mxu0 }
 0x89e   :  { %v5591_v8 = vadd.f32 %v6189_v35, %v10938_v42  ;;  %v5585_v12 = vpop.f32.mrb[165].mxu0 }
 0x89f   :  { %v5586_v53 = vadd.f32 %v10938_v42, %v5585_v12 }
 0x8a0   :  { %5730 = vst.msk [vmem:[%s11113_s13 + $0x28] sm:$0xff] %vm5724_vm0, %v5591_v8 }
 0x8a1   :  { %5729 = vst.msk [vmem:[%s11113_s13 + $0x20] sm:$0xff] %vm5724_vm0, %v5586_v53 }
 0x8a5   :  { %v6192_v56 = vpop.f32.mrb[166].mxu0 }
 0x8a6   :  { %v5601_v20 = vadd.f32 %v6192_v56, %v10938_v42  ;;  %v5595_v52 = vpop.f32.mrb[167].mxu0 }
 0x8a7   :  { %v5596_v22 = vadd.f32 %v10938_v42, %v5595_v52 }
 0x8a8   :  { %5732 = vst.msk [vmem:[%s11113_s13 + $0x38] sm:$0xff] %vm5724_vm0, %v5601_v20 }
 0x8a9   :  { %5731 = vst.msk [vmem:[%s11113_s13 + $0x30] sm:$0xff] %vm5724_vm0, %v5596_v22 }
 0x8ad   :  { %v6195_v3 = vpop.f32.mrb[168].mxu0 }
 0x8ae   :  { %v5611_v57 = vadd.f32 %v6195_v3, %v10938_v42  ;;  %v5605_v41 = vpop.f32.mrb[169].mxu0 }
 0x8af   :  { %v5606_v32 = vadd.f32 %v10938_v42, %v5605_v41 }
 0x8b0   :  { %5734 = vst.msk [vmem:[%s11113_s13 + $0x48] sm:$0xff] %vm5724_vm0, %v5611_v57 }
 0x8b1   :  { %5733 = vst.msk [vmem:[%s11113_s13 + $0x40] sm:$0xff] %vm5724_vm0, %v5606_v32 }
 0x8b5   :  { %v6198_v62 = vpop.f32.mrb[170].mxu0 }
 0x8b6   :  { %v5621_v55 = vadd.f32 %v6198_v62, %v10938_v42  ;;  %v5615_v47 = vpop.f32.mrb[171].mxu0 }
 0x8b7   :  { %v5616_v2 = vadd.f32 %v10938_v42, %v5615_v47 }
 0x8b8   :  { %5736 = vst.msk [vmem:[%s11113_s13 + $0x58] sm:$0xff] %vm5724_vm0, %v5621_v55 }
 0x8b9   :  { %5735 = vst.msk [vmem:[%s11113_s13 + $0x50] sm:$0xff] %vm5724_vm0, %v5616_v2 }
 0x8bd   :  { %v6201_v28 = vpop.f32.mrb[172].mxu0 }
 0x8be   :  { %v5631_v48 = vadd.f32 %v6201_v28, %v10938_v42  ;;  %v5625_v54 = vpop.f32.mrb[173].mxu0 }
 0x8bf   :  { %v5626_v40 = vadd.f32 %v10938_v42, %v5625_v54 }
 0x8c0   :  { %5738 = vst.msk [vmem:[%s11113_s13 + $0x68] sm:$0xff] %vm5724_vm0, %v5631_v48 }
 0x8c1   :  { %5737 = vst.msk [vmem:[%s11113_s13 + $0x60] sm:$0xff] %vm5724_vm0, %v5626_v40 }
 0x8c5   :  { %v6204_v31 = vpop.f32.mrb[174].mxu0 }
 0x8c6   :  { %v5641_v38 = vadd.f32 %v6204_v31, %v10938_v42  ;;  %v5635_v63 = vpop.f32.mrb[175].mxu0 }
 0x8c7   :  { %v5636_v13 = vadd.f32 %v10938_v42, %v5635_v63 }
 0x8c8   :  { %5740 = vst.msk [vmem:[%s11113_s13 + $0x78] sm:$0xff] %vm5724_vm0, %v5641_v38 }
 0x8c9   :  { %5739 = vst.msk [vmem:[%s11113_s13 + $0x70] sm:$0xff] %vm5724_vm0, %v5636_v13 }
 0x8cd   :  { %v6207_v9 = vpop.f32.mrb[176].mxu0 }
 0x8ce   :  { %v5651_v5 = vadd.f32 %v6207_v9, %v10938_v42  ;;  %v5645_v18 = vpop.f32.mrb[177].mxu0 }
 0x8cf   :  { %v5646_v1 = vadd.f32 %v10938_v42, %v5645_v18 }
 0x8d0   :  { %5742 = vst.msk [vmem:[%s11113_s13 + $0x88] sm:$0xff] %vm5724_vm0, %v5651_v5 }
 0x8d1   :  { %5741 = vst.msk [vmem:[%s11113_s13 + $0x80] sm:$0xff] %vm5724_vm0, %v5646_v1 }
 0x8d5   :  { %v6210_v15 = vpop.f32.mrb[178].mxu0 }
 0x8d6   :  { %v5661_v19 = vadd.f32 %v6210_v15, %v10938_v42  ;;  %v5655_v59 = vpop.f32.mrb[179].mxu0 }
 0x8d7   :  { %v5656_v27 = vadd.f32 %v10938_v42, %v5655_v59 }
 0x8d8   :  { %5744 = vst.msk [vmem:[%s11113_s13 + $0x98] sm:$0xff] %vm5724_vm0, %v5661_v19 }
 0x8d9   :  { %5743 = vst.msk [vmem:[%s11113_s13 + $0x90] sm:$0xff] %vm5724_vm0, %v5656_v27 }
 0x8dd   :  { %v6213_v36 = vpop.f32.mrb[180].mxu0 }
 0x8de   :  { %v5671_v61 = vadd.f32 %v6213_v36, %v10938_v42  ;;  %v5665_v16 = vpop.f32.mrb[181].mxu0 }
 0x8df   :  { %v5666_v11 = vadd.f32 %v10938_v42, %v5665_v16 }
 0x8e0   :  { %5746 = vst.msk [vmem:[%s11113_s13 + $0xa8] sm:$0xff] %vm5724_vm0, %v5671_v61 }
 0x8e1   :  { %5745 = vst.msk [vmem:[%s11113_s13 + $0xa0] sm:$0xff] %vm5724_vm0, %v5666_v11 }
 0x8e5   :  { %v6216_v44 = vpop.f32.mrb[182].mxu0 }
 0x8e6   :  { %v5681_v46 = vadd.f32 %v6216_v44, %v10938_v42  ;;  %v5675_v58 = vpop.f32.mrb[183].mxu0 }
 0x8e7   :  { %v5676_v34 = vadd.f32 %v10938_v42, %v5675_v58 }
 0x8e8   :  { %5748 = vst.msk [vmem:[%s11113_s13 + $0xb8] sm:$0xff] %vm5724_vm0, %v5681_v46 }
 0x8e9   :  { %5747 = vst.msk [vmem:[%s11113_s13 + $0xb0] sm:$0xff] %vm5724_vm0, %v5676_v34 }
 0x8ed   :  { %v6219_v29 = vpop.f32.mrb[184].mxu0 }
 0x8ee   :  { %v5691_v45 = vadd.f32 %v6219_v29, %v10938_v42  ;;  %v5685_v0 = vpop.f32.mrb[185].mxu0 }
 0x8ef   :  { %v5686_v24 = vadd.f32 %v10938_v42, %v5685_v0 }
 0x8f0   :  { %5750 = vst.msk [vmem:[%s11113_s13 + $0xc8] sm:$0xff] %vm5724_vm0, %v5691_v45 }
 0x8f1   :  { %5749 = vst.msk [vmem:[%s11113_s13 + $0xc0] sm:$0xff] %vm5724_vm0, %v5686_v24 }
 0x8f5   :  { %v6222_v60 = vpop.f32.mrb[186].mxu0 }
 0x8f6   :  { %v5701_v50 = vadd.f32 %v6222_v60, %v10938_v42  ;;  %v5695_v51 = vpop.f32.mrb[187].mxu0 }
 0x8f7   :  { %v5696_v14 = vadd.f32 %v10938_v42, %v5695_v51 }
 0x8f8   :  { %5752 = vst.msk [vmem:[%s11113_s13 + $0xd8] sm:$0xff] %vm5724_vm0, %v5701_v50 }
 0x8f9   :  { %5751 = vst.msk [vmem:[%s11113_s13 + $0xd0] sm:$0xff] %vm5724_vm0, %v5696_v14 }
 0x8fd   :  { %v6225_v4 = vpop.f32.mrb[188].mxu0 }
 0x8fe   :  { %v5711_v7 = vadd.f32 %v6225_v4, %v10938_v42  ;;  %v5705_v25 = vpop.f32.mrb[189].mxu0 }
 0x8ff   :  { %v5706_v43 = vadd.f32 %v10938_v42, %v5705_v25 }
 0x900   :  { %5754 = vst.msk [vmem:[%s11113_s13 + $0xe8] sm:$0xff] %vm5724_vm0, %v5711_v7 }
 0x901   :  { %5753 = vst.msk [vmem:[%s11113_s13 + $0xe0] sm:$0xff] %vm5724_vm0, %v5706_v43 }
 0x905   :  { %v6228_v39 = vpop.f32.mrb[190].mxu0 }
 0x906   :  { %v5721_v30 = vadd.f32 %v6228_v39, %v10938_v42  ;;  %v5715_v37 = vpop.f32.mrb[191].mxu0 }
 0x907   :  { %v5716_v23 = vadd.f32 %v10938_v42, %v5715_v37 }
 0x908   :  { %5756 = vst.msk [vmem:[%s11113_s13 + $0xf8] sm:$0xff] %vm5724_vm0, %v5721_v30 }
 0x909   :  { %5755 = vst.msk [vmem:[%s11113_s13 + $0xf0] sm:$0xff] %vm5724_vm0, %v5716_v23 }

</bundles_post_ra>
